<compile_context>
chip_gen: v6e
topology: v6e:2x2x1
jax: 0.10.0
libtpu: 0.0.40
codegen_flags: <defaults>
</compile_context>

<pallas_src>
import math
import functools

import jax
import jax.numpy as jnp
from jax.experimental import pallas as pl
from jax.experimental.pallas import tpu as pltpu


def _gelu(x):
    # exact (erf) GELU, matching torch.nn.GELU default.
    # (tanh-approx GELU would co-issue on the EUP slot and is cheaper, but it
    #  deviates slightly from the module's semantics, so exact erf is kept.)
    return 0.5 * x * (1.0 + jax.lax.erf(x * (1.0 / math.sqrt(2.0))))


def _down_kernel(bn, Hp, Wp, Cin, Cout, lane_dense, im2col_cin,
                 xw_ref, emb_ref,
                 w1a_ref, g1a_ref, b1a_ref,
                 w1b_ref, g1b_ref, b1b_ref,
                 w2a_ref, g2a_ref, b2a_ref,
                 w2b_ref, g2b_ref, b2b_ref,
                 o_ref, *scratch):
    patch_ref = scratch[0] if scratch else None
    BH = bn * Hp

    # ----- boundary masks for the shifted conv taps (built once, reused by all 4 convs)
    rin = jax.lax.broadcasted_iota(jnp.int32, (bn, Hp, Wp, 1), 1).reshape(BH, Wp, 1)
    col = jax.lax.broadcasted_iota(jnp.int32, (1, Wp, 1), 1)
    first_row, last_row = rin == 0, rin == Hp - 1
    first_col, last_col = col == 0, col == Wp - 1

    def make_tap(x, dy, dx):
        # tap(dy,dx)[h,w] = x[h+dy-1, w+dx-1], zero outside the sample.
        if dy == 1:
            yh = x
        else:
            yh = jnp.roll(x, 1 - dy, axis=0)                   # major-axis roll (tile moves)
            yh = jnp.where(first_row if dy == 0 else last_row, 0.0, yh)
        if dx == 1:
            tp = yh
        else:
            tp = pltpu.roll(yh, (1 - dx) % Wp, axis=1)          # XLU sublane rotate
            tp = jnp.where(first_col if dx == 0 else last_col, 0.0, tp)
        return tp

    def conv3x3(x, w_ref, cin, cout):
        if cin % 128 == 0 and patch_ref is not None:
            # Lane-aligned im2col: taps written into a reusable VMEM scratch
            # (no 9-copy Python list, no misaligned lane concat), then ONE
            # bf16 MXU matmul with K = 9*cin and f32 accumulation.
            k = 0
            for dy in range(3):
                for dx in range(3):
                    patch_ref[:, k * cin:(k + 1) * cin] = (
                        make_tap(x, dy, dx).reshape(BH * Wp, cin)
                        .astype(patch_ref.dtype))
                    k += 1
            y = jnp.dot(patch_ref[:, 0:9 * cin], w_ref[...],
                        preferred_element_type=jnp.float32)
        else:
            # cin not a 128-multiple: avoid the lane-misaligned concat
            # entirely -- 9 accumulating K=cin bf16 matmuls, only one tap live
            # at a time (bounds the per-conv VMEM footprint).
            y = jnp.zeros((BH * Wp, cout), jnp.float32)
            k = 0
            for dy in range(3):
                for dx in range(3):
                    tp = (make_tap(x, dy, dx).reshape(BH * Wp, cin)
                          .astype(jnp.bfloat16))
                    y = y + jnp.dot(tp, w_ref[k * cin:(k + 1) * cin, :],
                                    preferred_element_type=jnp.float32)
                    k += 1
        return y.reshape(BH, Wp, cout)

    def group_norm(x, g_ref, b_ref, c):
        # GroupNorm(num_groups=1): per-sample stats over (Hp, Wp, C), eps=1e-5.
        # One-pass stats (var = E[x^2] - mu^2); fine at these magnitudes.
        x4 = x.reshape(bn, Hp, Wp, c)
        mu = jnp.mean(x4, axis=(1, 2, 3), keepdims=True)
        var = jnp.mean(x4 * x4, axis=(1, 2, 3), keepdims=True) - mu * mu
        xn = (x4 - mu) * jax.lax.rsqrt(var + 1e-5)
        g = g_ref[...].reshape(1, 1, 1, c)
        b = b_ref[...].reshape(1, 1, 1, c)
        return (xn * g + b).reshape(BH, Wp, c)

    # ----- 2x2 max-pool from the pure-reshape windowed layout (bn, Hp, 2, Wp, 2*Cin)
    xw = xw_ref[...]
    xr = jnp.maximum(xw[:, :, 0], xw[:, :, 1])                  # row-pair max (major axis, VPU)
    xp = jnp.maximum(xr[..., :Cin], xr[..., Cin:])              # col-pair max (lane halves)
    xp = xp.reshape(BH, Wp, Cin)

    # ----- DoubleConv #1 (residual, Cin -> Cin)
    h = conv3x3(xp, w1a_ref, Cin, Cin)
    h = _gelu(group_norm(h, g1a_ref, b1a_ref, Cin))
    h = conv3x3(h, w1b_ref, Cin, Cin)
    h = group_norm(h, g1b_ref, b1b_ref, Cin)
    r = _gelu(xp + h)

    # ----- DoubleConv #2 (Cin -> Cout)
    h2 = conv3x3(r, w2a_ref, Cin, Cout)
    h2 = _gelu(group_norm(h2, g2a_ref, b2a_ref, Cout))
    h2 = conv3x3(h2, w2b_ref, Cout, Cout)
    h2 = group_norm(h2, g2b_ref, b2b_ref, Cout)

    # ----- + time embedding (Linear(SiLU(t)) precomputed in wrapper), broadcast add
    out = h2.reshape(bn, Hp, Wp, Cout) + emb_ref[...].reshape(bn, 1, 1, Cout)
    if lane_dense:
        # lane-dense store: (bn, Hp, Wp*Cout) avoids masked partial vst when Cout < 128.
        o_ref[...] = out.reshape(bn, Hp, Wp * Cout).astype(o_ref.dtype)
    else:
        o_ref[...] = out.astype(o_ref.dtype)


def down_forward(x, t, params, *, block_n=1):
    """x: (N, C_in, H, W) f32 (NCHW), t: (N, emb_dim). Returns (N, C_out, H/2, W/2).

    Requirements / tuning notes:
      * Wp = W//2 must be a multiple of 8 (sublane alignment; keeps in-kernel
        reshapes free views).
      * choose block_n so the grid has >= 2 steps on v7x (2 TensorCores), and
        so block_n*Hp*Wp >= 256 on v6e if VMEM allows (full MXU M tiles).
    """
    N, Cin, H, W = x.shape
    assert H % 2 == 0 and W % 2 == 0, (H, W)
    Hp, Wp = H // 2, W // 2
    Cout = params["w2b"].shape[-1]
    assert N % block_n == 0, (N, block_n)
    assert Wp % 8 == 0, f"Wp={Wp} must be a multiple of 8 (sublane alignment)"
    bn = block_n

    # ONE HBM transpose (NCHW -> NHWC); the 2x2 windowing below is a pure
    # reshape (free view), so no extra HBM pass for the pooling layout.
    xw = x.transpose(0, 2, 3, 1).reshape(N, Hp, 2, Wp, 2 * Cin)

    # time embedding precomputed with plain XLA (tiny matmul).
    emb = (jax.nn.silu(t) @ params["wl"] + params["bl"]).reshape(N, 1, Cout)

    # conv weights (3,3,ci,co) -> (9*ci, co), cast to bf16 (MXU operands; also
    # halves weight DMA bytes / VMEM). GN gamma/beta stay f32.
    def wflat(k):
        w = params[k]
        return w.reshape(9 * w.shape[2], w.shape[3]).astype(jnp.bfloat16)

    p_args = [wflat("w1a"), params["g1a"], params["b1a"],
              wflat("w1b"), params["g1b"], params["b1b"],
              wflat("w2a"), params["g2a"], params["b2a"],
              wflat("w2b"), params["g2b"], params["b2b"]]

    lane_dense = (Cout % 128 != 0)
    if lane_dense:
        out_shape = jax.ShapeDtypeStruct((N, Hp, Wp * Cout), jnp.float32)
        out_spec = pl.BlockSpec((bn, Hp, Wp * Cout), lambda i: (i, 0, 0))
    else:
        out_shape = jax.ShapeDtypeStruct((N, Hp, Wp, Cout), jnp.float32)
        out_spec = pl.BlockSpec((bn, Hp, Wp, Cout), lambda i: (i, 0, 0, 0))

    # im2col scratch only for convs whose input channels are lane-aligned.
    im2col_cin = max([c for c in (Cin, Cout) if c % 128 == 0], default=0)
    scratch_shapes = []
    if im2col_cin:
        scratch_shapes.append(
            pltpu.VMEM((bn * Hp * Wp, 9 * im2col_cin), jnp.bfloat16))

    # VMEM budget from the actual working set, capped at ~3/4 of physical VMEM
    # (generation-aware: ~48 MiB on v7x, ~96 MiB on v5e/v6e).
    in_bytes = bn * Hp * 2 * Wp * 2 * Cin * 4
    out_bytes = bn * Hp * Wp * Cout * 4
    act_bytes = bn * Hp * Wp * max(Cin, Cout) * 4
    w_bytes = sum(int(a.size) * a.dtype.itemsize for a in p_args)
    patch_bytes = bn * Hp * Wp * 9 * im2col_cin * 2
    ws = 2 * (in_bytes + out_bytes) + 2 * w_bytes + 8 * act_bytes + patch_bytes
    try:
        phys = int(pltpu.get_tpu_info().vmem_capacity_bytes)
    except Exception:
        phys = 64 << 20
    cap = min(phys * 3 // 4, 100 << 20)
    vmem_limit = int(min(max(2 * ws, 32 << 20), cap))

    def build(single_buffer_params):
        def param_spec(a):
            nd = a.ndim
            if single_buffer_params:
                # grid-invariant weights: single buffer, no re-DMA across steps.
                return pl.BlockSpec(a.shape, lambda i, _nd=nd: (0,) * _nd,
                                    pipeline_mode=pl.Buffered(buffer_count=1))
            return pl.BlockSpec(a.shape, lambda i, _nd=nd: (0,) * _nd)

        in_specs = ([pl.BlockSpec((bn, Hp, 2, Wp, 2 * Cin),
                                  lambda i: (i, 0, 0, 0, 0)),
                     pl.BlockSpec((bn, 1, Cout), lambda i: (i, 0, 0))]
                    + [param_spec(a) for a in p_args])

        return pl.pallas_call(
            functools.partial(_down_kernel, bn, Hp, Wp, Cin, Cout,
                              lane_dense, im2col_cin),
            out_shape=out_shape,
            grid_spec=pltpu.PrefetchScalarGridSpec(
                num_scalar_prefetch=0,
                grid=(N // bn,),
                in_specs=in_specs,
                out_specs=out_spec,
                scratch_shapes=scratch_shapes),
            compiler_params=pltpu.CompilerParams(
                dimension_semantics=("parallel",),
                vmem_limit_bytes=vmem_limit),
        )

    try:
        out = build(True)(xw, emb, *p_args)
    except Exception:
        # older JAX without BlockSpec pipeline_mode support: default buffering.
        out = build(False)(xw, emb, *p_args)

    if lane_dense:
        out = out.reshape(N, Hp, Wp, Cout)
    # module boundary is NCHW (matches the PyTorch spec); one HBM pass.
    return out.transpose(0, 3, 1, 2)


def init_params(key, cin, cout, emb_dim):
    ks = jax.random.split(key, 10)

    def conv_w(k, ci, co):
        bound = 1.0 / math.sqrt(ci * 9)
        return jax.random.uniform(k, (3, 3, ci, co), jnp.float32, -bound, bound)

    lb = 1.0 / math.sqrt(emb_dim)
    return {
        "w1a": conv_w(ks[0], cin, cin),
        "g1a": 1.0 + 0.1 * jax.random.normal(ks[4], (1, cin), jnp.float32),
        "b1a": 0.1 * jax.random.normal(ks[5], (1, cin), jnp.float32),
        "w1b": conv_w(ks[1], cin, cin),
        "g1b": jnp.ones((1, cin), jnp.float32),
        "b1b": jnp.zeros((1, cin), jnp.float32),
        "w2a": conv_w(ks[2], cin, cout),
        "g2a": 1.0 + 0.1 * jax.random.normal(ks[6], (1, cout), jnp.float32),
        "b2a": 0.1 * jax.random.normal(ks[7], (1, cout), jnp.float32),
        "w2b": conv_w(ks[3], cout, cout),
        "g2b": jnp.ones((1, cout), jnp.float32),
        "b2b": jnp.zeros((1, cout), jnp.float32),
        "wl": jax.random.uniform(ks[8], (emb_dim, cout), jnp.float32, -lb, lb),
        "bl": jax.random.uniform(ks[9], (1, cout), jnp.float32, -lb, lb),
    }


def ref_forward(x, t, params):
    """Pure-JAX f32 reference (same math as the PyTorch module), NCHW in/out."""
    xh = x.transpose(0, 2, 3, 1)
    N, H, W, C = xh.shape
    xp = xh.reshape(N, H // 2, 2, W // 2, 2, C).max(axis=(2, 4))

    def conv(v, w):
        return jax.lax.conv_general_dilated(
            v, w, (1, 1), "SAME", dimension_numbers=("NHWC", "HWIO", "NHWC"))

    def gn(v, g, b):
        mu = v.mean(axis=(1, 2, 3), keepdims=True)
        var = ((v - mu) ** 2).mean(axis=(1, 2, 3), keepdims=True)
        return ((v - mu) * jax.lax.rsqrt(var + 1e-5) * g.reshape(1, 1, 1, -1)
                + b.reshape(1, 1, 1, -1))

    gelu = lambda v: 0.5 * v * (1.0 + jax.lax.erf(v / math.sqrt(2.0)))

    h = gelu(gn(conv(xp, params["w1a"]), params["g1a"], params["b1a"]))
    h = gn(conv(h, params["w1b"]), params["g1b"], params["b1b"])
    r = gelu(xp + h)

    h2 = gelu(gn(conv(r, params["w2a"]), params["g2a"], params["b2a"]))
    h2 = gn(conv(h2, params["w2b"]), params["g2b"], params["b2b"])

    emb = (t * jax.nn.sigmoid(t)) @ params["wl"] + params["bl"]
    out = h2 + emb[:, None, None, :]
    return out.transpose(0, 3, 1, 2)


if __name__ == "__main__":
    key = jax.random.PRNGKey(0)
    kx, kt, kp = jax.random.split(key, 3)

    N, Cin, Cout, H, W, EMB = 2, 4, 8, 16, 16, 32
    x = jax.random.normal(kx, (N, Cin, H, W), jnp.float32)
    t = jax.random.normal(kt, (N, EMB), jnp.float32)
    params = init_params(kp, Cin, Cout, EMB)

    ref = ref_forward(x, t, params)

    # block_n=1: 2 grid steps (keeps both v7x TensorCores busy);
    # block_n=2: both samples in one step (amortizes per-step overhead).
    for bn in (1, 2):
        out = jax.block_until_ready(down_forward(x, t, params, block_n=bn))
        assert out.shape == (N, Cout, H // 2, W // 2), out.shape
        err = float(jnp.max(jnp.abs(out - ref)))
        # tolerance loosened for bf16 MXU operands (f32 accumulation).
        assert err < 1e-1, f"max abs err {err}"

    print("KERNEL_OK")
</pallas_src>

<mosaic_0001>
module attributes {stable_mosaic.version = 11 : i64} {
  func.func @_down_kernel(%arg0: i32, %arg1: memref<1x8x2x8x8xf32, #tpu.memory_space<vmem>>, %arg2: memref<1x1x8xf32, #tpu.memory_space<vmem>>, %arg3: memref<36x4xbf16, #tpu.memory_space<vmem>>, %arg4: memref<1x4xf32, #tpu.memory_space<vmem>>, %arg5: memref<1x4xf32, #tpu.memory_space<vmem>>, %arg6: memref<36x4xbf16, #tpu.memory_space<vmem>>, %arg7: memref<1x4xf32, #tpu.memory_space<vmem>>, %arg8: memref<1x4xf32, #tpu.memory_space<vmem>>, %arg9: memref<36x8xbf16, #tpu.memory_space<vmem>>, %arg10: memref<1x8xf32, #tpu.memory_space<vmem>>, %arg11: memref<1x8xf32, #tpu.memory_space<vmem>>, %arg12: memref<72x8xbf16, #tpu.memory_space<vmem>>, %arg13: memref<1x8xf32, #tpu.memory_space<vmem>>, %arg14: memref<1x8xf32, #tpu.memory_space<vmem>>, %arg15: memref<1x8x64xf32, #tpu.memory_space<vmem>>) attributes {dimension_semantics = [#tpu.dimension_semantics<parallel>], iteration_bounds = array<i64: 2>, scalar_prefetch = 0 : i64, scratch_operands = 0 : i64, tpu.core_type = #tpu.core_type<tc>, window_params = [{transform_indices = @transform_0, window_bounds = array<i64: 1, 8, 2, 8, 8>}, {transform_indices = @transform_1, window_bounds = array<i64: 1, 1, 8>}, {pipeline_mode = #tpu.pipeline_mode<synchronous>, transform_indices = @transform_2, window_bounds = array<i64: 36, 4>}, {pipeline_mode = #tpu.pipeline_mode<synchronous>, transform_indices = @transform_3, window_bounds = array<i64: 1, 4>}, {pipeline_mode = #tpu.pipeline_mode<synchronous>, transform_indices = @transform_4, window_bounds = array<i64: 1, 4>}, {pipeline_mode = #tpu.pipeline_mode<synchronous>, transform_indices = @transform_5, window_bounds = array<i64: 36, 4>}, {pipeline_mode = #tpu.pipeline_mode<synchronous>, transform_indices = @transform_6, window_bounds = array<i64: 1, 4>}, {pipeline_mode = #tpu.pipeline_mode<synchronous>, transform_indices = @transform_7, window_bounds = array<i64: 1, 4>}, {pipeline_mode = #tpu.pipeline_mode<synchronous>, transform_indices = @transform_8, window_bounds = array<i64: 36, 8>}, {pipeline_mode = #tpu.pipeline_mode<synchronous>, transform_indices = @transform_9, window_bounds = array<i64: 1, 8>}, {pipeline_mode = #tpu.pipeline_mode<synchronous>, transform_indices = @transform_10, window_bounds = array<i64: 1, 8>}, {pipeline_mode = #tpu.pipeline_mode<synchronous>, transform_indices = @transform_11, window_bounds = array<i64: 72, 8>}, {pipeline_mode = #tpu.pipeline_mode<synchronous>, transform_indices = @transform_12, window_bounds = array<i64: 1, 8>}, {pipeline_mode = #tpu.pipeline_mode<synchronous>, transform_indices = @transform_13, window_bounds = array<i64: 1, 8>}, {transform_indices = @transform_14, window_bounds = array<i64: 1, 8, 64>}]} {
    %0 = tpu.iota {dimensions = array<i32: 1>} : vector<1x8x8x1xi32>
    %1 = vector.shape_cast %0 : vector<1x8x8x1xi32> to vector<8x8x1xi32>
    %2 = tpu.iota {dimensions = array<i32: 1>} : vector<1x8x1xi32>
    %c0_i32 = arith.constant 0 : i32
    %3 = vector.broadcast %c0_i32 : i32 to vector<8x8x1xi32>
    %4 = arith.cmpi eq, %1, %3 : vector<8x8x1xi32>
    %c7_i32 = arith.constant 7 : i32
    %5 = vector.broadcast %c7_i32 : i32 to vector<8x8x1xi32>
    %6 = arith.cmpi eq, %1, %5 : vector<8x8x1xi32>
    %c0_i32_0 = arith.constant 0 : i32
    %7 = vector.broadcast %c0_i32_0 : i32 to vector<1x8x1xi32>
    %8 = arith.cmpi eq, %2, %7 : vector<1x8x1xi32>
    %c7_i32_1 = arith.constant 7 : i32
    %9 = vector.broadcast %c7_i32_1 : i32 to vector<1x8x1xi32>
    %10 = arith.cmpi eq, %2, %9 : vector<1x8x1xi32>
    %c0 = arith.constant 0 : index
    %c0_2 = arith.constant 0 : index
    %c0_3 = arith.constant 0 : index
    %c0_4 = arith.constant 0 : index
    %c0_5 = arith.constant 0 : index
    %11 = vector.load %arg1[%c0, %c0_2, %c0_3, %c0_4, %c0_5] : memref<1x8x2x8x8xf32, #tpu.memory_space<vmem>>, vector<1x8x2x8x8xf32>
    %12 = vector.extract_strided_slice %11 {offsets = [0, 0, 0, 0, 0], sizes = [1, 8, 1, 8, 8], strides = [1, 1, 1, 1, 1]} : vector<1x8x2x8x8xf32> to vector<1x8x1x8x8xf32>
    %13 = vector.shape_cast %12 : vector<1x8x1x8x8xf32> to vector<1x8x8x8xf32>
    %14 = vector.extract_strided_slice %11 {offsets = [0, 0, 1, 0, 0], sizes = [1, 8, 1, 8, 8], strides = [1, 1, 1, 1, 1]} : vector<1x8x2x8x8xf32> to vector<1x8x1x8x8xf32>
    %15 = vector.shape_cast %14 : vector<1x8x1x8x8xf32> to vector<1x8x8x8xf32>
    %16 = arith.maximumf %13, %15 : vector<1x8x8x8xf32>
    %17 = vector.extract_strided_slice %16 {offsets = [0, 0, 0, 0], sizes = [1, 8, 8, 4], strides = [1, 1, 1, 1]} : vector<1x8x8x8xf32> to vector<1x8x8x4xf32>
    %18 = vector.extract_strided_slice %16 {offsets = [0, 0, 0, 4], sizes = [1, 8, 8, 4], strides = [1, 1, 1, 1]} : vector<1x8x8x8xf32> to vector<1x8x8x4xf32>
    %19 = arith.maximumf %17, %18 : vector<1x8x8x4xf32>
    %20 = vector.shape_cast %19 : vector<1x8x8x4xf32> to vector<8x8x4xf32>
    %cst = arith.constant 0.000000e+00 : f32
    %21 = vector.broadcast %cst : f32 to vector<64x4xf32>
    %22 = vector.extract_strided_slice %20 {offsets = [7, 0, 0], sizes = [1, 8, 4], strides = [1, 1, 1]} : vector<8x8x4xf32> to vector<1x8x4xf32>
    %23 = vector.extract_strided_slice %20 {offsets = [0, 0, 0], sizes = [7, 8, 4], strides = [1, 1, 1]} : vector<8x8x4xf32> to vector<7x8x4xf32>
    %24 = tpu.concatenate %22, %23 in 0 : vector<1x8x4xf32>, vector<7x8x4xf32> -> vector<8x8x4xf32>
    %cst_6 = arith.constant 0.000000e+00 : f32
    %25 = vector.shape_cast %4 : vector<8x8x1xi1> to vector<8x8x1xi1>
    %26 = vector.broadcast %25 : vector<8x8x1xi1> to vector<8x8x4xi1>
    %27 = vector.broadcast %cst_6 : f32 to vector<8x8x4xf32>
    %28 = arith.select %26, %27, %24 : vector<8x8x4xi1>, vector<8x8x4xf32>
    %c1_i32 = arith.constant 1 : i32
    %29 = tpu.dynamic_rotate %28 by %c1_i32 dim 1 : vector<8x8x4xf32>, i32 -> vector<8x8x4xf32>
    %cst_7 = arith.constant 0.000000e+00 : f32
    %30 = vector.shape_cast %8 : vector<1x8x1xi1> to vector<1x8x1xi1>
    %31 = vector.broadcast %30 : vector<1x8x1xi1> to vector<8x8x4xi1>
    %32 = vector.broadcast %cst_7 : f32 to vector<8x8x4xf32>
    %33 = arith.select %31, %32, %29 : vector<8x8x4xi1>, vector<8x8x4xf32>
    %34 = vector.shape_cast %33 : vector<8x8x4xf32> to vector<64x4xf32>
    %35 = arith.truncf %34 : vector<64x4xf32> to vector<64x4xbf16>
    %c0_8 = arith.constant 0 : index
    %c0_9 = arith.constant 0 : index
    %36 = vector.load %arg3[%c0_8, %c0_9] : memref<36x4xbf16, #tpu.memory_space<vmem>>, vector<4x4xbf16>
    %cst_10 = arith.constant dense<0.000000e+00> : vector<64x4xf32>
    %37 = tpu.matmul %35, %36, %cst_10 {dimension_numbers = #tpu.dot_dimension_numbers<[1], [0], [0], [1], [0, 0, 1, 1], [], []>} : vector<64x4xbf16>, vector<4x4xbf16>, vector<64x4xf32> -> vector<64x4xf32>
    %38 = arith.addf %21, %37 : vector<64x4xf32>
    %39 = vector.extract_strided_slice %20 {offsets = [7, 0, 0], sizes = [1, 8, 4], strides = [1, 1, 1]} : vector<8x8x4xf32> to vector<1x8x4xf32>
    %40 = vector.extract_strided_slice %20 {offsets = [0, 0, 0], sizes = [7, 8, 4], strides = [1, 1, 1]} : vector<8x8x4xf32> to vector<7x8x4xf32>
    %41 = tpu.concatenate %39, %40 in 0 : vector<1x8x4xf32>, vector<7x8x4xf32> -> vector<8x8x4xf32>
    %cst_11 = arith.constant 0.000000e+00 : f32
    %42 = vector.shape_cast %4 : vector<8x8x1xi1> to vector<8x8x1xi1>
    %43 = vector.broadcast %42 : vector<8x8x1xi1> to vector<8x8x4xi1>
    %44 = vector.broadcast %cst_11 : f32 to vector<8x8x4xf32>
    %45 = arith.select %43, %44, %41 : vector<8x8x4xi1>, vector<8x8x4xf32>
    %46 = vector.shape_cast %45 : vector<8x8x4xf32> to vector<64x4xf32>
    %47 = arith.truncf %46 : vector<64x4xf32> to vector<64x4xbf16>
    %c4 = arith.constant 4 : index
    %c0_12 = arith.constant 0 : index
    %48 = vector.load %arg3[%c4, %c0_12] : memref<36x4xbf16, #tpu.memory_space<vmem>>, vector<4x4xbf16>
    %cst_13 = arith.constant dense<0.000000e+00> : vector<64x4xf32>
    %49 = tpu.matmul %47, %48, %cst_13 {dimension_numbers = #tpu.dot_dimension_numbers<[1], [0], [0], [1], [0, 0, 1, 1], [], []>} : vector<64x4xbf16>, vector<4x4xbf16>, vector<64x4xf32> -> vector<64x4xf32>
    %50 = arith.addf %38, %49 : vector<64x4xf32>
    %51 = vector.extract_strided_slice %20 {offsets = [7, 0, 0], sizes = [1, 8, 4], strides = [1, 1, 1]} : vector<8x8x4xf32> to vector<1x8x4xf32>
    %52 = vector.extract_strided_slice %20 {offsets = [0, 0, 0], sizes = [7, 8, 4], strides = [1, 1, 1]} : vector<8x8x4xf32> to vector<7x8x4xf32>
    %53 = tpu.concatenate %51, %52 in 0 : vector<1x8x4xf32>, vector<7x8x4xf32> -> vector<8x8x4xf32>
    %cst_14 = arith.constant 0.000000e+00 : f32
    %54 = vector.shape_cast %4 : vector<8x8x1xi1> to vector<8x8x1xi1>
    %55 = vector.broadcast %54 : vector<8x8x1xi1> to vector<8x8x4xi1>
    %56 = vector.broadcast %cst_14 : f32 to vector<8x8x4xf32>
    %57 = arith.select %55, %56, %53 : vector<8x8x4xi1>, vector<8x8x4xf32>
    %c7_i32_15 = arith.constant 7 : i32
    %58 = tpu.dynamic_rotate %57 by %c7_i32_15 dim 1 : vector<8x8x4xf32>, i32 -> vector<8x8x4xf32>
    %cst_16 = arith.constant 0.000000e+00 : f32
    %59 = vector.shape_cast %10 : vector<1x8x1xi1> to vector<1x8x1xi1>
    %60 = vector.broadcast %59 : vector<1x8x1xi1> to vector<8x8x4xi1>
    %61 = vector.broadcast %cst_16 : f32 to vector<8x8x4xf32>
    %62 = arith.select %60, %61, %58 : vector<8x8x4xi1>, vector<8x8x4xf32>
    %63 = vector.shape_cast %62 : vector<8x8x4xf32> to vector<64x4xf32>
    %64 = arith.truncf %63 : vector<64x4xf32> to vector<64x4xbf16>
    %c8 = arith.constant 8 : index
    %c0_17 = arith.constant 0 : index
    %65 = vector.load %arg3[%c8, %c0_17] : memref<36x4xbf16, #tpu.memory_space<vmem>>, vector<4x4xbf16>
    %cst_18 = arith.constant dense<0.000000e+00> : vector<64x4xf32>
    %66 = tpu.matmul %64, %65, %cst_18 {dimension_numbers = #tpu.dot_dimension_numbers<[1], [0], [0], [1], [0, 0, 1, 1], [], []>} : vector<64x4xbf16>, vector<4x4xbf16>, vector<64x4xf32> -> vector<64x4xf32>
    %67 = arith.addf %50, %66 : vector<64x4xf32>
    %c1_i32_19 = arith.constant 1 : i32
    %68 = tpu.dynamic_rotate %20 by %c1_i32_19 dim 1 : vector<8x8x4xf32>, i32 -> vector<8x8x4xf32>
    %cst_20 = arith.constant 0.000000e+00 : f32
    %69 = vector.shape_cast %8 : vector<1x8x1xi1> to vector<1x8x1xi1>
    %70 = vector.broadcast %69 : vector<1x8x1xi1> to vector<8x8x4xi1>
    %71 = vector.broadcast %cst_20 : f32 to vector<8x8x4xf32>
    %72 = arith.select %70, %71, %68 : vector<8x8x4xi1>, vector<8x8x4xf32>
    %73 = vector.shape_cast %72 : vector<8x8x4xf32> to vector<64x4xf32>
    %74 = arith.truncf %73 : vector<64x4xf32> to vector<64x4xbf16>
    %c12 = arith.constant 12 : index
    %c0_21 = arith.constant 0 : index
    %75 = vector.load %arg3[%c12, %c0_21] : memref<36x4xbf16, #tpu.memory_space<vmem>>, vector<4x4xbf16>
    %cst_22 = arith.constant dense<0.000000e+00> : vector<64x4xf32>
    %76 = tpu.matmul %74, %75, %cst_22 {dimension_numbers = #tpu.dot_dimension_numbers<[1], [0], [0], [1], [0, 0, 1, 1], [], []>} : vector<64x4xbf16>, vector<4x4xbf16>, vector<64x4xf32> -> vector<64x4xf32>
    %77 = arith.addf %67, %76 : vector<64x4xf32>
    %78 = vector.shape_cast %20 : vector<8x8x4xf32> to vector<64x4xf32>
    %79 = arith.truncf %78 : vector<64x4xf32> to vector<64x4xbf16>
    %c16 = arith.constant 16 : index
    %c0_23 = arith.constant 0 : index
    %80 = vector.load %arg3[%c16, %c0_23] : memref<36x4xbf16, #tpu.memory_space<vmem>>, vector<4x4xbf16>
    %cst_24 = arith.constant dense<0.000000e+00> : vector<64x4xf32>
    %81 = tpu.matmul %79, %80, %cst_24 {dimension_numbers = #tpu.dot_dimension_numbers<[1], [0], [0], [1], [0, 0, 1, 1], [], []>} : vector<64x4xbf16>, vector<4x4xbf16>, vector<64x4xf32> -> vector<64x4xf32>
    %82 = arith.addf %77, %81 : vector<64x4xf32>
    %c7_i32_25 = arith.constant 7 : i32
    %83 = tpu.dynamic_rotate %20 by %c7_i32_25 dim 1 : vector<8x8x4xf32>, i32 -> vector<8x8x4xf32>
    %cst_26 = arith.constant 0.000000e+00 : f32
    %84 = vector.shape_cast %10 : vector<1x8x1xi1> to vector<1x8x1xi1>
    %85 = vector.broadcast %84 : vector<1x8x1xi1> to vector<8x8x4xi1>
    %86 = vector.broadcast %cst_26 : f32 to vector<8x8x4xf32>
    %87 = arith.select %85, %86, %83 : vector<8x8x4xi1>, vector<8x8x4xf32>
    %88 = vector.shape_cast %87 : vector<8x8x4xf32> to vector<64x4xf32>
    %89 = arith.truncf %88 : vector<64x4xf32> to vector<64x4xbf16>
    %c20 = arith.constant 20 : index
    %c0_27 = arith.constant 0 : index
    %90 = vector.load %arg3[%c20, %c0_27] : memref<36x4xbf16, #tpu.memory_space<vmem>>, vector<4x4xbf16>
    %cst_28 = arith.constant dense<0.000000e+00> : vector<64x4xf32>
    %91 = tpu.matmul %89, %90, %cst_28 {dimension_numbers = #tpu.dot_dimension_numbers<[1], [0], [0], [1], [0, 0, 1, 1], [], []>} : vector<64x4xbf16>, vector<4x4xbf16>, vector<64x4xf32> -> vector<64x4xf32>
    %92 = arith.addf %82, %91 : vector<64x4xf32>
    %93 = vector.extract_strided_slice %20 {offsets = [1, 0, 0], sizes = [7, 8, 4], strides = [1, 1, 1]} : vector<8x8x4xf32> to vector<7x8x4xf32>
    %94 = vector.extract_strided_slice %20 {offsets = [0, 0, 0], sizes = [1, 8, 4], strides = [1, 1, 1]} : vector<8x8x4xf32> to vector<1x8x4xf32>
    %95 = tpu.concatenate %93, %94 in 0 : vector<7x8x4xf32>, vector<1x8x4xf32> -> vector<8x8x4xf32>
    %cst_29 = arith.constant 0.000000e+00 : f32
    %96 = vector.shape_cast %6 : vector<8x8x1xi1> to vector<8x8x1xi1>
    %97 = vector.broadcast %96 : vector<8x8x1xi1> to vector<8x8x4xi1>
    %98 = vector.broadcast %cst_29 : f32 to vector<8x8x4xf32>
    %99 = arith.select %97, %98, %95 : vector<8x8x4xi1>, vector<8x8x4xf32>
    %c1_i32_30 = arith.constant 1 : i32
    %100 = tpu.dynamic_rotate %99 by %c1_i32_30 dim 1 : vector<8x8x4xf32>, i32 -> vector<8x8x4xf32>
    %cst_31 = arith.constant 0.000000e+00 : f32
    %101 = vector.shape_cast %8 : vector<1x8x1xi1> to vector<1x8x1xi1>
    %102 = vector.broadcast %101 : vector<1x8x1xi1> to vector<8x8x4xi1>
    %103 = vector.broadcast %cst_31 : f32 to vector<8x8x4xf32>
    %104 = arith.select %102, %103, %100 : vector<8x8x4xi1>, vector<8x8x4xf32>
    %105 = vector.shape_cast %104 : vector<8x8x4xf32> to vector<64x4xf32>
    %106 = arith.truncf %105 : vector<64x4xf32> to vector<64x4xbf16>
    %c24 = arith.constant 24 : index
    %c0_32 = arith.constant 0 : index
    %107 = vector.load %arg3[%c24, %c0_32] : memref<36x4xbf16, #tpu.memory_space<vmem>>, vector<4x4xbf16>
    %cst_33 = arith.constant dense<0.000000e+00> : vector<64x4xf32>
    %108 = tpu.matmul %106, %107, %cst_33 {dimension_numbers = #tpu.dot_dimension_numbers<[1], [0], [0], [1], [0, 0, 1, 1], [], []>} : vector<64x4xbf16>, vector<4x4xbf16>, vector<64x4xf32> -> vector<64x4xf32>
    %109 = arith.addf %92, %108 : vector<64x4xf32>
    %110 = vector.extract_strided_slice %20 {offsets = [1, 0, 0], sizes = [7, 8, 4], strides = [1, 1, 1]} : vector<8x8x4xf32> to vector<7x8x4xf32>
    %111 = vector.extract_strided_slice %20 {offsets = [0, 0, 0], sizes = [1, 8, 4], strides = [1, 1, 1]} : vector<8x8x4xf32> to vector<1x8x4xf32>
    %112 = tpu.concatenate %110, %111 in 0 : vector<7x8x4xf32>, vector<1x8x4xf32> -> vector<8x8x4xf32>
    %cst_34 = arith.constant 0.000000e+00 : f32
    %113 = vector.shape_cast %6 : vector<8x8x1xi1> to vector<8x8x1xi1>
    %114 = vector.broadcast %113 : vector<8x8x1xi1> to vector<8x8x4xi1>
    %115 = vector.broadcast %cst_34 : f32 to vector<8x8x4xf32>
    %116 = arith.select %114, %115, %112 : vector<8x8x4xi1>, vector<8x8x4xf32>
    %117 = vector.shape_cast %116 : vector<8x8x4xf32> to vector<64x4xf32>
    %118 = arith.truncf %117 : vector<64x4xf32> to vector<64x4xbf16>
    %c28 = arith.constant 28 : index
    %c0_35 = arith.constant 0 : index
    %119 = vector.load %arg3[%c28, %c0_35] : memref<36x4xbf16, #tpu.memory_space<vmem>>, vector<4x4xbf16>
    %cst_36 = arith.constant dense<0.000000e+00> : vector<64x4xf32>
    %120 = tpu.matmul %118, %119, %cst_36 {dimension_numbers = #tpu.dot_dimension_numbers<[1], [0], [0], [1], [0, 0, 1, 1], [], []>} : vector<64x4xbf16>, vector<4x4xbf16>, vector<64x4xf32> -> vector<64x4xf32>
    %121 = arith.addf %109, %120 : vector<64x4xf32>
    %122 = vector.extract_strided_slice %20 {offsets = [1, 0, 0], sizes = [7, 8, 4], strides = [1, 1, 1]} : vector<8x8x4xf32> to vector<7x8x4xf32>
    %123 = vector.extract_strided_slice %20 {offsets = [0, 0, 0], sizes = [1, 8, 4], strides = [1, 1, 1]} : vector<8x8x4xf32> to vector<1x8x4xf32>
    %124 = tpu.concatenate %122, %123 in 0 : vector<7x8x4xf32>, vector<1x8x4xf32> -> vector<8x8x4xf32>
    %cst_37 = arith.constant 0.000000e+00 : f32
    %125 = vector.shape_cast %6 : vector<8x8x1xi1> to vector<8x8x1xi1>
    %126 = vector.broadcast %125 : vector<8x8x1xi1> to vector<8x8x4xi1>
    %127 = vector.broadcast %cst_37 : f32 to vector<8x8x4xf32>
    %128 = arith.select %126, %127, %124 : vector<8x8x4xi1>, vector<8x8x4xf32>
    %c7_i32_38 = arith.constant 7 : i32
    %129 = tpu.dynamic_rotate %128 by %c7_i32_38 dim 1 : vector<8x8x4xf32>, i32 -> vector<8x8x4xf32>
    %cst_39 = arith.constant 0.000000e+00 : f32
    %130 = vector.shape_cast %10 : vector<1x8x1xi1> to vector<1x8x1xi1>
    %131 = vector.broadcast %130 : vector<1x8x1xi1> to vector<8x8x4xi1>
    %132 = vector.broadcast %cst_39 : f32 to vector<8x8x4xf32>
    %133 = arith.select %131, %132, %129 : vector<8x8x4xi1>, vector<8x8x4xf32>
    %134 = vector.shape_cast %133 : vector<8x8x4xf32> to vector<64x4xf32>
    %135 = arith.truncf %134 : vector<64x4xf32> to vector<64x4xbf16>
    %c32 = arith.constant 32 : index
    %c0_40 = arith.constant 0 : index
    %136 = vector.load %arg3[%c32, %c0_40] : memref<36x4xbf16, #tpu.memory_space<vmem>>, vector<4x4xbf16>
    %cst_41 = arith.constant dense<0.000000e+00> : vector<64x4xf32>
    %137 = tpu.matmul %135, %136, %cst_41 {dimension_numbers = #tpu.dot_dimension_numbers<[1], [0], [0], [1], [0, 0, 1, 1], [], []>} : vector<64x4xbf16>, vector<4x4xbf16>, vector<64x4xf32> -> vector<64x4xf32>
    %138 = arith.addf %121, %137 : vector<64x4xf32>
    %139 = vector.shape_cast %138 : vector<64x4xf32> to vector<8x8x4xf32>
    %140 = vector.shape_cast %139 : vector<8x8x4xf32> to vector<1x8x8x4xf32>
    %cst_42 = arith.constant dense<0.000000e+00> : vector<1xf32>
    %141 = vector.multi_reduction <add>, %140, %cst_42 [1, 2, 3] : vector<1x8x8x4xf32> to vector<1xf32>
    %142 = vector.shape_cast %141 : vector<1xf32> to vector<1x1x1x1xf32>
    %cst_43 = arith.constant 2.560000e+02 : f32
    %143 = vector.broadcast %cst_43 : f32 to vector<1x1x1x1xf32>
    %144 = arith.divf %142, %143 : vector<1x1x1x1xf32>
    %145 = arith.mulf %140, %140 : vector<1x8x8x4xf32>
    %cst_44 = arith.constant dense<0.000000e+00> : vector<1xf32>
    %146 = vector.multi_reduction <add>, %145, %cst_44 [1, 2, 3] : vector<1x8x8x4xf32> to vector<1xf32>
    %147 = vector.shape_cast %146 : vector<1xf32> to vector<1x1x1x1xf32>
    %cst_45 = arith.constant 2.560000e+02 : f32
    %148 = vector.broadcast %cst_45 : f32 to vector<1x1x1x1xf32>
    %149 = arith.divf %147, %148 : vector<1x1x1x1xf32>
    %150 = arith.mulf %144, %144 : vector<1x1x1x1xf32>
    %151 = arith.subf %149, %150 : vector<1x1x1x1xf32>
    %152 = vector.broadcast %144 : vector<1x1x1x1xf32> to vector<1x8x8x4xf32>
    %153 = arith.subf %140, %152 : vector<1x8x8x4xf32>
    %cst_46 = arith.constant 9.99999974E-6 : f32
    %154 = vector.broadcast %cst_46 : f32 to vector<1x1x1x1xf32>
    %155 = arith.addf %151, %154 : vector<1x1x1x1xf32>
    %156 = math.rsqrt %155 : vector<1x1x1x1xf32>
    %157 = vector.broadcast %156 : vector<1x1x1x1xf32> to vector<1x8x8x4xf32>
    %158 = arith.mulf %153, %157 : vector<1x8x8x4xf32>
    %c0_47 = arith.constant 0 : index
    %c0_48 = arith.constant 0 : index
    %159 = vector.load %arg4[%c0_47, %c0_48] : memref<1x4xf32, #tpu.memory_space<vmem>>, vector<1x4xf32>
    %160 = vector.shape_cast %159 : vector<1x4xf32> to vector<1x1x1x4xf32>
    %c0_49 = arith.constant 0 : index
    %c0_50 = arith.constant 0 : index
    %161 = vector.load %arg5[%c0_49, %c0_50] : memref<1x4xf32, #tpu.memory_space<vmem>>, vector<1x4xf32>
    %162 = vector.shape_cast %161 : vector<1x4xf32> to vector<1x1x1x4xf32>
    %163 = vector.broadcast %160 : vector<1x1x1x4xf32> to vector<1x8x8x4xf32>
    %164 = arith.mulf %158, %163 : vector<1x8x8x4xf32>
    %165 = vector.broadcast %162 : vector<1x1x1x4xf32> to vector<1x8x8x4xf32>
    %166 = arith.addf %164, %165 : vector<1x8x8x4xf32>
    %167 = vector.shape_cast %166 : vector<1x8x8x4xf32> to vector<8x8x4xf32>
    %cst_51 = arith.constant 5.000000e-01 : f32
    %168 = vector.broadcast %cst_51 : f32 to vector<8x8x4xf32>
    %169 = arith.mulf %168, %167 : vector<8x8x4xf32>
    %cst_52 = arith.constant 0.707106769 : f32
    %170 = vector.broadcast %cst_52 : f32 to vector<8x8x4xf32>
    %171 = arith.mulf %167, %170 : vector<8x8x4xf32>
    %172 = math.erf %171 : vector<8x8x4xf32>
    %cst_53 = arith.constant 1.000000e+00 : f32
    %173 = vector.broadcast %cst_53 : f32 to vector<8x8x4xf32>
    %174 = arith.addf %173, %172 : vector<8x8x4xf32>
    %175 = arith.mulf %169, %174 : vector<8x8x4xf32>
    %cst_54 = arith.constant 0.000000e+00 : f32
    %176 = vector.broadcast %cst_54 : f32 to vector<64x4xf32>
    %177 = vector.extract_strided_slice %175 {offsets = [7, 0, 0], sizes = [1, 8, 4], strides = [1, 1, 1]} : vector<8x8x4xf32> to vector<1x8x4xf32>
    %178 = vector.extract_strided_slice %175 {offsets = [0, 0, 0], sizes = [7, 8, 4], strides = [1, 1, 1]} : vector<8x8x4xf32> to vector<7x8x4xf32>
    %179 = tpu.concatenate %177, %178 in 0 : vector<1x8x4xf32>, vector<7x8x4xf32> -> vector<8x8x4xf32>
    %cst_55 = arith.constant 0.000000e+00 : f32
    %180 = vector.shape_cast %4 : vector<8x8x1xi1> to vector<8x8x1xi1>
    %181 = vector.broadcast %180 : vector<8x8x1xi1> to vector<8x8x4xi1>
    %182 = vector.broadcast %cst_55 : f32 to vector<8x8x4xf32>
    %183 = arith.select %181, %182, %179 : vector<8x8x4xi1>, vector<8x8x4xf32>
    %c1_i32_56 = arith.constant 1 : i32
    %184 = tpu.dynamic_rotate %183 by %c1_i32_56 dim 1 : vector<8x8x4xf32>, i32 -> vector<8x8x4xf32>
    %cst_57 = arith.constant 0.000000e+00 : f32
    %185 = vector.shape_cast %8 : vector<1x8x1xi1> to vector<1x8x1xi1>
    %186 = vector.broadcast %185 : vector<1x8x1xi1> to vector<8x8x4xi1>
    %187 = vector.broadcast %cst_57 : f32 to vector<8x8x4xf32>
    %188 = arith.select %186, %187, %184 : vector<8x8x4xi1>, vector<8x8x4xf32>
    %189 = vector.shape_cast %188 : vector<8x8x4xf32> to vector<64x4xf32>
    %190 = arith.truncf %189 : vector<64x4xf32> to vector<64x4xbf16>
    %c0_58 = arith.constant 0 : index
    %c0_59 = arith.constant 0 : index
    %191 = vector.load %arg6[%c0_58, %c0_59] : memref<36x4xbf16, #tpu.memory_space<vmem>>, vector<4x4xbf16>
    %cst_60 = arith.constant dense<0.000000e+00> : vector<64x4xf32>
    %192 = tpu.matmul %190, %191, %cst_60 {dimension_numbers = #tpu.dot_dimension_numbers<[1], [0], [0], [1], [0, 0, 1, 1], [], []>} : vector<64x4xbf16>, vector<4x4xbf16>, vector<64x4xf32> -> vector<64x4xf32>
    %193 = arith.addf %176, %192 : vector<64x4xf32>
    %194 = vector.extract_strided_slice %175 {offsets = [7, 0, 0], sizes = [1, 8, 4], strides = [1, 1, 1]} : vector<8x8x4xf32> to vector<1x8x4xf32>
    %195 = vector.extract_strided_slice %175 {offsets = [0, 0, 0], sizes = [7, 8, 4], strides = [1, 1, 1]} : vector<8x8x4xf32> to vector<7x8x4xf32>
    %196 = tpu.concatenate %194, %195 in 0 : vector<1x8x4xf32>, vector<7x8x4xf32> -> vector<8x8x4xf32>
    %cst_61 = arith.constant 0.000000e+00 : f32
    %197 = vector.shape_cast %4 : vector<8x8x1xi1> to vector<8x8x1xi1>
    %198 = vector.broadcast %197 : vector<8x8x1xi1> to vector<8x8x4xi1>
    %199 = vector.broadcast %cst_61 : f32 to vector<8x8x4xf32>
    %200 = arith.select %198, %199, %196 : vector<8x8x4xi1>, vector<8x8x4xf32>
    %201 = vector.shape_cast %200 : vector<8x8x4xf32> to vector<64x4xf32>
    %202 = arith.truncf %201 : vector<64x4xf32> to vector<64x4xbf16>
    %c4_62 = arith.constant 4 : index
    %c0_63 = arith.constant 0 : index
    %203 = vector.load %arg6[%c4_62, %c0_63] : memref<36x4xbf16, #tpu.memory_space<vmem>>, vector<4x4xbf16>
    %cst_64 = arith.constant dense<0.000000e+00> : vector<64x4xf32>
    %204 = tpu.matmul %202, %203, %cst_64 {dimension_numbers = #tpu.dot_dimension_numbers<[1], [0], [0], [1], [0, 0, 1, 1], [], []>} : vector<64x4xbf16>, vector<4x4xbf16>, vector<64x4xf32> -> vector<64x4xf32>
    %205 = arith.addf %193, %204 : vector<64x4xf32>
    %206 = vector.extract_strided_slice %175 {offsets = [7, 0, 0], sizes = [1, 8, 4], strides = [1, 1, 1]} : vector<8x8x4xf32> to vector<1x8x4xf32>
    %207 = vector.extract_strided_slice %175 {offsets = [0, 0, 0], sizes = [7, 8, 4], strides = [1, 1, 1]} : vector<8x8x4xf32> to vector<7x8x4xf32>
    %208 = tpu.concatenate %206, %207 in 0 : vector<1x8x4xf32>, vector<7x8x4xf32> -> vector<8x8x4xf32>
    %cst_65 = arith.constant 0.000000e+00 : f32
    %209 = vector.shape_cast %4 : vector<8x8x1xi1> to vector<8x8x1xi1>
    %210 = vector.broadcast %209 : vector<8x8x1xi1> to vector<8x8x4xi1>
    %211 = vector.broadcast %cst_65 : f32 to vector<8x8x4xf32>
    %212 = arith.select %210, %211, %208 : vector<8x8x4xi1>, vector<8x8x4xf32>
    %c7_i32_66 = arith.constant 7 : i32
    %213 = tpu.dynamic_rotate %212 by %c7_i32_66 dim 1 : vector<8x8x4xf32>, i32 -> vector<8x8x4xf32>
    %cst_67 = arith.constant 0.000000e+00 : f32
    %214 = vector.shape_cast %10 : vector<1x8x1xi1> to vector<1x8x1xi1>
    %215 = vector.broadcast %214 : vector<1x8x1xi1> to vector<8x8x4xi1>
    %216 = vector.broadcast %cst_67 : f32 to vector<8x8x4xf32>
    %217 = arith.select %215, %216, %213 : vector<8x8x4xi1>, vector<8x8x4xf32>
    %218 = vector.shape_cast %217 : vector<8x8x4xf32> to vector<64x4xf32>
    %219 = arith.truncf %218 : vector<64x4xf32> to vector<64x4xbf16>
    %c8_68 = arith.constant 8 : index
    %c0_69 = arith.constant 0 : index
    %220 = vector.load %arg6[%c8_68, %c0_69] : memref<36x4xbf16, #tpu.memory_space<vmem>>, vector<4x4xbf16>
    %cst_70 = arith.constant dense<0.000000e+00> : vector<64x4xf32>
    %221 = tpu.matmul %219, %220, %cst_70 {dimension_numbers = #tpu.dot_dimension_numbers<[1], [0], [0], [1], [0, 0, 1, 1], [], []>} : vector<64x4xbf16>, vector<4x4xbf16>, vector<64x4xf32> -> vector<64x4xf32>
    %222 = arith.addf %205, %221 : vector<64x4xf32>
    %c1_i32_71 = arith.constant 1 : i32
    %223 = tpu.dynamic_rotate %175 by %c1_i32_71 dim 1 : vector<8x8x4xf32>, i32 -> vector<8x8x4xf32>
    %cst_72 = arith.constant 0.000000e+00 : f32
    %224 = vector.shape_cast %8 : vector<1x8x1xi1> to vector<1x8x1xi1>
    %225 = vector.broadcast %224 : vector<1x8x1xi1> to vector<8x8x4xi1>
    %226 = vector.broadcast %cst_72 : f32 to vector<8x8x4xf32>
    %227 = arith.select %225, %226, %223 : vector<8x8x4xi1>, vector<8x8x4xf32>
    %228 = vector.shape_cast %227 : vector<8x8x4xf32> to vector<64x4xf32>
    %229 = arith.truncf %228 : vector<64x4xf32> to vector<64x4xbf16>
    %c12_73 = arith.constant 12 : index
    %c0_74 = arith.constant 0 : index
    %230 = vector.load %arg6[%c12_73, %c0_74] : memref<36x4xbf16, #tpu.memory_space<vmem>>, vector<4x4xbf16>
    %cst_75 = arith.constant dense<0.000000e+00> : vector<64x4xf32>
    %231 = tpu.matmul %229, %230, %cst_75 {dimension_numbers = #tpu.dot_dimension_numbers<[1], [0], [0], [1], [0, 0, 1, 1], [], []>} : vector<64x4xbf16>, vector<4x4xbf16>, vector<64x4xf32> -> vector<64x4xf32>
    %232 = arith.addf %222, %231 : vector<64x4xf32>
    %233 = vector.shape_cast %175 : vector<8x8x4xf32> to vector<64x4xf32>
    %234 = arith.truncf %233 : vector<64x4xf32> to vector<64x4xbf16>
    %c16_76 = arith.constant 16 : index
    %c0_77 = arith.constant 0 : index
    %235 = vector.load %arg6[%c16_76, %c0_77] : memref<36x4xbf16, #tpu.memory_space<vmem>>, vector<4x4xbf16>
    %cst_78 = arith.constant dense<0.000000e+00> : vector<64x4xf32>
    %236 = tpu.matmul %234, %235, %cst_78 {dimension_numbers = #tpu.dot_dimension_numbers<[1], [0], [0], [1], [0, 0, 1, 1], [], []>} : vector<64x4xbf16>, vector<4x4xbf16>, vector<64x4xf32> -> vector<64x4xf32>
    %237 = arith.addf %232, %236 : vector<64x4xf32>
    %c7_i32_79 = arith.constant 7 : i32
    %238 = tpu.dynamic_rotate %175 by %c7_i32_79 dim 1 : vector<8x8x4xf32>, i32 -> vector<8x8x4xf32>
    %cst_80 = arith.constant 0.000000e+00 : f32
    %239 = vector.shape_cast %10 : vector<1x8x1xi1> to vector<1x8x1xi1>
    %240 = vector.broadcast %239 : vector<1x8x1xi1> to vector<8x8x4xi1>
    %241 = vector.broadcast %cst_80 : f32 to vector<8x8x4xf32>
    %242 = arith.select %240, %241, %238 : vector<8x8x4xi1>, vector<8x8x4xf32>
    %243 = vector.shape_cast %242 : vector<8x8x4xf32> to vector<64x4xf32>
    %244 = arith.truncf %243 : vector<64x4xf32> to vector<64x4xbf16>
    %c20_81 = arith.constant 20 : index
    %c0_82 = arith.constant 0 : index
    %245 = vector.load %arg6[%c20_81, %c0_82] : memref<36x4xbf16, #tpu.memory_space<vmem>>, vector<4x4xbf16>
    %cst_83 = arith.constant dense<0.000000e+00> : vector<64x4xf32>
    %246 = tpu.matmul %244, %245, %cst_83 {dimension_numbers = #tpu.dot_dimension_numbers<[1], [0], [0], [1], [0, 0, 1, 1], [], []>} : vector<64x4xbf16>, vector<4x4xbf16>, vector<64x4xf32> -> vector<64x4xf32>
    %247 = arith.addf %237, %246 : vector<64x4xf32>
    %248 = vector.extract_strided_slice %175 {offsets = [1, 0, 0], sizes = [7, 8, 4], strides = [1, 1, 1]} : vector<8x8x4xf32> to vector<7x8x4xf32>
    %249 = vector.extract_strided_slice %175 {offsets = [0, 0, 0], sizes = [1, 8, 4], strides = [1, 1, 1]} : vector<8x8x4xf32> to vector<1x8x4xf32>
    %250 = tpu.concatenate %248, %249 in 0 : vector<7x8x4xf32>, vector<1x8x4xf32> -> vector<8x8x4xf32>
    %cst_84 = arith.constant 0.000000e+00 : f32
    %251 = vector.shape_cast %6 : vector<8x8x1xi1> to vector<8x8x1xi1>
    %252 = vector.broadcast %251 : vector<8x8x1xi1> to vector<8x8x4xi1>
    %253 = vector.broadcast %cst_84 : f32 to vector<8x8x4xf32>
    %254 = arith.select %252, %253, %250 : vector<8x8x4xi1>, vector<8x8x4xf32>
    %c1_i32_85 = arith.constant 1 : i32
    %255 = tpu.dynamic_rotate %254 by %c1_i32_85 dim 1 : vector<8x8x4xf32>, i32 -> vector<8x8x4xf32>
    %cst_86 = arith.constant 0.000000e+00 : f32
    %256 = vector.shape_cast %8 : vector<1x8x1xi1> to vector<1x8x1xi1>
    %257 = vector.broadcast %256 : vector<1x8x1xi1> to vector<8x8x4xi1>
    %258 = vector.broadcast %cst_86 : f32 to vector<8x8x4xf32>
    %259 = arith.select %257, %258, %255 : vector<8x8x4xi1>, vector<8x8x4xf32>
    %260 = vector.shape_cast %259 : vector<8x8x4xf32> to vector<64x4xf32>
    %261 = arith.truncf %260 : vector<64x4xf32> to vector<64x4xbf16>
    %c24_87 = arith.constant 24 : index
    %c0_88 = arith.constant 0 : index
    %262 = vector.load %arg6[%c24_87, %c0_88] : memref<36x4xbf16, #tpu.memory_space<vmem>>, vector<4x4xbf16>
    %cst_89 = arith.constant dense<0.000000e+00> : vector<64x4xf32>
    %263 = tpu.matmul %261, %262, %cst_89 {dimension_numbers = #tpu.dot_dimension_numbers<[1], [0], [0], [1], [0, 0, 1, 1], [], []>} : vector<64x4xbf16>, vector<4x4xbf16>, vector<64x4xf32> -> vector<64x4xf32>
    %264 = arith.addf %247, %263 : vector<64x4xf32>
    %265 = vector.extract_strided_slice %175 {offsets = [1, 0, 0], sizes = [7, 8, 4], strides = [1, 1, 1]} : vector<8x8x4xf32> to vector<7x8x4xf32>
    %266 = vector.extract_strided_slice %175 {offsets = [0, 0, 0], sizes = [1, 8, 4], strides = [1, 1, 1]} : vector<8x8x4xf32> to vector<1x8x4xf32>
    %267 = tpu.concatenate %265, %266 in 0 : vector<7x8x4xf32>, vector<1x8x4xf32> -> vector<8x8x4xf32>
    %cst_90 = arith.constant 0.000000e+00 : f32
    %268 = vector.shape_cast %6 : vector<8x8x1xi1> to vector<8x8x1xi1>
    %269 = vector.broadcast %268 : vector<8x8x1xi1> to vector<8x8x4xi1>
    %270 = vector.broadcast %cst_90 : f32 to vector<8x8x4xf32>
    %271 = arith.select %269, %270, %267 : vector<8x8x4xi1>, vector<8x8x4xf32>
    %272 = vector.shape_cast %271 : vector<8x8x4xf32> to vector<64x4xf32>
    %273 = arith.truncf %272 : vector<64x4xf32> to vector<64x4xbf16>
    %c28_91 = arith.constant 28 : index
    %c0_92 = arith.constant 0 : index
    %274 = vector.load %arg6[%c28_91, %c0_92] : memref<36x4xbf16, #tpu.memory_space<vmem>>, vector<4x4xbf16>
    %cst_93 = arith.constant dense<0.000000e+00> : vector<64x4xf32>
    %275 = tpu.matmul %273, %274, %cst_93 {dimension_numbers = #tpu.dot_dimension_numbers<[1], [0], [0], [1], [0, 0, 1, 1], [], []>} : vector<64x4xbf16>, vector<4x4xbf16>, vector<64x4xf32> -> vector<64x4xf32>
    %276 = arith.addf %264, %275 : vector<64x4xf32>
    %277 = vector.extract_strided_slice %175 {offsets = [1, 0, 0], sizes = [7, 8, 4], strides = [1, 1, 1]} : vector<8x8x4xf32> to vector<7x8x4xf32>
    %278 = vector.extract_strided_slice %175 {offsets = [0, 0, 0], sizes = [1, 8, 4], strides = [1, 1, 1]} : vector<8x8x4xf32> to vector<1x8x4xf32>
    %279 = tpu.concatenate %277, %278 in 0 : vector<7x8x4xf32>, vector<1x8x4xf32> -> vector<8x8x4xf32>
    %cst_94 = arith.constant 0.000000e+00 : f32
    %280 = vector.shape_cast %6 : vector<8x8x1xi1> to vector<8x8x1xi1>
    %281 = vector.broadcast %280 : vector<8x8x1xi1> to vector<8x8x4xi1>
    %282 = vector.broadcast %cst_94 : f32 to vector<8x8x4xf32>
    %283 = arith.select %281, %282, %279 : vector<8x8x4xi1>, vector<8x8x4xf32>
    %c7_i32_95 = arith.constant 7 : i32
    %284 = tpu.dynamic_rotate %283 by %c7_i32_95 dim 1 : vector<8x8x4xf32>, i32 -> vector<8x8x4xf32>
    %cst_96 = arith.constant 0.000000e+00 : f32
    %285 = vector.shape_cast %10 : vector<1x8x1xi1> to vector<1x8x1xi1>
    %286 = vector.broadcast %285 : vector<1x8x1xi1> to vector<8x8x4xi1>
    %287 = vector.broadcast %cst_96 : f32 to vector<8x8x4xf32>
    %288 = arith.select %286, %287, %284 : vector<8x8x4xi1>, vector<8x8x4xf32>
    %289 = vector.shape_cast %288 : vector<8x8x4xf32> to vector<64x4xf32>
    %290 = arith.truncf %289 : vector<64x4xf32> to vector<64x4xbf16>
    %c32_97 = arith.constant 32 : index
    %c0_98 = arith.constant 0 : index
    %291 = vector.load %arg6[%c32_97, %c0_98] : memref<36x4xbf16, #tpu.memory_space<vmem>>, vector<4x4xbf16>
    %cst_99 = arith.constant dense<0.000000e+00> : vector<64x4xf32>
    %292 = tpu.matmul %290, %291, %cst_99 {dimension_numbers = #tpu.dot_dimension_numbers<[1], [0], [0], [1], [0, 0, 1, 1], [], []>} : vector<64x4xbf16>, vector<4x4xbf16>, vector<64x4xf32> -> vector<64x4xf32>
    %293 = arith.addf %276, %292 : vector<64x4xf32>
    %294 = vector.shape_cast %293 : vector<64x4xf32> to vector<8x8x4xf32>
    %295 = vector.shape_cast %294 : vector<8x8x4xf32> to vector<1x8x8x4xf32>
    %cst_100 = arith.constant dense<0.000000e+00> : vector<1xf32>
    %296 = vector.multi_reduction <add>, %295, %cst_100 [1, 2, 3] : vector<1x8x8x4xf32> to vector<1xf32>
    %297 = vector.shape_cast %296 : vector<1xf32> to vector<1x1x1x1xf32>
    %cst_101 = arith.constant 2.560000e+02 : f32
    %298 = vector.broadcast %cst_101 : f32 to vector<1x1x1x1xf32>
    %299 = arith.divf %297, %298 : vector<1x1x1x1xf32>
    %300 = arith.mulf %295, %295 : vector<1x8x8x4xf32>
    %cst_102 = arith.constant dense<0.000000e+00> : vector<1xf32>
    %301 = vector.multi_reduction <add>, %300, %cst_102 [1, 2, 3] : vector<1x8x8x4xf32> to vector<1xf32>
    %302 = vector.shape_cast %301 : vector<1xf32> to vector<1x1x1x1xf32>
    %cst_103 = arith.constant 2.560000e+02 : f32
    %303 = vector.broadcast %cst_103 : f32 to vector<1x1x1x1xf32>
    %304 = arith.divf %302, %303 : vector<1x1x1x1xf32>
    %305 = arith.mulf %299, %299 : vector<1x1x1x1xf32>
    %306 = arith.subf %304, %305 : vector<1x1x1x1xf32>
    %307 = vector.broadcast %299 : vector<1x1x1x1xf32> to vector<1x8x8x4xf32>
    %308 = arith.subf %295, %307 : vector<1x8x8x4xf32>
    %cst_104 = arith.constant 9.99999974E-6 : f32
    %309 = vector.broadcast %cst_104 : f32 to vector<1x1x1x1xf32>
    %310 = arith.addf %306, %309 : vector<1x1x1x1xf32>
    %311 = math.rsqrt %310 : vector<1x1x1x1xf32>
    %312 = vector.broadcast %311 : vector<1x1x1x1xf32> to vector<1x8x8x4xf32>
    %313 = arith.mulf %308, %312 : vector<1x8x8x4xf32>
    %c0_105 = arith.constant 0 : index
    %c0_106 = arith.constant 0 : index
    %314 = vector.load %arg7[%c0_105, %c0_106] : memref<1x4xf32, #tpu.memory_space<vmem>>, vector<1x4xf32>
    %315 = vector.shape_cast %314 : vector<1x4xf32> to vector<1x1x1x4xf32>
    %c0_107 = arith.constant 0 : index
    %c0_108 = arith.constant 0 : index
    %316 = vector.load %arg8[%c0_107, %c0_108] : memref<1x4xf32, #tpu.memory_space<vmem>>, vector<1x4xf32>
    %317 = vector.shape_cast %316 : vector<1x4xf32> to vector<1x1x1x4xf32>
    %318 = vector.broadcast %315 : vector<1x1x1x4xf32> to vector<1x8x8x4xf32>
    %319 = arith.mulf %313, %318 : vector<1x8x8x4xf32>
    %320 = vector.broadcast %317 : vector<1x1x1x4xf32> to vector<1x8x8x4xf32>
    %321 = arith.addf %319, %320 : vector<1x8x8x4xf32>
    %322 = vector.shape_cast %321 : vector<1x8x8x4xf32> to vector<8x8x4xf32>
    %323 = arith.addf %20, %322 : vector<8x8x4xf32>
    %cst_109 = arith.constant 5.000000e-01 : f32
    %324 = vector.broadcast %cst_109 : f32 to vector<8x8x4xf32>
    %325 = arith.mulf %324, %323 : vector<8x8x4xf32>
    %cst_110 = arith.constant 0.707106769 : f32
    %326 = vector.broadcast %cst_110 : f32 to vector<8x8x4xf32>
    %327 = arith.mulf %323, %326 : vector<8x8x4xf32>
    %328 = math.erf %327 : vector<8x8x4xf32>
    %cst_111 = arith.constant 1.000000e+00 : f32
    %329 = vector.broadcast %cst_111 : f32 to vector<8x8x4xf32>
    %330 = arith.addf %329, %328 : vector<8x8x4xf32>
    %331 = arith.mulf %325, %330 : vector<8x8x4xf32>
    %cst_112 = arith.constant 0.000000e+00 : f32
    %332 = vector.broadcast %cst_112 : f32 to vector<64x8xf32>
    %333 = vector.extract_strided_slice %331 {offsets = [7, 0, 0], sizes = [1, 8, 4], strides = [1, 1, 1]} : vector<8x8x4xf32> to vector<1x8x4xf32>
    %334 = vector.extract_strided_slice %331 {offsets = [0, 0, 0], sizes = [7, 8, 4], strides = [1, 1, 1]} : vector<8x8x4xf32> to vector<7x8x4xf32>
    %335 = tpu.concatenate %333, %334 in 0 : vector<1x8x4xf32>, vector<7x8x4xf32> -> vector<8x8x4xf32>
    %cst_113 = arith.constant 0.000000e+00 : f32
    %336 = vector.shape_cast %4 : vector<8x8x1xi1> to vector<8x8x1xi1>
    %337 = vector.broadcast %336 : vector<8x8x1xi1> to vector<8x8x4xi1>
    %338 = vector.broadcast %cst_113 : f32 to vector<8x8x4xf32>
    %339 = arith.select %337, %338, %335 : vector<8x8x4xi1>, vector<8x8x4xf32>
    %c1_i32_114 = arith.constant 1 : i32
    %340 = tpu.dynamic_rotate %339 by %c1_i32_114 dim 1 : vector<8x8x4xf32>, i32 -> vector<8x8x4xf32>
    %cst_115 = arith.constant 0.000000e+00 : f32
    %341 = vector.shape_cast %8 : vector<1x8x1xi1> to vector<1x8x1xi1>
    %342 = vector.broadcast %341 : vector<1x8x1xi1> to vector<8x8x4xi1>
    %343 = vector.broadcast %cst_115 : f32 to vector<8x8x4xf32>
    %344 = arith.select %342, %343, %340 : vector<8x8x4xi1>, vector<8x8x4xf32>
    %345 = vector.shape_cast %344 : vector<8x8x4xf32> to vector<64x4xf32>
    %346 = arith.truncf %345 : vector<64x4xf32> to vector<64x4xbf16>
    %c0_116 = arith.constant 0 : index
    %c0_117 = arith.constant 0 : index
    %347 = vector.load %arg9[%c0_116, %c0_117] : memref<36x8xbf16, #tpu.memory_space<vmem>>, vector<4x8xbf16>
    %cst_118 = arith.constant dense<0.000000e+00> : vector<64x8xf32>
    %348 = tpu.matmul %346, %347, %cst_118 {dimension_numbers = #tpu.dot_dimension_numbers<[1], [0], [0], [1], [0, 0, 1, 1], [], []>} : vector<64x4xbf16>, vector<4x8xbf16>, vector<64x8xf32> -> vector<64x8xf32>
    %349 = arith.addf %332, %348 : vector<64x8xf32>
    %350 = vector.extract_strided_slice %331 {offsets = [7, 0, 0], sizes = [1, 8, 4], strides = [1, 1, 1]} : vector<8x8x4xf32> to vector<1x8x4xf32>
    %351 = vector.extract_strided_slice %331 {offsets = [0, 0, 0], sizes = [7, 8, 4], strides = [1, 1, 1]} : vector<8x8x4xf32> to vector<7x8x4xf32>
    %352 = tpu.concatenate %350, %351 in 0 : vector<1x8x4xf32>, vector<7x8x4xf32> -> vector<8x8x4xf32>
    %cst_119 = arith.constant 0.000000e+00 : f32
    %353 = vector.shape_cast %4 : vector<8x8x1xi1> to vector<8x8x1xi1>
    %354 = vector.broadcast %353 : vector<8x8x1xi1> to vector<8x8x4xi1>
    %355 = vector.broadcast %cst_119 : f32 to vector<8x8x4xf32>
    %356 = arith.select %354, %355, %352 : vector<8x8x4xi1>, vector<8x8x4xf32>
    %357 = vector.shape_cast %356 : vector<8x8x4xf32> to vector<64x4xf32>
    %358 = arith.truncf %357 : vector<64x4xf32> to vector<64x4xbf16>
    %c4_120 = arith.constant 4 : index
    %c0_121 = arith.constant 0 : index
    %359 = vector.load %arg9[%c4_120, %c0_121] : memref<36x8xbf16, #tpu.memory_space<vmem>>, vector<4x8xbf16>
    %cst_122 = arith.constant dense<0.000000e+00> : vector<64x8xf32>
    %360 = tpu.matmul %358, %359, %cst_122 {dimension_numbers = #tpu.dot_dimension_numbers<[1], [0], [0], [1], [0, 0, 1, 1], [], []>} : vector<64x4xbf16>, vector<4x8xbf16>, vector<64x8xf32> -> vector<64x8xf32>
    %361 = arith.addf %349, %360 : vector<64x8xf32>
    %362 = vector.extract_strided_slice %331 {offsets = [7, 0, 0], sizes = [1, 8, 4], strides = [1, 1, 1]} : vector<8x8x4xf32> to vector<1x8x4xf32>
    %363 = vector.extract_strided_slice %331 {offsets = [0, 0, 0], sizes = [7, 8, 4], strides = [1, 1, 1]} : vector<8x8x4xf32> to vector<7x8x4xf32>
    %364 = tpu.concatenate %362, %363 in 0 : vector<1x8x4xf32>, vector<7x8x4xf32> -> vector<8x8x4xf32>
    %cst_123 = arith.constant 0.000000e+00 : f32
    %365 = vector.shape_cast %4 : vector<8x8x1xi1> to vector<8x8x1xi1>
    %366 = vector.broadcast %365 : vector<8x8x1xi1> to vector<8x8x4xi1>
    %367 = vector.broadcast %cst_123 : f32 to vector<8x8x4xf32>
    %368 = arith.select %366, %367, %364 : vector<8x8x4xi1>, vector<8x8x4xf32>
    %c7_i32_124 = arith.constant 7 : i32
    %369 = tpu.dynamic_rotate %368 by %c7_i32_124 dim 1 : vector<8x8x4xf32>, i32 -> vector<8x8x4xf32>
    %cst_125 = arith.constant 0.000000e+00 : f32
    %370 = vector.shape_cast %10 : vector<1x8x1xi1> to vector<1x8x1xi1>
    %371 = vector.broadcast %370 : vector<1x8x1xi1> to vector<8x8x4xi1>
    %372 = vector.broadcast %cst_125 : f32 to vector<8x8x4xf32>
    %373 = arith.select %371, %372, %369 : vector<8x8x4xi1>, vector<8x8x4xf32>
    %374 = vector.shape_cast %373 : vector<8x8x4xf32> to vector<64x4xf32>
    %375 = arith.truncf %374 : vector<64x4xf32> to vector<64x4xbf16>
    %c8_126 = arith.constant 8 : index
    %c0_127 = arith.constant 0 : index
    %376 = vector.load %arg9[%c8_126, %c0_127] : memref<36x8xbf16, #tpu.memory_space<vmem>>, vector<4x8xbf16>
    %cst_128 = arith.constant dense<0.000000e+00> : vector<64x8xf32>
    %377 = tpu.matmul %375, %376, %cst_128 {dimension_numbers = #tpu.dot_dimension_numbers<[1], [0], [0], [1], [0, 0, 1, 1], [], []>} : vector<64x4xbf16>, vector<4x8xbf16>, vector<64x8xf32> -> vector<64x8xf32>
    %378 = arith.addf %361, %377 : vector<64x8xf32>
    %c1_i32_129 = arith.constant 1 : i32
    %379 = tpu.dynamic_rotate %331 by %c1_i32_129 dim 1 : vector<8x8x4xf32>, i32 -> vector<8x8x4xf32>
    %cst_130 = arith.constant 0.000000e+00 : f32
    %380 = vector.shape_cast %8 : vector<1x8x1xi1> to vector<1x8x1xi1>
    %381 = vector.broadcast %380 : vector<1x8x1xi1> to vector<8x8x4xi1>
    %382 = vector.broadcast %cst_130 : f32 to vector<8x8x4xf32>
    %383 = arith.select %381, %382, %379 : vector<8x8x4xi1>, vector<8x8x4xf32>
    %384 = vector.shape_cast %383 : vector<8x8x4xf32> to vector<64x4xf32>
    %385 = arith.truncf %384 : vector<64x4xf32> to vector<64x4xbf16>
    %c12_131 = arith.constant 12 : index
    %c0_132 = arith.constant 0 : index
    %386 = vector.load %arg9[%c12_131, %c0_132] : memref<36x8xbf16, #tpu.memory_space<vmem>>, vector<4x8xbf16>
    %cst_133 = arith.constant dense<0.000000e+00> : vector<64x8xf32>
    %387 = tpu.matmul %385, %386, %cst_133 {dimension_numbers = #tpu.dot_dimension_numbers<[1], [0], [0], [1], [0, 0, 1, 1], [], []>} : vector<64x4xbf16>, vector<4x8xbf16>, vector<64x8xf32> -> vector<64x8xf32>
    %388 = arith.addf %378, %387 : vector<64x8xf32>
    %389 = vector.shape_cast %331 : vector<8x8x4xf32> to vector<64x4xf32>
    %390 = arith.truncf %389 : vector<64x4xf32> to vector<64x4xbf16>
    %c16_134 = arith.constant 16 : index
    %c0_135 = arith.constant 0 : index
    %391 = vector.load %arg9[%c16_134, %c0_135] : memref<36x8xbf16, #tpu.memory_space<vmem>>, vector<4x8xbf16>
    %cst_136 = arith.constant dense<0.000000e+00> : vector<64x8xf32>
    %392 = tpu.matmul %390, %391, %cst_136 {dimension_numbers = #tpu.dot_dimension_numbers<[1], [0], [0], [1], [0, 0, 1, 1], [], []>} : vector<64x4xbf16>, vector<4x8xbf16>, vector<64x8xf32> -> vector<64x8xf32>
    %393 = arith.addf %388, %392 : vector<64x8xf32>
    %c7_i32_137 = arith.constant 7 : i32
    %394 = tpu.dynamic_rotate %331 by %c7_i32_137 dim 1 : vector<8x8x4xf32>, i32 -> vector<8x8x4xf32>
    %cst_138 = arith.constant 0.000000e+00 : f32
    %395 = vector.shape_cast %10 : vector<1x8x1xi1> to vector<1x8x1xi1>
    %396 = vector.broadcast %395 : vector<1x8x1xi1> to vector<8x8x4xi1>
    %397 = vector.broadcast %cst_138 : f32 to vector<8x8x4xf32>
    %398 = arith.select %396, %397, %394 : vector<8x8x4xi1>, vector<8x8x4xf32>
    %399 = vector.shape_cast %398 : vector<8x8x4xf32> to vector<64x4xf32>
    %400 = arith.truncf %399 : vector<64x4xf32> to vector<64x4xbf16>
    %c20_139 = arith.constant 20 : index
    %c0_140 = arith.constant 0 : index
    %401 = vector.load %arg9[%c20_139, %c0_140] : memref<36x8xbf16, #tpu.memory_space<vmem>>, vector<4x8xbf16>
    %cst_141 = arith.constant dense<0.000000e+00> : vector<64x8xf32>
    %402 = tpu.matmul %400, %401, %cst_141 {dimension_numbers = #tpu.dot_dimension_numbers<[1], [0], [0], [1], [0, 0, 1, 1], [], []>} : vector<64x4xbf16>, vector<4x8xbf16>, vector<64x8xf32> -> vector<64x8xf32>
    %403 = arith.addf %393, %402 : vector<64x8xf32>
    %404 = vector.extract_strided_slice %331 {offsets = [1, 0, 0], sizes = [7, 8, 4], strides = [1, 1, 1]} : vector<8x8x4xf32> to vector<7x8x4xf32>
    %405 = vector.extract_strided_slice %331 {offsets = [0, 0, 0], sizes = [1, 8, 4], strides = [1, 1, 1]} : vector<8x8x4xf32> to vector<1x8x4xf32>
    %406 = tpu.concatenate %404, %405 in 0 : vector<7x8x4xf32>, vector<1x8x4xf32> -> vector<8x8x4xf32>
    %cst_142 = arith.constant 0.000000e+00 : f32
    %407 = vector.shape_cast %6 : vector<8x8x1xi1> to vector<8x8x1xi1>
    %408 = vector.broadcast %407 : vector<8x8x1xi1> to vector<8x8x4xi1>
    %409 = vector.broadcast %cst_142 : f32 to vector<8x8x4xf32>
    %410 = arith.select %408, %409, %406 : vector<8x8x4xi1>, vector<8x8x4xf32>
    %c1_i32_143 = arith.constant 1 : i32
    %411 = tpu.dynamic_rotate %410 by %c1_i32_143 dim 1 : vector<8x8x4xf32>, i32 -> vector<8x8x4xf32>
    %cst_144 = arith.constant 0.000000e+00 : f32
    %412 = vector.shape_cast %8 : vector<1x8x1xi1> to vector<1x8x1xi1>
    %413 = vector.broadcast %412 : vector<1x8x1xi1> to vector<8x8x4xi1>
    %414 = vector.broadcast %cst_144 : f32 to vector<8x8x4xf32>
    %415 = arith.select %413, %414, %411 : vector<8x8x4xi1>, vector<8x8x4xf32>
    %416 = vector.shape_cast %415 : vector<8x8x4xf32> to vector<64x4xf32>
    %417 = arith.truncf %416 : vector<64x4xf32> to vector<64x4xbf16>
    %c24_145 = arith.constant 24 : index
    %c0_146 = arith.constant 0 : index
    %418 = vector.load %arg9[%c24_145, %c0_146] : memref<36x8xbf16, #tpu.memory_space<vmem>>, vector<4x8xbf16>
    %cst_147 = arith.constant dense<0.000000e+00> : vector<64x8xf32>
    %419 = tpu.matmul %417, %418, %cst_147 {dimension_numbers = #tpu.dot_dimension_numbers<[1], [0], [0], [1], [0, 0, 1, 1], [], []>} : vector<64x4xbf16>, vector<4x8xbf16>, vector<64x8xf32> -> vector<64x8xf32>
    %420 = arith.addf %403, %419 : vector<64x8xf32>
    %421 = vector.extract_strided_slice %331 {offsets = [1, 0, 0], sizes = [7, 8, 4], strides = [1, 1, 1]} : vector<8x8x4xf32> to vector<7x8x4xf32>
    %422 = vector.extract_strided_slice %331 {offsets = [0, 0, 0], sizes = [1, 8, 4], strides = [1, 1, 1]} : vector<8x8x4xf32> to vector<1x8x4xf32>
    %423 = tpu.concatenate %421, %422 in 0 : vector<7x8x4xf32>, vector<1x8x4xf32> -> vector<8x8x4xf32>
    %cst_148 = arith.constant 0.000000e+00 : f32
    %424 = vector.shape_cast %6 : vector<8x8x1xi1> to vector<8x8x1xi1>
    %425 = vector.broadcast %424 : vector<8x8x1xi1> to vector<8x8x4xi1>
    %426 = vector.broadcast %cst_148 : f32 to vector<8x8x4xf32>
    %427 = arith.select %425, %426, %423 : vector<8x8x4xi1>, vector<8x8x4xf32>
    %428 = vector.shape_cast %427 : vector<8x8x4xf32> to vector<64x4xf32>
    %429 = arith.truncf %428 : vector<64x4xf32> to vector<64x4xbf16>
    %c28_149 = arith.constant 28 : index
    %c0_150 = arith.constant 0 : index
    %430 = vector.load %arg9[%c28_149, %c0_150] : memref<36x8xbf16, #tpu.memory_space<vmem>>, vector<4x8xbf16>
    %cst_151 = arith.constant dense<0.000000e+00> : vector<64x8xf32>
    %431 = tpu.matmul %429, %430, %cst_151 {dimension_numbers = #tpu.dot_dimension_numbers<[1], [0], [0], [1], [0, 0, 1, 1], [], []>} : vector<64x4xbf16>, vector<4x8xbf16>, vector<64x8xf32> -> vector<64x8xf32>
    %432 = arith.addf %420, %431 : vector<64x8xf32>
    %433 = vector.extract_strided_slice %331 {offsets = [1, 0, 0], sizes = [7, 8, 4], strides = [1, 1, 1]} : vector<8x8x4xf32> to vector<7x8x4xf32>
    %434 = vector.extract_strided_slice %331 {offsets = [0, 0, 0], sizes = [1, 8, 4], strides = [1, 1, 1]} : vector<8x8x4xf32> to vector<1x8x4xf32>
    %435 = tpu.concatenate %433, %434 in 0 : vector<7x8x4xf32>, vector<1x8x4xf32> -> vector<8x8x4xf32>
    %cst_152 = arith.constant 0.000000e+00 : f32
    %436 = vector.shape_cast %6 : vector<8x8x1xi1> to vector<8x8x1xi1>
    %437 = vector.broadcast %436 : vector<8x8x1xi1> to vector<8x8x4xi1>
    %438 = vector.broadcast %cst_152 : f32 to vector<8x8x4xf32>
    %439 = arith.select %437, %438, %435 : vector<8x8x4xi1>, vector<8x8x4xf32>
    %c7_i32_153 = arith.constant 7 : i32
    %440 = tpu.dynamic_rotate %439 by %c7_i32_153 dim 1 : vector<8x8x4xf32>, i32 -> vector<8x8x4xf32>
    %cst_154 = arith.constant 0.000000e+00 : f32
    %441 = vector.shape_cast %10 : vector<1x8x1xi1> to vector<1x8x1xi1>
    %442 = vector.broadcast %441 : vector<1x8x1xi1> to vector<8x8x4xi1>
    %443 = vector.broadcast %cst_154 : f32 to vector<8x8x4xf32>
    %444 = arith.select %442, %443, %440 : vector<8x8x4xi1>, vector<8x8x4xf32>
    %445 = vector.shape_cast %444 : vector<8x8x4xf32> to vector<64x4xf32>
    %446 = arith.truncf %445 : vector<64x4xf32> to vector<64x4xbf16>
    %c32_155 = arith.constant 32 : index
    %c0_156 = arith.constant 0 : index
    %447 = vector.load %arg9[%c32_155, %c0_156] : memref<36x8xbf16, #tpu.memory_space<vmem>>, vector<4x8xbf16>
    %cst_157 = arith.constant dense<0.000000e+00> : vector<64x8xf32>
    %448 = tpu.matmul %446, %447, %cst_157 {dimension_numbers = #tpu.dot_dimension_numbers<[1], [0], [0], [1], [0, 0, 1, 1], [], []>} : vector<64x4xbf16>, vector<4x8xbf16>, vector<64x8xf32> -> vector<64x8xf32>
    %449 = arith.addf %432, %448 : vector<64x8xf32>
    %450 = vector.shape_cast %449 : vector<64x8xf32> to vector<8x8x8xf32>
    %451 = vector.shape_cast %450 : vector<8x8x8xf32> to vector<1x8x8x8xf32>
    %cst_158 = arith.constant dense<0.000000e+00> : vector<1xf32>
    %452 = vector.multi_reduction <add>, %451, %cst_158 [1, 2, 3] : vector<1x8x8x8xf32> to vector<1xf32>
    %453 = vector.shape_cast %452 : vector<1xf32> to vector<1x1x1x1xf32>
    %cst_159 = arith.constant 5.120000e+02 : f32
    %454 = vector.broadcast %cst_159 : f32 to vector<1x1x1x1xf32>
    %455 = arith.divf %453, %454 : vector<1x1x1x1xf32>
    %456 = arith.mulf %451, %451 : vector<1x8x8x8xf32>
    %cst_160 = arith.constant dense<0.000000e+00> : vector<1xf32>
    %457 = vector.multi_reduction <add>, %456, %cst_160 [1, 2, 3] : vector<1x8x8x8xf32> to vector<1xf32>
    %458 = vector.shape_cast %457 : vector<1xf32> to vector<1x1x1x1xf32>
    %cst_161 = arith.constant 5.120000e+02 : f32
    %459 = vector.broadcast %cst_161 : f32 to vector<1x1x1x1xf32>
    %460 = arith.divf %458, %459 : vector<1x1x1x1xf32>
    %461 = arith.mulf %455, %455 : vector<1x1x1x1xf32>
    %462 = arith.subf %460, %461 : vector<1x1x1x1xf32>
    %463 = vector.broadcast %455 : vector<1x1x1x1xf32> to vector<1x8x8x8xf32>
    %464 = arith.subf %451, %463 : vector<1x8x8x8xf32>
    %cst_162 = arith.constant 9.99999974E-6 : f32
    %465 = vector.broadcast %cst_162 : f32 to vector<1x1x1x1xf32>
    %466 = arith.addf %462, %465 : vector<1x1x1x1xf32>
    %467 = math.rsqrt %466 : vector<1x1x1x1xf32>
    %468 = vector.broadcast %467 : vector<1x1x1x1xf32> to vector<1x8x8x8xf32>
    %469 = arith.mulf %464, %468 : vector<1x8x8x8xf32>
    %c0_163 = arith.constant 0 : index
    %c0_164 = arith.constant 0 : index
    %470 = vector.load %arg10[%c0_163, %c0_164] : memref<1x8xf32, #tpu.memory_space<vmem>>, vector<1x8xf32>
    %471 = vector.shape_cast %470 : vector<1x8xf32> to vector<1x1x1x8xf32>
    %c0_165 = arith.constant 0 : index
    %c0_166 = arith.constant 0 : index
    %472 = vector.load %arg11[%c0_165, %c0_166] : memref<1x8xf32, #tpu.memory_space<vmem>>, vector<1x8xf32>
    %473 = vector.shape_cast %472 : vector<1x8xf32> to vector<1x1x1x8xf32>
    %474 = vector.broadcast %471 : vector<1x1x1x8xf32> to vector<1x8x8x8xf32>
    %475 = arith.mulf %469, %474 : vector<1x8x8x8xf32>
    %476 = vector.broadcast %473 : vector<1x1x1x8xf32> to vector<1x8x8x8xf32>
    %477 = arith.addf %475, %476 : vector<1x8x8x8xf32>
    %478 = vector.shape_cast %477 : vector<1x8x8x8xf32> to vector<8x8x8xf32>
    %cst_167 = arith.constant 5.000000e-01 : f32
    %479 = vector.broadcast %cst_167 : f32 to vector<8x8x8xf32>
    %480 = arith.mulf %479, %478 : vector<8x8x8xf32>
    %cst_168 = arith.constant 0.707106769 : f32
    %481 = vector.broadcast %cst_168 : f32 to vector<8x8x8xf32>
    %482 = arith.mulf %478, %481 : vector<8x8x8xf32>
    %483 = math.erf %482 : vector<8x8x8xf32>
    %cst_169 = arith.constant 1.000000e+00 : f32
    %484 = vector.broadcast %cst_169 : f32 to vector<8x8x8xf32>
    %485 = arith.addf %484, %483 : vector<8x8x8xf32>
    %486 = arith.mulf %480, %485 : vector<8x8x8xf32>
    %cst_170 = arith.constant 0.000000e+00 : f32
    %487 = vector.broadcast %cst_170 : f32 to vector<64x8xf32>
    %488 = vector.extract_strided_slice %486 {offsets = [7, 0, 0], sizes = [1, 8, 8], strides = [1, 1, 1]} : vector<8x8x8xf32> to vector<1x8x8xf32>
    %489 = vector.extract_strided_slice %486 {offsets = [0, 0, 0], sizes = [7, 8, 8], strides = [1, 1, 1]} : vector<8x8x8xf32> to vector<7x8x8xf32>
    %490 = tpu.concatenate %488, %489 in 0 : vector<1x8x8xf32>, vector<7x8x8xf32> -> vector<8x8x8xf32>
    %cst_171 = arith.constant 0.000000e+00 : f32
    %491 = vector.shape_cast %4 : vector<8x8x1xi1> to vector<8x8x1xi1>
    %492 = vector.broadcast %491 : vector<8x8x1xi1> to vector<8x8x8xi1>
    %493 = vector.broadcast %cst_171 : f32 to vector<8x8x8xf32>
    %494 = arith.select %492, %493, %490 : vector<8x8x8xi1>, vector<8x8x8xf32>
    %c1_i32_172 = arith.constant 1 : i32
    %495 = tpu.dynamic_rotate %494 by %c1_i32_172 dim 1 : vector<8x8x8xf32>, i32 -> vector<8x8x8xf32>
    %cst_173 = arith.constant 0.000000e+00 : f32
    %496 = vector.shape_cast %8 : vector<1x8x1xi1> to vector<1x8x1xi1>
    %497 = vector.broadcast %496 : vector<1x8x1xi1> to vector<8x8x8xi1>
    %498 = vector.broadcast %cst_173 : f32 to vector<8x8x8xf32>
    %499 = arith.select %497, %498, %495 : vector<8x8x8xi1>, vector<8x8x8xf32>
    %500 = vector.shape_cast %499 : vector<8x8x8xf32> to vector<64x8xf32>
    %501 = arith.truncf %500 : vector<64x8xf32> to vector<64x8xbf16>
    %c0_174 = arith.constant 0 : index
    %c0_175 = arith.constant 0 : index
    %502 = vector.load %arg12[%c0_174, %c0_175] : memref<72x8xbf16, #tpu.memory_space<vmem>>, vector<8x8xbf16>
    %cst_176 = arith.constant dense<0.000000e+00> : vector<64x8xf32>
    %503 = tpu.matmul %501, %502, %cst_176 {dimension_numbers = #tpu.dot_dimension_numbers<[1], [0], [0], [1], [0, 0, 1, 1], [], []>} : vector<64x8xbf16>, vector<8x8xbf16>, vector<64x8xf32> -> vector<64x8xf32>
    %504 = arith.addf %487, %503 : vector<64x8xf32>
    %505 = vector.extract_strided_slice %486 {offsets = [7, 0, 0], sizes = [1, 8, 8], strides = [1, 1, 1]} : vector<8x8x8xf32> to vector<1x8x8xf32>
    %506 = vector.extract_strided_slice %486 {offsets = [0, 0, 0], sizes = [7, 8, 8], strides = [1, 1, 1]} : vector<8x8x8xf32> to vector<7x8x8xf32>
    %507 = tpu.concatenate %505, %506 in 0 : vector<1x8x8xf32>, vector<7x8x8xf32> -> vector<8x8x8xf32>
    %cst_177 = arith.constant 0.000000e+00 : f32
    %508 = vector.shape_cast %4 : vector<8x8x1xi1> to vector<8x8x1xi1>
    %509 = vector.broadcast %508 : vector<8x8x1xi1> to vector<8x8x8xi1>
    %510 = vector.broadcast %cst_177 : f32 to vector<8x8x8xf32>
    %511 = arith.select %509, %510, %507 : vector<8x8x8xi1>, vector<8x8x8xf32>
    %512 = vector.shape_cast %511 : vector<8x8x8xf32> to vector<64x8xf32>
    %513 = arith.truncf %512 : vector<64x8xf32> to vector<64x8xbf16>
    %c8_178 = arith.constant 8 : index
    %c0_179 = arith.constant 0 : index
    %514 = vector.load %arg12[%c8_178, %c0_179] : memref<72x8xbf16, #tpu.memory_space<vmem>>, vector<8x8xbf16>
    %cst_180 = arith.constant dense<0.000000e+00> : vector<64x8xf32>
    %515 = tpu.matmul %513, %514, %cst_180 {dimension_numbers = #tpu.dot_dimension_numbers<[1], [0], [0], [1], [0, 0, 1, 1], [], []>} : vector<64x8xbf16>, vector<8x8xbf16>, vector<64x8xf32> -> vector<64x8xf32>
    %516 = arith.addf %504, %515 : vector<64x8xf32>
    %517 = vector.extract_strided_slice %486 {offsets = [7, 0, 0], sizes = [1, 8, 8], strides = [1, 1, 1]} : vector<8x8x8xf32> to vector<1x8x8xf32>
    %518 = vector.extract_strided_slice %486 {offsets = [0, 0, 0], sizes = [7, 8, 8], strides = [1, 1, 1]} : vector<8x8x8xf32> to vector<7x8x8xf32>
    %519 = tpu.concatenate %517, %518 in 0 : vector<1x8x8xf32>, vector<7x8x8xf32> -> vector<8x8x8xf32>
    %cst_181 = arith.constant 0.000000e+00 : f32
    %520 = vector.shape_cast %4 : vector<8x8x1xi1> to vector<8x8x1xi1>
    %521 = vector.broadcast %520 : vector<8x8x1xi1> to vector<8x8x8xi1>
    %522 = vector.broadcast %cst_181 : f32 to vector<8x8x8xf32>
    %523 = arith.select %521, %522, %519 : vector<8x8x8xi1>, vector<8x8x8xf32>
    %c7_i32_182 = arith.constant 7 : i32
    %524 = tpu.dynamic_rotate %523 by %c7_i32_182 dim 1 : vector<8x8x8xf32>, i32 -> vector<8x8x8xf32>
    %cst_183 = arith.constant 0.000000e+00 : f32
    %525 = vector.shape_cast %10 : vector<1x8x1xi1> to vector<1x8x1xi1>
    %526 = vector.broadcast %525 : vector<1x8x1xi1> to vector<8x8x8xi1>
    %527 = vector.broadcast %cst_183 : f32 to vector<8x8x8xf32>
    %528 = arith.select %526, %527, %524 : vector<8x8x8xi1>, vector<8x8x8xf32>
    %529 = vector.shape_cast %528 : vector<8x8x8xf32> to vector<64x8xf32>
    %530 = arith.truncf %529 : vector<64x8xf32> to vector<64x8xbf16>
    %c16_184 = arith.constant 16 : index
    %c0_185 = arith.constant 0 : index
    %531 = vector.load %arg12[%c16_184, %c0_185] : memref<72x8xbf16, #tpu.memory_space<vmem>>, vector<8x8xbf16>
    %cst_186 = arith.constant dense<0.000000e+00> : vector<64x8xf32>
    %532 = tpu.matmul %530, %531, %cst_186 {dimension_numbers = #tpu.dot_dimension_numbers<[1], [0], [0], [1], [0, 0, 1, 1], [], []>} : vector<64x8xbf16>, vector<8x8xbf16>, vector<64x8xf32> -> vector<64x8xf32>
    %533 = arith.addf %516, %532 : vector<64x8xf32>
    %c1_i32_187 = arith.constant 1 : i32
    %534 = tpu.dynamic_rotate %486 by %c1_i32_187 dim 1 : vector<8x8x8xf32>, i32 -> vector<8x8x8xf32>
    %cst_188 = arith.constant 0.000000e+00 : f32
    %535 = vector.shape_cast %8 : vector<1x8x1xi1> to vector<1x8x1xi1>
    %536 = vector.broadcast %535 : vector<1x8x1xi1> to vector<8x8x8xi1>
    %537 = vector.broadcast %cst_188 : f32 to vector<8x8x8xf32>
    %538 = arith.select %536, %537, %534 : vector<8x8x8xi1>, vector<8x8x8xf32>
    %539 = vector.shape_cast %538 : vector<8x8x8xf32> to vector<64x8xf32>
    %540 = arith.truncf %539 : vector<64x8xf32> to vector<64x8xbf16>
    %c24_189 = arith.constant 24 : index
    %c0_190 = arith.constant 0 : index
    %541 = vector.load %arg12[%c24_189, %c0_190] : memref<72x8xbf16, #tpu.memory_space<vmem>>, vector<8x8xbf16>
    %cst_191 = arith.constant dense<0.000000e+00> : vector<64x8xf32>
    %542 = tpu.matmul %540, %541, %cst_191 {dimension_numbers = #tpu.dot_dimension_numbers<[1], [0], [0], [1], [0, 0, 1, 1], [], []>} : vector<64x8xbf16>, vector<8x8xbf16>, vector<64x8xf32> -> vector<64x8xf32>
    %543 = arith.addf %533, %542 : vector<64x8xf32>
    %544 = vector.shape_cast %486 : vector<8x8x8xf32> to vector<64x8xf32>
    %545 = arith.truncf %544 : vector<64x8xf32> to vector<64x8xbf16>
    %c32_192 = arith.constant 32 : index
    %c0_193 = arith.constant 0 : index
    %546 = vector.load %arg12[%c32_192, %c0_193] : memref<72x8xbf16, #tpu.memory_space<vmem>>, vector<8x8xbf16>
    %cst_194 = arith.constant dense<0.000000e+00> : vector<64x8xf32>
    %547 = tpu.matmul %545, %546, %cst_194 {dimension_numbers = #tpu.dot_dimension_numbers<[1], [0], [0], [1], [0, 0, 1, 1], [], []>} : vector<64x8xbf16>, vector<8x8xbf16>, vector<64x8xf32> -> vector<64x8xf32>
    %548 = arith.addf %543, %547 : vector<64x8xf32>
    %c7_i32_195 = arith.constant 7 : i32
    %549 = tpu.dynamic_rotate %486 by %c7_i32_195 dim 1 : vector<8x8x8xf32>, i32 -> vector<8x8x8xf32>
    %cst_196 = arith.constant 0.000000e+00 : f32
    %550 = vector.shape_cast %10 : vector<1x8x1xi1> to vector<1x8x1xi1>
    %551 = vector.broadcast %550 : vector<1x8x1xi1> to vector<8x8x8xi1>
    %552 = vector.broadcast %cst_196 : f32 to vector<8x8x8xf32>
    %553 = arith.select %551, %552, %549 : vector<8x8x8xi1>, vector<8x8x8xf32>
    %554 = vector.shape_cast %553 : vector<8x8x8xf32> to vector<64x8xf32>
    %555 = arith.truncf %554 : vector<64x8xf32> to vector<64x8xbf16>
    %c40 = arith.constant 40 : index
    %c0_197 = arith.constant 0 : index
    %556 = vector.load %arg12[%c40, %c0_197] : memref<72x8xbf16, #tpu.memory_space<vmem>>, vector<8x8xbf16>
    %cst_198 = arith.constant dense<0.000000e+00> : vector<64x8xf32>
    %557 = tpu.matmul %555, %556, %cst_198 {dimension_numbers = #tpu.dot_dimension_numbers<[1], [0], [0], [1], [0, 0, 1, 1], [], []>} : vector<64x8xbf16>, vector<8x8xbf16>, vector<64x8xf32> -> vector<64x8xf32>
    %558 = arith.addf %548, %557 : vector<64x8xf32>
    %559 = vector.extract_strided_slice %486 {offsets = [1, 0, 0], sizes = [7, 8, 8], strides = [1, 1, 1]} : vector<8x8x8xf32> to vector<7x8x8xf32>
    %560 = vector.extract_strided_slice %486 {offsets = [0, 0, 0], sizes = [1, 8, 8], strides = [1, 1, 1]} : vector<8x8x8xf32> to vector<1x8x8xf32>
    %561 = tpu.concatenate %559, %560 in 0 : vector<7x8x8xf32>, vector<1x8x8xf32> -> vector<8x8x8xf32>
    %cst_199 = arith.constant 0.000000e+00 : f32
    %562 = vector.shape_cast %6 : vector<8x8x1xi1> to vector<8x8x1xi1>
    %563 = vector.broadcast %562 : vector<8x8x1xi1> to vector<8x8x8xi1>
    %564 = vector.broadcast %cst_199 : f32 to vector<8x8x8xf32>
    %565 = arith.select %563, %564, %561 : vector<8x8x8xi1>, vector<8x8x8xf32>
    %c1_i32_200 = arith.constant 1 : i32
    %566 = tpu.dynamic_rotate %565 by %c1_i32_200 dim 1 : vector<8x8x8xf32>, i32 -> vector<8x8x8xf32>
    %cst_201 = arith.constant 0.000000e+00 : f32
    %567 = vector.shape_cast %8 : vector<1x8x1xi1> to vector<1x8x1xi1>
    %568 = vector.broadcast %567 : vector<1x8x1xi1> to vector<8x8x8xi1>
    %569 = vector.broadcast %cst_201 : f32 to vector<8x8x8xf32>
    %570 = arith.select %568, %569, %566 : vector<8x8x8xi1>, vector<8x8x8xf32>
    %571 = vector.shape_cast %570 : vector<8x8x8xf32> to vector<64x8xf32>
    %572 = arith.truncf %571 : vector<64x8xf32> to vector<64x8xbf16>
    %c48 = arith.constant 48 : index
    %c0_202 = arith.constant 0 : index
    %573 = vector.load %arg12[%c48, %c0_202] : memref<72x8xbf16, #tpu.memory_space<vmem>>, vector<8x8xbf16>
    %cst_203 = arith.constant dense<0.000000e+00> : vector<64x8xf32>
    %574 = tpu.matmul %572, %573, %cst_203 {dimension_numbers = #tpu.dot_dimension_numbers<[1], [0], [0], [1], [0, 0, 1, 1], [], []>} : vector<64x8xbf16>, vector<8x8xbf16>, vector<64x8xf32> -> vector<64x8xf32>
    %575 = arith.addf %558, %574 : vector<64x8xf32>
    %576 = vector.extract_strided_slice %486 {offsets = [1, 0, 0], sizes = [7, 8, 8], strides = [1, 1, 1]} : vector<8x8x8xf32> to vector<7x8x8xf32>
    %577 = vector.extract_strided_slice %486 {offsets = [0, 0, 0], sizes = [1, 8, 8], strides = [1, 1, 1]} : vector<8x8x8xf32> to vector<1x8x8xf32>
    %578 = tpu.concatenate %576, %577 in 0 : vector<7x8x8xf32>, vector<1x8x8xf32> -> vector<8x8x8xf32>
    %cst_204 = arith.constant 0.000000e+00 : f32
    %579 = vector.shape_cast %6 : vector<8x8x1xi1> to vector<8x8x1xi1>
    %580 = vector.broadcast %579 : vector<8x8x1xi1> to vector<8x8x8xi1>
    %581 = vector.broadcast %cst_204 : f32 to vector<8x8x8xf32>
    %582 = arith.select %580, %581, %578 : vector<8x8x8xi1>, vector<8x8x8xf32>
    %583 = vector.shape_cast %582 : vector<8x8x8xf32> to vector<64x8xf32>
    %584 = arith.truncf %583 : vector<64x8xf32> to vector<64x8xbf16>
    %c56 = arith.constant 56 : index
    %c0_205 = arith.constant 0 : index
    %585 = vector.load %arg12[%c56, %c0_205] : memref<72x8xbf16, #tpu.memory_space<vmem>>, vector<8x8xbf16>
    %cst_206 = arith.constant dense<0.000000e+00> : vector<64x8xf32>
    %586 = tpu.matmul %584, %585, %cst_206 {dimension_numbers = #tpu.dot_dimension_numbers<[1], [0], [0], [1], [0, 0, 1, 1], [], []>} : vector<64x8xbf16>, vector<8x8xbf16>, vector<64x8xf32> -> vector<64x8xf32>
    %587 = arith.addf %575, %586 : vector<64x8xf32>
    %588 = vector.extract_strided_slice %486 {offsets = [1, 0, 0], sizes = [7, 8, 8], strides = [1, 1, 1]} : vector<8x8x8xf32> to vector<7x8x8xf32>
    %589 = vector.extract_strided_slice %486 {offsets = [0, 0, 0], sizes = [1, 8, 8], strides = [1, 1, 1]} : vector<8x8x8xf32> to vector<1x8x8xf32>
    %590 = tpu.concatenate %588, %589 in 0 : vector<7x8x8xf32>, vector<1x8x8xf32> -> vector<8x8x8xf32>
    %cst_207 = arith.constant 0.000000e+00 : f32
    %591 = vector.shape_cast %6 : vector<8x8x1xi1> to vector<8x8x1xi1>
    %592 = vector.broadcast %591 : vector<8x8x1xi1> to vector<8x8x8xi1>
    %593 = vector.broadcast %cst_207 : f32 to vector<8x8x8xf32>
    %594 = arith.select %592, %593, %590 : vector<8x8x8xi1>, vector<8x8x8xf32>
    %c7_i32_208 = arith.constant 7 : i32
    %595 = tpu.dynamic_rotate %594 by %c7_i32_208 dim 1 : vector<8x8x8xf32>, i32 -> vector<8x8x8xf32>
    %cst_209 = arith.constant 0.000000e+00 : f32
    %596 = vector.shape_cast %10 : vector<1x8x1xi1> to vector<1x8x1xi1>
    %597 = vector.broadcast %596 : vector<1x8x1xi1> to vector<8x8x8xi1>
    %598 = vector.broadcast %cst_209 : f32 to vector<8x8x8xf32>
    %599 = arith.select %597, %598, %595 : vector<8x8x8xi1>, vector<8x8x8xf32>
    %600 = vector.shape_cast %599 : vector<8x8x8xf32> to vector<64x8xf32>
    %601 = arith.truncf %600 : vector<64x8xf32> to vector<64x8xbf16>
    %c64 = arith.constant 64 : index
    %c0_210 = arith.constant 0 : index
    %602 = vector.load %arg12[%c64, %c0_210] : memref<72x8xbf16, #tpu.memory_space<vmem>>, vector<8x8xbf16>
    %cst_211 = arith.constant dense<0.000000e+00> : vector<64x8xf32>
    %603 = tpu.matmul %601, %602, %cst_211 {dimension_numbers = #tpu.dot_dimension_numbers<[1], [0], [0], [1], [0, 0, 1, 1], [], []>} : vector<64x8xbf16>, vector<8x8xbf16>, vector<64x8xf32> -> vector<64x8xf32>
    %604 = arith.addf %587, %603 : vector<64x8xf32>
    %605 = vector.shape_cast %604 : vector<64x8xf32> to vector<8x8x8xf32>
    %606 = vector.shape_cast %605 : vector<8x8x8xf32> to vector<1x8x8x8xf32>
    %cst_212 = arith.constant dense<0.000000e+00> : vector<1xf32>
    %607 = vector.multi_reduction <add>, %606, %cst_212 [1, 2, 3] : vector<1x8x8x8xf32> to vector<1xf32>
    %608 = vector.shape_cast %607 : vector<1xf32> to vector<1x1x1x1xf32>
    %cst_213 = arith.constant 5.120000e+02 : f32
    %609 = vector.broadcast %cst_213 : f32 to vector<1x1x1x1xf32>
    %610 = arith.divf %608, %609 : vector<1x1x1x1xf32>
    %611 = arith.mulf %606, %606 : vector<1x8x8x8xf32>
    %cst_214 = arith.constant dense<0.000000e+00> : vector<1xf32>
    %612 = vector.multi_reduction <add>, %611, %cst_214 [1, 2, 3] : vector<1x8x8x8xf32> to vector<1xf32>
    %613 = vector.shape_cast %612 : vector<1xf32> to vector<1x1x1x1xf32>
    %cst_215 = arith.constant 5.120000e+02 : f32
    %614 = vector.broadcast %cst_215 : f32 to vector<1x1x1x1xf32>
    %615 = arith.divf %613, %614 : vector<1x1x1x1xf32>
    %616 = arith.mulf %610, %610 : vector<1x1x1x1xf32>
    %617 = arith.subf %615, %616 : vector<1x1x1x1xf32>
    %618 = vector.broadcast %610 : vector<1x1x1x1xf32> to vector<1x8x8x8xf32>
    %619 = arith.subf %606, %618 : vector<1x8x8x8xf32>
    %cst_216 = arith.constant 9.99999974E-6 : f32
    %620 = vector.broadcast %cst_216 : f32 to vector<1x1x1x1xf32>
    %621 = arith.addf %617, %620 : vector<1x1x1x1xf32>
    %622 = math.rsqrt %621 : vector<1x1x1x1xf32>
    %623 = vector.broadcast %622 : vector<1x1x1x1xf32> to vector<1x8x8x8xf32>
    %624 = arith.mulf %619, %623 : vector<1x8x8x8xf32>
    %c0_217 = arith.constant 0 : index
    %c0_218 = arith.constant 0 : index
    %625 = vector.load %arg13[%c0_217, %c0_218] : memref<1x8xf32, #tpu.memory_space<vmem>>, vector<1x8xf32>
    %626 = vector.shape_cast %625 : vector<1x8xf32> to vector<1x1x1x8xf32>
    %c0_219 = arith.constant 0 : index
    %c0_220 = arith.constant 0 : index
    %627 = vector.load %arg14[%c0_219, %c0_220] : memref<1x8xf32, #tpu.memory_space<vmem>>, vector<1x8xf32>
    %628 = vector.shape_cast %627 : vector<1x8xf32> to vector<1x1x1x8xf32>
    %629 = vector.broadcast %626 : vector<1x1x1x8xf32> to vector<1x8x8x8xf32>
    %630 = arith.mulf %624, %629 : vector<1x8x8x8xf32>
    %631 = vector.broadcast %628 : vector<1x1x1x8xf32> to vector<1x8x8x8xf32>
    %632 = arith.addf %630, %631 : vector<1x8x8x8xf32>
    %633 = vector.shape_cast %632 : vector<1x8x8x8xf32> to vector<8x8x8xf32>
    %634 = vector.shape_cast %633 : vector<8x8x8xf32> to vector<1x8x8x8xf32>
    %c0_221 = arith.constant 0 : index
    %c0_222 = arith.constant 0 : index
    %c0_223 = arith.constant 0 : index
    %635 = vector.load %arg2[%c0_221, %c0_222, %c0_223] : memref<1x1x8xf32, #tpu.memory_space<vmem>>, vector<1x1x8xf32>
    %636 = vector.shape_cast %635 : vector<1x1x8xf32> to vector<1x1x1x8xf32>
    %637 = vector.broadcast %636 : vector<1x1x1x8xf32> to vector<1x8x8x8xf32>
    %638 = arith.addf %634, %637 : vector<1x8x8x8xf32>
    %639 = vector.shape_cast %638 : vector<1x8x8x8xf32> to vector<1x8x64xf32>
    %c0_224 = arith.constant 0 : index
    %c0_225 = arith.constant 0 : index
    %c0_226 = arith.constant 0 : index
    %640 = vector.load %arg15[%c0_224, %c0_225, %c0_226] : memref<1x8x64xf32, #tpu.memory_space<vmem>>, vector<1x8x64xf32>
    tpu.vector_store %arg15[%c0_224, %c0_225, %c0_226], %639 {strides = array<i32>} : memref<1x8x64xf32, #tpu.memory_space<vmem>>, vector<1x8x64xf32>,
    return
  }
  func.func @transform_0(%arg0: i32) -> (i32, i32, i32, i32, i32) {
    %c0_i32 = arith.constant 0 : i32
    %c0_i32_0 = arith.constant 0 : i32
    %c0_i32_1 = arith.constant 0 : i32
    %c0_i32_2 = arith.constant 0 : i32
    %c0_i32_3 = arith.constant 0 : i32
    return %arg0, %c0_i32, %c0_i32_0, %c0_i32_1, %c0_i32_2 : i32, i32, i32, i32, i32
  }
  func.func @transform_1(%arg0: i32) -> (i32, i32, i32) {
    %c0_i32 = arith.constant 0 : i32
    %c0_i32_0 = arith.constant 0 : i32
    %c0_i32_1 = arith.constant 0 : i32
    return %arg0, %c0_i32, %c0_i32_0 : i32, i32, i32
  }
  func.func @transform_2(%arg0: i32) -> (i32, i32) {
    %c0_i32 = arith.constant 0 : i32
    %c0_i32_0 = arith.constant 0 : i32
    %c0_i32_1 = arith.constant 0 : i32
    return %c0_i32, %c0_i32_0 : i32, i32
  }
  func.func @transform_3(%arg0: i32) -> (i32, i32) {
    %c0_i32 = arith.constant 0 : i32
    %c0_i32_0 = arith.constant 0 : i32
    %c0_i32_1 = arith.constant 0 : i32
    return %c0_i32, %c0_i32_0 : i32, i32
  }
  func.func @transform_4(%arg0: i32) -> (i32, i32) {
    %c0_i32 = arith.constant 0 : i32
    %c0_i32_0 = arith.constant 0 : i32
    %c0_i32_1 = arith.constant 0 : i32
    return %c0_i32, %c0_i32_0 : i32, i32
  }
  func.func @transform_5(%arg0: i32) -> (i32, i32) {
    %c0_i32 = arith.constant 0 : i32
    %c0_i32_0 = arith.constant 0 : i32
    %c0_i32_1 = arith.constant 0 : i32
    return %c0_i32, %c0_i32_0 : i32, i32
  }
  func.func @transform_6(%arg0: i32) -> (i32, i32) {
    %c0_i32 = arith.constant 0 : i32
    %c0_i32_0 = arith.constant 0 : i32
    %c0_i32_1 = arith.constant 0 : i32
    return %c0_i32, %c0_i32_0 : i32, i32
  }
  func.func @transform_7(%arg0: i32) -> (i32, i32) {
    %c0_i32 = arith.constant 0 : i32
    %c0_i32_0 = arith.constant 0 : i32
    %c0_i32_1 = arith.constant 0 : i32
    return %c0_i32, %c0_i32_0 : i32, i32
  }
  func.func @transform_8(%arg0: i32) -> (i32, i32) {
    %c0_i32 = arith.constant 0 : i32
    %c0_i32_0 = arith.constant 0 : i32
    %c0_i32_1 = arith.constant 0 : i32
    return %c0_i32, %c0_i32_0 : i32, i32
  }
  func.func @transform_9(%arg0: i32) -> (i32, i32) {
    %c0_i32 = arith.constant 0 : i32
    %c0_i32_0 = arith.constant 0 : i32
    %c0_i32_1 = arith.constant 0 : i32
    return %c0_i32, %c0_i32_0 : i32, i32
  }
  func.func @transform_10(%arg0: i32) -> (i32, i32) {
    %c0_i32 = arith.constant 0 : i32
    %c0_i32_0 = arith.constant 0 : i32
    %c0_i32_1 = arith.constant 0 : i32
    return %c0_i32, %c0_i32_0 : i32, i32
  }
  func.func @transform_11(%arg0: i32) -> (i32, i32) {
    %c0_i32 = arith.constant 0 : i32
    %c0_i32_0 = arith.constant 0 : i32
    %c0_i32_1 = arith.constant 0 : i32
    return %c0_i32, %c0_i32_0 : i32, i32
  }
  func.func @transform_12(%arg0: i32) -> (i32, i32) {
    %c0_i32 = arith.constant 0 : i32
    %c0_i32_0 = arith.constant 0 : i32
    %c0_i32_1 = arith.constant 0 : i32
    return %c0_i32, %c0_i32_0 : i32, i32
  }
  func.func @transform_13(%arg0: i32) -> (i32, i32) {
    %c0_i32 = arith.constant 0 : i32
    %c0_i32_0 = arith.constant 0 : i32
    %c0_i32_1 = arith.constant 0 : i32
    return %c0_i32, %c0_i32_0 : i32, i32
  }
  func.func @transform_14(%arg0: i32) -> (i32, i32, i32) {
    %c0_i32 = arith.constant 0 : i32
    %c0_i32_0 = arith.constant 0 : i32
    %c0_i32_1 = arith.constant 0 : i32
    return %arg0, %c0_i32, %c0_i32_0 : i32, i32, i32
  }
}

module attributes {stable_mosaic.version = 11 : i64} {
  func.func @_down_kernel(%arg0: i32, %arg1: memref<1x8x2x8x8xf32, #tpu.memory_space<vmem>>, %arg2: memref<1x1x8xf32, #tpu.memory_space<vmem>>, %arg3: memref<36x4xbf16, #tpu.memory_space<vmem>>, %arg4: memref<1x4xf32, #tpu.memory_space<vmem>>, %arg5: memref<1x4xf32, #tpu.memory_space<vmem>>, %arg6: memref<36x4xbf16, #tpu.memory_space<vmem>>, %arg7: memref<1x4xf32, #tpu.memory_space<vmem>>, %arg8: memref<1x4xf32, #tpu.memory_space<vmem>>, %arg9: memref<36x8xbf16, #tpu.memory_space<vmem>>, %arg10: memref<1x8xf32, #tpu.memory_space<vmem>>, %arg11: memref<1x8xf32, #tpu.memory_space<vmem>>, %arg12: memref<72x8xbf16, #tpu.memory_space<vmem>>, %arg13: memref<1x8xf32, #tpu.memory_space<vmem>>, %arg14: memref<1x8xf32, #tpu.memory_space<vmem>>, %arg15: memref<1x8x64xf32, #tpu.memory_space<vmem>>) attributes {dimension_semantics = [#tpu.dimension_semantics<parallel>], iteration_bounds = array<i64: 2>, scalar_prefetch = 0 : i64, scratch_operands = 0 : i64, tpu.core_type = #tpu.core_type<tc>, window_params = [{transform_indices = @transform_0, window_bounds = array<i64: 1, 8, 2, 8, 8>}, {transform_indices = @transform_1, window_bounds = array<i64: 1, 1, 8>}, {pipeline_mode = #tpu.pipeline_mode<synchronous>, transform_indices = @transform_2, window_bounds = array<i64: 36, 4>}, {pipeline_mode = #tpu.pipeline_mode<synchronous>, transform_indices = @transform_3, window_bounds = array<i64: 1, 4>}, {pipeline_mode = #tpu.pipeline_mode<synchronous>, transform_indices = @transform_4, window_bounds = array<i64: 1, 4>}, {pipeline_mode = #tpu.pipeline_mode<synchronous>, transform_indices = @transform_5, window_bounds = array<i64: 36, 4>}, {pipeline_mode = #tpu.pipeline_mode<synchronous>, transform_indices = @transform_6, window_bounds = array<i64: 1, 4>}, {pipeline_mode = #tpu.pipeline_mode<synchronous>, transform_indices = @transform_7, window_bounds = array<i64: 1, 4>}, {pipeline_mode = #tpu.pipeline_mode<synchronous>, transform_indices = @transform_8, window_bounds = array<i64: 36, 8>}, {pipeline_mode = #tpu.pipeline_mode<synchronous>, transform_indices = @transform_9, window_bounds = array<i64: 1, 8>}, {pipeline_mode = #tpu.pipeline_mode<synchronous>, transform_indices = @transform_10, window_bounds = array<i64: 1, 8>}, {pipeline_mode = #tpu.pipeline_mode<synchronous>, transform_indices = @transform_11, window_bounds = array<i64: 72, 8>}, {pipeline_mode = #tpu.pipeline_mode<synchronous>, transform_indices = @transform_12, window_bounds = array<i64: 1, 8>}, {pipeline_mode = #tpu.pipeline_mode<synchronous>, transform_indices = @transform_13, window_bounds = array<i64: 1, 8>}, {transform_indices = @transform_14, window_bounds = array<i64: 1, 8, 64>}]} {
    %0 = tpu.iota {dimensions = array<i32: 1>} : vector<1x8x8x1xi32>
    %1 = vector.shape_cast %0 : vector<1x8x8x1xi32> to vector<8x8x1xi32>
    %2 = tpu.iota {dimensions = array<i32: 1>} : vector<1x8x1xi32>
    %c0_i32 = arith.constant 0 : i32
    %3 = vector.broadcast %c0_i32 : i32 to vector<8x8x1xi32>
    %4 = arith.cmpi eq, %1, %3 : vector<8x8x1xi32>
    %c7_i32 = arith.constant 7 : i32
    %5 = vector.broadcast %c7_i32 : i32 to vector<8x8x1xi32>
    %6 = arith.cmpi eq, %1, %5 : vector<8x8x1xi32>
    %c0_i32_0 = arith.constant 0 : i32
    %7 = vector.broadcast %c0_i32_0 : i32 to vector<1x8x1xi32>
    %8 = arith.cmpi eq, %2, %7 : vector<1x8x1xi32>
    %c7_i32_1 = arith.constant 7 : i32
    %9 = vector.broadcast %c7_i32_1 : i32 to vector<1x8x1xi32>
    %10 = arith.cmpi eq, %2, %9 : vector<1x8x1xi32>
    %c0 = arith.constant 0 : index
    %c0_2 = arith.constant 0 : index
    %c0_3 = arith.constant 0 : index
    %c0_4 = arith.constant 0 : index
    %c0_5 = arith.constant 0 : index
    %11 = vector.load %arg1[%c0, %c0_2, %c0_3, %c0_4, %c0_5] : memref<1x8x2x8x8xf32, #tpu.memory_space<vmem>>, vector<1x8x2x8x8xf32>
    %12 = vector.extract_strided_slice %11 {offsets = [0, 0, 0, 0, 0], sizes = [1, 8, 1, 8, 8], strides = [1, 1, 1, 1, 1]} : vector<1x8x2x8x8xf32> to vector<1x8x1x8x8xf32>
    %13 = vector.shape_cast %12 : vector<1x8x1x8x8xf32> to vector<1x8x8x8xf32>
    %14 = vector.extract_strided_slice %11 {offsets = [0, 0, 1, 0, 0], sizes = [1, 8, 1, 8, 8], strides = [1, 1, 1, 1, 1]} : vector<1x8x2x8x8xf32> to vector<1x8x1x8x8xf32>
    %15 = vector.shape_cast %14 : vector<1x8x1x8x8xf32> to vector<1x8x8x8xf32>
    %16 = arith.maximumf %13, %15 : vector<1x8x8x8xf32>
    %17 = vector.extract_strided_slice %16 {offsets = [0, 0, 0, 0], sizes = [1, 8, 8, 4], strides = [1, 1, 1, 1]} : vector<1x8x8x8xf32> to vector<1x8x8x4xf32>
    %18 = vector.extract_strided_slice %16 {offsets = [0, 0, 0, 4], sizes = [1, 8, 8, 4], strides = [1, 1, 1, 1]} : vector<1x8x8x8xf32> to vector<1x8x8x4xf32>
    %19 = arith.maximumf %17, %18 : vector<1x8x8x4xf32>
    %20 = vector.shape_cast %19 : vector<1x8x8x4xf32> to vector<8x8x4xf32>
    %cst = arith.constant 0.000000e+00 : f32
    %21 = vector.broadcast %cst : f32 to vector<64x4xf32>
    %22 = vector.extract_strided_slice %20 {offsets = [7, 0, 0], sizes = [1, 8, 4], strides = [1, 1, 1]} : vector<8x8x4xf32> to vector<1x8x4xf32>
    %23 = vector.extract_strided_slice %20 {offsets = [0, 0, 0], sizes = [7, 8, 4], strides = [1, 1, 1]} : vector<8x8x4xf32> to vector<7x8x4xf32>
    %24 = tpu.concatenate %22, %23 in 0 : vector<1x8x4xf32>, vector<7x8x4xf32> -> vector<8x8x4xf32>
    %cst_6 = arith.constant 0.000000e+00 : f32
    %25 = vector.shape_cast %4 : vector<8x8x1xi1> to vector<8x8x1xi1>
    %26 = vector.broadcast %25 : vector<8x8x1xi1> to vector<8x8x4xi1>
    %27 = vector.broadcast %cst_6 : f32 to vector<8x8x4xf32>
    %28 = arith.select %26, %27, %24 : vector<8x8x4xi1>, vector<8x8x4xf32>
    %c1_i32 = arith.constant 1 : i32
    %29 = tpu.dynamic_rotate %28 by %c1_i32 dim 1 : vector<8x8x4xf32>, i32 -> vector<8x8x4xf32>
    %cst_7 = arith.constant 0.000000e+00 : f32
    %30 = vector.shape_cast %8 : vector<1x8x1xi1> to vector<1x8x1xi1>
    %31 = vector.broadcast %30 : vector<1x8x1xi1> to vector<8x8x4xi1>
    %32 = vector.broadcast %cst_7 : f32 to vector<8x8x4xf32>
    %33 = arith.select %31, %32, %29 : vector<8x8x4xi1>, vector<8x8x4xf32>
    %34 = vector.shape_cast %33 : vector<8x8x4xf32> to vector<64x4xf32>
    %35 = arith.truncf %34 : vector<64x4xf32> to vector<64x4xbf16>
    %c0_8 = arith.constant 0 : index
    %c0_9 = arith.constant 0 : index
    %36 = vector.load %arg3[%c0_8, %c0_9] : memref<36x4xbf16, #tpu.memory_space<vmem>>, vector<4x4xbf16>
    %cst_10 = arith.constant dense<0.000000e+00> : vector<64x4xf32>
    %37 = tpu.matmul %35, %36, %cst_10 {dimension_numbers = #tpu.dot_dimension_numbers<[1], [0], [0], [1], [0, 0, 1, 1], [], []>} : vector<64x4xbf16>, vector<4x4xbf16>, vector<64x4xf32> -> vector<64x4xf32>
    %38 = arith.addf %21, %37 : vector<64x4xf32>
    %39 = vector.extract_strided_slice %20 {offsets = [7, 0, 0], sizes = [1, 8, 4], strides = [1, 1, 1]} : vector<8x8x4xf32> to vector<1x8x4xf32>
    %40 = vector.extract_strided_slice %20 {offsets = [0, 0, 0], sizes = [7, 8, 4], strides = [1, 1, 1]} : vector<8x8x4xf32> to vector<7x8x4xf32>
    %41 = tpu.concatenate %39, %40 in 0 : vector<1x8x4xf32>, vector<7x8x4xf32> -> vector<8x8x4xf32>
    %cst_11 = arith.constant 0.000000e+00 : f32
    %42 = vector.shape_cast %4 : vector<8x8x1xi1> to vector<8x8x1xi1>
    %43 = vector.broadcast %42 : vector<8x8x1xi1> to vector<8x8x4xi1>
    %44 = vector.broadcast %cst_11 : f32 to vector<8x8x4xf32>
    %45 = arith.select %43, %44, %41 : vector<8x8x4xi1>, vector<8x8x4xf32>
    %46 = vector.shape_cast %45 : vector<8x8x4xf32> to vector<64x4xf32>
    %47 = arith.truncf %46 : vector<64x4xf32> to vector<64x4xbf16>
    %c4 = arith.constant 4 : index
    %c0_12 = arith.constant 0 : index
    %48 = vector.load %arg3[%c4, %c0_12] : memref<36x4xbf16, #tpu.memory_space<vmem>>, vector<4x4xbf16>
    %cst_13 = arith.constant dense<0.000000e+00> : vector<64x4xf32>
    %49 = tpu.matmul %47, %48, %cst_13 {dimension_numbers = #tpu.dot_dimension_numbers<[1], [0], [0], [1], [0, 0, 1, 1], [], []>} : vector<64x4xbf16>, vector<4x4xbf16>, vector<64x4xf32> -> vector<64x4xf32>
    %50 = arith.addf %38, %49 : vector<64x4xf32>
    %51 = vector.extract_strided_slice %20 {offsets = [7, 0, 0], sizes = [1, 8, 4], strides = [1, 1, 1]} : vector<8x8x4xf32> to vector<1x8x4xf32>
    %52 = vector.extract_strided_slice %20 {offsets = [0, 0, 0], sizes = [7, 8, 4], strides = [1, 1, 1]} : vector<8x8x4xf32> to vector<7x8x4xf32>
    %53 = tpu.concatenate %51, %52 in 0 : vector<1x8x4xf32>, vector<7x8x4xf32> -> vector<8x8x4xf32>
    %cst_14 = arith.constant 0.000000e+00 : f32
    %54 = vector.shape_cast %4 : vector<8x8x1xi1> to vector<8x8x1xi1>
    %55 = vector.broadcast %54 : vector<8x8x1xi1> to vector<8x8x4xi1>
    %56 = vector.broadcast %cst_14 : f32 to vector<8x8x4xf32>
    %57 = arith.select %55, %56, %53 : vector<8x8x4xi1>, vector<8x8x4xf32>
    %c7_i32_15 = arith.constant 7 : i32
    %58 = tpu.dynamic_rotate %57 by %c7_i32_15 dim 1 : vector<8x8x4xf32>, i32 -> vector<8x8x4xf32>
    %cst_16 = arith.constant 0.000000e+00 : f32
    %59 = vector.shape_cast %10 : vector<1x8x1xi1> to vector<1x8x1xi1>
    %60 = vector.broadcast %59 : vector<1x8x1xi1> to vector<8x8x4xi1>
    %61 = vector.broadcast %cst_16 : f32 to vector<8x8x4xf32>
    %62 = arith.select %60, %61, %58 : vector<8x8x4xi1>, vector<8x8x4xf32>
    %63 = vector.shape_cast %62 : vector<8x8x4xf32> to vector<64x4xf32>
    %64 = arith.truncf %63 : vector<64x4xf32> to vector<64x4xbf16>
    %c8 = arith.constant 8 : index
    %c0_17 = arith.constant 0 : index
    %65 = vector.load %arg3[%c8, %c0_17] : memref<36x4xbf16, #tpu.memory_space<vmem>>, vector<4x4xbf16>
    %cst_18 = arith.constant dense<0.000000e+00> : vector<64x4xf32>
    %66 = tpu.matmul %64, %65, %cst_18 {dimension_numbers = #tpu.dot_dimension_numbers<[1], [0], [0], [1], [0, 0, 1, 1], [], []>} : vector<64x4xbf16>, vector<4x4xbf16>, vector<64x4xf32> -> vector<64x4xf32>
    %67 = arith.addf %50, %66 : vector<64x4xf32>
    %c1_i32_19 = arith.constant 1 : i32
    %68 = tpu.dynamic_rotate %20 by %c1_i32_19 dim 1 : vector<8x8x4xf32>, i32 -> vector<8x8x4xf32>
    %cst_20 = arith.constant 0.000000e+00 : f32
    %69 = vector.shape_cast %8 : vector<1x8x1xi1> to vector<1x8x1xi1>
    %70 = vector.broadcast %69 : vector<1x8x1xi1> to vector<8x8x4xi1>
    %71 = vector.broadcast %cst_20 : f32 to vector<8x8x4xf32>
    %72 = arith.select %70, %71, %68 : vector<8x8x4xi1>, vector<8x8x4xf32>
    %73 = vector.shape_cast %72 : vector<8x8x4xf32> to vector<64x4xf32>
    %74 = arith.truncf %73 : vector<64x4xf32> to vector<64x4xbf16>
    %c12 = arith.constant 12 : index
    %c0_21 = arith.constant 0 : index
    %75 = vector.load %arg3[%c12, %c0_21] : memref<36x4xbf16, #tpu.memory_space<vmem>>, vector<4x4xbf16>
    %cst_22 = arith.constant dense<0.000000e+00> : vector<64x4xf32>
    %76 = tpu.matmul %74, %75, %cst_22 {dimension_numbers = #tpu.dot_dimension_numbers<[1], [0], [0], [1], [0, 0, 1, 1], [], []>} : vector<64x4xbf16>, vector<4x4xbf16>, vector<64x4xf32> -> vector<64x4xf32>
    %77 = arith.addf %67, %76 : vector<64x4xf32>
    %78 = vector.shape_cast %20 : vector<8x8x4xf32> to vector<64x4xf32>
    %79 = arith.truncf %78 : vector<64x4xf32> to vector<64x4xbf16>
    %c16 = arith.constant 16 : index
    %c0_23 = arith.constant 0 : index
    %80 = vector.load %arg3[%c16, %c0_23] : memref<36x4xbf16, #tpu.memory_space<vmem>>, vector<4x4xbf16>
    %cst_24 = arith.constant dense<0.000000e+00> : vector<64x4xf32>
    %81 = tpu.matmul %79, %80, %cst_24 {dimension_numbers = #tpu.dot_dimension_numbers<[1], [0], [0], [1], [0, 0, 1, 1], [], []>} : vector<64x4xbf16>, vector<4x4xbf16>, vector<64x4xf32> -> vector<64x4xf32>
    %82 = arith.addf %77, %81 : vector<64x4xf32>
    %c7_i32_25 = arith.constant 7 : i32
    %83 = tpu.dynamic_rotate %20 by %c7_i32_25 dim 1 : vector<8x8x4xf32>, i32 -> vector<8x8x4xf32>
    %cst_26 = arith.constant 0.000000e+00 : f32
    %84 = vector.shape_cast %10 : vector<1x8x1xi1> to vector<1x8x1xi1>
    %85 = vector.broadcast %84 : vector<1x8x1xi1> to vector<8x8x4xi1>
    %86 = vector.broadcast %cst_26 : f32 to vector<8x8x4xf32>
    %87 = arith.select %85, %86, %83 : vector<8x8x4xi1>, vector<8x8x4xf32>
    %88 = vector.shape_cast %87 : vector<8x8x4xf32> to vector<64x4xf32>
    %89 = arith.truncf %88 : vector<64x4xf32> to vector<64x4xbf16>
    %c20 = arith.constant 20 : index
    %c0_27 = arith.constant 0 : index
    %90 = vector.load %arg3[%c20, %c0_27] : memref<36x4xbf16, #tpu.memory_space<vmem>>, vector<4x4xbf16>
    %cst_28 = arith.constant dense<0.000000e+00> : vector<64x4xf32>
    %91 = tpu.matmul %89, %90, %cst_28 {dimension_numbers = #tpu.dot_dimension_numbers<[1], [0], [0], [1], [0, 0, 1, 1], [], []>} : vector<64x4xbf16>, vector<4x4xbf16>, vector<64x4xf32> -> vector<64x4xf32>
    %92 = arith.addf %82, %91 : vector<64x4xf32>
    %93 = vector.extract_strided_slice %20 {offsets = [1, 0, 0], sizes = [7, 8, 4], strides = [1, 1, 1]} : vector<8x8x4xf32> to vector<7x8x4xf32>
    %94 = vector.extract_strided_slice %20 {offsets = [0, 0, 0], sizes = [1, 8, 4], strides = [1, 1, 1]} : vector<8x8x4xf32> to vector<1x8x4xf32>
    %95 = tpu.concatenate %93, %94 in 0 : vector<7x8x4xf32>, vector<1x8x4xf32> -> vector<8x8x4xf32>
    %cst_29 = arith.constant 0.000000e+00 : f32
    %96 = vector.shape_cast %6 : vector<8x8x1xi1> to vector<8x8x1xi1>
    %97 = vector.broadcast %96 : vector<8x8x1xi1> to vector<8x8x4xi1>
    %98 = vector.broadcast %cst_29 : f32 to vector<8x8x4xf32>
    %99 = arith.select %97, %98, %95 : vector<8x8x4xi1>, vector<8x8x4xf32>
    %c1_i32_30 = arith.constant 1 : i32
    %100 = tpu.dynamic_rotate %99 by %c1_i32_30 dim 1 : vector<8x8x4xf32>, i32 -> vector<8x8x4xf32>
    %cst_31 = arith.constant 0.000000e+00 : f32
    %101 = vector.shape_cast %8 : vector<1x8x1xi1> to vector<1x8x1xi1>
    %102 = vector.broadcast %101 : vector<1x8x1xi1> to vector<8x8x4xi1>
    %103 = vector.broadcast %cst_31 : f32 to vector<8x8x4xf32>
    %104 = arith.select %102, %103, %100 : vector<8x8x4xi1>, vector<8x8x4xf32>
    %105 = vector.shape_cast %104 : vector<8x8x4xf32> to vector<64x4xf32>
    %106 = arith.truncf %105 : vector<64x4xf32> to vector<64x4xbf16>
    %c24 = arith.constant 24 : index
    %c0_32 = arith.constant 0 : index
    %107 = vector.load %arg3[%c24, %c0_32] : memref<36x4xbf16, #tpu.memory_space<vmem>>, vector<4x4xbf16>
    %cst_33 = arith.constant dense<0.000000e+00> : vector<64x4xf32>
    %108 = tpu.matmul %106, %107, %cst_33 {dimension_numbers = #tpu.dot_dimension_numbers<[1], [0], [0], [1], [0, 0, 1, 1], [], []>} : vector<64x4xbf16>, vector<4x4xbf16>, vector<64x4xf32> -> vector<64x4xf32>
    %109 = arith.addf %92, %108 : vector<64x4xf32>
    %110 = vector.extract_strided_slice %20 {offsets = [1, 0, 0], sizes = [7, 8, 4], strides = [1, 1, 1]} : vector<8x8x4xf32> to vector<7x8x4xf32>
    %111 = vector.extract_strided_slice %20 {offsets = [0, 0, 0], sizes = [1, 8, 4], strides = [1, 1, 1]} : vector<8x8x4xf32> to vector<1x8x4xf32>
    %112 = tpu.concatenate %110, %111 in 0 : vector<7x8x4xf32>, vector<1x8x4xf32> -> vector<8x8x4xf32>
    %cst_34 = arith.constant 0.000000e+00 : f32
    %113 = vector.shape_cast %6 : vector<8x8x1xi1> to vector<8x8x1xi1>
    %114 = vector.broadcast %113 : vector<8x8x1xi1> to vector<8x8x4xi1>
    %115 = vector.broadcast %cst_34 : f32 to vector<8x8x4xf32>
    %116 = arith.select %114, %115, %112 : vector<8x8x4xi1>, vector<8x8x4xf32>
    %117 = vector.shape_cast %116 : vector<8x8x4xf32> to vector<64x4xf32>
    %118 = arith.truncf %117 : vector<64x4xf32> to vector<64x4xbf16>
    %c28 = arith.constant 28 : index
    %c0_35 = arith.constant 0 : index
    %119 = vector.load %arg3[%c28, %c0_35] : memref<36x4xbf16, #tpu.memory_space<vmem>>, vector<4x4xbf16>
    %cst_36 = arith.constant dense<0.000000e+00> : vector<64x4xf32>
    %120 = tpu.matmul %118, %119, %cst_36 {dimension_numbers = #tpu.dot_dimension_numbers<[1], [0], [0], [1], [0, 0, 1, 1], [], []>} : vector<64x4xbf16>, vector<4x4xbf16>, vector<64x4xf32> -> vector<64x4xf32>
    %121 = arith.addf %109, %120 : vector<64x4xf32>
    %122 = vector.extract_strided_slice %20 {offsets = [1, 0, 0], sizes = [7, 8, 4], strides = [1, 1, 1]} : vector<8x8x4xf32> to vector<7x8x4xf32>
    %123 = vector.extract_strided_slice %20 {offsets = [0, 0, 0], sizes = [1, 8, 4], strides = [1, 1, 1]} : vector<8x8x4xf32> to vector<1x8x4xf32>
    %124 = tpu.concatenate %122, %123 in 0 : vector<7x8x4xf32>, vector<1x8x4xf32> -> vector<8x8x4xf32>
    %cst_37 = arith.constant 0.000000e+00 : f32
    %125 = vector.shape_cast %6 : vector<8x8x1xi1> to vector<8x8x1xi1>
    %126 = vector.broadcast %125 : vector<8x8x1xi1> to vector<8x8x4xi1>
    %127 = vector.broadcast %cst_37 : f32 to vector<8x8x4xf32>
    %128 = arith.select %126, %127, %124 : vector<8x8x4xi1>, vector<8x8x4xf32>
    %c7_i32_38 = arith.constant 7 : i32
    %129 = tpu.dynamic_rotate %128 by %c7_i32_38 dim 1 : vector<8x8x4xf32>, i32 -> vector<8x8x4xf32>
    %cst_39 = arith.constant 0.000000e+00 : f32
    %130 = vector.shape_cast %10 : vector<1x8x1xi1> to vector<1x8x1xi1>
    %131 = vector.broadcast %130 : vector<1x8x1xi1> to vector<8x8x4xi1>
    %132 = vector.broadcast %cst_39 : f32 to vector<8x8x4xf32>
    %133 = arith.select %131, %132, %129 : vector<8x8x4xi1>, vector<8x8x4xf32>
    %134 = vector.shape_cast %133 : vector<8x8x4xf32> to vector<64x4xf32>
    %135 = arith.truncf %134 : vector<64x4xf32> to vector<64x4xbf16>
    %c32 = arith.constant 32 : index
    %c0_40 = arith.constant 0 : index
    %136 = vector.load %arg3[%c32, %c0_40] : memref<36x4xbf16, #tpu.memory_space<vmem>>, vector<4x4xbf16>
    %cst_41 = arith.constant dense<0.000000e+00> : vector<64x4xf32>
    %137 = tpu.matmul %135, %136, %cst_41 {dimension_numbers = #tpu.dot_dimension_numbers<[1], [0], [0], [1], [0, 0, 1, 1], [], []>} : vector<64x4xbf16>, vector<4x4xbf16>, vector<64x4xf32> -> vector<64x4xf32>
    %138 = arith.addf %121, %137 : vector<64x4xf32>
    %139 = vector.shape_cast %138 : vector<64x4xf32> to vector<8x8x4xf32>
    %140 = vector.shape_cast %139 : vector<8x8x4xf32> to vector<1x8x8x4xf32>
    %cst_42 = arith.constant dense<0.000000e+00> : vector<1xf32>
    %141 = vector.multi_reduction <add>, %140, %cst_42 [1, 2, 3] : vector<1x8x8x4xf32> to vector<1xf32>
    %142 = vector.shape_cast %141 : vector<1xf32> to vector<1x1x1x1xf32>
    %cst_43 = arith.constant 2.560000e+02 : f32
    %143 = vector.broadcast %cst_43 : f32 to vector<1x1x1x1xf32>
    %144 = arith.divf %142, %143 : vector<1x1x1x1xf32>
    %145 = arith.mulf %140, %140 : vector<1x8x8x4xf32>
    %cst_44 = arith.constant dense<0.000000e+00> : vector<1xf32>
    %146 = vector.multi_reduction <add>, %145, %cst_44 [1, 2, 3] : vector<1x8x8x4xf32> to vector<1xf32>
    %147 = vector.shape_cast %146 : vector<1xf32> to vector<1x1x1x1xf32>
    %cst_45 = arith.constant 2.560000e+02 : f32
    %148 = vector.broadcast %cst_45 : f32 to vector<1x1x1x1xf32>
    %149 = arith.divf %147, %148 : vector<1x1x1x1xf32>
    %150 = arith.mulf %144, %144 : vector<1x1x1x1xf32>
    %151 = arith.subf %149, %150 : vector<1x1x1x1xf32>
    %152 = vector.broadcast %144 : vector<1x1x1x1xf32> to vector<1x8x8x4xf32>
    %153 = arith.subf %140, %152 : vector<1x8x8x4xf32>
    %cst_46 = arith.constant 9.99999974E-6 : f32
    %154 = vector.broadcast %cst_46 : f32 to vector<1x1x1x1xf32>
    %155 = arith.addf %151, %154 : vector<1x1x1x1xf32>
    %156 = math.rsqrt %155 : vector<1x1x1x1xf32>
    %157 = vector.broadcast %156 : vector<1x1x1x1xf32> to vector<1x8x8x4xf32>
    %158 = arith.mulf %153, %157 : vector<1x8x8x4xf32>
    %c0_47 = arith.constant 0 : index
    %c0_48 = arith.constant 0 : index
    %159 = vector.load %arg4[%c0_47, %c0_48] : memref<1x4xf32, #tpu.memory_space<vmem>>, vector<1x4xf32>
    %160 = vector.shape_cast %159 : vector<1x4xf32> to vector<1x1x1x4xf32>
    %c0_49 = arith.constant 0 : index
    %c0_50 = arith.constant 0 : index
    %161 = vector.load %arg5[%c0_49, %c0_50] : memref<1x4xf32, #tpu.memory_space<vmem>>, vector<1x4xf32>
    %162 = vector.shape_cast %161 : vector<1x4xf32> to vector<1x1x1x4xf32>
    %163 = vector.broadcast %160 : vector<1x1x1x4xf32> to vector<1x8x8x4xf32>
    %164 = arith.mulf %158, %163 : vector<1x8x8x4xf32>
    %165 = vector.broadcast %162 : vector<1x1x1x4xf32> to vector<1x8x8x4xf32>
    %166 = arith.addf %164, %165 : vector<1x8x8x4xf32>
    %167 = vector.shape_cast %166 : vector<1x8x8x4xf32> to vector<8x8x4xf32>
    %cst_51 = arith.constant 5.000000e-01 : f32
    %168 = vector.broadcast %cst_51 : f32 to vector<8x8x4xf32>
    %169 = arith.mulf %168, %167 : vector<8x8x4xf32>
    %cst_52 = arith.constant 0.707106769 : f32
    %170 = vector.broadcast %cst_52 : f32 to vector<8x8x4xf32>
    %171 = arith.mulf %167, %170 : vector<8x8x4xf32>
    %172 = math.erf %171 : vector<8x8x4xf32>
    %cst_53 = arith.constant 1.000000e+00 : f32
    %173 = vector.broadcast %cst_53 : f32 to vector<8x8x4xf32>
    %174 = arith.addf %173, %172 : vector<8x8x4xf32>
    %175 = arith.mulf %169, %174 : vector<8x8x4xf32>
    %cst_54 = arith.constant 0.000000e+00 : f32
    %176 = vector.broadcast %cst_54 : f32 to vector<64x4xf32>
    %177 = vector.extract_strided_slice %175 {offsets = [7, 0, 0], sizes = [1, 8, 4], strides = [1, 1, 1]} : vector<8x8x4xf32> to vector<1x8x4xf32>
    %178 = vector.extract_strided_slice %175 {offsets = [0, 0, 0], sizes = [7, 8, 4], strides = [1, 1, 1]} : vector<8x8x4xf32> to vector<7x8x4xf32>
    %179 = tpu.concatenate %177, %178 in 0 : vector<1x8x4xf32>, vector<7x8x4xf32> -> vector<8x8x4xf32>
    %cst_55 = arith.constant 0.000000e+00 : f32
    %180 = vector.shape_cast %4 : vector<8x8x1xi1> to vector<8x8x1xi1>
    %181 = vector.broadcast %180 : vector<8x8x1xi1> to vector<8x8x4xi1>
    %182 = vector.broadcast %cst_55 : f32 to vector<8x8x4xf32>
    %183 = arith.select %181, %182, %179 : vector<8x8x4xi1>, vector<8x8x4xf32>
    %c1_i32_56 = arith.constant 1 : i32
    %184 = tpu.dynamic_rotate %183 by %c1_i32_56 dim 1 : vector<8x8x4xf32>, i32 -> vector<8x8x4xf32>
    %cst_57 = arith.constant 0.000000e+00 : f32
    %185 = vector.shape_cast %8 : vector<1x8x1xi1> to vector<1x8x1xi1>
    %186 = vector.broadcast %185 : vector<1x8x1xi1> to vector<8x8x4xi1>
    %187 = vector.broadcast %cst_57 : f32 to vector<8x8x4xf32>
    %188 = arith.select %186, %187, %184 : vector<8x8x4xi1>, vector<8x8x4xf32>
    %189 = vector.shape_cast %188 : vector<8x8x4xf32> to vector<64x4xf32>
    %190 = arith.truncf %189 : vector<64x4xf32> to vector<64x4xbf16>
    %c0_58 = arith.constant 0 : index
    %c0_59 = arith.constant 0 : index
    %191 = vector.load %arg6[%c0_58, %c0_59] : memref<36x4xbf16, #tpu.memory_space<vmem>>, vector<4x4xbf16>
    %cst_60 = arith.constant dense<0.000000e+00> : vector<64x4xf32>
    %192 = tpu.matmul %190, %191, %cst_60 {dimension_numbers = #tpu.dot_dimension_numbers<[1], [0], [0], [1], [0, 0, 1, 1], [], []>} : vector<64x4xbf16>, vector<4x4xbf16>, vector<64x4xf32> -> vector<64x4xf32>
    %193 = arith.addf %176, %192 : vector<64x4xf32>
    %194 = vector.extract_strided_slice %175 {offsets = [7, 0, 0], sizes = [1, 8, 4], strides = [1, 1, 1]} : vector<8x8x4xf32> to vector<1x8x4xf32>
    %195 = vector.extract_strided_slice %175 {offsets = [0, 0, 0], sizes = [7, 8, 4], strides = [1, 1, 1]} : vector<8x8x4xf32> to vector<7x8x4xf32>
    %196 = tpu.concatenate %194, %195 in 0 : vector<1x8x4xf32>, vector<7x8x4xf32> -> vector<8x8x4xf32>
    %cst_61 = arith.constant 0.000000e+00 : f32
    %197 = vector.shape_cast %4 : vector<8x8x1xi1> to vector<8x8x1xi1>
    %198 = vector.broadcast %197 : vector<8x8x1xi1> to vector<8x8x4xi1>
    %199 = vector.broadcast %cst_61 : f32 to vector<8x8x4xf32>
    %200 = arith.select %198, %199, %196 : vector<8x8x4xi1>, vector<8x8x4xf32>
    %201 = vector.shape_cast %200 : vector<8x8x4xf32> to vector<64x4xf32>
    %202 = arith.truncf %201 : vector<64x4xf32> to vector<64x4xbf16>
    %c4_62 = arith.constant 4 : index
    %c0_63 = arith.constant 0 : index
    %203 = vector.load %arg6[%c4_62, %c0_63] : memref<36x4xbf16, #tpu.memory_space<vmem>>, vector<4x4xbf16>
    %cst_64 = arith.constant dense<0.000000e+00> : vector<64x4xf32>
    %204 = tpu.matmul %202, %203, %cst_64 {dimension_numbers = #tpu.dot_dimension_numbers<[1], [0], [0], [1], [0, 0, 1, 1], [], []>} : vector<64x4xbf16>, vector<4x4xbf16>, vector<64x4xf32> -> vector<64x4xf32>
    %205 = arith.addf %193, %204 : vector<64x4xf32>
    %206 = vector.extract_strided_slice %175 {offsets = [7, 0, 0], sizes = [1, 8, 4], strides = [1, 1, 1]} : vector<8x8x4xf32> to vector<1x8x4xf32>
    %207 = vector.extract_strided_slice %175 {offsets = [0, 0, 0], sizes = [7, 8, 4], strides = [1, 1, 1]} : vector<8x8x4xf32> to vector<7x8x4xf32>
    %208 = tpu.concatenate %206, %207 in 0 : vector<1x8x4xf32>, vector<7x8x4xf32> -> vector<8x8x4xf32>
    %cst_65 = arith.constant 0.000000e+00 : f32
    %209 = vector.shape_cast %4 : vector<8x8x1xi1> to vector<8x8x1xi1>
    %210 = vector.broadcast %209 : vector<8x8x1xi1> to vector<8x8x4xi1>
    %211 = vector.broadcast %cst_65 : f32 to vector<8x8x4xf32>
    %212 = arith.select %210, %211, %208 : vector<8x8x4xi1>, vector<8x8x4xf32>
    %c7_i32_66 = arith.constant 7 : i32
    %213 = tpu.dynamic_rotate %212 by %c7_i32_66 dim 1 : vector<8x8x4xf32>, i32 -> vector<8x8x4xf32>
    %cst_67 = arith.constant 0.000000e+00 : f32
    %214 = vector.shape_cast %10 : vector<1x8x1xi1> to vector<1x8x1xi1>
    %215 = vector.broadcast %214 : vector<1x8x1xi1> to vector<8x8x4xi1>
    %216 = vector.broadcast %cst_67 : f32 to vector<8x8x4xf32>
    %217 = arith.select %215, %216, %213 : vector<8x8x4xi1>, vector<8x8x4xf32>
    %218 = vector.shape_cast %217 : vector<8x8x4xf32> to vector<64x4xf32>
    %219 = arith.truncf %218 : vector<64x4xf32> to vector<64x4xbf16>
    %c8_68 = arith.constant 8 : index
    %c0_69 = arith.constant 0 : index
    %220 = vector.load %arg6[%c8_68, %c0_69] : memref<36x4xbf16, #tpu.memory_space<vmem>>, vector<4x4xbf16>
    %cst_70 = arith.constant dense<0.000000e+00> : vector<64x4xf32>
    %221 = tpu.matmul %219, %220, %cst_70 {dimension_numbers = #tpu.dot_dimension_numbers<[1], [0], [0], [1], [0, 0, 1, 1], [], []>} : vector<64x4xbf16>, vector<4x4xbf16>, vector<64x4xf32> -> vector<64x4xf32>
    %222 = arith.addf %205, %221 : vector<64x4xf32>
    %c1_i32_71 = arith.constant 1 : i32
    %223 = tpu.dynamic_rotate %175 by %c1_i32_71 dim 1 : vector<8x8x4xf32>, i32 -> vector<8x8x4xf32>
    %cst_72 = arith.constant 0.000000e+00 : f32
    %224 = vector.shape_cast %8 : vector<1x8x1xi1> to vector<1x8x1xi1>
    %225 = vector.broadcast %224 : vector<1x8x1xi1> to vector<8x8x4xi1>
    %226 = vector.broadcast %cst_72 : f32 to vector<8x8x4xf32>
    %227 = arith.select %225, %226, %223 : vector<8x8x4xi1>, vector<8x8x4xf32>
    %228 = vector.shape_cast %227 : vector<8x8x4xf32> to vector<64x4xf32>
    %229 = arith.truncf %228 : vector<64x4xf32> to vector<64x4xbf16>
    %c12_73 = arith.constant 12 : index
    %c0_74 = arith.constant 0 : index
    %230 = vector.load %arg6[%c12_73, %c0_74] : memref<36x4xbf16, #tpu.memory_space<vmem>>, vector<4x4xbf16>
    %cst_75 = arith.constant dense<0.000000e+00> : vector<64x4xf32>
    %231 = tpu.matmul %229, %230, %cst_75 {dimension_numbers = #tpu.dot_dimension_numbers<[1], [0], [0], [1], [0, 0, 1, 1], [], []>} : vector<64x4xbf16>, vector<4x4xbf16>, vector<64x4xf32> -> vector<64x4xf32>
    %232 = arith.addf %222, %231 : vector<64x4xf32>
    %233 = vector.shape_cast %175 : vector<8x8x4xf32> to vector<64x4xf32>
    %234 = arith.truncf %233 : vector<64x4xf32> to vector<64x4xbf16>
    %c16_76 = arith.constant 16 : index
    %c0_77 = arith.constant 0 : index
    %235 = vector.load %arg6[%c16_76, %c0_77] : memref<36x4xbf16, #tpu.memory_space<vmem>>, vector<4x4xbf16>
    %cst_78 = arith.constant dense<0.000000e+00> : vector<64x4xf32>
    %236 = tpu.matmul %234, %235, %cst_78 {dimension_numbers = #tpu.dot_dimension_numbers<[1], [0], [0], [1], [0, 0, 1, 1], [], []>} : vector<64x4xbf16>, vector<4x4xbf16>, vector<64x4xf32> -> vector<64x4xf32>
    %237 = arith.addf %232, %236 : vector<64x4xf32>
    %c7_i32_79 = arith.constant 7 : i32
    %238 = tpu.dynamic_rotate %175 by %c7_i32_79 dim 1 : vector<8x8x4xf32>, i32 -> vector<8x8x4xf32>
    %cst_80 = arith.constant 0.000000e+00 : f32
    %239 = vector.shape_cast %10 : vector<1x8x1xi1> to vector<1x8x1xi1>
    %240 = vector.broadcast %239 : vector<1x8x1xi1> to vector<8x8x4xi1>
    %241 = vector.broadcast %cst_80 : f32 to vector<8x8x4xf32>
    %242 = arith.select %240, %241, %238 : vector<8x8x4xi1>, vector<8x8x4xf32>
    %243 = vector.shape_cast %242 : vector<8x8x4xf32> to vector<64x4xf32>
    %244 = arith.truncf %243 : vector<64x4xf32> to vector<64x4xbf16>
    %c20_81 = arith.constant 20 : index
    %c0_82 = arith.constant 0 : index
    %245 = vector.load %arg6[%c20_81, %c0_82] : memref<36x4xbf16, #tpu.memory_space<vmem>>, vector<4x4xbf16>
    %cst_83 = arith.constant dense<0.000000e+00> : vector<64x4xf32>
    %246 = tpu.matmul %244, %245, %cst_83 {dimension_numbers = #tpu.dot_dimension_numbers<[1], [0], [0], [1], [0, 0, 1, 1], [], []>} : vector<64x4xbf16>, vector<4x4xbf16>, vector<64x4xf32> -> vector<64x4xf32>
    %247 = arith.addf %237, %246 : vector<64x4xf32>
    %248 = vector.extract_strided_slice %175 {offsets = [1, 0, 0], sizes = [7, 8, 4], strides = [1, 1, 1]} : vector<8x8x4xf32> to vector<7x8x4xf32>
    %249 = vector.extract_strided_slice %175 {offsets = [0, 0, 0], sizes = [1, 8, 4], strides = [1, 1, 1]} : vector<8x8x4xf32> to vector<1x8x4xf32>
    %250 = tpu.concatenate %248, %249 in 0 : vector<7x8x4xf32>, vector<1x8x4xf32> -> vector<8x8x4xf32>
    %cst_84 = arith.constant 0.000000e+00 : f32
    %251 = vector.shape_cast %6 : vector<8x8x1xi1> to vector<8x8x1xi1>
    %252 = vector.broadcast %251 : vector<8x8x1xi1> to vector<8x8x4xi1>
    %253 = vector.broadcast %cst_84 : f32 to vector<8x8x4xf32>
    %254 = arith.select %252, %253, %250 : vector<8x8x4xi1>, vector<8x8x4xf32>
    %c1_i32_85 = arith.constant 1 : i32
    %255 = tpu.dynamic_rotate %254 by %c1_i32_85 dim 1 : vector<8x8x4xf32>, i32 -> vector<8x8x4xf32>
    %cst_86 = arith.constant 0.000000e+00 : f32
    %256 = vector.shape_cast %8 : vector<1x8x1xi1> to vector<1x8x1xi1>
    %257 = vector.broadcast %256 : vector<1x8x1xi1> to vector<8x8x4xi1>
    %258 = vector.broadcast %cst_86 : f32 to vector<8x8x4xf32>
    %259 = arith.select %257, %258, %255 : vector<8x8x4xi1>, vector<8x8x4xf32>
    %260 = vector.shape_cast %259 : vector<8x8x4xf32> to vector<64x4xf32>
    %261 = arith.truncf %260 : vector<64x4xf32> to vector<64x4xbf16>
    %c24_87 = arith.constant 24 : index
    %c0_88 = arith.constant 0 : index
    %262 = vector.load %arg6[%c24_87, %c0_88] : memref<36x4xbf16, #tpu.memory_space<vmem>>, vector<4x4xbf16>
    %cst_89 = arith.constant dense<0.000000e+00> : vector<64x4xf32>
    %263 = tpu.matmul %261, %262, %cst_89 {dimension_numbers = #tpu.dot_dimension_numbers<[1], [0], [0], [1], [0, 0, 1, 1], [], []>} : vector<64x4xbf16>, vector<4x4xbf16>, vector<64x4xf32> -> vector<64x4xf32>
    %264 = arith.addf %247, %263 : vector<64x4xf32>
    %265 = vector.extract_strided_slice %175 {offsets = [1, 0, 0], sizes = [7, 8, 4], strides = [1, 1, 1]} : vector<8x8x4xf32> to vector<7x8x4xf32>
    %266 = vector.extract_strided_slice %175 {offsets = [0, 0, 0], sizes = [1, 8, 4], strides = [1, 1, 1]} : vector<8x8x4xf32> to vector<1x8x4xf32>
    %267 = tpu.concatenate %265, %266 in 0 : vector<7x8x4xf32>, vector<1x8x4xf32> -> vector<8x8x4xf32>
    %cst_90 = arith.constant 0.000000e+00 : f32
    %268 = vector.shape_cast %6 : vector<8x8x1xi1> to vector<8x8x1xi1>
    %269 = vector.broadcast %268 : vector<8x8x1xi1> to vector<8x8x4xi1>
    %270 = vector.broadcast %cst_90 : f32 to vector<8x8x4xf32>
    %271 = arith.select %269, %270, %267 : vector<8x8x4xi1>, vector<8x8x4xf32>
    %272 = vector.shape_cast %271 : vector<8x8x4xf32> to vector<64x4xf32>
    %273 = arith.truncf %272 : vector<64x4xf32> to vector<64x4xbf16>
    %c28_91 = arith.constant 28 : index
    %c0_92 = arith.constant 0 : index
    %274 = vector.load %arg6[%c28_91, %c0_92] : memref<36x4xbf16, #tpu.memory_space<vmem>>, vector<4x4xbf16>
    %cst_93 = arith.constant dense<0.000000e+00> : vector<64x4xf32>
    %275 = tpu.matmul %273, %274, %cst_93 {dimension_numbers = #tpu.dot_dimension_numbers<[1], [0], [0], [1], [0, 0, 1, 1], [], []>} : vector<64x4xbf16>, vector<4x4xbf16>, vector<64x4xf32> -> vector<64x4xf32>
    %276 = arith.addf %264, %275 : vector<64x4xf32>
    %277 = vector.extract_strided_slice %175 {offsets = [1, 0, 0], sizes = [7, 8, 4], strides = [1, 1, 1]} : vector<8x8x4xf32> to vector<7x8x4xf32>
    %278 = vector.extract_strided_slice %175 {offsets = [0, 0, 0], sizes = [1, 8, 4], strides = [1, 1, 1]} : vector<8x8x4xf32> to vector<1x8x4xf32>
    %279 = tpu.concatenate %277, %278 in 0 : vector<7x8x4xf32>, vector<1x8x4xf32> -> vector<8x8x4xf32>
    %cst_94 = arith.constant 0.000000e+00 : f32
    %280 = vector.shape_cast %6 : vector<8x8x1xi1> to vector<8x8x1xi1>
    %281 = vector.broadcast %280 : vector<8x8x1xi1> to vector<8x8x4xi1>
    %282 = vector.broadcast %cst_94 : f32 to vector<8x8x4xf32>
    %283 = arith.select %281, %282, %279 : vector<8x8x4xi1>, vector<8x8x4xf32>
    %c7_i32_95 = arith.constant 7 : i32
    %284 = tpu.dynamic_rotate %283 by %c7_i32_95 dim 1 : vector<8x8x4xf32>, i32 -> vector<8x8x4xf32>
    %cst_96 = arith.constant 0.000000e+00 : f32
    %285 = vector.shape_cast %10 : vector<1x8x1xi1> to vector<1x8x1xi1>
    %286 = vector.broadcast %285 : vector<1x8x1xi1> to vector<8x8x4xi1>
    %287 = vector.broadcast %cst_96 : f32 to vector<8x8x4xf32>
    %288 = arith.select %286, %287, %284 : vector<8x8x4xi1>, vector<8x8x4xf32>
    %289 = vector.shape_cast %288 : vector<8x8x4xf32> to vector<64x4xf32>
    %290 = arith.truncf %289 : vector<64x4xf32> to vector<64x4xbf16>
    %c32_97 = arith.constant 32 : index
    %c0_98 = arith.constant 0 : index
    %291 = vector.load %arg6[%c32_97, %c0_98] : memref<36x4xbf16, #tpu.memory_space<vmem>>, vector<4x4xbf16>
    %cst_99 = arith.constant dense<0.000000e+00> : vector<64x4xf32>
    %292 = tpu.matmul %290, %291, %cst_99 {dimension_numbers = #tpu.dot_dimension_numbers<[1], [0], [0], [1], [0, 0, 1, 1], [], []>} : vector<64x4xbf16>, vector<4x4xbf16>, vector<64x4xf32> -> vector<64x4xf32>
    %293 = arith.addf %276, %292 : vector<64x4xf32>
    %294 = vector.shape_cast %293 : vector<64x4xf32> to vector<8x8x4xf32>
    %295 = vector.shape_cast %294 : vector<8x8x4xf32> to vector<1x8x8x4xf32>
    %cst_100 = arith.constant dense<0.000000e+00> : vector<1xf32>
    %296 = vector.multi_reduction <add>, %295, %cst_100 [1, 2, 3] : vector<1x8x8x4xf32> to vector<1xf32>
    %297 = vector.shape_cast %296 : vector<1xf32> to vector<1x1x1x1xf32>
    %cst_101 = arith.constant 2.560000e+02 : f32
    %298 = vector.broadcast %cst_101 : f32 to vector<1x1x1x1xf32>
    %299 = arith.divf %297, %298 : vector<1x1x1x1xf32>
    %300 = arith.mulf %295, %295 : vector<1x8x8x4xf32>
    %cst_102 = arith.constant dense<0.000000e+00> : vector<1xf32>
    %301 = vector.multi_reduction <add>, %300, %cst_102 [1, 2, 3] : vector<1x8x8x4xf32> to vector<1xf32>
    %302 = vector.shape_cast %301 : vector<1xf32> to vector<1x1x1x1xf32>
    %cst_103 = arith.constant 2.560000e+02 : f32
    %303 = vector.broadcast %cst_103 : f32 to vector<1x1x1x1xf32>
    %304 = arith.divf %302, %303 : vector<1x1x1x1xf32>
    %305 = arith.mulf %299, %299 : vector<1x1x1x1xf32>
    %306 = arith.subf %304, %305 : vector<1x1x1x1xf32>
    %307 = vector.broadcast %299 : vector<1x1x1x1xf32> to vector<1x8x8x4xf32>
    %308 = arith.subf %295, %307 : vector<1x8x8x4xf32>
    %cst_104 = arith.constant 9.99999974E-6 : f32
    %309 = vector.broadcast %cst_104 : f32 to vector<1x1x1x1xf32>
    %310 = arith.addf %306, %309 : vector<1x1x1x1xf32>
    %311 = math.rsqrt %310 : vector<1x1x1x1xf32>
    %312 = vector.broadcast %311 : vector<1x1x1x1xf32> to vector<1x8x8x4xf32>
    %313 = arith.mulf %308, %312 : vector<1x8x8x4xf32>
    %c0_105 = arith.constant 0 : index
    %c0_106 = arith.constant 0 : index
    %314 = vector.load %arg7[%c0_105, %c0_106] : memref<1x4xf32, #tpu.memory_space<vmem>>, vector<1x4xf32>
    %315 = vector.shape_cast %314 : vector<1x4xf32> to vector<1x1x1x4xf32>
    %c0_107 = arith.constant 0 : index
    %c0_108 = arith.constant 0 : index
    %316 = vector.load %arg8[%c0_107, %c0_108] : memref<1x4xf32, #tpu.memory_space<vmem>>, vector<1x4xf32>
    %317 = vector.shape_cast %316 : vector<1x4xf32> to vector<1x1x1x4xf32>
    %318 = vector.broadcast %315 : vector<1x1x1x4xf32> to vector<1x8x8x4xf32>
    %319 = arith.mulf %313, %318 : vector<1x8x8x4xf32>
    %320 = vector.broadcast %317 : vector<1x1x1x4xf32> to vector<1x8x8x4xf32>
    %321 = arith.addf %319, %320 : vector<1x8x8x4xf32>
    %322 = vector.shape_cast %321 : vector<1x8x8x4xf32> to vector<8x8x4xf32>
    %323 = arith.addf %20, %322 : vector<8x8x4xf32>
    %cst_109 = arith.constant 5.000000e-01 : f32
    %324 = vector.broadcast %cst_109 : f32 to vector<8x8x4xf32>
    %325 = arith.mulf %324, %323 : vector<8x8x4xf32>
    %cst_110 = arith.constant 0.707106769 : f32
    %326 = vector.broadcast %cst_110 : f32 to vector<8x8x4xf32>
    %327 = arith.mulf %323, %326 : vector<8x8x4xf32>
    %328 = math.erf %327 : vector<8x8x4xf32>
    %cst_111 = arith.constant 1.000000e+00 : f32
    %329 = vector.broadcast %cst_111 : f32 to vector<8x8x4xf32>
    %330 = arith.addf %329, %328 : vector<8x8x4xf32>
    %331 = arith.mulf %325, %330 : vector<8x8x4xf32>
    %cst_112 = arith.constant 0.000000e+00 : f32
    %332 = vector.broadcast %cst_112 : f32 to vector<64x8xf32>
    %333 = vector.extract_strided_slice %331 {offsets = [7, 0, 0], sizes = [1, 8, 4], strides = [1, 1, 1]} : vector<8x8x4xf32> to vector<1x8x4xf32>
    %334 = vector.extract_strided_slice %331 {offsets = [0, 0, 0], sizes = [7, 8, 4], strides = [1, 1, 1]} : vector<8x8x4xf32> to vector<7x8x4xf32>
    %335 = tpu.concatenate %333, %334 in 0 : vector<1x8x4xf32>, vector<7x8x4xf32> -> vector<8x8x4xf32>
    %cst_113 = arith.constant 0.000000e+00 : f32
    %336 = vector.shape_cast %4 : vector<8x8x1xi1> to vector<8x8x1xi1>
    %337 = vector.broadcast %336 : vector<8x8x1xi1> to vector<8x8x4xi1>
    %338 = vector.broadcast %cst_113 : f32 to vector<8x8x4xf32>
    %339 = arith.select %337, %338, %335 : vector<8x8x4xi1>, vector<8x8x4xf32>
    %c1_i32_114 = arith.constant 1 : i32
    %340 = tpu.dynamic_rotate %339 by %c1_i32_114 dim 1 : vector<8x8x4xf32>, i32 -> vector<8x8x4xf32>
    %cst_115 = arith.constant 0.000000e+00 : f32
    %341 = vector.shape_cast %8 : vector<1x8x1xi1> to vector<1x8x1xi1>
    %342 = vector.broadcast %341 : vector<1x8x1xi1> to vector<8x8x4xi1>
    %343 = vector.broadcast %cst_115 : f32 to vector<8x8x4xf32>
    %344 = arith.select %342, %343, %340 : vector<8x8x4xi1>, vector<8x8x4xf32>
    %345 = vector.shape_cast %344 : vector<8x8x4xf32> to vector<64x4xf32>
    %346 = arith.truncf %345 : vector<64x4xf32> to vector<64x4xbf16>
    %c0_116 = arith.constant 0 : index
    %c0_117 = arith.constant 0 : index
    %347 = vector.load %arg9[%c0_116, %c0_117] : memref<36x8xbf16, #tpu.memory_space<vmem>>, vector<4x8xbf16>
    %cst_118 = arith.constant dense<0.000000e+00> : vector<64x8xf32>
    %348 = tpu.matmul %346, %347, %cst_118 {dimension_numbers = #tpu.dot_dimension_numbers<[1], [0], [0], [1], [0, 0, 1, 1], [], []>} : vector<64x4xbf16>, vector<4x8xbf16>, vector<64x8xf32> -> vector<64x8xf32>
    %349 = arith.addf %332, %348 : vector<64x8xf32>
    %350 = vector.extract_strided_slice %331 {offsets = [7, 0, 0], sizes = [1, 8, 4], strides = [1, 1, 1]} : vector<8x8x4xf32> to vector<1x8x4xf32>
    %351 = vector.extract_strided_slice %331 {offsets = [0, 0, 0], sizes = [7, 8, 4], strides = [1, 1, 1]} : vector<8x8x4xf32> to vector<7x8x4xf32>
    %352 = tpu.concatenate %350, %351 in 0 : vector<1x8x4xf32>, vector<7x8x4xf32> -> vector<8x8x4xf32>
    %cst_119 = arith.constant 0.000000e+00 : f32
    %353 = vector.shape_cast %4 : vector<8x8x1xi1> to vector<8x8x1xi1>
    %354 = vector.broadcast %353 : vector<8x8x1xi1> to vector<8x8x4xi1>
    %355 = vector.broadcast %cst_119 : f32 to vector<8x8x4xf32>
    %356 = arith.select %354, %355, %352 : vector<8x8x4xi1>, vector<8x8x4xf32>
    %357 = vector.shape_cast %356 : vector<8x8x4xf32> to vector<64x4xf32>
    %358 = arith.truncf %357 : vector<64x4xf32> to vector<64x4xbf16>
    %c4_120 = arith.constant 4 : index
    %c0_121 = arith.constant 0 : index
    %359 = vector.load %arg9[%c4_120, %c0_121] : memref<36x8xbf16, #tpu.memory_space<vmem>>, vector<4x8xbf16>
    %cst_122 = arith.constant dense<0.000000e+00> : vector<64x8xf32>
    %360 = tpu.matmul %358, %359, %cst_122 {dimension_numbers = #tpu.dot_dimension_numbers<[1], [0], [0], [1], [0, 0, 1, 1], [], []>} : vector<64x4xbf16>, vector<4x8xbf16>, vector<64x8xf32> -> vector<64x8xf32>
    %361 = arith.addf %349, %360 : vector<64x8xf32>
    %362 = vector.extract_strided_slice %331 {offsets = [7, 0, 0], sizes = [1, 8, 4], strides = [1, 1, 1]} : vector<8x8x4xf32> to vector<1x8x4xf32>
    %363 = vector.extract_strided_slice %331 {offsets = [0, 0, 0], sizes = [7, 8, 4], strides = [1, 1, 1]} : vector<8x8x4xf32> to vector<7x8x4xf32>
    %364 = tpu.concatenate %362, %363 in 0 : vector<1x8x4xf32>, vector<7x8x4xf32> -> vector<8x8x4xf32>
    %cst_123 = arith.constant 0.000000e+00 : f32
    %365 = vector.shape_cast %4 : vector<8x8x1xi1> to vector<8x8x1xi1>
    %366 = vector.broadcast %365 : vector<8x8x1xi1> to vector<8x8x4xi1>
    %367 = vector.broadcast %cst_123 : f32 to vector<8x8x4xf32>
    %368 = arith.select %366, %367, %364 : vector<8x8x4xi1>, vector<8x8x4xf32>
    %c7_i32_124 = arith.constant 7 : i32
    %369 = tpu.dynamic_rotate %368 by %c7_i32_124 dim 1 : vector<8x8x4xf32>, i32 -> vector<8x8x4xf32>
    %cst_125 = arith.constant 0.000000e+00 : f32
    %370 = vector.shape_cast %10 : vector<1x8x1xi1> to vector<1x8x1xi1>
    %371 = vector.broadcast %370 : vector<1x8x1xi1> to vector<8x8x4xi1>
    %372 = vector.broadcast %cst_125 : f32 to vector<8x8x4xf32>
    %373 = arith.select %371, %372, %369 : vector<8x8x4xi1>, vector<8x8x4xf32>
    %374 = vector.shape_cast %373 : vector<8x8x4xf32> to vector<64x4xf32>
    %375 = arith.truncf %374 : vector<64x4xf32> to vector<64x4xbf16>
    %c8_126 = arith.constant 8 : index
    %c0_127 = arith.constant 0 : index
    %376 = vector.load %arg9[%c8_126, %c0_127] : memref<36x8xbf16, #tpu.memory_space<vmem>>, vector<4x8xbf16>
    %cst_128 = arith.constant dense<0.000000e+00> : vector<64x8xf32>
    %377 = tpu.matmul %375, %376, %cst_128 {dimension_numbers = #tpu.dot_dimension_numbers<[1], [0], [0], [1], [0, 0, 1, 1], [], []>} : vector<64x4xbf16>, vector<4x8xbf16>, vector<64x8xf32> -> vector<64x8xf32>
    %378 = arith.addf %361, %377 : vector<64x8xf32>
    %c1_i32_129 = arith.constant 1 : i32
    %379 = tpu.dynamic_rotate %331 by %c1_i32_129 dim 1 : vector<8x8x4xf32>, i32 -> vector<8x8x4xf32>
    %cst_130 = arith.constant 0.000000e+00 : f32
    %380 = vector.shape_cast %8 : vector<1x8x1xi1> to vector<1x8x1xi1>
    %381 = vector.broadcast %380 : vector<1x8x1xi1> to vector<8x8x4xi1>
    %382 = vector.broadcast %cst_130 : f32 to vector<8x8x4xf32>
    %383 = arith.select %381, %382, %379 : vector<8x8x4xi1>, vector<8x8x4xf32>
    %384 = vector.shape_cast %383 : vector<8x8x4xf32> to vector<64x4xf32>
    %385 = arith.truncf %384 : vector<64x4xf32> to vector<64x4xbf16>
    %c12_131 = arith.constant 12 : index
    %c0_132 = arith.constant 0 : index
    %386 = vector.load %arg9[%c12_131, %c0_132] : memref<36x8xbf16, #tpu.memory_space<vmem>>, vector<4x8xbf16>
    %cst_133 = arith.constant dense<0.000000e+00> : vector<64x8xf32>
    %387 = tpu.matmul %385, %386, %cst_133 {dimension_numbers = #tpu.dot_dimension_numbers<[1], [0], [0], [1], [0, 0, 1, 1], [], []>} : vector<64x4xbf16>, vector<4x8xbf16>, vector<64x8xf32> -> vector<64x8xf32>
    %388 = arith.addf %378, %387 : vector<64x8xf32>
    %389 = vector.shape_cast %331 : vector<8x8x4xf32> to vector<64x4xf32>
    %390 = arith.truncf %389 : vector<64x4xf32> to vector<64x4xbf16>
    %c16_134 = arith.constant 16 : index
    %c0_135 = arith.constant 0 : index
    %391 = vector.load %arg9[%c16_134, %c0_135] : memref<36x8xbf16, #tpu.memory_space<vmem>>, vector<4x8xbf16>
    %cst_136 = arith.constant dense<0.000000e+00> : vector<64x8xf32>
    %392 = tpu.matmul %390, %391, %cst_136 {dimension_numbers = #tpu.dot_dimension_numbers<[1], [0], [0], [1], [0, 0, 1, 1], [], []>} : vector<64x4xbf16>, vector<4x8xbf16>, vector<64x8xf32> -> vector<64x8xf32>
    %393 = arith.addf %388, %392 : vector<64x8xf32>
    %c7_i32_137 = arith.constant 7 : i32
    %394 = tpu.dynamic_rotate %331 by %c7_i32_137 dim 1 : vector<8x8x4xf32>, i32 -> vector<8x8x4xf32>
    %cst_138 = arith.constant 0.000000e+00 : f32
    %395 = vector.shape_cast %10 : vector<1x8x1xi1> to vector<1x8x1xi1>
    %396 = vector.broadcast %395 : vector<1x8x1xi1> to vector<8x8x4xi1>
    %397 = vector.broadcast %cst_138 : f32 to vector<8x8x4xf32>
    %398 = arith.select %396, %397, %394 : vector<8x8x4xi1>, vector<8x8x4xf32>
    %399 = vector.shape_cast %398 : vector<8x8x4xf32> to vector<64x4xf32>
    %400 = arith.truncf %399 : vector<64x4xf32> to vector<64x4xbf16>
    %c20_139 = arith.constant 20 : index
    %c0_140 = arith.constant 0 : index
    %401 = vector.load %arg9[%c20_139, %c0_140] : memref<36x8xbf16, #tpu.memory_space<vmem>>, vector<4x8xbf16>
    %cst_141 = arith.constant dense<0.000000e+00> : vector<64x8xf32>
    %402 = tpu.matmul %400, %401, %cst_141 {dimension_numbers = #tpu.dot_dimension_numbers<[1], [0], [0], [1], [0, 0, 1, 1], [], []>} : vector<64x4xbf16>, vector<4x8xbf16>, vector<64x8xf32> -> vector<64x8xf32>
    %403 = arith.addf %393, %402 : vector<64x8xf32>
    %404 = vector.extract_strided_slice %331 {offsets = [1, 0, 0], sizes = [7, 8, 4], strides = [1, 1, 1]} : vector<8x8x4xf32> to vector<7x8x4xf32>
    %405 = vector.extract_strided_slice %331 {offsets = [0, 0, 0], sizes = [1, 8, 4], strides = [1, 1, 1]} : vector<8x8x4xf32> to vector<1x8x4xf32>
    %406 = tpu.concatenate %404, %405 in 0 : vector<7x8x4xf32>, vector<1x8x4xf32> -> vector<8x8x4xf32>
    %cst_142 = arith.constant 0.000000e+00 : f32
    %407 = vector.shape_cast %6 : vector<8x8x1xi1> to vector<8x8x1xi1>
    %408 = vector.broadcast %407 : vector<8x8x1xi1> to vector<8x8x4xi1>
    %409 = vector.broadcast %cst_142 : f32 to vector<8x8x4xf32>
    %410 = arith.select %408, %409, %406 : vector<8x8x4xi1>, vector<8x8x4xf32>
    %c1_i32_143 = arith.constant 1 : i32
    %411 = tpu.dynamic_rotate %410 by %c1_i32_143 dim 1 : vector<8x8x4xf32>, i32 -> vector<8x8x4xf32>
    %cst_144 = arith.constant 0.000000e+00 : f32
    %412 = vector.shape_cast %8 : vector<1x8x1xi1> to vector<1x8x1xi1>
    %413 = vector.broadcast %412 : vector<1x8x1xi1> to vector<8x8x4xi1>
    %414 = vector.broadcast %cst_144 : f32 to vector<8x8x4xf32>
    %415 = arith.select %413, %414, %411 : vector<8x8x4xi1>, vector<8x8x4xf32>
    %416 = vector.shape_cast %415 : vector<8x8x4xf32> to vector<64x4xf32>
    %417 = arith.truncf %416 : vector<64x4xf32> to vector<64x4xbf16>
    %c24_145 = arith.constant 24 : index
    %c0_146 = arith.constant 0 : index
    %418 = vector.load %arg9[%c24_145, %c0_146] : memref<36x8xbf16, #tpu.memory_space<vmem>>, vector<4x8xbf16>
    %cst_147 = arith.constant dense<0.000000e+00> : vector<64x8xf32>
    %419 = tpu.matmul %417, %418, %cst_147 {dimension_numbers = #tpu.dot_dimension_numbers<[1], [0], [0], [1], [0, 0, 1, 1], [], []>} : vector<64x4xbf16>, vector<4x8xbf16>, vector<64x8xf32> -> vector<64x8xf32>
    %420 = arith.addf %403, %419 : vector<64x8xf32>
    %421 = vector.extract_strided_slice %331 {offsets = [1, 0, 0], sizes = [7, 8, 4], strides = [1, 1, 1]} : vector<8x8x4xf32> to vector<7x8x4xf32>
    %422 = vector.extract_strided_slice %331 {offsets = [0, 0, 0], sizes = [1, 8, 4], strides = [1, 1, 1]} : vector<8x8x4xf32> to vector<1x8x4xf32>
    %423 = tpu.concatenate %421, %422 in 0 : vector<7x8x4xf32>, vector<1x8x4xf32> -> vector<8x8x4xf32>
    %cst_148 = arith.constant 0.000000e+00 : f32
    %424 = vector.shape_cast %6 : vector<8x8x1xi1> to vector<8x8x1xi1>
    %425 = vector.broadcast %424 : vector<8x8x1xi1> to vector<8x8x4xi1>
    %426 = vector.broadcast %cst_148 : f32 to vector<8x8x4xf32>
    %427 = arith.select %425, %426, %423 : vector<8x8x4xi1>, vector<8x8x4xf32>
    %428 = vector.shape_cast %427 : vector<8x8x4xf32> to vector<64x4xf32>
    %429 = arith.truncf %428 : vector<64x4xf32> to vector<64x4xbf16>
    %c28_149 = arith.constant 28 : index
    %c0_150 = arith.constant 0 : index
    %430 = vector.load %arg9[%c28_149, %c0_150] : memref<36x8xbf16, #tpu.memory_space<vmem>>, vector<4x8xbf16>
    %cst_151 = arith.constant dense<0.000000e+00> : vector<64x8xf32>
    %431 = tpu.matmul %429, %430, %cst_151 {dimension_numbers = #tpu.dot_dimension_numbers<[1], [0], [0], [1], [0, 0, 1, 1], [], []>} : vector<64x4xbf16>, vector<4x8xbf16>, vector<64x8xf32> -> vector<64x8xf32>
    %432 = arith.addf %420, %431 : vector<64x8xf32>
    %433 = vector.extract_strided_slice %331 {offsets = [1, 0, 0], sizes = [7, 8, 4], strides = [1, 1, 1]} : vector<8x8x4xf32> to vector<7x8x4xf32>
    %434 = vector.extract_strided_slice %331 {offsets = [0, 0, 0], sizes = [1, 8, 4], strides = [1, 1, 1]} : vector<8x8x4xf32> to vector<1x8x4xf32>
    %435 = tpu.concatenate %433, %434 in 0 : vector<7x8x4xf32>, vector<1x8x4xf32> -> vector<8x8x4xf32>
    %cst_152 = arith.constant 0.000000e+00 : f32
    %436 = vector.shape_cast %6 : vector<8x8x1xi1> to vector<8x8x1xi1>
    %437 = vector.broadcast %436 : vector<8x8x1xi1> to vector<8x8x4xi1>
    %438 = vector.broadcast %cst_152 : f32 to vector<8x8x4xf32>
    %439 = arith.select %437, %438, %435 : vector<8x8x4xi1>, vector<8x8x4xf32>
    %c7_i32_153 = arith.constant 7 : i32
    %440 = tpu.dynamic_rotate %439 by %c7_i32_153 dim 1 : vector<8x8x4xf32>, i32 -> vector<8x8x4xf32>
    %cst_154 = arith.constant 0.000000e+00 : f32
    %441 = vector.shape_cast %10 : vector<1x8x1xi1> to vector<1x8x1xi1>
    %442 = vector.broadcast %441 : vector<1x8x1xi1> to vector<8x8x4xi1>
    %443 = vector.broadcast %cst_154 : f32 to vector<8x8x4xf32>
    %444 = arith.select %442, %443, %440 : vector<8x8x4xi1>, vector<8x8x4xf32>
    %445 = vector.shape_cast %444 : vector<8x8x4xf32> to vector<64x4xf32>
    %446 = arith.truncf %445 : vector<64x4xf32> to vector<64x4xbf16>
    %c32_155 = arith.constant 32 : index
    %c0_156 = arith.constant 0 : index
    %447 = vector.load %arg9[%c32_155, %c0_156] : memref<36x8xbf16, #tpu.memory_space<vmem>>, vector<4x8xbf16>
    %cst_157 = arith.constant dense<0.000000e+00> : vector<64x8xf32>
    %448 = tpu.matmul %446, %447, %cst_157 {dimension_numbers = #tpu.dot_dimension_numbers<[1], [0], [0], [1], [0, 0, 1, 1], [], []>} : vector<64x4xbf16>, vector<4x8xbf16>, vector<64x8xf32> -> vector<64x8xf32>
    %449 = arith.addf %432, %448 : vector<64x8xf32>
    %450 = vector.shape_cast %449 : vector<64x8xf32> to vector<8x8x8xf32>
    %451 = vector.shape_cast %450 : vector<8x8x8xf32> to vector<1x8x8x8xf32>
    %cst_158 = arith.constant dense<0.000000e+00> : vector<1xf32>
    %452 = vector.multi_reduction <add>, %451, %cst_158 [1, 2, 3] : vector<1x8x8x8xf32> to vector<1xf32>
    %453 = vector.shape_cast %452 : vector<1xf32> to vector<1x1x1x1xf32>
    %cst_159 = arith.constant 5.120000e+02 : f32
    %454 = vector.broadcast %cst_159 : f32 to vector<1x1x1x1xf32>
    %455 = arith.divf %453, %454 : vector<1x1x1x1xf32>
    %456 = arith.mulf %451, %451 : vector<1x8x8x8xf32>
    %cst_160 = arith.constant dense<0.000000e+00> : vector<1xf32>
    %457 = vector.multi_reduction <add>, %456, %cst_160 [1, 2, 3] : vector<1x8x8x8xf32> to vector<1xf32>
    %458 = vector.shape_cast %457 : vector<1xf32> to vector<1x1x1x1xf32>
    %cst_161 = arith.constant 5.120000e+02 : f32
    %459 = vector.broadcast %cst_161 : f32 to vector<1x1x1x1xf32>
    %460 = arith.divf %458, %459 : vector<1x1x1x1xf32>
    %461 = arith.mulf %455, %455 : vector<1x1x1x1xf32>
    %462 = arith.subf %460, %461 : vector<1x1x1x1xf32>
    %463 = vector.broadcast %455 : vector<1x1x1x1xf32> to vector<1x8x8x8xf32>
    %464 = arith.subf %451, %463 : vector<1x8x8x8xf32>
    %cst_162 = arith.constant 9.99999974E-6 : f32
    %465 = vector.broadcast %cst_162 : f32 to vector<1x1x1x1xf32>
    %466 = arith.addf %462, %465 : vector<1x1x1x1xf32>
    %467 = math.rsqrt %466 : vector<1x1x1x1xf32>
    %468 = vector.broadcast %467 : vector<1x1x1x1xf32> to vector<1x8x8x8xf32>
    %469 = arith.mulf %464, %468 : vector<1x8x8x8xf32>
    %c0_163 = arith.constant 0 : index
    %c0_164 = arith.constant 0 : index
    %470 = vector.load %arg10[%c0_163, %c0_164] : memref<1x8xf32, #tpu.memory_space<vmem>>, vector<1x8xf32>
    %471 = vector.shape_cast %470 : vector<1x8xf32> to vector<1x1x1x8xf32>
    %c0_165 = arith.constant 0 : index
    %c0_166 = arith.constant 0 : index
    %472 = vector.load %arg11[%c0_165, %c0_166] : memref<1x8xf32, #tpu.memory_space<vmem>>, vector<1x8xf32>
    %473 = vector.shape_cast %472 : vector<1x8xf32> to vector<1x1x1x8xf32>
    %474 = vector.broadcast %471 : vector<1x1x1x8xf32> to vector<1x8x8x8xf32>
    %475 = arith.mulf %469, %474 : vector<1x8x8x8xf32>
    %476 = vector.broadcast %473 : vector<1x1x1x8xf32> to vector<1x8x8x8xf32>
    %477 = arith.addf %475, %476 : vector<1x8x8x8xf32>
    %478 = vector.shape_cast %477 : vector<1x8x8x8xf32> to vector<8x8x8xf32>
    %cst_167 = arith.constant 5.000000e-01 : f32
    %479 = vector.broadcast %cst_167 : f32 to vector<8x8x8xf32>
    %480 = arith.mulf %479, %478 : vector<8x8x8xf32>
    %cst_168 = arith.constant 0.707106769 : f32
    %481 = vector.broadcast %cst_168 : f32 to vector<8x8x8xf32>
    %482 = arith.mulf %478, %481 : vector<8x8x8xf32>
    %483 = math.erf %482 : vector<8x8x8xf32>
    %cst_169 = arith.constant 1.000000e+00 : f32
    %484 = vector.broadcast %cst_169 : f32 to vector<8x8x8xf32>
    %485 = arith.addf %484, %483 : vector<8x8x8xf32>
    %486 = arith.mulf %480, %485 : vector<8x8x8xf32>
    %cst_170 = arith.constant 0.000000e+00 : f32
    %487 = vector.broadcast %cst_170 : f32 to vector<64x8xf32>
    %488 = vector.extract_strided_slice %486 {offsets = [7, 0, 0], sizes = [1, 8, 8], strides = [1, 1, 1]} : vector<8x8x8xf32> to vector<1x8x8xf32>
    %489 = vector.extract_strided_slice %486 {offsets = [0, 0, 0], sizes = [7, 8, 8], strides = [1, 1, 1]} : vector<8x8x8xf32> to vector<7x8x8xf32>
    %490 = tpu.concatenate %488, %489 in 0 : vector<1x8x8xf32>, vector<7x8x8xf32> -> vector<8x8x8xf32>
    %cst_171 = arith.constant 0.000000e+00 : f32
    %491 = vector.shape_cast %4 : vector<8x8x1xi1> to vector<8x8x1xi1>
    %492 = vector.broadcast %491 : vector<8x8x1xi1> to vector<8x8x8xi1>
    %493 = vector.broadcast %cst_171 : f32 to vector<8x8x8xf32>
    %494 = arith.select %492, %493, %490 : vector<8x8x8xi1>, vector<8x8x8xf32>
    %c1_i32_172 = arith.constant 1 : i32
    %495 = tpu.dynamic_rotate %494 by %c1_i32_172 dim 1 : vector<8x8x8xf32>, i32 -> vector<8x8x8xf32>
    %cst_173 = arith.constant 0.000000e+00 : f32
    %496 = vector.shape_cast %8 : vector<1x8x1xi1> to vector<1x8x1xi1>
    %497 = vector.broadcast %496 : vector<1x8x1xi1> to vector<8x8x8xi1>
    %498 = vector.broadcast %cst_173 : f32 to vector<8x8x8xf32>
    %499 = arith.select %497, %498, %495 : vector<8x8x8xi1>, vector<8x8x8xf32>
    %500 = vector.shape_cast %499 : vector<8x8x8xf32> to vector<64x8xf32>
    %501 = arith.truncf %500 : vector<64x8xf32> to vector<64x8xbf16>
    %c0_174 = arith.constant 0 : index
    %c0_175 = arith.constant 0 : index
    %502 = vector.load %arg12[%c0_174, %c0_175] : memref<72x8xbf16, #tpu.memory_space<vmem>>, vector<8x8xbf16>
    %cst_176 = arith.constant dense<0.000000e+00> : vector<64x8xf32>
    %503 = tpu.matmul %501, %502, %cst_176 {dimension_numbers = #tpu.dot_dimension_numbers<[1], [0], [0], [1], [0, 0, 1, 1], [], []>} : vector<64x8xbf16>, vector<8x8xbf16>, vector<64x8xf32> -> vector<64x8xf32>
    %504 = arith.addf %487, %503 : vector<64x8xf32>
    %505 = vector.extract_strided_slice %486 {offsets = [7, 0, 0], sizes = [1, 8, 8], strides = [1, 1, 1]} : vector<8x8x8xf32> to vector<1x8x8xf32>
    %506 = vector.extract_strided_slice %486 {offsets = [0, 0, 0], sizes = [7, 8, 8], strides = [1, 1, 1]} : vector<8x8x8xf32> to vector<7x8x8xf32>
    %507 = tpu.concatenate %505, %506 in 0 : vector<1x8x8xf32>, vector<7x8x8xf32> -> vector<8x8x8xf32>
    %cst_177 = arith.constant 0.000000e+00 : f32
    %508 = vector.shape_cast %4 : vector<8x8x1xi1> to vector<8x8x1xi1>
    %509 = vector.broadcast %508 : vector<8x8x1xi1> to vector<8x8x8xi1>
    %510 = vector.broadcast %cst_177 : f32 to vector<8x8x8xf32>
    %511 = arith.select %509, %510, %507 : vector<8x8x8xi1>, vector<8x8x8xf32>
    %512 = vector.shape_cast %511 : vector<8x8x8xf32> to vector<64x8xf32>
    %513 = arith.truncf %512 : vector<64x8xf32> to vector<64x8xbf16>
    %c8_178 = arith.constant 8 : index
    %c0_179 = arith.constant 0 : index
    %514 = vector.load %arg12[%c8_178, %c0_179] : memref<72x8xbf16, #tpu.memory_space<vmem>>, vector<8x8xbf16>
    %cst_180 = arith.constant dense<0.000000e+00> : vector<64x8xf32>
    %515 = tpu.matmul %513, %514, %cst_180 {dimension_numbers = #tpu.dot_dimension_numbers<[1], [0], [0], [1], [0, 0, 1, 1], [], []>} : vector<64x8xbf16>, vector<8x8xbf16>, vector<64x8xf32> -> vector<64x8xf32>
    %516 = arith.addf %504, %515 : vector<64x8xf32>
    %517 = vector.extract_strided_slice %486 {offsets = [7, 0, 0], sizes = [1, 8, 8], strides = [1, 1, 1]} : vector<8x8x8xf32> to vector<1x8x8xf32>
    %518 = vector.extract_strided_slice %486 {offsets = [0, 0, 0], sizes = [7, 8, 8], strides = [1, 1, 1]} : vector<8x8x8xf32> to vector<7x8x8xf32>
    %519 = tpu.concatenate %517, %518 in 0 : vector<1x8x8xf32>, vector<7x8x8xf32> -> vector<8x8x8xf32>
    %cst_181 = arith.constant 0.000000e+00 : f32
    %520 = vector.shape_cast %4 : vector<8x8x1xi1> to vector<8x8x1xi1>
    %521 = vector.broadcast %520 : vector<8x8x1xi1> to vector<8x8x8xi1>
    %522 = vector.broadcast %cst_181 : f32 to vector<8x8x8xf32>
    %523 = arith.select %521, %522, %519 : vector<8x8x8xi1>, vector<8x8x8xf32>
    %c7_i32_182 = arith.constant 7 : i32
    %524 = tpu.dynamic_rotate %523 by %c7_i32_182 dim 1 : vector<8x8x8xf32>, i32 -> vector<8x8x8xf32>
    %cst_183 = arith.constant 0.000000e+00 : f32
    %525 = vector.shape_cast %10 : vector<1x8x1xi1> to vector<1x8x1xi1>
    %526 = vector.broadcast %525 : vector<1x8x1xi1> to vector<8x8x8xi1>
    %527 = vector.broadcast %cst_183 : f32 to vector<8x8x8xf32>
    %528 = arith.select %526, %527, %524 : vector<8x8x8xi1>, vector<8x8x8xf32>
    %529 = vector.shape_cast %528 : vector<8x8x8xf32> to vector<64x8xf32>
    %530 = arith.truncf %529 : vector<64x8xf32> to vector<64x8xbf16>
    %c16_184 = arith.constant 16 : index
    %c0_185 = arith.constant 0 : index
    %531 = vector.load %arg12[%c16_184, %c0_185] : memref<72x8xbf16, #tpu.memory_space<vmem>>, vector<8x8xbf16>
    %cst_186 = arith.constant dense<0.000000e+00> : vector<64x8xf32>
    %532 = tpu.matmul %530, %531, %cst_186 {dimension_numbers = #tpu.dot_dimension_numbers<[1], [0], [0], [1], [0, 0, 1, 1], [], []>} : vector<64x8xbf16>, vector<8x8xbf16>, vector<64x8xf32> -> vector<64x8xf32>
    %533 = arith.addf %516, %532 : vector<64x8xf32>
    %c1_i32_187 = arith.constant 1 : i32
    %534 = tpu.dynamic_rotate %486 by %c1_i32_187 dim 1 : vector<8x8x8xf32>, i32 -> vector<8x8x8xf32>
    %cst_188 = arith.constant 0.000000e+00 : f32
    %535 = vector.shape_cast %8 : vector<1x8x1xi1> to vector<1x8x1xi1>
    %536 = vector.broadcast %535 : vector<1x8x1xi1> to vector<8x8x8xi1>
    %537 = vector.broadcast %cst_188 : f32 to vector<8x8x8xf32>
    %538 = arith.select %536, %537, %534 : vector<8x8x8xi1>, vector<8x8x8xf32>
    %539 = vector.shape_cast %538 : vector<8x8x8xf32> to vector<64x8xf32>
    %540 = arith.truncf %539 : vector<64x8xf32> to vector<64x8xbf16>
    %c24_189 = arith.constant 24 : index
    %c0_190 = arith.constant 0 : index
    %541 = vector.load %arg12[%c24_189, %c0_190] : memref<72x8xbf16, #tpu.memory_space<vmem>>, vector<8x8xbf16>
    %cst_191 = arith.constant dense<0.000000e+00> : vector<64x8xf32>
    %542 = tpu.matmul %540, %541, %cst_191 {dimension_numbers = #tpu.dot_dimension_numbers<[1], [0], [0], [1], [0, 0, 1, 1], [], []>} : vector<64x8xbf16>, vector<8x8xbf16>, vector<64x8xf32> -> vector<64x8xf32>
    %543 = arith.addf %533, %542 : vector<64x8xf32>
    %544 = vector.shape_cast %486 : vector<8x8x8xf32> to vector<64x8xf32>
    %545 = arith.truncf %544 : vector<64x8xf32> to vector<64x8xbf16>
    %c32_192 = arith.constant 32 : index
    %c0_193 = arith.constant 0 : index
    %546 = vector.load %arg12[%c32_192, %c0_193] : memref<72x8xbf16, #tpu.memory_space<vmem>>, vector<8x8xbf16>
    %cst_194 = arith.constant dense<0.000000e+00> : vector<64x8xf32>
    %547 = tpu.matmul %545, %546, %cst_194 {dimension_numbers = #tpu.dot_dimension_numbers<[1], [0], [0], [1], [0, 0, 1, 1], [], []>} : vector<64x8xbf16>, vector<8x8xbf16>, vector<64x8xf32> -> vector<64x8xf32>
    %548 = arith.addf %543, %547 : vector<64x8xf32>
    %c7_i32_195 = arith.constant 7 : i32
    %549 = tpu.dynamic_rotate %486 by %c7_i32_195 dim 1 : vector<8x8x8xf32>, i32 -> vector<8x8x8xf32>
    %cst_196 = arith.constant 0.000000e+00 : f32
    %550 = vector.shape_cast %10 : vector<1x8x1xi1> to vector<1x8x1xi1>
    %551 = vector.broadcast %550 : vector<1x8x1xi1> to vector<8x8x8xi1>
    %552 = vector.broadcast %cst_196 : f32 to vector<8x8x8xf32>
    %553 = arith.select %551, %552, %549 : vector<8x8x8xi1>, vector<8x8x8xf32>
    %554 = vector.shape_cast %553 : vector<8x8x8xf32> to vector<64x8xf32>
    %555 = arith.truncf %554 : vector<64x8xf32> to vector<64x8xbf16>
    %c40 = arith.constant 40 : index
    %c0_197 = arith.constant 0 : index
    %556 = vector.load %arg12[%c40, %c0_197] : memref<72x8xbf16, #tpu.memory_space<vmem>>, vector<8x8xbf16>
    %cst_198 = arith.constant dense<0.000000e+00> : vector<64x8xf32>
    %557 = tpu.matmul %555, %556, %cst_198 {dimension_numbers = #tpu.dot_dimension_numbers<[1], [0], [0], [1], [0, 0, 1, 1], [], []>} : vector<64x8xbf16>, vector<8x8xbf16>, vector<64x8xf32> -> vector<64x8xf32>
    %558 = arith.addf %548, %557 : vector<64x8xf32>
    %559 = vector.extract_strided_slice %486 {offsets = [1, 0, 0], sizes = [7, 8, 8], strides = [1, 1, 1]} : vector<8x8x8xf32> to vector<7x8x8xf32>
    %560 = vector.extract_strided_slice %486 {offsets = [0, 0, 0], sizes = [1, 8, 8], strides = [1, 1, 1]} : vector<8x8x8xf32> to vector<1x8x8xf32>
    %561 = tpu.concatenate %559, %560 in 0 : vector<7x8x8xf32>, vector<1x8x8xf32> -> vector<8x8x8xf32>
    %cst_199 = arith.constant 0.000000e+00 : f32
    %562 = vector.shape_cast %6 : vector<8x8x1xi1> to vector<8x8x1xi1>
    %563 = vector.broadcast %562 : vector<8x8x1xi1> to vector<8x8x8xi1>
    %564 = vector.broadcast %cst_199 : f32 to vector<8x8x8xf32>
    %565 = arith.select %563, %564, %561 : vector<8x8x8xi1>, vector<8x8x8xf32>
    %c1_i32_200 = arith.constant 1 : i32
    %566 = tpu.dynamic_rotate %565 by %c1_i32_200 dim 1 : vector<8x8x8xf32>, i32 -> vector<8x8x8xf32>
    %cst_201 = arith.constant 0.000000e+00 : f32
    %567 = vector.shape_cast %8 : vector<1x8x1xi1> to vector<1x8x1xi1>
    %568 = vector.broadcast %567 : vector<1x8x1xi1> to vector<8x8x8xi1>
    %569 = vector.broadcast %cst_201 : f32 to vector<8x8x8xf32>
    %570 = arith.select %568, %569, %566 : vector<8x8x8xi1>, vector<8x8x8xf32>
    %571 = vector.shape_cast %570 : vector<8x8x8xf32> to vector<64x8xf32>
    %572 = arith.truncf %571 : vector<64x8xf32> to vector<64x8xbf16>
    %c48 = arith.constant 48 : index
    %c0_202 = arith.constant 0 : index
    %573 = vector.load %arg12[%c48, %c0_202] : memref<72x8xbf16, #tpu.memory_space<vmem>>, vector<8x8xbf16>
    %cst_203 = arith.constant dense<0.000000e+00> : vector<64x8xf32>
    %574 = tpu.matmul %572, %573, %cst_203 {dimension_numbers = #tpu.dot_dimension_numbers<[1], [0], [0], [1], [0, 0, 1, 1], [], []>} : vector<64x8xbf16>, vector<8x8xbf16>, vector<64x8xf32> -> vector<64x8xf32>
    %575 = arith.addf %558, %574 : vector<64x8xf32>
    %576 = vector.extract_strided_slice %486 {offsets = [1, 0, 0], sizes = [7, 8, 8], strides = [1, 1, 1]} : vector<8x8x8xf32> to vector<7x8x8xf32>
    %577 = vector.extract_strided_slice %486 {offsets = [0, 0, 0], sizes = [1, 8, 8], strides = [1, 1, 1]} : vector<8x8x8xf32> to vector<1x8x8xf32>
    %578 = tpu.concatenate %576, %577 in 0 : vector<7x8x8xf32>, vector<1x8x8xf32> -> vector<8x8x8xf32>
    %cst_204 = arith.constant 0.000000e+00 : f32
    %579 = vector.shape_cast %6 : vector<8x8x1xi1> to vector<8x8x1xi1>
    %580 = vector.broadcast %579 : vector<8x8x1xi1> to vector<8x8x8xi1>
    %581 = vector.broadcast %cst_204 : f32 to vector<8x8x8xf32>
    %582 = arith.select %580, %581, %578 : vector<8x8x8xi1>, vector<8x8x8xf32>
    %583 = vector.shape_cast %582 : vector<8x8x8xf32> to vector<64x8xf32>
    %584 = arith.truncf %583 : vector<64x8xf32> to vector<64x8xbf16>
    %c56 = arith.constant 56 : index
    %c0_205 = arith.constant 0 : index
    %585 = vector.load %arg12[%c56, %c0_205] : memref<72x8xbf16, #tpu.memory_space<vmem>>, vector<8x8xbf16>
    %cst_206 = arith.constant dense<0.000000e+00> : vector<64x8xf32>
    %586 = tpu.matmul %584, %585, %cst_206 {dimension_numbers = #tpu.dot_dimension_numbers<[1], [0], [0], [1], [0, 0, 1, 1], [], []>} : vector<64x8xbf16>, vector<8x8xbf16>, vector<64x8xf32> -> vector<64x8xf32>
    %587 = arith.addf %575, %586 : vector<64x8xf32>
    %588 = vector.extract_strided_slice %486 {offsets = [1, 0, 0], sizes = [7, 8, 8], strides = [1, 1, 1]} : vector<8x8x8xf32> to vector<7x8x8xf32>
    %589 = vector.extract_strided_slice %486 {offsets = [0, 0, 0], sizes = [1, 8, 8], strides = [1, 1, 1]} : vector<8x8x8xf32> to vector<1x8x8xf32>
    %590 = tpu.concatenate %588, %589 in 0 : vector<7x8x8xf32>, vector<1x8x8xf32> -> vector<8x8x8xf32>
    %cst_207 = arith.constant 0.000000e+00 : f32
    %591 = vector.shape_cast %6 : vector<8x8x1xi1> to vector<8x8x1xi1>
    %592 = vector.broadcast %591 : vector<8x8x1xi1> to vector<8x8x8xi1>
    %593 = vector.broadcast %cst_207 : f32 to vector<8x8x8xf32>
    %594 = arith.select %592, %593, %590 : vector<8x8x8xi1>, vector<8x8x8xf32>
    %c7_i32_208 = arith.constant 7 : i32
    %595 = tpu.dynamic_rotate %594 by %c7_i32_208 dim 1 : vector<8x8x8xf32>, i32 -> vector<8x8x8xf32>
    %cst_209 = arith.constant 0.000000e+00 : f32
    %596 = vector.shape_cast %10 : vector<1x8x1xi1> to vector<1x8x1xi1>
    %597 = vector.broadcast %596 : vector<1x8x1xi1> to vector<8x8x8xi1>
    %598 = vector.broadcast %cst_209 : f32 to vector<8x8x8xf32>
    %599 = arith.select %597, %598, %595 : vector<8x8x8xi1>, vector<8x8x8xf32>
    %600 = vector.shape_cast %599 : vector<8x8x8xf32> to vector<64x8xf32>
    %601 = arith.truncf %600 : vector<64x8xf32> to vector<64x8xbf16>
    %c64 = arith.constant 64 : index
    %c0_210 = arith.constant 0 : index
    %602 = vector.load %arg12[%c64, %c0_210] : memref<72x8xbf16, #tpu.memory_space<vmem>>, vector<8x8xbf16>
    %cst_211 = arith.constant dense<0.000000e+00> : vector<64x8xf32>
    %603 = tpu.matmul %601, %602, %cst_211 {dimension_numbers = #tpu.dot_dimension_numbers<[1], [0], [0], [1], [0, 0, 1, 1], [], []>} : vector<64x8xbf16>, vector<8x8xbf16>, vector<64x8xf32> -> vector<64x8xf32>
    %604 = arith.addf %587, %603 : vector<64x8xf32>
    %605 = vector.shape_cast %604 : vector<64x8xf32> to vector<8x8x8xf32>
    %606 = vector.shape_cast %605 : vector<8x8x8xf32> to vector<1x8x8x8xf32>
    %cst_212 = arith.constant dense<0.000000e+00> : vector<1xf32>
    %607 = vector.multi_reduction <add>, %606, %cst_212 [1, 2, 3] : vector<1x8x8x8xf32> to vector<1xf32>
    %608 = vector.shape_cast %607 : vector<1xf32> to vector<1x1x1x1xf32>
    %cst_213 = arith.constant 5.120000e+02 : f32
    %609 = vector.broadcast %cst_213 : f32 to vector<1x1x1x1xf32>
    %610 = arith.divf %608, %609 : vector<1x1x1x1xf32>
    %611 = arith.mulf %606, %606 : vector<1x8x8x8xf32>
    %cst_214 = arith.constant dense<0.000000e+00> : vector<1xf32>
    %612 = vector.multi_reduction <add>, %611, %cst_214 [1, 2, 3] : vector<1x8x8x8xf32> to vector<1xf32>
    %613 = vector.shape_cast %612 : vector<1xf32> to vector<1x1x1x1xf32>
    %cst_215 = arith.constant 5.120000e+02 : f32
    %614 = vector.broadcast %cst_215 : f32 to vector<1x1x1x1xf32>
    %615 = arith.divf %613, %614 : vector<1x1x1x1xf32>
    %616 = arith.mulf %610, %610 : vector<1x1x1x1xf32>
    %617 = arith.subf %615, %616 : vector<1x1x1x1xf32>
    %618 = vector.broadcast %610 : vector<1x1x1x1xf32> to vector<1x8x8x8xf32>
    %619 = arith.subf %606, %618 : vector<1x8x8x8xf32>
    %cst_216 = arith.constant 9.99999974E-6 : f32
    %620 = vector.broadcast %cst_216 : f32 to vector<1x1x1x1xf32>
    %621 = arith.addf %617, %620 : vector<1x1x1x1xf32>
    %622 = math.rsqrt %621 : vector<1x1x1x1xf32>
    %623 = vector.broadcast %622 : vector<1x1x1x1xf32> to vector<1x8x8x8xf32>
    %624 = arith.mulf %619, %623 : vector<1x8x8x8xf32>
    %c0_217 = arith.constant 0 : index
    %c0_218 = arith.constant 0 : index
    %625 = vector.load %arg13[%c0_217, %c0_218] : memref<1x8xf32, #tpu.memory_space<vmem>>, vector<1x8xf32>
    %626 = vector.shape_cast %625 : vector<1x8xf32> to vector<1x1x1x8xf32>
    %c0_219 = arith.constant 0 : index
    %c0_220 = arith.constant 0 : index
    %627 = vector.load %arg14[%c0_219, %c0_220] : memref<1x8xf32, #tpu.memory_space<vmem>>, vector<1x8xf32>
    %628 = vector.shape_cast %627 : vector<1x8xf32> to vector<1x1x1x8xf32>
    %629 = vector.broadcast %626 : vector<1x1x1x8xf32> to vector<1x8x8x8xf32>
    %630 = arith.mulf %624, %629 : vector<1x8x8x8xf32>
    %631 = vector.broadcast %628 : vector<1x1x1x8xf32> to vector<1x8x8x8xf32>
    %632 = arith.addf %630, %631 : vector<1x8x8x8xf32>
    %633 = vector.shape_cast %632 : vector<1x8x8x8xf32> to vector<8x8x8xf32>
    %634 = vector.shape_cast %633 : vector<8x8x8xf32> to vector<1x8x8x8xf32>
    %c0_221 = arith.constant 0 : index
    %c0_222 = arith.constant 0 : index
    %c0_223 = arith.constant 0 : index
    %635 = vector.load %arg2[%c0_221, %c0_222, %c0_223] : memref<1x1x8xf32, #tpu.memory_space<vmem>>, vector<1x1x8xf32>
    %636 = vector.shape_cast %635 : vector<1x1x8xf32> to vector<1x1x1x8xf32>
    %637 = vector.broadcast %636 : vector<1x1x1x8xf32> to vector<1x8x8x8xf32>
    %638 = arith.addf %634, %637 : vector<1x8x8x8xf32>
    %639 = vector.shape_cast %638 : vector<1x8x8x8xf32> to vector<1x8x64xf32>
    %c0_224 = arith.constant 0 : index
    %c0_225 = arith.constant 0 : index
    %c0_226 = arith.constant 0 : index
    %640 = vector.load %arg15[%c0_224, %c0_225, %c0_226] : memref<1x8x64xf32, #tpu.memory_space<vmem>>, vector<1x8x64xf32>
    tpu.vector_store %arg15[%c0_224, %c0_225, %c0_226], %639 {strides = array<i32>} : memref<1x8x64xf32, #tpu.memory_space<vmem>>, vector<1x8x64xf32>,
    return
  }
  func.func @transform_0(%arg0: i32) -> (i32, i32, i32, i32, i32) {
    %c0_i32 = arith.constant 0 : i32
    %c0_i32_0 = arith.constant 0 : i32
    %c0_i32_1 = arith.constant 0 : i32
    %c0_i32_2 = arith.constant 0 : i32
    %c0_i32_3 = arith.constant 0 : i32
    return %arg0, %c0_i32, %c0_i32_0, %c0_i32_1, %c0_i32_2 : i32, i32, i32, i32, i32
  }
  func.func @transform_1(%arg0: i32) -> (i32, i32, i32) {
    %c0_i32 = arith.constant 0 : i32
    %c0_i32_0 = arith.constant 0 : i32
    %c0_i32_1 = arith.constant 0 : i32
    return %arg0, %c0_i32, %c0_i32_0 : i32, i32, i32
  }
  func.func @transform_2(%arg0: i32) -> (i32, i32) {
    %c0_i32 = arith.constant 0 : i32
    %c0_i32_0 = arith.constant 0 : i32
    %c0_i32_1 = arith.constant 0 : i32
    return %c0_i32, %c0_i32_0 : i32, i32
  }
  func.func @transform_3(%arg0: i32) -> (i32, i32) {
    %c0_i32 = arith.constant 0 : i32
    %c0_i32_0 = arith.constant 0 : i32
    %c0_i32_1 = arith.constant 0 : i32
    return %c0_i32, %c0_i32_0 : i32, i32
  }
  func.func @transform_4(%arg0: i32) -> (i32, i32) {
    %c0_i32 = arith.constant 0 : i32
    %c0_i32_0 = arith.constant 0 : i32
    %c0_i32_1 = arith.constant 0 : i32
    return %c0_i32, %c0_i32_0 : i32, i32
  }
  func.func @transform_5(%arg0: i32) -> (i32, i32) {
    %c0_i32 = arith.constant 0 : i32
    %c0_i32_0 = arith.constant 0 : i32
    %c0_i32_1 = arith.constant 0 : i32
    return %c0_i32, %c0_i32_0 : i32, i32
  }
  func.func @transform_6(%arg0: i32) -> (i32, i32) {
    %c0_i32 = arith.constant 0 : i32
    %c0_i32_0 = arith.constant 0 : i32
    %c0_i32_1 = arith.constant 0 : i32
    return %c0_i32, %c0_i32_0 : i32, i32
  }
  func.func @transform_7(%arg0: i32) -> (i32, i32) {
    %c0_i32 = arith.constant 0 : i32
    %c0_i32_0 = arith.constant 0 : i32
    %c0_i32_1 = arith.constant 0 : i32
    return %c0_i32, %c0_i32_0 : i32, i32
  }
  func.func @transform_8(%arg0: i32) -> (i32, i32) {
    %c0_i32 = arith.constant 0 : i32
    %c0_i32_0 = arith.constant 0 : i32
    %c0_i32_1 = arith.constant 0 : i32
    return %c0_i32, %c0_i32_0 : i32, i32
  }
  func.func @transform_9(%arg0: i32) -> (i32, i32) {
    %c0_i32 = arith.constant 0 : i32
    %c0_i32_0 = arith.constant 0 : i32
    %c0_i32_1 = arith.constant 0 : i32
    return %c0_i32, %c0_i32_0 : i32, i32
  }
  func.func @transform_10(%arg0: i32) -> (i32, i32) {
    %c0_i32 = arith.constant 0 : i32
    %c0_i32_0 = arith.constant 0 : i32
    %c0_i32_1 = arith.constant 0 : i32
    return %c0_i32, %c0_i32_0 : i32, i32
  }
  func.func @transform_11(%arg0: i32) -> (i32, i32) {
    %c0_i32 = arith.constant 0 : i32
    %c0_i32_0 = arith.constant 0 : i32
    %c0_i32_1 = arith.constant 0 : i32
    return %c0_i32, %c0_i32_0 : i32, i32
  }
  func.func @transform_12(%arg0: i32) -> (i32, i32) {
    %c0_i32 = arith.constant 0 : i32
    %c0_i32_0 = arith.constant 0 : i32
    %c0_i32_1 = arith.constant 0 : i32
    return %c0_i32, %c0_i32_0 : i32, i32
  }
  func.func @transform_13(%arg0: i32) -> (i32, i32) {
    %c0_i32 = arith.constant 0 : i32
    %c0_i32_0 = arith.constant 0 : i32
    %c0_i32_1 = arith.constant 0 : i32
    return %c0_i32, %c0_i32_0 : i32, i32
  }
  func.func @transform_14(%arg0: i32) -> (i32, i32, i32) {
    %c0_i32 = arith.constant 0 : i32
    %c0_i32_0 = arith.constant 0 : i32
    %c0_i32_1 = arith.constant 0 : i32
    return %arg0, %c0_i32, %c0_i32_0 : i32, i32, i32
  }
}

</mosaic_0001>

<bundles_post_ra>
// kernel: tpu_custom_call.1
= control target key start
LH: loop header
LB: loop body
LE: loop exit
PB: predicated region body
PF: predicated region fallthrough
CT: control target
= control target key end

     0   :  { %s7376_s0 = inlined_call_operand.hbm [shape: f32[2,8,2,8,8], index: 0, kind: input, shape index: {}]   ;;  %s7377_s1 = inlined_call_operand.vmem [shape: f32[2,1,8], index: 1, kind: input, shape index: {}]   ;;  %s7378_s2 = inlined_call_operand.vmem [shape: bf16[36,4], index: 2, kind: input, shape index: {}]   ;;  %s7379_s3 = inlined_call_operand.vmem [shape: f32[1,4], index: 3, kind: input, shape index: {}]   ;;  %s7380_s4 = inlined_call_operand.vmem [shape: f32[1,4], index: 4, kind: input, shape index: {}]   ;;  %s7381_s5 = inlined_call_operand.vmem [shape: bf16[36,4], index: 5, kind: input, shape index: {}]   ;;  %s7382_s6 = inlined_call_operand.vmem [shape: f32[1,4], index: 6, kind: input, shape index: {}]   ;;  %s7383_s7 = inlined_call_operand.vmem [shape: f32[1,4], index: 7, kind: input, shape index: {}]   ;;  %s7384_s8 = inlined_call_operand.vmem [shape: bf16[36,8], index: 8, kind: input, shape index: {}]   ;;  %s7385_s9 = inlined_call_operand.vmem [shape: f32[1,8], index: 9, kind: input, shape index: {}]   ;;  %s7386_s10 = inlined_call_operand.vmem [shape: f32[1,8], index: 10, kind: input, shape index: {}]   ;;  %s7387_s11 = inlined_call_operand.vmem [shape: bf16[72,8], index: 11, kind: input, shape index: {}]   ;;  %s7388_s12 = inlined_call_operand.vmem [shape: f32[1,8], index: 12, kind: input, shape index: {}]   ;;  %s7389_s13 = inlined_call_operand.vmem [shape: f32[1,8], index: 13, kind: input, shape index: {}]   ;;  %s7390_s14 = inlined_call_operand.hbm [shape: f32[2,8,64], index: 14, kind: output, shape index: {}]  }
   0x1   :  { %7426 = sst [smem:[#allocation28_spill]] %s7390_s14 }
   0x2   :  { %19 = vsyncpa [#allocation3], 0 }
   0x3   :  { %21 = vsyncpa [#allocation3 + $0x1], 0 }
   0x4   :  { %22 = vsyncpa [#allocation4], 0 }
   0x5   :  { %24 = vsyncpa [#allocation4 + $0x1], 0  ;;  %s6000_s29 = smov 0   ;;  %s6002_s30 = smov 0  }
   0x6   :  { %s6004_s15 = smov 0   ;;  %s6006_s16 = smov 0  }
   0x7 LB: > { %7427 = sst [smem:[#allocation8_spill]] %s5896_s29  ;;  %s6021_s17 = sadd.s32 4294967295, %s5908_s16   ;;  %s5908_s16 = sphi %s6006_s16, %s7502_s16   ;;  %s5904_s15 = sphi %s6004_s15, %s7504_s15   ;;  %s5900_s30 = sphi %s6002_s30, %s7506_s30   ;;  %s5896_s29 = sphi %s6000_s29, %s7505_s29  }
   0x8   : > { %7428 = sst [smem:[#allocation9_spill]] %s5904_s15  ;;  %s4934_s18 = sadd.s32 4294967294, %s5908_s16  }
   0x9   : > { %s6025_s19 = sadd.s32 1, %s5908_s16   ;;  %s37_s20 = sadd.s32 1, %s5904_s15 }
   0xa   : > { %7429 = sst [smem:[#allocation10_spill]] %s6025_s19  ;;  %s34_s21 = ssub.s32 %s5908_s16, %s6025_s19 }
   0xb   : > { %p44_p0 = scmp.ne.s32.totalorder %s5904_s15, %s5900_s30  ;;  %p35_p1 = scmp.eq.s32.totalorder %s34_s21, 0 }
   0xc   : > { %p45_p2 = scmp.eq.s32.totalorder %s5908_s16, 0  ;;  %p50_p3 = scmp.ne.s32.totalorder %s5900_s30, %s5896_s29 }
   0xd   : > { %p51_p4 = scmp.eq.s32.totalorder %s6021_s17, 0  ;;  %p352_p7 = scmp.eq.s32.totalorder %s6021_s17, 1 }
   0xe   : > { %s6037_s22 = scalar_select %p35_p1, %s5904_s15, %s37_s20  }
   0xf   : > { %p6039_p5 = por %p45_p2, %p44_p0  ;;  %p6043_p6 = por %p51_p4, %p50_p3 }
  0x10   : > { %7430 = sst [smem:[#allocation11_spill]] %s6037_s22  ;;  %p358_p8 = scmp.eq.s32.totalorder %s4934_s18, 1 }
  0x11   : > { %s7432_s24 = scalar_select %p6043_p6, 1, 0 }
  0x12   : > { %p5701_p10 = scmp.lt.s32.totalorder %s5908_s16, 2  ;;  %p6050_p11 = por %p352_p7, %p44_p0 }
  0x13   : > { %p6054_p12 = por %p358_p8, %p50_p3  ;;  %s414_s27 = sand.u32 1, %s5904_s15  }
  0x14   : > { %s7433_s25 = scalar_select %p6050_p11, 1, 0 }
  0x15   : > { %s7435_s26 = scalar_select %p6054_p12, 1, 0 }
  0x16   : > { %7434 = sst [smem:[#allocation12_spill]] %s7433_s25  ;;  %s5112_s28 = sshll.u32 %s5908_s16, 11 }
  0x17   : > { %7436 = sst [smem:[#allocation13_spill]] %s7435_s26  ;;  %s4937_s20 = sshll.u32 %s414_s27, 7 }
  0x18   : > { %s6063_s19 = scalar_lea.hbm %s7376_s0, %s5112_s28  ;;  %s418_s18 = scalar_lea.vmem [#allocation2], %s4937_s20 }
  0x19   : > { %s425_s29 = sshll.u32 %s418_s18, 4  ;;  %p6067_p13 = pnand %p5701_p10, %p6039_p5  ;;  %s6071_s29 = int_to_ptr.vmem [resolvable:$true] %s425_s29 }
  0x1a   : > { %s6073_s15 = scalar_lea.sflag [#allocation3], %s414_s27  ;;  %s5816_s26 = scalar_lea.hbm %s6063_s19, 2048 }
  0x1b   : > { %p5817_p0 = scmp.ne.s32.totalorder %s6063_s19, %s5816_s26  ;;  %p5818_p1 = pneg %p6067_p13 }
  0x1c   : > { %s5821_s20 = scalar_lea.hbm %s7376_s0, 4096  ;;  %p5822_p4 = scmp.lt.s32.totalorder %s6063_s19, %s7376_s0 }
  0x1d   : > { %p5819_p2 = pnand %p5818_p1, %p5817_p0  ;;  %p5823_p5 = scmp.lt.s32.totalorder %s5821_s20, %s5816_s26 }
  0x1f   : > { %p5820_p3 = pneg %p5819_p2  ;;  %p5824_p7 = por %p5823_p5, %p5822_p4 }
  0x21   : > { %p5825_p8 = pnand %p5824_p7, %p5820_p3 }
  0x23   : > { %5828 = shalt.err (!%p5825_p8)
}
  0x24   : > { %s5829_s27 = scalar_lea.vmem %s6071_s29, 2048  ;;  %s5910_s18 = smov [#allocation2]  }
  0x25   : > { %p5830_p10 = scmp.ne.s32.totalorder %s6071_s29, %s5829_s27  ;;  %s5834_s25 = sshll.u32 %s5910_s18, 4  ;;  %s5835_s25 = int_to_ptr.vmem [resolvable:$false] %s5834_s25 }
  0x26   : > { %s5836_s22 = scalar_lea.vmem %s5835_s25, 4096  ;;  %p5837_p2 = scmp.lt.s32.totalorder %s6071_s29, %s5835_s25 }
  0x27   : > { %p5832_p9 = pnand %p5830_p10, %p5818_p1  ;;  %p5838_p12 = scmp.lt.s32.totalorder %s5836_s22, %s5829_s27 }
  0x29   : > { %p5833_p0 = pneg %p5832_p9  ;;  %p5839_p11 = por %p5838_p12, %p5837_p2 }
  0x2b   : > { %p5840_p6 = pnand %p5839_p11, %p5833_p0 }
  0x2d   : > { %5843 = shalt.err (!%p5840_p6)
}
  0x2e   : > { %s5911_s26 = smov 128   ;;  %s5912_s28 = smov 8  }
  0x2f   : > { %5696 = dma.hbm_to_vmem [thread:$0]  (!%p6067_p13), %s6063_s19, 2048, %s6071_s29, %s6073_s15, %s5911_s26, %s5911_s26, %s5912_s28  }
  0x30   : > { %p4940_p9 = scmp.ge.s32.totalorder %s5908_s16, 1  ;;  %p439_p1 = scmp.lt.s32.totalorder %s5908_s16, 3 }
  0x32   : > { %p440_p3 = pnand %p4940_p9, %p439_p1 }
  0x34   : > { %443 = sbr.rel (%p440_p3) target bundleno = 2251 (0x8cb), region = 76 }
  0x39   : > { %s6097_s25 = sand.u32 1, %s5900_s30   ;;  %p7438_p6 = scmp.ne.s32.totalorder %s7432_s24, 0 }
  0x3a   : > { %s4941_s20 = sshll.u32 %s6097_s25, 7  ;;  %s446_s23 = scalar_lea.sflag [#allocation3], %s6097_s25 }
  0x3b   : > { %s6101_s21 = scalar_lea.vmem [#allocation2], %s4941_s20 }
  0x3c   : > { %5887 = dma.done.wait (%p7438_p6), %s446_s23, 2048  }
  0x3d   : > { %5889 = vsyncadd (%p7438_p6), %s446_s23, 4294965248  ;;  %v509_v0 = vld [vmem:[%s6101_s21 + $0x20] sm:$0xff]  ;;  %v510_v1 = vld [vmem:[%s6101_s21 + $0x28] sm:$0xff]  ;;  %s5913_s14 = smov 124   ;;  %vm622_vm0 = vcmask 1041408   ;;  %v501_v32 = vlaneseq  ;;  %v7401_v35 = vmov 0.0  }
  0x3e   : > { %v505_v2 = vld [vmem:[%s6101_s21] sm:$0xff]  ;;  %v523_v3 = vmax.f32 %v509_v0, %v510_v1  ;;  %v506_v4 = vld [vmem:[%s6101_s21 + $0x8] sm:$0xff]  ;;  %v511_v5 = vld [vmem:[%s6101_s21 + $0x30] sm:$0xff]  ;;  %v577_v36 = vrot.slane %v7401_v35, 7  ;;  %vm609_vm2 = vcmask 31744   ;;  %v771_v57 = vrot.slane %v7401_v35, 1 }
  0x3f   : > { %v512_v6 = vld [vmem:[%s6101_s21 + $0x38] sm:$0xff]  ;;  %v521_v7 = vmax.f32 %v505_v2, %v506_v4  ;;  %v507_v8 = vld [vmem:[%s6101_s21 + $0x10] sm:$0xff]  ;;  %v513_v14 = vld [vmem:[%s6101_s21 + $0x40] sm:$0xff]  ;;  %v6152_v33 = vshrl.u32 %v501_v32, 7  ;;  %vm3525_vm4 = vcmask 64512   ;;  %vm3719_vm5 = vcmask 1043456  }
  0x40   : > { %v508_v9 = vld [vmem:[%s6101_s21 + $0x18] sm:$0xff]  ;;  %541 = vrot.lane.b32.xlu1 %v523_v3, %s5913_s14  ;;  %v524_v10 = vmax.f32 %v511_v5, %v512_v6  ;;  %v515_v12 = vld [vmem:[%s6101_s21 + $0x50] sm:$0xff]  ;;  %v514_v15 = vld [vmem:[%s6101_s21 + $0x48] sm:$0xff]  ;;  %p497_p11 = scmp.lt.s32.totalorder %s6021_s17, 1  ;;  %s5917_s15 = smov 16   ;;  %vm4827_vm6 = vcmask 130048  }
  0x41   : > { %537 = vrot.lane.b32.xlu0 %v521_v7, %s5913_s14  ;;  %v522_v11 = vmax.f32 %v507_v8, %v508_v9  ;;  %v516_v13 = vld [vmem:[%s6101_s21 + $0x58] sm:$0xff]  ;;  %v5748_v16 = vld [vmem:[%s7378_s2] ss:$0 sps:$4 sm:$0xcc]   ;;  %v519_v17 = vld [vmem:[%s6101_s21 + $0x70] sm:$0xff]  ;;  %v525_v25 = vmax.f32 %v513_v14, %v514_v15  ;;  %7439 = vst [vmem:[#allocation14_spill] sm:$0xff] %v6152_v33 }
  0x42   : > { %v520_v18 = vld [vmem:[%s6101_s21 + $0x78] sm:$0xff]  ;;  %v599_v19 = vld [vmem:[%s7378_s2] sm:$0x3]  ;;  %v526_v20 = vmax.f32 %v515_v12, %v516_v13  ;;  %v608_v22 = vrot.slane %v5748_v16, 2  ;;  %v793_v23 = vld [vmem:[%s7378_s2 + $0x4] sm:$0x3] }
  0x43   : > { %v517_v21 = vld [vmem:[%s6101_s21 + $0x60] sm:$0xff]  ;;  %5654 = vmatprep.subr.msk.bf16.mxu1 %vm622_vm0, %v599_v19  ;;  %v704_v24 = vsel %vm622_vm0, %v599_v19, 0  ;;  %v518_v26 = vld [vmem:[%s6101_s21 + $0x68] sm:$0xff]  ;;  %v6144_v29 = vmax.f32 %v519_v17, %v520_v18  ;;  %vm503_vm1 = vcmp.eq.s32.totalorder %v6152_v33, 0  ;;  %v807_v55 = vsel %vm622_vm0, %v793_v23, 0  ;;  %s7301_s22 = scalar_select %p497_p11, %s6021_s17, 1 }
  0x44   : > { %543 = vrot.lane.b32.xlu1 %v524_v10, %s5913_s14  ;;  %5304 = vmatpush3.bf16.msra.mxu1 %v704_v24  ;;  %v624_v27 = vsel %vm622_vm0, %v608_v22, 0  ;;  %v5749_v28 = vld [vmem:[%s7378_s2 + $0x4] ss:$0 sps:$4 sm:$0xcc]   ;;  %v527_v30 = vmax.f32 %v517_v21, %v518_v26  ;;  %v6166_v44 = vsel %vm503_vm1, 0.0, %v577_v36  ;;  %vm504_vm3 = vcmp.eq.s32.totalorder %v6152_v33, 7 }
  0x45   : > { %539 = vrot.lane.b32.xlu0 %v522_v11, %s5913_s14  ;;  %5653 = vmatprep.subr.msk.bf16.mxu0 %vm622_vm0, %v608_v22  ;;  %v906_v31 = vrot.slane %v5749_v28, 2  ;;  %7442 = vst [vmem:[#allocation17_spill] sm:$0xff] %v6166_v44  ;;  %v6179_v50 = vld [vmem:[%s7378_s2 + $0x8] ss:$0 sps:$4 sm:$0xcc]   ;;  %v6222_v6 = vsel %vm504_vm3, 0.0, %v771_v57  ;;  %s499_s21 = scalar_lea.vmem %s7377_s1, %s7301_s22 }
  0x46   : > { %5294 = vmatpush3.bf16.msra.mxu0 %v624_v27  ;;  %v999_v59 = vld [vmem:[%s7378_s2 + $0x8] sm:$0x3]  ;;  %v1112_v2 = vrot.slane %v6179_v50, 2  ;;  %7447 = vst [vmem:[#allocation22_spill] sm:$0xff] %v6222_v6  ;;  %s5918_s19 = smov 8   ;;  %s5919_s24 = smov 40  }
  0x47   : > { %5655 = vmatprep.subr.msk.bf16.mxu0 %vm622_vm0, %v793_v23  ;;  %5656 = vmatprep.subr.msk.bf16.mxu1 %vm622_vm0, %v906_v31  ;;  %v920_v1 = vsel %vm622_vm0, %v906_v31, 0  ;;  %v5751_v28 = vld [vmem:[%s7378_s2 + $0xc] ss:$0 sps:$4 sm:$0xcc]   ;;  %v1013_v32 = vsel %vm622_vm0, %v999_v59, 0  ;;  %s5920_s27 = smov 24  }
  0x48   : > { %547 = vrot.lane.b32.xlu1 %v526_v20, %s5913_s14  ;;  %s5921_s18 = smov 56   ;;  %s5922_s22 = smov 32   ;;  %vm4829_vm7 = vcmask 195584   ;;  %vm4831_vm8 = vcmask 261120   ;;  %vm4833_vm9 = vcmask 326656   ;;  %vm4835_vm10 = vcmask 392192  }
  0x49   : > { %545 = vrot.lane.b32.xlu0 %v525_v25, %s5913_s14  ;;  %s5923_s26 = smov 48   ;;  %s4942_s28 = sshll.u32 %s6097_s25, 3  ;;  %vm4837_vm11 = vcmask 457728   ;;  %vm4839_vm12 = vcmask 523264  }
  0x4a   : > { %s5109_s20 = sshll.u32 %s6021_s17, 7  ;;  %s7495_s23 = sld [smem:[#allocation12_spill]] }
  0x4b   : > { %s5924_s17 = smov [#allocation5]  }
  0x4c   : > { %551 = vrot.lane.b32.xlu1 %v6144_v29, %s5913_s14 }
  0x4d   : > { %549 = vrot.lane.b32.xlu0 %v527_v30, %s5913_s14 }
  0x50   : > { %p7497_p13 = scmp.ne.s32.totalorder %s7495_s23, 0 }
  0xb2   : > { %v542_v34 = vpop.permute.xlu1 %541 }
  0xb3   : > { %v6155_v37 = vmax.f32 %v523_v3, %v542_v34  ;;  %v538_v38 = vpop.permute.xlu0 %537 }
  0xb4   : > { %v6158_v39 = vmax.f32 %v521_v7, %v538_v38 }
  0xb5   : > { %7440 = vst [vmem:[#allocation15_spill] sm:$0xff] %v6155_v37  ;;  %v580_v43 = vrot.slane %v6155_v37, 7  ;;  %v774_v15 = vrot.slane %v6155_v37, 1 }
  0xb6   : > { %7441 = vst [vmem:[#allocation16_spill] sm:$0xff] %v6158_v39  ;;  %v544_v40 = vpop.permute.xlu1 %543  ;;  %v600_v41 = vpack.c.bf16 %v6158_v39, %v7401_v35  ;;  %v578_v42 = vrot.slane %v6158_v39, 7  ;;  %v772_v58 = vrot.slane %v6158_v39, 1 }
  0xb7   : > { %v540_v45 = vpop.permute.xlu0 %539  ;;  %v6168_v46 = vmax.f32 %v524_v10, %v544_v40  ;;  %v6184_v53 = vsel %vm503_vm1, 0.0, %v580_v43  ;;  %v784_v24 = vsel %vm504_vm3, 0.0, %v774_v15  ;;  %v1208_v40 = vld [vmem:[%s7378_s2 + $0xc] sm:$0x3]  ;;  %v1293_v43 = vrot.slane %v5751_v28, 2 }
  0xb8   : > { %v6170_v47 = vmax.f32 %v522_v11, %v540_v45  ;;  %5295 = vmatprep.mubr.msk.bf16.mxu0 %vm609_vm2, %v600_v41  ;;  %v588_v48 = vsel %vm503_vm1, 0.0, %v578_v42  ;;  %v782_v7 = vsel %vm504_vm3, 0.0, %v772_v58  ;;  %v1126_v42 = vsel %vm622_vm0, %v1112_v2, 0 }
  0xb9   : > { %7443 = vst [vmem:[#allocation18_spill] sm:$0xff] %v6168_v46  ;;  %v595_v49 = vpack.c.bf16 %v588_v48, %v6166_v44  ;;  %v581_v61 = vrot.slane %v6168_v46, 7  ;;  %v789_v17 = vpack.c.bf16 %v782_v7, %v6222_v6  ;;  %v775_v23 = vrot.slane %v6168_v46, 1 }
  0xba   : > { %7444 = vst [vmem:[#allocation19_spill] sm:$0xff] %v6170_v47  ;;  %v548_v51 = vpop.permute.xlu1 %547  ;;  %v579_v52 = vrot.slane %v6170_v47, 7  ;;  %v6188_v54 = vpack.c.bf16 %v6155_v37, %v6170_v47  ;;  %v773_v16 = vrot.slane %v6170_v47, 1  ;;  %v996_v57 = vpack.c.bf16 %v6168_v46, %v6155_v37 }
  0xbb   : > { %5305 = vmatprep.mubr.msk.bf16.mxu1 %vm609_vm2, %v595_v49  ;;  %v546_v56 = vpop.permute.xlu0 %545  ;;  %v6198_v60 = vmax.f32 %v526_v20, %v548_v51  ;;  %v591_v8 = vsel %vm503_vm1, 0.0, %v581_v61  ;;  %v785_v34 = vsel %vm504_vm3, 0.0, %v775_v23  ;;  %v1213_v58 = vsel %vm622_vm0, %v1208_v40, 0  ;;  %v1378_v61 = vld [vmem:[%s7378_s2 + $0x10] sm:$0x3] }
  0xbc   : > { %v589_v62 = vsel %vm503_vm1, 0.0, %v579_v52  ;;  %v6203_v63 = vmax.f32 %v525_v25, %v546_v56  ;;  %5296 = vmatmul.mubr.msk.bf16.vlgmr.msra.gmra.mxu0 %vm609_vm2, %v6188_v54  ;;  %v783_v25 = vsel %vm504_vm3, 0.0, %v773_v16  ;;  %v899_v41 = vpack.c.bf16 %v591_v8, %v6184_v53 }
  0xbd   : > { %7445 = vst [vmem:[#allocation20_spill] sm:$0xff] %v6198_v60  ;;  %v6208_v0 = vpack.c.bf16 %v6184_v53, %v589_v62  ;;  %5314 = vmatpush3.bf16.msra.mxu0 %v807_v55  ;;  %v583_v11 = vrot.slane %v6198_v60, 7  ;;  %v898_v22 = vpack.c.bf16 %v589_v62, %v588_v48  ;;  %v995_v53 = vpack.c.bf16 %v6170_v47, %v6158_v39 }
  0xbe   : > { %7446 = vst [vmem:[#allocation21_spill] sm:$0xff] %v6203_v63  ;;  %v6214_v3 = vpack.c.bf16 %v6203_v63, %v6168_v46  ;;  %v582_v4 = vrot.slane %v6203_v63, 7  ;;  %5657 = vmatprep.subr.msk.bf16.mxu0 %vm622_vm0, %v999_v59  ;;  %v776_v20 = vrot.slane %v6203_v63, 1  ;;  %v552_v26 = vpop.permute.xlu1 %551  ;;  %v1104_v56 = vpack.c.bf16 %v783_v25, %v782_v7 }
  0xbf   : > { %5306 = vmatmul.mubr.msk.bf16.vlgmr.msra.gmra.mxu1 %vm609_vm2, %v6208_v0  ;;  %v550_v5 = vpop.permute.xlu0 %549  ;;  %v593_v18 = vsel %vm503_vm1, 0.0, %v583_v11  ;;  %v6272_v31 = vmax.f32 %v6144_v29, %v552_v26  ;;  %v777_v29 = vrot.slane %v6198_v60, 1  ;;  %v997_v59 = vpack.c.bf16 %v6198_v60, %v6203_v63 }
  0xc0   : > { %v6228_v9 = vmax.f32 %v527_v30, %v550_v5  ;;  %5299 = vmatprep.mubr.msk.bf16.mxu0 %vm609_vm2, %v6214_v3  ;;  %v592_v10 = vsel %vm503_vm1, 0.0, %v582_v4  ;;  %5324 = vmatpush3.bf16.msra.mxu1 %v920_v1  ;;  %v786_v27 = vsel %vm504_vm3, 0.0, %v776_v20  ;;  %v790_v30 = vpack.c.bf16 %v784_v24, %v783_v25 }
  0xc1   : > { %v6235_v12 = vpack.c.bf16 %v592_v10, %v591_v8  ;;  %5658 = vmatprep.subr.msk.bf16.mxu1 %vm622_vm0, %v1112_v2  ;;  %7449 = vst [vmem:[#allocation24_spill] sm:$0xff] %v6272_v31  ;;  %v791_v36 = vpack.c.bf16 %v786_v27, %v785_v34  ;;  %v900_v45 = vpack.c.bf16 %v593_v18, %v592_v10  ;;  %v889_v48 = vrot.slane %v6272_v31, 7 }
  0xc2   : > { %7448 = vst [vmem:[#allocation23_spill] sm:$0xff] %v6228_v9  ;;  %v6240_v13 = vpack.c.bf16 %v6228_v9, %v6198_v60  ;;  %v584_v14 = vrot.slane %v6228_v9, 7  ;;  %v778_v38 = vrot.slane %v6228_v9, 1  ;;  %v787_v50 = vsel %vm504_vm3, 0.0, %v777_v29 }
  0xc3   : > { %5309 = vmatprep.mubr.msk.bf16.mxu1 %vm609_vm2, %v6235_v12  ;;  %v897_v52 = vsel %vm503_vm1, 0.0, %v889_v48  ;;  %v1105_v62 = vpack.c.bf16 %v785_v34, %v784_v24  ;;  %v1298_v1 = vsel %vm622_vm0, %v1293_v43, 0  ;;  %v1106_v2 = vpack.c.bf16 %v787_v50, %v786_v27 }
  0xc4   : > { %5300 = vmatmul.mubr.msk.bf16.gmra.mxu0 %vm609_vm2, %v6240_v13  ;;  %v594_v19 = vsel %vm503_vm1, 0.0, %v584_v14  ;;  %v788_v49 = vsel %vm504_vm3, 0.0, %v778_v38  ;;  %v1095_v4 = vrot.slane %v6272_v31, 1  ;;  %v998_v5 = vpack.c.bf16 %v6272_v31, %v6228_v9 }
  0xc5   : > { %5315 = vmatprep.mubr.msk.bf16.mxu0 %vm609_vm2, %v789_v17  ;;  %v6256_v21 = vpack.c.bf16 %v594_v19, %v593_v18  ;;  %v792_v51 = vpack.c.bf16 %v788_v49, %v787_v50  ;;  %v901_v55 = vpack.c.bf16 %v897_v52, %v594_v19  ;;  %v1383_v10 = vsel %vm622_vm0, %v1378_v61, 0 }
  0xc6   : > { %v1103_v7 = vsel %vm504_vm3, 0.0, %v1095_v4 }
  0xc7   : > { %5310 = vmatmul.mubr.msk.bf16.gmra.mxu1 %vm609_vm2, %v6256_v21  ;;  %v1107_v8 = vpack.c.bf16 %v1103_v7, %v788_v49 }
  0xc8   : > { %5325 = vmatprep.mubr.msk.bf16.mxu1 %vm609_vm2, %v898_v22 }
  0xcc   : > { %5316 = vmatmul.mubr.msk.bf16.vlgmr.msra.gmra.mxu0 %vm609_vm2, %v790_v30 }
  0xcd   : > { %5334 = vmatpush3.bf16.msra.mxu0 %v1013_v32  ;;  %5319 = vmatprep.mubr.msk.bf16.mxu0 %vm609_vm2, %v791_v36 }
  0xce   : > { %5659 = vmatprep.subr.msk.bf16.mxu0 %vm622_vm0, %v1208_v40 }
  0xcf   : > { %5326 = vmatmul.mubr.msk.bf16.vlgmr.msra.gmra.mxu1 %vm609_vm2, %v899_v41 }
  0xd0   : > { %5329 = vmatprep.mubr.msk.bf16.mxu1 %vm609_vm2, %v900_v45  ;;  %5344 = vmatpush3.bf16.msra.mxu1 %v1126_v42 }
  0xd1   : > { %5660 = vmatprep.subr.msk.bf16.mxu1 %vm622_vm0, %v1293_v43 }
  0xd4   : > { %5320 = vmatmul.mubr.msk.bf16.gmra.mxu0 %vm609_vm2, %v792_v51 }
  0xd5   : > { %5335 = vmatprep.mubr.msk.bf16.mxu0 %vm609_vm2, %v995_v53 }
  0xd7   : > { %5330 = vmatmul.mubr.msk.bf16.gmra.mxu1 %vm609_vm2, %v901_v55 }
  0xd8   : > { %5345 = vmatprep.mubr.msk.bf16.mxu1 %vm609_vm2, %v1104_v56 }
  0xdc   : > { %5336 = vmatmul.mubr.msk.bf16.vlgmr.msra.gmra.mxu0 %vm609_vm2, %v996_v57 }
  0xdd   : > { %5354 = vmatpush3.bf16.msra.mxu0 %v1213_v58  ;;  %5339 = vmatprep.mubr.msk.bf16.mxu0 %vm609_vm2, %v997_v59 }
  0xde   : > { %5661 = vmatprep.subr.msk.bf16.mxu0 %vm622_vm0, %v1378_v61 }
  0xdf   : > { %5346 = vmatmul.mubr.msk.bf16.vlgmr.msra.gmra.mxu1 %vm609_vm2, %v1105_v62 }
  0xe0   : > { %5349 = vmatprep.mubr.msk.bf16.mxu1 %vm609_vm2, %v1106_v2  ;;  %5364 = vmatpush3.bf16.msra.mxu1 %v1298_v1 }
  0xe4   : > { %5340 = vmatmul.mubr.msk.bf16.gmra.mxu0 %vm609_vm2, %v998_v5 }
  0xe5   : > { %5355 = vmatprep.mubr.msk.bf16.mxu0 %vm609_vm2, %v6208_v0  ;;  %v1207_v0 = vpack.c.bf16 %v6166_v44, %v897_v52 }
  0xe7   : > { %5350 = vmatmul.mubr.msk.bf16.gmra.mxu1 %vm609_vm2, %v1107_v8 }
  0xe8   : > { %5365 = vmatprep.mubr.msk.bf16.mxu1 %vm609_vm2, %v6188_v54  ;;  %v1288_v54 = vpack.c.bf16 %v7401_v35, %v6272_v31 }
  0xec   : > { %5356 = vmatmul.mubr.msk.bf16.vlgmr.msra.gmra.mxu0 %vm609_vm2, %v6235_v12 }
  0xed   : > { %5374 = vmatpush3.bf16.msra.mxu0 %v1383_v10  ;;  %5359 = vmatprep.mubr.msk.bf16.mxu0 %vm609_vm2, %v6256_v21 }
  0xef   : > { %5366 = vmatmul.mubr.msk.bf16.vlgmr.msra.gmra.mxu1 %vm609_vm2, %v6214_v3  ;;  %v1377_v3 = vpack.c.bf16 %v6222_v6, %v1103_v7 }
  0xf0   : > { %5369 = vmatprep.mubr.msk.bf16.mxu1 %vm609_vm2, %v6240_v13 }
  0xf4   : > { %5360 = vmatmul.mubr.msk.bf16.gmra.mxu0 %vm609_vm2, %v1207_v0 }
  0xf5   : > { %5375 = vmatprep.mubr.msk.bf16.mxu0 %vm609_vm2, %v790_v30 }
  0xf7   : > { %5370 = vmatmul.mubr.msk.bf16.gmra.mxu1 %vm609_vm2, %v1288_v54 }
  0xfc   : > { %5376 = vmatmul.mubr.msk.bf16.vlgmr.msra.gmra.mxu0 %vm609_vm2, %v791_v36 }
  0xfd   : > { %5379 = vmatprep.mubr.msk.bf16.mxu0 %vm609_vm2, %v792_v51 }
 0x104   : > { %5380 = vmatmul.mubr.msk.bf16.gmra.mxu0 %vm609_vm2, %v1377_v3 }
 0x17c   : > { %v5297_v11 = vpop.f32.mrf.mxu0 }
 0x17e   : > { %v660_v12 = vpop.f32.mrf.mxu0 }
 0x17f   : > { %v5307_v13 = vpop.f32.mrf.mxu1 }
 0x180   : > { %v5298_v14 = vpop.f32.mrf.mxu0  ;;  %v749_v0 = vadd.f32 %v5307_v13, %v5297_v11 }
 0x181   : > { %v740_v15 = vpop.f32.mrf.mxu1 }
 0x182   : > { %v663_v16 = vpop.f32.mrf.mxu0  ;;  %v741_v7 = vadd.f32 %v740_v15, %v660_v12 }
 0x183   : > { %v5308_v17 = vpop.f32.mrf.mxu1 }
 0x184   : > { %v5301_v18 = vpop.f32.mrf.mxu0  ;;  %v752_v31 = vadd.f32 %v5308_v17, %v5298_v14 }
 0x185   : > { %v743_v19 = vpop.f32.mrf.mxu1 }
 0x186   : > { %v676_v20 = vpop.f32.mrf.mxu0  ;;  %v744_v9 = vadd.f32 %v743_v19, %v663_v16 }
 0x187   : > { %v5311_v21 = vpop.f32.mrf.mxu1 }
 0x188   : > { %v6347_v22 = vpop.f32.mrf.mxu0 }
 0x189   : > { %v756_v23 = vpop.f32.mrf.mxu1 }
 0x18a   : > { %v679_v24 = vpop.f32.mrf.mxu0  ;;  %v757_v44 = vadd.f32 %v756_v23, %v676_v20 }
 0x18b   : > { %v5312_v25 = vpop.f32.mrf.mxu1 }
 0x18c   : > { %v5317_v26 = vpop.f32.mrf.mxu0  ;;  %v768_v16 = vadd.f32 %v5312_v25, %v6347_v22 }
 0x18d   : > { %v759_v27 = vpop.f32.mrf.mxu1  ;;  %v876_v60 = vadd.f32 %v5317_v26, %v749_v0 }
 0x18e   : > { %v843_v28 = vpop.f32.mrf.mxu0  ;;  %v760_v17 = vadd.f32 %v759_v27, %v679_v24 }
 0x18f   : > { %v5327_v30 = vpop.f32.mrf.mxu1  ;;  %v874_v54 = vadd.f32 %v843_v28, %v741_v7 }
 0x190   : > { %v5318_v32 = vpop.f32.mrf.mxu0  ;;  %v989_v12 = vadd.f32 %v5327_v30, %v876_v60 }
 0x191   : > { %v956_v34 = vpop.f32.mrf.mxu1  ;;  %v877_v37 = vadd.f32 %v5318_v32, %v752_v31 }
 0x192   : > { %v846_v36 = vpop.f32.mrf.mxu0  ;;  %v987_v47 = vadd.f32 %v956_v34, %v874_v54 }
 0x193   : > { %v5328_v38 = vpop.f32.mrf.mxu1  ;;  %v875_v39 = vadd.f32 %v846_v36, %v744_v9 }
 0x194   : > { %v5321_v40 = vpop.f32.mrf.mxu0  ;;  %v990_v28 = vadd.f32 %v5328_v38, %v877_v37 }
 0x195   : > { %v959_v41 = vpop.f32.mrf.mxu1 }
 0x196   : > { %v859_v29 = vpop.f32.mrf.mxu0  ;;  %v988_v7 = vadd.f32 %v959_v41, %v875_v39 }
 0x197   : > { %v5331_v42 = vpop.f32.mrf.mxu1  ;;  %v878_v11 = vadd.f32 %v859_v29, %v757_v44 }
 0x198   : > { %v5322_v43 = vpop.f32.mrf.mxu0 }
 0x199   : > { %v972_v45 = vpop.f32.mrf.mxu1  ;;  %v881_v20 = vadd.f32 %v5322_v43, %v768_v16 }
 0x19a   : > { %v862_v48 = vpop.f32.mrf.mxu0  ;;  %v991_v23 = vadd.f32 %v972_v45, %v878_v11 }
 0x19b   : > { %v6349_v49 = vpop.f32.mrf.mxu1  ;;  %v879_v60 = vadd.f32 %v862_v48, %v760_v17 }
 0x19c   : > { %v5337_v50 = vpop.f32.mrf.mxu0  ;;  %v994_v22 = vadd.f32 %v6349_v49, %v881_v20 }
 0x19d   : > { %v6351_v51 = vpop.f32.mrf.mxu1 }
 0x19e   : > { %v1049_v52 = vpop.f32.mrf.mxu0  ;;  %v992_v24 = vadd.f32 %v6351_v51, %v879_v60 }
 0x19f   : > { %v5347_v53 = vpop.f32.mrf.mxu1  ;;  %v1080_v15 = vadd.f32 %v1049_v52, %v987_v47 }
 0x1a0   : > { %v5338_v55 = vpop.f32.mrf.mxu0 }
 0x1a1   : > { %v1162_v56 = vpop.f32.mrf.mxu1  ;;  %v1083_v26 = vadd.f32 %v5338_v55, %v990_v28 }
 0x1a2   : > { %v1052_v57 = vpop.f32.mrf.mxu0  ;;  %v1193_v9 = vadd.f32 %v1162_v56, %v1080_v15 }
 0x1a3   : > { %v5348_v58 = vpop.f32.mrf.mxu1  ;;  %v1081_v32 = vadd.f32 %v1052_v57, %v988_v7 }
 0x1a4   : > { %v5341_v59 = vpop.f32.mrf.mxu0  ;;  %v1196_v34 = vadd.f32 %v5348_v58, %v1083_v26 }
 0x1a5   : > { %v1165_v61 = vpop.f32.mrf.mxu1 }
 0x1a6   : > { %v1065_v62 = vpop.f32.mrf.mxu0  ;;  %v1194_v36 = vadd.f32 %v1165_v61, %v1081_v32 }
 0x1a7   : > { %v6353_v1 = vpop.f32.mrf.mxu1  ;;  %v1084_v37 = vadd.f32 %v1065_v62, %v991_v23 }
 0x1a8   : > { %7450 = vst [vmem:[#allocation25_spill] sm:$0xff] %v6353_v1  ;;  %v5342_v2 = vpop.f32.mrf.mxu0  ;;  %v765_v1 = vadd.f32 %v5311_v21, %v5301_v18 }
 0x1a9   : > { %v1178_v4 = vpop.f32.mrf.mxu1  ;;  %v1087_v45 = vadd.f32 %v5342_v2, %v994_v22 }
 0x1aa   : > { %v1068_v5 = vpop.f32.mrf.mxu0  ;;  %v880_v19 = vadd.f32 %v5321_v40, %v765_v1  ;;  %v1197_v48 = vadd.f32 %v1178_v4, %v1084_v37 }
 0x1ab   : > { %v6355_v8 = vpop.f32.mrf.mxu1 }
 0x1ac   : > { %7451 = vst [vmem:[#allocation26_spill] sm:$0xff] %v6355_v8  ;;  %v5357_v10 = vpop.f32.mrf.mxu0  ;;  %v993_v21 = vadd.f32 %v5331_v42, %v880_v19 }
 0x1ad   : > { %v6357_v3 = vpop.f32.mrf.mxu1 }
 0x1ae   : > { %7452 = vst [vmem:[#allocation27_spill] sm:$0xff] %v6357_v3  ;;  %v1249_v35 = vpop.f32.mrf.mxu0  ;;  %v1082_v3 = vadd.f32 %v5337_v50, %v989_v12  ;;  %v1086_v25 = vadd.f32 %v5341_v59, %v993_v21 }
 0x1af   : > { %v5367_v63 = vpop.f32.mrf.mxu1  ;;  %v1280_v18 = vadd.f32 %v1249_v35, %v1193_v9  ;;  %v1085_v35 = vadd.f32 %v1068_v5, %v992_v24 }
 0x1b0   : > { %v5358_v46 = vpop.f32.mrf.mxu0  ;;  %v1195_v30 = vadd.f32 %v5347_v53, %v1082_v3  ;;  %v7453_v53 = vld [vmem:[#allocation25_spill] sm:$0xff] }
 0x1b1   : > { %v1334_v6 = vpop.f32.mrf.mxu1  ;;  %v1283_v40 = vadd.f32 %v5358_v46, %v1196_v34  ;;  %v1199_v55 = vadd.f32 %v7453_v53, %v1086_v25 }
 0x1b2   : > { %v1252_v33 = vpop.f32.mrf.mxu0  ;;  %v1282_v38 = vadd.f32 %v5357_v10, %v1195_v30  ;;  %v1365_v41 = vadd.f32 %v1334_v6, %v1280_v18 }
 0x1b3   : > { %v5368_v8 = vpop.f32.mrf.mxu1  ;;  %v1281_v29 = vadd.f32 %v1252_v33, %v1194_v36  ;;  %v7454_v46 = vld [vmem:[#allocation26_spill] sm:$0xff] }
 0x1b4   : > { %v5361_v13 = vpop.f32.mrf.mxu0  ;;  %v1367_v42 = vadd.f32 %v5367_v63, %v1282_v38  ;;  %v1368_v49 = vadd.f32 %v5368_v8, %v1283_v40  ;;  %v1200_v6 = vadd.f32 %v7454_v46, %v1087_v45  ;;  %v1633_v46 = vld [vmem:[%s7381_s5] sm:$0x3] }
 0x1b5   : > { %v1337_v14 = vpop.f32.mrf.mxu1  ;;  %v7455_v33 = vld [vmem:[#allocation27_spill] sm:$0xff]  ;;  %v1286_v62 = vadd.f32 %v5361_v13, %v1199_v55  ;;  %5663 = vmatprep.subr.msk.bf16.mxu0 %vm622_vm0, %v1633_v46 }
 0x1b6   : > { %v1265_v31 = vpop.f32.mrf.mxu0  ;;  %v1366_v58 = vadd.f32 %v1337_v14, %v1281_v29  ;;  %v1198_v61 = vadd.f32 %v7455_v33, %v1085_v35 }
 0x1b7   : > { %v5371_v44 = vpop.f32.mrf.mxu1  ;;  %v1284_v56 = vadd.f32 %v1265_v31, %v1197_v48 }
 0x1b8   : > { %v5362_v47 = vpop.f32.mrf.mxu0  ;;  %v1371_v13 = vadd.f32 %v5371_v44, %v1286_v62  ;;  %v6434_v62 = vld [vmem:[%s7381_s5 + $0x4] sm:$0x3] }
 0x1b9   : > { %v1350_v43 = vpop.f32.mrf.mxu1  ;;  %v1287_v5 = vadd.f32 %v5362_v47, %v1200_v6  ;;  %v1736_v6 = vsel %vm622_vm0, %v1633_v46, 0 }
 0x1ba   : > { %v1268_v39 = vpop.f32.mrf.mxu0  ;;  %v1369_v10 = vadd.f32 %v1350_v43, %v1284_v56  ;;  %5394 = vmatpush3.bf16.msra.mxu0 %v1736_v6 }
 0x1bb   : > { %v5372_v51 = vpop.f32.mrf.mxu1  ;;  %v1285_v8 = vadd.f32 %v1268_v39, %v1198_v61 }
 0x1bc   : > { %v5377_v27 = vpop.f32.mrf.mxu0  ;;  %v1372_v26 = vadd.f32 %v5372_v51, %v1287_v5  ;;  %v5752_v51 = vld [vmem:[%s7381_s5] ss:$0 sps:$4 sm:$0xcc]  }
 0x1bd   : > { %v6365_v59 = vadd.f32 %v5377_v27, %v1367_v42  ;;  %v1353_v3 = vpop.f32.mrf.mxu1  ;;  %v1642_v33 = vrot.slane %v5752_v51, 2 }
 0x1be   : > { %v1419_v50 = vpop.f32.mrf.mxu0  ;;  %v1370_v9 = vadd.f32 %v1353_v3, %v1285_v8 }
 0x1bf   : > { %v6362_v52 = vadd.f32 %v1419_v50, %v1365_v41  ;;  %v1485_v54 = vmul.f32 %v6365_v59, %v6365_v59  ;;  %v1461_v28 = vsel %vm609_vm2, %v6365_v59, 0.0  ;;  %5662 = vmatprep.subr.msk.bf16.mxu1 %vm622_vm0, %v1642_v33  ;;  %v1656_v61 = vsel %vm622_vm0, %v1642_v33, 0 }
 0x1c0   : > { %v5378_v57 = vpop.f32.mrf.mxu0  ;;  %5384 = vmatpush3.bf16.msra.mxu1 %v1656_v61 }
 0x1c1   : > { %v1483_v63 = vmul.f32 %v6362_v52, %v6362_v52  ;;  %v6371_v2 = vadd.f32 %v5378_v57, %v1368_v49  ;;  %v1458_v12 = vsel %vm609_vm2, %v6362_v52, 0.0  ;;  %v1494_v60 = vsel %vm609_vm2, %v1485_v54, 0.0  ;;  %5664 = vmatprep.subr.msk.bf16.mxu1 %vm622_vm0, %v6434_v62 }
 0x1c2   : > { %v1422_v1 = vpop.f32.mrf.mxu0 }
 0x1c3   : > { %v6373_v4 = vadd.f32 %v1422_v1, %v1366_v58  ;;  %v1491_v16 = vsel %vm609_vm2, %v1483_v63, 0.0  ;;  %v1486_v17 = vmul.f32 %v6371_v2, %v6371_v2  ;;  %v1463_v47 = vsel %vm609_vm2, %v6371_v2, 0.0  ;;  %v6441_v1 = vld [vmem:[%s7381_s5 + $0x4] ss:$0 sps:$4 sm:$0xcc]  }
 0x1c4   : > { %v5381_v0 = vpop.f32.mrf.mxu0  ;;  %v1936_v63 = vrot.slane %v6441_v1, 2 }
 0x1c5   : > { %v1459_v15 = vsel %vm609_vm2, %v6373_v4, 0.0  ;;  %v1484_v11 = vmul.f32 %v6373_v4, %v6373_v4  ;;  %v6394_v30 = vadd.f32 %v5381_v0, %v1371_v13  ;;  %v1496_v39 = vsel %vm609_vm2, %v1486_v17, 0.0 }
 0x1c6   : > { %v1460_v7 = vadd.f32 %v1459_v15, %v1458_v12  ;;  %v1435_v14 = vpop.f32.mrf.mxu0  ;;  %5665 = vmatprep.subr.msk.bf16.mxu0 %vm622_vm0, %v1936_v63 }
 0x1c7   : > { %v1492_v19 = vsel %vm609_vm2, %v1484_v11, 0.0  ;;  %v6389_v31 = vadd.f32 %v1435_v14, %v1369_v10  ;;  %v1489_v25 = vmul.f32 %v6394_v30, %v6394_v30  ;;  %v1469_v45 = vsel %vm609_vm2, %v6394_v30, 0.0 }
 0x1c8   : > { %v1462_v32 = vadd.f32 %v1461_v28, %v1460_v7  ;;  %v1493_v20 = vadd.f32 %v1492_v19, %v1491_v16  ;;  %v5382_v23 = vpop.f32.mrf.mxu0 }
 0x1c9   : > { %v1487_v18 = vmul.f32 %v6389_v31, %v6389_v31  ;;  %v1465_v34 = vsel %vm609_vm2, %v6389_v31, 0.0  ;;  %v6401_v36 = vadd.f32 %v5382_v23, %v1372_v26  ;;  %v1502_v55 = vsel %vm609_vm2, %v1489_v25, 0.0 }
 0x1ca   : > { %v1495_v44 = vadd.f32 %v1494_v60, %v1493_v20  ;;  %v1464_v21 = vadd.f32 %v1463_v47, %v1462_v32  ;;  %v1438_v37 = vpop.f32.mrf.mxu0 }
 0x1cb   : > { %v6403_v38 = vadd.f32 %v1438_v37, %v1370_v9  ;;  %v1498_v27 = vsel %vm609_vm2, %v1487_v18, 0.0  ;;  %v1490_v48 = vmul.f32 %v6401_v36, %v6401_v36  ;;  %v1471_v53 = vsel %vm609_vm2, %v6401_v36, 0.0 }
 0x1cc   : > { %v1466_v22 = vadd.f32 %v1465_v34, %v1464_v21  ;;  %v1497_v24 = vadd.f32 %v1496_v39, %v1495_v44  ;;  %v4983_v44 = vld [vmem:[%s7379_s3] ss:$0 sm:$0xff] }
 0x1cd   : > { %v1467_v40 = vsel %vm609_vm2, %v6403_v38, 0.0  ;;  %v1488_v41 = vmul.f32 %v6403_v38, %v6403_v38  ;;  %v1504_v49 = vsel %vm609_vm2, %v1490_v48, 0.0 }
 0x1ce   : > { %v1468_v29 = vadd.f32 %v1467_v40, %v1466_v22  ;;  %v1499_v43 = vadd.f32 %v1498_v27, %v1497_v24 }
 0x1cf   : > { %v1500_v35 = vsel %vm609_vm2, %v1488_v41, 0.0 }
 0x1d0   : > { %v1470_v50 = vadd.f32 %v1469_v45, %v1468_v29  ;;  %v1501_v42 = vadd.f32 %v1500_v35, %v1499_v43 }
 0x1d2   : > { %v1472_v56 = vadd.f32 %v1471_v53, %v1470_v50  ;;  %v1503_v57 = vadd.f32 %v1502_v55, %v1501_v42 }
 0x1d4   : > { %1473 = vadd.xlane.f32.xlu0 %v1472_v56  ;;  %v1505_v58 = vadd.f32 %v1504_v49, %v1503_v57 }
 0x1d6   : > { %1506 = vadd.xlane.f32.xlu1 %v1505_v58 }
 0x25d   : > { %v1474_v5 = vpop.xlane.xlu0 %1473 }
 0x25e   : > { %v1475_v10 = vrot.slane %v1474_v5, 4 }
 0x25f   : > { %v1507_v8 = vpop.xlane.xlu1 %1506 }
 0x260   : > { %v1476_v0 = vadd.f32 %v1475_v10, %v1474_v5  ;;  %v1508_v54 = vrot.slane %v1507_v8, 4 }
 0x262   : > { %v1477_v3 = vrot.slane %v1476_v0, 2  ;;  %v1509_v12 = vadd.f32 %v1508_v54, %v1507_v8 }
 0x264   : > { %v1478_v15 = vadd.f32 %v1477_v3, %v1476_v0  ;;  %v1510_v11 = vrot.slane %v1509_v12, 2  ;;  %v1837_v3 = vsel %vm622_vm0, %v6434_v62, 0 }
 0x266   : > { %v1479_v13 = vrot.slane %v1478_v15, 1  ;;  %v1511_v28 = vadd.f32 %v1510_v11, %v1509_v12  ;;  %v1950_v12 = vsel %vm622_vm0, %v1936_v63, 0 }
 0x268   : > { %v1480_v7 = vadd.f32 %v1479_v13, %v1478_v15  ;;  %v1512_v14 = vrot.slane %v1511_v28, 1 }
 0x26a   : > { %v1482_v16 = vmul.f32 0.00390625, %v1480_v7  ;;  %v1513_v17 = vadd.f32 %v1512_v14, %v1511_v28 }
 0x26c   : > { %v1514_v19 = vmul.f32 0.00390625, %v1513_v17  ;;  %v1515_v26 = vmul.f32 %v1482_v16, %v1482_v16  ;;  %v1517_v20 = vsub.f32 %v6362_v52, %v1482_v16  ;;  %v1518_v23 = vsub.f32 %v6373_v4, %v1482_v16 }
 0x26d   : > { %v1519_v60 = vsub.f32 %v6365_v59, %v1482_v16  ;;  %v1520_v47 = vsub.f32 %v6371_v2, %v1482_v16  ;;  %v1521_v21 = vsub.f32 %v6389_v31, %v1482_v16  ;;  %v1522_v37 = vsub.f32 %v6403_v38, %v1482_v16  ;;  %v4984_v59 = vld [vmem:[%s7380_s4] ss:$0 sm:$0xff] }
 0x26e   : > { %v1516_v9 = vsub.f32 %v1514_v19, %v1515_v26  ;;  %v1523_v39 = vsub.f32 %v6394_v30, %v1482_v16  ;;  %v1524_v56 = vsub.f32 %v6401_v36, %v1482_v16 }
 0x270   : > { %v1525_v32 = vadd.f32 1e-05, %v1516_v9 }
 0x272   : > { %5760 = vrsqrt.f32 %v1525_v32 }
 0x27f   : > { %v5761_v18 = vpop.eup %5760 }
 0x280   : > { %v1527_v34 = vmul.f32 %v5761_v18, %v1517_v20  ;;  %v1528_v22 = vmul.f32 %v5761_v18, %v1518_v23  ;;  %v1529_v52 = vmul.f32 %v5761_v18, %v1519_v60  ;;  %v1530_v24 = vmul.f32 %v5761_v18, %v1520_v47 }
 0x281   : > { %v1531_v2 = vmul.f32 %v5761_v18, %v1521_v21  ;;  %v1532_v4 = vmul.f32 %v5761_v18, %v1522_v37  ;;  %v1533_v25 = vmul.f32 %v5761_v18, %v1523_v39  ;;  %v1534_v46 = vmul.f32 %v5761_v18, %v1524_v56 }
 0x282   : > { %v1543_v27 = vmul.f32 %v4983_v44, %v1527_v34  ;;  %v1544_v40 = vmul.f32 %v4983_v44, %v1528_v22  ;;  %v1545_v41 = vmul.f32 %v4983_v44, %v1529_v52  ;;  %v1546_v29 = vmul.f32 %v4983_v44, %v1530_v24  ;;  %v6485_v22 = vld [vmem:[%s7381_s5 + $0x8] ss:$0 sps:$4 sm:$0xcc]  }
 0x283   : > { %v1547_v31 = vmul.f32 %v4983_v44, %v1531_v2  ;;  %v1548_v43 = vmul.f32 %v4983_v44, %v1532_v4  ;;  %v1549_v38 = vmul.f32 %v4983_v44, %v1533_v25  ;;  %v1550_v61 = vmul.f32 %v4983_v44, %v1534_v46  ;;  %v7458_v25 = vld [vmem:[#allocation17_spill] sm:$0xff] }
 0x284   : > { %v1557_v45 = vadd.f32 %v4984_v59, %v1543_v27  ;;  %v1558_v30 = vadd.f32 %v4984_v59, %v1544_v40  ;;  %v1559_v48 = vadd.f32 %v4984_v59, %v1545_v41  ;;  %v1560_v35 = vadd.f32 %v4984_v59, %v1546_v29 }
 0x285   : > { %v1561_v50 = vadd.f32 %v4984_v59, %v1547_v31  ;;  %v1562_v42 = vadd.f32 %v4984_v59, %v1548_v43  ;;  %v1563_v55 = vadd.f32 %v4984_v59, %v1549_v38  ;;  %v6461_v5 = vadd.f32 %v4984_v59, %v1550_v61  ;;  %v2029_v31 = vld [vmem:[%s7381_s5 + $0x8] sm:$0x3] }
 0x286   : > { %v1573_v53 = vmul.f32 0.70710677, %v1557_v45  ;;  %v1574_v57 = vmul.f32 0.70710677, %v1558_v30  ;;  %v1575_v49 = vmul.f32 0.70710677, %v1559_v48 }
 0x287   : > { %v1576_v58 = vmul.f32 0.70710677, %v1560_v35  ;;  %v1577_v51 = vmul.f32 0.70710677, %v1561_v50  ;;  %v1578_v6 = vmul.f32 0.70710677, %v1562_v42 }
 0x288   : > { %5762 = verf.f32 %v1573_v53  ;;  %v1579_v33 = vmul.f32 0.70710677, %v1563_v55  ;;  %v1580_v10 = vmul.f32 0.70710677, %v6461_v5  ;;  %v1565_v0 = vmul.f32 0.5, %v1557_v45 }
 0x289   : > { %5764 = verf.f32 %v1574_v57  ;;  %v1566_v11 = vmul.f32 0.5, %v1558_v30  ;;  %v1567_v13 = vmul.f32 0.5, %v1559_v48  ;;  %v1568_v7 = vmul.f32 0.5, %v1560_v35 }
 0x28a   : > { %5766 = verf.f32 %v1575_v49  ;;  %v1569_v19 = vmul.f32 0.5, %v1561_v50  ;;  %v1570_v62 = vmul.f32 0.5, %v1562_v42  ;;  %v1571_v20 = vmul.f32 0.5, %v1563_v55 }
 0x28b   : > { %5768 = verf.f32 %v1576_v58  ;;  %v7456_v23 = vmov 0.0   ;;  %v2142_v42 = vrot.slane %v6485_v22, 2 }
 0x28c   : > { %5770 = verf.f32 %v1577_v51 }
 0x28d   : > { %5772 = verf.f32 %v1578_v6 }
 0x28e   : > { %5774 = verf.f32 %v1579_v33  ;;  %v7459_v33 = vld [vmem:[#allocation22_spill] sm:$0xff] }
 0x28f   : > { %5776 = verf.f32 %v1580_v10 }
 0x295   : > { %v5763_v36 = vpop.eup %5762 }
 0x296   : > { %v5765_v8 = vpop.eup %5764  ;;  %v1589_v54 = vadd.f32 1.0, %v5763_v36 }
 0x297   : > { %v5767_v15 = vpop.eup %5766  ;;  %v1590_v28 = vadd.f32 1.0, %v5765_v8 }
 0x298   : > { %v5769_v14 = vpop.eup %5768  ;;  %v6469_v16 = vmul.f32 %v1589_v54, %v1565_v0  ;;  %v1591_v17 = vadd.f32 1.0, %v5767_v15 }
 0x299   : > { %v5771_v26 = vpop.eup %5770  ;;  %v6471_v9 = vmul.f32 %v1590_v28, %v1566_v11  ;;  %v1592_v32 = vadd.f32 1.0, %v5769_v14  ;;  %v5755_v14 = vld [vmem:[%s7381_s5 + $0xc] ss:$0 sps:$4 sm:$0xcc]  }
 0x29a   : > { %v5773_v1 = vpop.eup %5772  ;;  %v1634_v63 = vpack.c.bf16 %v6469_v16, %v7456_v23  ;;  %v6475_v60 = vmul.f32 %v1591_v17, %v1567_v13  ;;  %v1593_v47 = vadd.f32 1.0, %v5771_v26  ;;  %v1614_v18 = vrot.slane %v6469_v16, 7 }
 0x29b   : > { %v5775_v44 = vpop.eup %5774  ;;  %v6478_v21 = vmul.f32 %v1592_v32, %v1568_v7  ;;  %v1615_v37 = vrot.slane %v6471_v9, 7  ;;  %v1594_v39 = vadd.f32 1.0, %v5773_v1  ;;  %v1804_v34 = vrot.slane %v6469_v16, 1  ;;  %v2238_v1 = vld [vmem:[%s7381_s5 + $0xc] sm:$0x3] }
 0x29c   : > { %5385 = vmatprep.mubr.msk.bf16.mxu1 %vm609_vm2, %v1634_v63  ;;  %v6490_v52 = vpack.c.bf16 %v6475_v60, %v6471_v9  ;;  %v6492_v24 = vmul.f32 %v1593_v47, %v1569_v19  ;;  %v1622_v2 = vsel %vm503_vm1, 0.0, %v1614_v18  ;;  %v1616_v4 = vrot.slane %v6475_v60, 7  ;;  %v5777_v6 = vpop.eup %5776 }
 0x29d   : > { %v1629_v27 = vpack.c.bf16 %v1622_v2, %v7458_v25  ;;  %v1623_v40 = vsel %vm503_vm1, 0.0, %v1615_v37  ;;  %v1617_v41 = vrot.slane %v6478_v21, 7  ;;  %v1595_v29 = vadd.f32 1.0, %v5775_v44 }
 0x29e   : > { %5386 = vmatmul.mubr.msk.bf16.vlgmr.msra.gmra.mxu1 %vm609_vm2, %v6490_v52  ;;  %v6508_v43 = vpack.c.bf16 %v6492_v24, %v6478_v21  ;;  %v1624_v38 = vsel %vm503_vm1, 0.0, %v1616_v4  ;;  %v1618_v45 = vrot.slane %v6492_v24, 7  ;;  %v6513_v30 = vmul.f32 %v1594_v39, %v1570_v62 }
 0x29f   : > { %5404 = vmatpush3.bf16.msra.mxu1 %v1837_v3  ;;  %5395 = vmatprep.mubr.msk.bf16.mxu0 %vm609_vm2, %v1629_v27  ;;  %v6516_v48 = vpack.c.bf16 %v1624_v38, %v1623_v40  ;;  %v1625_v35 = vsel %vm503_vm1, 0.0, %v1617_v41  ;;  %v6520_v50 = vmul.f32 %v1595_v29, %v1571_v20  ;;  %v1812_v49 = vsel %vm504_vm3, 0.0, %v1804_v34 }
 0x2a0   : > { %5389 = vmatprep.mubr.msk.bf16.mxu1 %vm609_vm2, %v6508_v43  ;;  %v1626_v53 = vsel %vm503_vm1, 0.0, %v1618_v45  ;;  %v1619_v55 = vrot.slane %v6513_v30, 7  ;;  %5666 = vmatprep.subr.msk.bf16.mxu1 %vm622_vm0, %v2029_v31  ;;  %v1819_v61 = vpack.c.bf16 %v1812_v49, %v7459_v33  ;;  %v1805_v10 = vrot.slane %v6471_v9, 1 }
 0x2a1   : > { %5396 = vmatmul.mubr.msk.bf16.vlgmr.msra.gmra.mxu0 %vm609_vm2, %v6516_v48  ;;  %v6531_v56 = vpack.c.bf16 %v1626_v53, %v1625_v35  ;;  %v1620_v57 = vrot.slane %v6520_v50, 7  ;;  %v6541_v58 = vpack.c.bf16 %v6520_v50, %v6513_v30  ;;  %v1806_v36 = vrot.slane %v6475_v60, 1 }
 0x2a2   : > { %5414 = vmatpush3.bf16.msra.mxu0 %v1950_v12  ;;  %v1627_v51 = vsel %vm503_vm1, 0.0, %v1619_v55  ;;  %v1807_v8 = vrot.slane %v6478_v21, 1  ;;  %v1808_v0 = vrot.slane %v6492_v24, 1  ;;  %v1928_v3 = vpack.c.bf16 %v1623_v40, %v1622_v2 }
 0x2a3   : > { %5399 = vmatprep.mubr.msk.bf16.mxu0 %vm609_vm2, %v6531_v56  ;;  %5667 = vmatprep.subr.msk.bf16.mxu0 %vm622_vm0, %v2142_v42  ;;  %v1628_v46 = vsel %vm503_vm1, 0.0, %v1620_v57  ;;  %v1596_v12 = vadd.f32 1.0, %v5777_v6  ;;  %v1813_v15 = vsel %vm504_vm3, 0.0, %v1805_v10  ;;  %v1814_v11 = vsel %vm504_vm3, 0.0, %v1806_v36 }
 0x2a4   : > { %v6555_v54 = vpack.c.bf16 %v1628_v46, %v1627_v51  ;;  %v1815_v13 = vsel %vm504_vm3, 0.0, %v1807_v8  ;;  %v1816_v28 = vsel %vm504_vm3, 0.0, %v1808_v0  ;;  %v1572_v7 = vmul.f32 0.5, %v6461_v5 }
 0x2a5   : > { %v1820_v17 = vpack.c.bf16 %v1814_v11, %v1813_v15  ;;  %v2043_v19 = vsel %vm622_vm0, %v2029_v31, 0  ;;  %v1821_v32 = vpack.c.bf16 %v1816_v28, %v1815_v13  ;;  %v1809_v62 = vrot.slane %v6513_v30, 1 }
 0x2a6   : > { %5390 = vmatmul.mubr.msk.bf16.gmra.mxu1 %vm609_vm2, %v6541_v58  ;;  %v1604_v26 = vmul.f32 %v1596_v12, %v1572_v7  ;;  %v1810_v20 = vrot.slane %v6520_v50, 1  ;;  %v1929_v5 = vpack.c.bf16 %v1625_v35, %v1624_v38  ;;  %v2156_v63 = vsel %vm622_vm0, %v2142_v42, 0 }
 0x2a7   : > { %5405 = vmatprep.mubr.msk.bf16.mxu1 %vm609_vm2, %v1819_v61  ;;  %v2323_v47 = vrot.slane %v5755_v14, 2  ;;  %v1930_v18 = vpack.c.bf16 %v1627_v51, %v1626_v53  ;;  %v1817_v37 = vsel %vm504_vm3, 0.0, %v1809_v62  ;;  %v2025_v2 = vpack.c.bf16 %v6471_v9, %v6469_v16  ;;  %v2408_v16 = vld [vmem:[%s7381_s5 + $0x10] sm:$0x3] }
 0x2a8   : > { %v1919_v44 = vrot.slane %v1604_v26, 7  ;;  %v1818_v39 = vsel %vm504_vm3, 0.0, %v1810_v20  ;;  %v2134_v27 = vpack.c.bf16 %v1813_v15, %v1812_v49  ;;  %v2026_v40 = vpack.c.bf16 %v6478_v21, %v6475_v60 }
 0x2a9   : > { %5400 = vmatmul.mubr.msk.bf16.gmra.mxu0 %vm609_vm2, %v6555_v54  ;;  %v1822_v34 = vpack.c.bf16 %v1818_v39, %v1817_v37  ;;  %v2243_v41 = vsel %vm622_vm0, %v2238_v1, 0  ;;  %v2027_v29 = vpack.c.bf16 %v6513_v30, %v6492_v24  ;;  %v2135_v9 = vpack.c.bf16 %v1815_v13, %v1814_v11 }
 0x2aa   : > { %5415 = vmatprep.mubr.msk.bf16.mxu0 %vm609_vm2, %v1928_v3  ;;  %v1927_v22 = vsel %vm503_vm1, 0.0, %v1919_v44  ;;  %v2328_v31 = vsel %vm622_vm0, %v2323_v47, 0  ;;  %v2136_v38 = vpack.c.bf16 %v1817_v37, %v1816_v28  ;;  %v2125_v45 = vrot.slane %v1604_v26, 1 }
 0x2ab   : > { %v1931_v4 = vpack.c.bf16 %v1927_v22, %v1628_v46  ;;  %v2028_v60 = vpack.c.bf16 %v1604_v26, %v6520_v50  ;;  %v2413_v30 = vsel %vm622_vm0, %v2408_v16, 0 }
 0x2ac   : > { %v2133_v21 = vsel %vm504_vm3, 0.0, %v2125_v45 }
 0x2ad   : > { %v2137_v24 = vpack.c.bf16 %v2133_v21, %v1818_v39  ;;  %v2407_v35 = vpack.c.bf16 %v7459_v33, %v2133_v21 }
 0x2ae   : > { %5406 = vmatmul.mubr.msk.bf16.vlgmr.msra.gmra.mxu1 %vm609_vm2, %v1820_v17 }
 0x2af   : > { %5424 = vmatpush3.bf16.msra.mxu1 %v2043_v19  ;;  %5409 = vmatprep.mubr.msk.bf16.mxu1 %vm609_vm2, %v1821_v32 }
 0x2b0   : > { %5668 = vmatprep.subr.msk.bf16.mxu1 %vm622_vm0, %v2238_v1 }
 0x2b1   : > { %5416 = vmatmul.mubr.msk.bf16.vlgmr.msra.gmra.mxu0 %vm609_vm2, %v1929_v5 }
 0x2b2   : > { %5419 = vmatprep.mubr.msk.bf16.mxu0 %vm609_vm2, %v1930_v18  ;;  %5434 = vmatpush3.bf16.msra.mxu0 %v2156_v63 }
 0x2b3   : > { %5669 = vmatprep.subr.msk.bf16.mxu0 %vm622_vm0, %v2323_v47 }
 0x2b6   : > { %5410 = vmatmul.mubr.msk.bf16.gmra.mxu1 %vm609_vm2, %v1822_v34 }
 0x2b7   : > { %5425 = vmatprep.mubr.msk.bf16.mxu1 %vm609_vm2, %v2025_v2 }
 0x2b9   : > { %5420 = vmatmul.mubr.msk.bf16.gmra.mxu0 %vm609_vm2, %v1931_v4 }
 0x2ba   : > { %5435 = vmatprep.mubr.msk.bf16.mxu0 %vm609_vm2, %v2134_v27 }
 0x2be   : > { %5426 = vmatmul.mubr.msk.bf16.vlgmr.msra.gmra.mxu1 %vm609_vm2, %v2026_v40 }
 0x2bf   : > { %5444 = vmatpush3.bf16.msra.mxu1 %v2243_v41  ;;  %5429 = vmatprep.mubr.msk.bf16.mxu1 %vm609_vm2, %v2027_v29 }
 0x2c0   : > { %5670 = vmatprep.subr.msk.bf16.mxu1 %vm622_vm0, %v2408_v16 }
 0x2c1   : > { %5436 = vmatmul.mubr.msk.bf16.vlgmr.msra.gmra.mxu0 %vm609_vm2, %v2135_v9 }
 0x2c2   : > { %5439 = vmatprep.mubr.msk.bf16.mxu0 %vm609_vm2, %v2136_v38  ;;  %5454 = vmatpush3.bf16.msra.mxu0 %v2328_v31 }
 0x2c6   : > { %5430 = vmatmul.mubr.msk.bf16.gmra.mxu1 %vm609_vm2, %v2028_v60 }
 0x2c7   : > { %5445 = vmatprep.mubr.msk.bf16.mxu1 %vm609_vm2, %v6516_v48  ;;  %v2237_v48 = vpack.c.bf16 %v7458_v25, %v1927_v22 }
 0x2c9   : > { %5440 = vmatmul.mubr.msk.bf16.gmra.mxu0 %vm609_vm2, %v2137_v24 }
 0x2ca   : > { %5455 = vmatprep.mubr.msk.bf16.mxu0 %vm609_vm2, %v6490_v52  ;;  %v2318_v52 = vpack.c.bf16 %v7456_v23, %v1604_v26 }
 0x2ce   : > { %5446 = vmatmul.mubr.msk.bf16.vlgmr.msra.gmra.mxu1 %vm609_vm2, %v6531_v56 }
 0x2cf   : > { %5464 = vmatpush3.bf16.msra.mxu1 %v2413_v30  ;;  %5449 = vmatprep.mubr.msk.bf16.mxu1 %vm609_vm2, %v6555_v54 }
 0x2d1   : > { %5456 = vmatmul.mubr.msk.bf16.vlgmr.msra.gmra.mxu0 %vm609_vm2, %v6508_v43 }
 0x2d2   : > { %5459 = vmatprep.mubr.msk.bf16.mxu0 %vm609_vm2, %v6541_v58 }
 0x2d6   : > { %5450 = vmatmul.mubr.msk.bf16.gmra.mxu1 %vm609_vm2, %v2237_v48 }
 0x2d7   : > { %5465 = vmatprep.mubr.msk.bf16.mxu1 %vm609_vm2, %v1820_v17 }
 0x2d9   : > { %5460 = vmatmul.mubr.msk.bf16.gmra.mxu0 %vm609_vm2, %v2318_v52 }
 0x2de   : > { %5466 = vmatmul.mubr.msk.bf16.vlgmr.msra.gmra.mxu1 %vm609_vm2, %v1821_v32 }
 0x2df   : > { %5469 = vmatprep.mubr.msk.bf16.mxu1 %vm609_vm2, %v1822_v34 }
 0x2e6   : > { %5470 = vmatmul.mubr.msk.bf16.gmra.mxu1 %vm609_vm2, %v2407_v35 }
 0x35e   : > { %v5387_v43 = vpop.f32.mrf.mxu1 }
 0x360   : > { %v1692_v50 = vpop.f32.mrf.mxu1 }
 0x361   : > { %v5397_v42 = vpop.f32.mrf.mxu0 }
 0x362   : > { %v5388_v53 = vpop.f32.mrf.mxu1  ;;  %v1781_v9 = vadd.f32 %v5397_v42, %v5387_v43 }
 0x363   : > { %v1772_v55 = vpop.f32.mrf.mxu0 }
 0x364   : > { %v1695_v56 = vpop.f32.mrf.mxu1  ;;  %v1773_v41 = vadd.f32 %v1772_v55, %v1692_v50 }
 0x365   : > { %v5398_v57 = vpop.f32.mrf.mxu0 }
 0x366   : > { %v5391_v49 = vpop.f32.mrf.mxu1  ;;  %v1784_v60 = vadd.f32 %v5398_v57, %v5388_v53 }
 0x367   : > { %v1775_v58 = vpop.f32.mrf.mxu0 }
 0x368   : > { %v1708_v51 = vpop.f32.mrf.mxu1  ;;  %v1776_v21 = vadd.f32 %v1775_v58, %v1695_v56 }
 0x369   : > { %v5401_v46 = vpop.f32.mrf.mxu0 }
 0x36a   : > { %v6638_v6 = vpop.f32.mrf.mxu1 }
 0x36b   : > { %v1788_v61 = vpop.f32.mrf.mxu0 }
 0x36c   : > { %v1711_v10 = vpop.f32.mrf.mxu1  ;;  %v1789_v59 = vadd.f32 %v1788_v61, %v1708_v51 }
 0x36d   : > { %v6640_v36 = vpop.f32.mrf.mxu0 }
 0x36e   : > { %v5407_v8 = vpop.f32.mrf.mxu1  ;;  %v1800_v51 = vadd.f32 %v6640_v36, %v6638_v6 }
 0x36f   : > { %v1791_v0 = vpop.f32.mrf.mxu0  ;;  %v1906_v24 = vadd.f32 %v5407_v8, %v1781_v9 }
 0x370   : > { %v1873_v54 = vpop.f32.mrf.mxu1  ;;  %v1792_v53 = vadd.f32 %v1791_v0, %v1711_v10 }
 0x371   : > { %v5417_v3 = vpop.f32.mrf.mxu0  ;;  %v1904_v31 = vadd.f32 %v1873_v54, %v1773_v41 }
 0x372   : > { %v5408_v12 = vpop.f32.mrf.mxu1  ;;  %v2019_v50 = vadd.f32 %v5417_v3, %v1906_v24 }
 0x373   : > { %v1986_v15 = vpop.f32.mrf.mxu0  ;;  %v1907_v52 = vadd.f32 %v5408_v12, %v1784_v60 }
 0x374   : > { %v1876_v11 = vpop.f32.mrf.mxu1  ;;  %v2017_v35 = vadd.f32 %v1986_v15, %v1904_v31 }
 0x375   : > { %v5418_v13 = vpop.f32.mrf.mxu0  ;;  %v1905_v33 = vadd.f32 %v1876_v11, %v1776_v21 }
 0x376   : > { %v5411_v28 = vpop.f32.mrf.mxu1  ;;  %v2020_v54 = vadd.f32 %v5418_v13, %v1907_v52 }
 0x377   : > { %v1989_v7 = vpop.f32.mrf.mxu0 }
 0x378   : > { %v1889_v14 = vpop.f32.mrf.mxu1  ;;  %v2018_v41 = vadd.f32 %v1989_v7, %v1905_v33 }
 0x379   : > { %v5421_v17 = vpop.f32.mrf.mxu0  ;;  %v1908_v43 = vadd.f32 %v1889_v14, %v1789_v59 }
 0x37a   : > { %v5412_v19 = vpop.f32.mrf.mxu1 }
 0x37b   : > { %v2002_v26 = vpop.f32.mrf.mxu0 }
 0x37c   : > { %v1892_v32 = vpop.f32.mrf.mxu1  ;;  %v2021_v61 = vadd.f32 %v2002_v26, %v1908_v43 }
 0x37d   : > { %v6642_v62 = vpop.f32.mrf.mxu0  ;;  %v1909_v3 = vadd.f32 %v1892_v32, %v1792_v53 }
 0x37e   : > { %v5427_v20 = vpop.f32.mrf.mxu1 }
 0x37f   : > { %v2005_v1 = vpop.f32.mrf.mxu0 }
 0x380   : > { %v2079_v5 = vpop.f32.mrf.mxu1  ;;  %v2022_v14 = vadd.f32 %v2005_v1, %v1909_v3 }
 0x381   : > { %v5437_v63 = vpop.f32.mrf.mxu0  ;;  %v2110_v55 = vadd.f32 %v2079_v5, %v2017_v35 }
 0x382   : > { %v5428_v47 = vpop.f32.mrf.mxu1 }
 0x383   : > { %v2192_v18 = vpop.f32.mrf.mxu0  ;;  %v2113_v8 = vadd.f32 %v5428_v47, %v2020_v54 }
 0x384   : > { %v2082_v44 = vpop.f32.mrf.mxu1  ;;  %v2223_v12 = vadd.f32 %v2192_v18, %v2110_v55 }
 0x385   : > { %v5438_v37 = vpop.f32.mrf.mxu0  ;;  %v2111_v15 = vadd.f32 %v2082_v44, %v2018_v41 }
 0x386   : > { %v5431_v39 = vpop.f32.mrf.mxu1  ;;  %v2226_v10 = vadd.f32 %v5438_v37, %v2113_v8 }
 0x387   : > { %v2195_v34 = vpop.f32.mrf.mxu0 }
 0x388   : > { %v2095_v22 = vpop.f32.mrf.mxu1  ;;  %v2224_v0 = vadd.f32 %v2195_v34, %v2111_v15 }
 0x389   : > { %v6644_v2 = vpop.f32.mrf.mxu0  ;;  %v2114_v13 = vadd.f32 %v2095_v22, %v2021_v61 }
 0x38a   : > { %v6646_v4 = vpop.f32.mrf.mxu1 }
 0x38b   : > { %7460 = vst [vmem:[#allocation25_spill] sm:$0xff] %v6646_v4  ;;  %v2208_v27 = vpop.f32.mrf.mxu0  ;;  %v1797_v4 = vadd.f32 %v5401_v46, %v5391_v49  ;;  %v1911_v46 = vadd.f32 %v5412_v19, %v1800_v51 }
 0x38c   : > { %v2098_v40 = vpop.f32.mrf.mxu1  ;;  %v2227_v36 = vadd.f32 %v2208_v27, %v2114_v13 }
 0x38d   : > { %v6648_v29 = vpop.f32.mrf.mxu0  ;;  %v1910_v56 = vadd.f32 %v5411_v28, %v1797_v4  ;;  %v2024_v6 = vadd.f32 %v6642_v62, %v1911_v46  ;;  %v2115_v26 = vadd.f32 %v2098_v40, %v2022_v14 }
 0x38e   : > { %7461 = vst [vmem:[#allocation26_spill] sm:$0xff] %v6648_v29  ;;  %v5447_v16 = vpop.f32.mrf.mxu1 }
 0x38f   : > { %v6650_v38 = vpop.f32.mrf.mxu0  ;;  %v2023_v59 = vadd.f32 %v5421_v17, %v1910_v56 }
 0x390   : > { %7462 = vst [vmem:[#allocation27_spill] sm:$0xff] %v6650_v38  ;;  %v2279_v45 = vpop.f32.mrf.mxu1  ;;  %v2112_v38 = vadd.f32 %v5427_v20, %v2019_v50 }
 0x391   : > { %v5457_v30 = vpop.f32.mrf.mxu0  ;;  %v2310_v49 = vadd.f32 %v2279_v45, %v2223_v12  ;;  %v2116_v20 = vadd.f32 %v5431_v39, %v2023_v59 }
 0x392   : > { %v5448_v48 = vpop.f32.mrf.mxu1  ;;  %v2225_v5 = vadd.f32 %v5437_v63, %v2112_v38  ;;  %v7463_v37 = vld [vmem:[#allocation25_spill] sm:$0xff] }
 0x393   : > { %v2364_v25 = vpop.f32.mrf.mxu0  ;;  %v2313_v18 = vadd.f32 %v5448_v48, %v2226_v10  ;;  %v2229_v22 = vadd.f32 %v6644_v2, %v2116_v20  ;;  %v2117_v34 = vadd.f32 %v7463_v37, %v2024_v6 }
 0x394   : > { %v2282_v23 = vpop.f32.mrf.mxu1  ;;  %v2312_v28 = vadd.f32 %v5447_v16, %v2225_v5  ;;  %v2395_v44 = vadd.f32 %v2364_v25, %v2310_v49 }
 0x395   : > { %v5458_v29 = vpop.f32.mrf.mxu0  ;;  %v2311_v4 = vadd.f32 %v2282_v23, %v2224_v0  ;;  %v7465_v2 = vld [vmem:[#allocation26_spill] sm:$0xff] }
 0x396   : > { %v5451_v42 = vpop.f32.mrf.mxu1  ;;  %v2397_v17 = vadd.f32 %v5457_v30, %v2312_v28  ;;  %v2398_v39 = vadd.f32 %v5458_v29, %v2313_v18  ;;  %v2230_v21 = vadd.f32 %v7465_v2, %v2117_v34  ;;  %v6735_v2 = vld [vmem:[%s7384_s8 + $0x4] ss:$0 sps:$4 sm:$0xcc]  }
 0x397   : > { %v2367_v57 = vpop.f32.mrf.mxu0  ;;  %v7464_v23 = vld [vmem:[#allocation27_spill] sm:$0xff]  ;;  %v2316_v62 = vadd.f32 %v5451_v42, %v2229_v22 }
 0x398   : > { %v2295_v58 = vpop.f32.mrf.mxu1  ;;  %v2396_v9 = vadd.f32 %v2367_v57, %v2311_v4  ;;  %v2228_v25 = vadd.f32 %v7464_v23, %v2115_v26  ;;  %v5756_v23 = vld [vmem:[%s7384_s8] ss:$0 sps:$4 sm:$0xcc]  }
 0x399   : > { %v5461_v33 = vpop.f32.mrf.mxu0  ;;  %v2314_v16 = vadd.f32 %v2295_v58, %v2227_v36 }
 0x39a   : > { %v5452_v11 = vpop.f32.mrf.mxu1  ;;  %v2401_v55 = vadd.f32 %v5461_v33, %v2316_v62 }
 0x39b   : > { %v2380_v32 = vpop.f32.mrf.mxu0  ;;  %v2317_v43 = vadd.f32 %v5452_v11, %v2230_v21  ;;  %v2973_v21 = vrot.slane %v6735_v2, 2 }
 0x39c   : > { %v2298_v7 = vpop.f32.mrf.mxu1  ;;  %v2399_v24 = vadd.f32 %v2380_v32, %v2314_v16 }
 0x39d   : > { %v5462_v27 = vpop.f32.mrf.mxu0  ;;  %v2315_v30 = vadd.f32 %v2298_v7, %v2228_v25  ;;  %v2670_v25 = vld [vmem:[%s7384_s8] sm:$0x3] }
 0x39e   : > { %v5467_v47 = vpop.f32.mrf.mxu1  ;;  %v2402_v33 = vadd.f32 %v5462_v27, %v2317_v43  ;;  %5672 = vmatprep.subr.msk.bf16.mxu1 %vm622_vm0, %v2670_v25  ;;  %v2773_v62 = vsel %vm622_vm0, %v2670_v25, 0  ;;  %v2679_v27 = vrot.slane %v5756_v23, 2  ;;  %v7468_v25 = vld [vmem:[#allocation15_spill] sm:$0xff] }
 0x39f   : > { %v6659_v31 = vadd.f32 %v5467_v47, %v2397_v17  ;;  %v2383_v54 = vpop.f32.mrf.mxu0  ;;  %5484 = vmatpush3.bf16.msra.mxu1 %v2773_v62 }
 0x3a0   : > { %v2449_v63 = vpop.f32.mrf.mxu1  ;;  %v2400_v11 = vadd.f32 %v2383_v54, %v2315_v30  ;;  %5671 = vmatprep.subr.msk.bf16.mxu0 %vm622_vm0, %v2679_v27  ;;  %5674 = vmatprep.subr.msk.bf16.mxu1 %vm622_vm0, %v2973_v21 }
 0x3a1   : > { %v6655_v19 = vadd.f32 %v2449_v63, %v2395_v44  ;;  %v2514_v48 = vmul.f32 %v6659_v31, %v6659_v31  ;;  %v2491_v42 = vsel %vm609_vm2, %v6659_v31, 0.0 }
 0x3a2   : > { %v5468_v1 = vpop.f32.mrf.mxu1 }
 0x3a3   : > { %v2512_v38 = vmul.f32 %v6655_v19, %v6655_v19  ;;  %v6664_v45 = vadd.f32 %v5468_v1, %v2398_v39  ;;  %v2488_v52 = vsel %vm609_vm2, %v6655_v19, 0.0  ;;  %v2523_v3 = vsel %vm609_vm2, %v2514_v48, 0.0 }
 0x3a4   : > { %v2452_v40 = vpop.f32.mrf.mxu1 }
 0x3a5   : > { %v6666_v60 = vadd.f32 %v2452_v40, %v2396_v9  ;;  %v2520_v56 = vsel %vm609_vm2, %v2512_v38, 0.0  ;;  %v2515_v57 = vmul.f32 %v6664_v45, %v6664_v45  ;;  %v2493_v5 = vsel %vm609_vm2, %v6664_v45, 0.0  ;;  %v6728_v38 = vld [vmem:[%s7384_s8 + $0x4] sm:$0x3] }
 0x3a6   : > { %v5471_v29 = vpop.f32.mrf.mxu1  ;;  %v2693_v40 = vsel %vm622_vm0, %v2679_v27, 0  ;;  %v7469_v27 = vld [vmem:[#allocation18_spill] sm:$0xff] }
 0x3a7   : > { %v2489_v35 = vsel %vm609_vm2, %v6666_v60, 0.0  ;;  %v2513_v50 = vmul.f32 %v6666_v60, %v6666_v60  ;;  %v6685_v51 = vadd.f32 %v5471_v29, %v2401_v55  ;;  %v2525_v7 = vsel %vm609_vm2, %v2515_v57, 0.0  ;;  %5474 = vmatpush3.bf16.msra.mxu0 %v2693_v40 }
 0x3a8   : > { %v2490_v41 = vadd.f32 %v2489_v35, %v2488_v52  ;;  %v2465_v53 = vpop.f32.mrf.mxu1  ;;  %5673 = vmatprep.subr.msk.bf16.mxu0 %vm622_vm0, %v6728_v38 }
 0x3a9   : > { %v2521_v58 = vsel %vm609_vm2, %v2513_v50, 0.0  ;;  %v6683_v8 = vadd.f32 %v2465_v53, %v2399_v24  ;;  %v2518_v28 = vmul.f32 %v6685_v51, %v6685_v51  ;;  %v2499_v26 = vsel %vm609_vm2, %v6685_v51, 0.0 }
 0x3aa   : > { %v2492_v12 = vadd.f32 %v2491_v42, %v2490_v41  ;;  %v2522_v15 = vadd.f32 %v2521_v58, %v2520_v56  ;;  %v5472_v61 = vpop.f32.mrf.mxu1 }
 0x3ab   : > { %v2516_v49 = vmul.f32 %v6683_v8, %v6683_v8  ;;  %v2495_v10 = vsel %vm609_vm2, %v6683_v8, 0.0  ;;  %v6700_v18 = vadd.f32 %v5472_v61, %v2402_v33  ;;  %v2531_v34 = vsel %vm609_vm2, %v2518_v28, 0.0 }
 0x3ac   : > { %v2524_v59 = vadd.f32 %v2523_v3, %v2522_v15  ;;  %v2494_v46 = vadd.f32 %v2493_v5, %v2492_v12  ;;  %v2468_v13 = vpop.f32.mrf.mxu1 }
 0x3ad   : > { %v6695_v0 = vadd.f32 %v2468_v13, %v2400_v11  ;;  %v2527_v47 = vsel %vm609_vm2, %v2516_v49, 0.0  ;;  %v2501_v22 = vsel %vm609_vm2, %v6700_v18, 0.0  ;;  %v2519_v37 = vmul.f32 %v6700_v18, %v6700_v18 }
 0x3ae   : > { %v2496_v14 = vadd.f32 %v2495_v10, %v2494_v46  ;;  %v2526_v20 = vadd.f32 %v2525_v7, %v2524_v59  ;;  %v5025_v46 = vld [vmem:[%s7382_s6] ss:$0 sm:$0xff] }
 0x3af   : > { %v2497_v44 = vsel %vm609_vm2, %v6695_v0, 0.0  ;;  %v2517_v4 = vmul.f32 %v6695_v0, %v6695_v0  ;;  %v2533_v39 = vsel %vm609_vm2, %v2519_v37, 0.0 }
 0x3b0   : > { %v2498_v6 = vadd.f32 %v2497_v44, %v2496_v14  ;;  %v2528_v36 = vadd.f32 %v2527_v47, %v2526_v20 }
 0x3b1   : > { %v2529_v32 = vsel %vm609_vm2, %v2517_v4, 0.0 }
 0x3b2   : > { %v2500_v63 = vadd.f32 %v2499_v26, %v2498_v6  ;;  %v2530_v17 = vadd.f32 %v2529_v32, %v2528_v36 }
 0x3b4   : > { %v2502_v16 = vadd.f32 %v2501_v22, %v2500_v63  ;;  %v2532_v1 = vadd.f32 %v2531_v34, %v2530_v17 }
 0x3b6   : > { %2503 = vadd.xlane.f32.xlu0 %v2502_v16  ;;  %v2534_v9 = vadd.f32 %v2533_v39, %v2532_v1  ;;  %v7466_v1 = vld [vmem:[#allocation16_spill] sm:$0xff] }
 0x3ba   : > { %2535 = vadd.xlane.f32.xlu0 %v2534_v9  ;;  %v7467_v9 = vld [vmem:[#allocation19_spill] sm:$0xff] }
 0x43f   : > { %v2504_v24 = vpop.xlane.xlu0 %2503 }
 0x440   : > { %v2505_v30 = vrot.slane %v2504_v24, 4 }
 0x442   : > { %v2506_v29 = vadd.f32 %v2505_v30, %v2504_v24  ;;  %v7470_v24 = vld [vmem:[#allocation21_spill] sm:$0xff] }
 0x443   : > { %v2536_v48 = vpop.xlane.xlu0 %2535 }
 0x444   : > { %v2507_v52 = vrot.slane %v2506_v29, 2  ;;  %v2537_v35 = vrot.slane %v2536_v48, 4 }
 0x446   : > { %v2508_v50 = vadd.f32 %v2507_v52, %v2506_v29  ;;  %v2538_v55 = vadd.f32 %v2537_v35, %v2536_v48  ;;  %v7471_v29 = vld [vmem:[#allocation20_spill] sm:$0xff]  ;;  %v7472_v52 = vld [vmem:[#allocation23_spill] sm:$0xff] }
 0x448   : > { %v2509_v43 = vrot.slane %v2508_v50, 1  ;;  %v2539_v42 = vrot.slane %v2538_v55, 2 }
 0x44a   : > { %v2510_v54 = vadd.f32 %v2509_v43, %v2508_v50  ;;  %v2540_v41 = vadd.f32 %v2539_v42, %v2538_v55 }
 0x44c   : > { %v2511_v53 = vmul.f32 0.00390625, %v2510_v54  ;;  %v2541_v56 = vrot.slane %v2540_v41, 1 }
 0x44e   : > { %v2542_v57 = vadd.f32 %v2541_v56, %v2540_v41  ;;  %v2544_v58 = vmul.f32 %v2511_v53, %v2511_v53  ;;  %v2546_v3 = vsub.f32 %v6655_v19, %v2511_v53  ;;  %v2547_v11 = vsub.f32 %v6666_v60, %v2511_v53 }
 0x44f   : > { %v2548_v5 = vsub.f32 %v6659_v31, %v2511_v53  ;;  %v2549_v49 = vsub.f32 %v6664_v45, %v2511_v53  ;;  %v2550_v13 = vsub.f32 %v6683_v8, %v2511_v53  ;;  %v2551_v33 = vsub.f32 %v6695_v0, %v2511_v53  ;;  %v5026_v31 = vld [vmem:[%s7383_s7] ss:$0 sm:$0xff] }
 0x450   : > { %v2543_v12 = vmul.f32 0.00390625, %v2542_v57  ;;  %v2552_v7 = vsub.f32 %v6685_v51, %v2511_v53  ;;  %v2553_v51 = vsub.f32 %v6700_v18, %v2511_v53  ;;  %v7473_v57 = vld [vmem:[#allocation24_spill] sm:$0xff] }
 0x452   : > { %v2545_v15 = vsub.f32 %v2543_v12, %v2544_v58 }
 0x454   : > { %v2554_v61 = vadd.f32 1e-05, %v2545_v15 }
 0x456   : > { %5778 = vrsqrt.f32 %v2554_v61 }
 0x463   : > { %v5779_v59 = vpop.eup %5778 }
 0x464   : > { %v2556_v10 = vmul.f32 %v5779_v59, %v2546_v3  ;;  %v2557_v28 = vmul.f32 %v5779_v59, %v2547_v11  ;;  %v2558_v19 = vmul.f32 %v5779_v59, %v2548_v5  ;;  %v2559_v14 = vmul.f32 %v5779_v59, %v2549_v49 }
 0x465   : > { %v2560_v45 = vmul.f32 %v5779_v59, %v2550_v13  ;;  %v2561_v60 = vmul.f32 %v5779_v59, %v2551_v33  ;;  %v2562_v20 = vmul.f32 %v5779_v59, %v2552_v7  ;;  %v2563_v16 = vmul.f32 %v5779_v59, %v2553_v51 }
 0x466   : > { %v2572_v47 = vmul.f32 %v5025_v46, %v2556_v10  ;;  %v2573_v44 = vmul.f32 %v5025_v46, %v2557_v28  ;;  %v2574_v4 = vmul.f32 %v5025_v46, %v2558_v19  ;;  %v2575_v6 = vmul.f32 %v5025_v46, %v2559_v14 }
 0x467   : > { %v2576_v8 = vmul.f32 %v5025_v46, %v2560_v45  ;;  %v2577_v36 = vmul.f32 %v5025_v46, %v2561_v60  ;;  %v2578_v0 = vmul.f32 %v5025_v46, %v2562_v20  ;;  %v2579_v54 = vmul.f32 %v5025_v46, %v2563_v16  ;;  %v7476_v16 = vld [vmem:[#allocation17_spill] sm:$0xff] }
 0x468   : > { %v2586_v26 = vadd.f32 %v5026_v31, %v2572_v47  ;;  %v2587_v32 = vadd.f32 %v5026_v31, %v2573_v44  ;;  %v2588_v63 = vadd.f32 %v5026_v31, %v2574_v4  ;;  %v2589_v17 = vadd.f32 %v5026_v31, %v2575_v6 }
 0x469   : > { %v2590_v22 = vadd.f32 %v5026_v31, %v2576_v8  ;;  %v2591_v37 = vadd.f32 %v5026_v31, %v2577_v36  ;;  %v2592_v34 = vadd.f32 %v5026_v31, %v2578_v0  ;;  %v2593_v56 = vadd.f32 %v5026_v31, %v2579_v54 }
 0x46a   : > { %v2594_v39 = vadd.f32 %v2586_v26, %v7466_v1  ;;  %v2595_v23 = vadd.f32 %v2587_v32, %v7467_v9  ;;  %v2596_v62 = vadd.f32 %v2588_v63, %v7468_v25  ;;  %v2597_v40 = vadd.f32 %v2589_v17, %v7469_v27  ;;  %v6787_v32 = vld [vmem:[%s7384_s8 + $0x8] ss:$0 sps:$4 sm:$0xcc]  }
 0x46b   : > { %v2598_v30 = vadd.f32 %v2590_v22, %v7470_v24  ;;  %v2599_v18 = vadd.f32 %v2591_v37, %v7471_v29  ;;  %v2600_v35 = vadd.f32 %v2592_v34, %v7472_v52  ;;  %v6763_v58 = vadd.f32 %v2593_v56, %v7473_v57  ;;  %v3066_v25 = vld [vmem:[%s7384_s8 + $0x8] sm:$0x3]  ;;  %v7477_v56 = vld [vmem:[#allocation22_spill] sm:$0xff] }
 0x46c   : > { %v2610_v48 = vmul.f32 0.70710677, %v2594_v39  ;;  %v2611_v50 = vmul.f32 0.70710677, %v2595_v23  ;;  %v2612_v55 = vmul.f32 0.70710677, %v2596_v62 }
 0x46d   : > { %v2613_v43 = vmul.f32 0.70710677, %v2597_v40  ;;  %v2614_v42 = vmul.f32 0.70710677, %v2598_v30  ;;  %v2615_v41 = vmul.f32 0.70710677, %v2599_v18 }
 0x46e   : > { %5780 = verf.f32 %v2610_v48  ;;  %v2616_v53 = vmul.f32 0.70710677, %v2600_v35  ;;  %v2617_v12 = vmul.f32 0.70710677, %v6763_v58  ;;  %v2602_v3 = vmul.f32 0.5, %v2594_v39 }
 0x46f   : > { %5782 = verf.f32 %v2611_v50  ;;  %v2874_v5 = vsel %vm622_vm0, %v6728_v38, 0  ;;  %v2987_v49 = vsel %vm622_vm0, %v2973_v21, 0  ;;  %v2603_v46 = vmul.f32 0.5, %v2595_v23 }
 0x470   : > { %5784 = verf.f32 %v2612_v55  ;;  %v2604_v13 = vmul.f32 0.5, %v2596_v62  ;;  %v2605_v7 = vmul.f32 0.5, %v2597_v40  ;;  %v2606_v14 = vmul.f32 0.5, %v2598_v30 }
 0x471   : > { %5786 = verf.f32 %v2613_v43  ;;  %v2607_v38 = vmul.f32 0.5, %v2599_v18  ;;  %v2608_v20 = vmul.f32 0.5, %v2600_v35  ;;  %v7474_v47 = vmov 0.0  }
 0x472   : > { %5788 = verf.f32 %v2614_v42  ;;  %v3179_v48 = vrot.slane %v6787_v32, 2 }
 0x473   : > { %5790 = verf.f32 %v2615_v41 }
 0x474   : > { %5792 = verf.f32 %v2616_v53 }
 0x475   : > { %5794 = verf.f32 %v2617_v12 }
 0x47b   : > { %v5781_v15 = vpop.eup %5780 }
 0x47c   : > { %v5783_v61 = vpop.eup %5782  ;;  %v2626_v11 = vadd.f32 1.0, %v5781_v15 }
 0x47d   : > { %v5785_v59 = vpop.eup %5784  ;;  %v2627_v33 = vadd.f32 1.0, %v5783_v61 }
 0x47e   : > { %v5787_v10 = vpop.eup %5786  ;;  %v6771_v28 = vmul.f32 %v2626_v11, %v2602_v3  ;;  %v2628_v19 = vadd.f32 1.0, %v5785_v59 }
 0x47f   : > { %v5789_v31 = vpop.eup %5788  ;;  %v6773_v45 = vmul.f32 %v2627_v33, %v2603_v46  ;;  %v2629_v60 = vadd.f32 1.0, %v5787_v10  ;;  %v5759_v10 = vld [vmem:[%s7384_s8 + $0xc] ss:$0 sps:$4 sm:$0xcc]  }
 0x480   : > { %v5791_v2 = vpop.eup %5790  ;;  %v2671_v21 = vpack.c.bf16 %v6771_v28, %v7474_v47  ;;  %v6777_v44 = vmul.f32 %v2628_v19, %v2604_v13  ;;  %v2630_v4 = vadd.f32 1.0, %v5789_v31  ;;  %v2651_v6 = vrot.slane %v6771_v28, 7 }
 0x481   : > { %v5793_v8 = vpop.eup %5792  ;;  %v6780_v36 = vmul.f32 %v2629_v60, %v2605_v7  ;;  %v2652_v0 = vrot.slane %v6773_v45, 7  ;;  %v2631_v51 = vadd.f32 1.0, %v5791_v2  ;;  %v2841_v26 = vrot.slane %v6771_v28, 1  ;;  %v3275_v2 = vld [vmem:[%s7384_s8 + $0xc] sm:$0x3] }
 0x482   : > { %5475 = vmatprep.mubr.msk.bf16.mxu0 %vm609_vm2, %v2671_v21  ;;  %v6792_v63 = vpack.c.bf16 %v6777_v44, %v6773_v45  ;;  %v6794_v17 = vmul.f32 %v2630_v4, %v2606_v14  ;;  %v2659_v37 = vsel %vm503_vm1, 0.0, %v2651_v6  ;;  %v2653_v34 = vrot.slane %v6777_v44, 7  ;;  %v5795_v53 = vpop.eup %5794 }
 0x483   : > { %v2666_v1 = vpack.c.bf16 %v2659_v37, %v7476_v16  ;;  %v2660_v39 = vsel %vm503_vm1, 0.0, %v2652_v0  ;;  %v2654_v9 = vrot.slane %v6780_v36, 7  ;;  %v2632_v23 = vadd.f32 1.0, %v5793_v8 }
 0x484   : > { %5476 = vmatmul.mubr.msk.bf16.vlgmr.msra.gmra.mxu0 %vm609_vm2, %v6792_v63  ;;  %v6810_v62 = vpack.c.bf16 %v6794_v17, %v6780_v36  ;;  %v2661_v27 = vsel %vm503_vm1, 0.0, %v2653_v34  ;;  %v2655_v40 = vrot.slane %v6794_v17, 7  ;;  %v6815_v24 = vmul.f32 %v2631_v51, %v2607_v38 }
 0x485   : > { %5494 = vmatpush3.bf16.msra.mxu0 %v2874_v5  ;;  %5485 = vmatprep.mubr.msk.bf16.mxu1 %vm609_vm2, %v2666_v1  ;;  %v6818_v30 = vpack.c.bf16 %v2661_v27, %v2660_v39  ;;  %v2662_v29 = vsel %vm503_vm1, 0.0, %v2654_v9  ;;  %v6822_v18 = vmul.f32 %v2632_v23, %v2608_v20  ;;  %v2849_v43 = vsel %vm504_vm3, 0.0, %v2841_v26 }
 0x486   : > { %5479 = vmatprep.mubr.msk.bf16.mxu0 %vm609_vm2, %v6810_v62  ;;  %v2663_v52 = vsel %vm503_vm1, 0.0, %v2655_v40  ;;  %v2656_v35 = vrot.slane %v6815_v24, 7  ;;  %5675 = vmatprep.subr.msk.bf16.mxu0 %vm622_vm0, %v3066_v25  ;;  %v2856_v57 = vpack.c.bf16 %v2849_v43, %v7477_v56  ;;  %v2842_v12 = vrot.slane %v6773_v45, 1 }
 0x487   : > { %5486 = vmatmul.mubr.msk.bf16.vlgmr.msra.gmra.mxu1 %vm609_vm2, %v6818_v30  ;;  %v6833_v50 = vpack.c.bf16 %v2663_v52, %v2662_v29  ;;  %v2657_v55 = vrot.slane %v6822_v18, 7  ;;  %v6843_v42 = vpack.c.bf16 %v6822_v18, %v6815_v24  ;;  %v2843_v15 = vrot.slane %v6777_v44, 1 }
 0x488   : > { %5504 = vmatpush3.bf16.msra.mxu1 %v2987_v49  ;;  %v2664_v54 = vsel %vm503_vm1, 0.0, %v2656_v35  ;;  %v2844_v61 = vrot.slane %v6780_v36, 1  ;;  %v2845_v3 = vrot.slane %v6794_v17, 1  ;;  %v2965_v5 = vpack.c.bf16 %v2660_v39, %v2659_v37 }
 0x489   : > { %5489 = vmatprep.mubr.msk.bf16.mxu1 %vm609_vm2, %v6833_v50  ;;  %5676 = vmatprep.subr.msk.bf16.mxu1 %vm622_vm0, %v3179_v48  ;;  %v2665_v41 = vsel %vm503_vm1, 0.0, %v2657_v55  ;;  %v2633_v49 = vadd.f32 1.0, %v5795_v53  ;;  %v2850_v59 = vsel %vm504_vm3, 0.0, %v2842_v12  ;;  %v2851_v46 = vsel %vm504_vm3, 0.0, %v2843_v15 }
 0x48a   : > { %v6857_v11 = vpack.c.bf16 %v2665_v41, %v2664_v54  ;;  %v2852_v13 = vsel %vm504_vm3, 0.0, %v2844_v61  ;;  %v2853_v33 = vsel %vm504_vm3, 0.0, %v2845_v3  ;;  %v2609_v7 = vmul.f32 0.5, %v6763_v58 }
 0x48b   : > { %v2857_v19 = vpack.c.bf16 %v2851_v46, %v2850_v59  ;;  %v3080_v14 = vsel %vm622_vm0, %v3066_v25, 0  ;;  %v2858_v60 = vpack.c.bf16 %v2853_v33, %v2852_v13  ;;  %v2846_v38 = vrot.slane %v6815_v24, 1 }
 0x48c   : > { %5480 = vmatmul.mubr.msk.bf16.gmra.mxu0 %vm609_vm2, %v6843_v42  ;;  %v2641_v31 = vmul.f32 %v2633_v49, %v2609_v7  ;;  %v2847_v20 = vrot.slane %v6822_v18, 1  ;;  %v2966_v58 = vpack.c.bf16 %v2662_v29, %v2661_v27  ;;  %v3193_v21 = vsel %vm622_vm0, %v3179_v48, 0 }
 0x48d   : > { %5495 = vmatprep.mubr.msk.bf16.mxu0 %vm609_vm2, %v2856_v57  ;;  %v3360_v4 = vrot.slane %v5759_v10, 2  ;;  %v2967_v6 = vpack.c.bf16 %v2664_v54, %v2663_v52  ;;  %v2854_v0 = vsel %vm504_vm3, 0.0, %v2846_v38  ;;  %v3062_v37 = vpack.c.bf16 %v6773_v45, %v6771_v28  ;;  %v3445_v28 = vld [vmem:[%s7384_s8 + $0x10] sm:$0x3] }
 0x48e   : > { %v2956_v8 = vrot.slane %v2641_v31, 7  ;;  %v2855_v51 = vsel %vm504_vm3, 0.0, %v2847_v20  ;;  %v3171_v1 = vpack.c.bf16 %v2850_v59, %v2849_v43  ;;  %v3063_v39 = vpack.c.bf16 %v6780_v36, %v6777_v44 }
 0x48f   : > { %5490 = vmatmul.mubr.msk.bf16.gmra.mxu1 %vm609_vm2, %v6857_v11  ;;  %v2859_v26 = vpack.c.bf16 %v2855_v51, %v2854_v0  ;;  %v3280_v9 = vsel %vm622_vm0, %v3275_v2, 0  ;;  %v3064_v23 = vpack.c.bf16 %v6815_v24, %v6794_v17  ;;  %v3172_v45 = vpack.c.bf16 %v2852_v13, %v2851_v46 }
 0x490   : > { %5505 = vmatprep.mubr.msk.bf16.mxu1 %vm609_vm2, %v2965_v5  ;;  %v2964_v32 = vsel %vm503_vm1, 0.0, %v2956_v8  ;;  %v3365_v25 = vsel %vm622_vm0, %v3360_v4, 0  ;;  %v3173_v27 = vpack.c.bf16 %v2854_v0, %v2853_v33  ;;  %v3162_v40 = vrot.slane %v2641_v31, 1 }
 0x491   : > { %v2968_v34 = vpack.c.bf16 %v2964_v32, %v2665_v41  ;;  %v3065_v44 = vpack.c.bf16 %v2641_v31, %v6822_v18  ;;  %v3450_v24 = vsel %vm622_vm0, %v3445_v28, 0 }
 0x492   : > { %v3170_v36 = vsel %vm504_vm3, 0.0, %v3162_v40 }
 0x493   : > { %v3174_v17 = vpack.c.bf16 %v3170_v36, %v2855_v51  ;;  %v3444_v29 = vpack.c.bf16 %v7477_v56, %v3170_v36 }
 0x494   : > { %5496 = vmatmul.mubr.msk.bf16.vlgmr.msra.gmra.mxu0 %vm609_vm2, %v2857_v19 }
 0x495   : > { %5514 = vmatpush3.bf16.msra.mxu0 %v3080_v14  ;;  %5499 = vmatprep.mubr.msk.bf16.mxu0 %vm609_vm2, %v2858_v60 }
 0x496   : > { %5677 = vmatprep.subr.msk.bf16.mxu0 %vm622_vm0, %v3275_v2 }
 0x497   : > { %5506 = vmatmul.mubr.msk.bf16.vlgmr.msra.gmra.mxu1 %vm609_vm2, %v2966_v58 }
 0x498   : > { %5509 = vmatprep.mubr.msk.bf16.mxu1 %vm609_vm2, %v2967_v6  ;;  %5524 = vmatpush3.bf16.msra.mxu1 %v3193_v21 }
 0x499   : > { %5678 = vmatprep.subr.msk.bf16.mxu1 %vm622_vm0, %v3360_v4 }
 0x49c   : > { %5500 = vmatmul.mubr.msk.bf16.gmra.mxu0 %vm609_vm2, %v2859_v26 }
 0x49d   : > { %5515 = vmatprep.mubr.msk.bf16.mxu0 %vm609_vm2, %v3062_v37 }
 0x49f   : > { %5510 = vmatmul.mubr.msk.bf16.gmra.mxu1 %vm609_vm2, %v2968_v34 }
 0x4a0   : > { %5525 = vmatprep.mubr.msk.bf16.mxu1 %vm609_vm2, %v3171_v1 }
 0x4a4   : > { %5516 = vmatmul.mubr.msk.bf16.vlgmr.msra.gmra.mxu0 %vm609_vm2, %v3063_v39 }
 0x4a5   : > { %5534 = vmatpush3.bf16.msra.mxu0 %v3280_v9  ;;  %5519 = vmatprep.mubr.msk.bf16.mxu0 %vm609_vm2, %v3064_v23 }
 0x4a6   : > { %5679 = vmatprep.subr.msk.bf16.mxu0 %vm622_vm0, %v3445_v28 }
 0x4a7   : > { %5526 = vmatmul.mubr.msk.bf16.vlgmr.msra.gmra.mxu1 %vm609_vm2, %v3172_v45 }
 0x4a8   : > { %5529 = vmatprep.mubr.msk.bf16.mxu1 %vm609_vm2, %v3173_v27  ;;  %5544 = vmatpush3.bf16.msra.mxu1 %v3365_v25 }
 0x4ac   : > { %5520 = vmatmul.mubr.msk.bf16.gmra.mxu0 %vm609_vm2, %v3065_v44 }
 0x4ad   : > { %5535 = vmatprep.mubr.msk.bf16.mxu0 %vm609_vm2, %v6818_v30  ;;  %v3274_v30 = vpack.c.bf16 %v7476_v16, %v2964_v32 }
 0x4af   : > { %5530 = vmatmul.mubr.msk.bf16.gmra.mxu1 %vm609_vm2, %v3174_v17 }
 0x4b0   : > { %5545 = vmatprep.mubr.msk.bf16.mxu1 %vm609_vm2, %v6792_v63  ;;  %v3355_v63 = vpack.c.bf16 %v7474_v47, %v2641_v31 }
 0x4b4   : > { %5536 = vmatmul.mubr.msk.bf16.vlgmr.msra.gmra.mxu0 %vm609_vm2, %v6833_v50 }
 0x4b5   : > { %5554 = vmatpush3.bf16.msra.mxu0 %v3450_v24  ;;  %5539 = vmatprep.mubr.msk.bf16.mxu0 %vm609_vm2, %v6857_v11 }
 0x4b7   : > { %5546 = vmatmul.mubr.msk.bf16.vlgmr.msra.gmra.mxu1 %vm609_vm2, %v6810_v62 }
 0x4b8   : > { %5549 = vmatprep.mubr.msk.bf16.mxu1 %vm609_vm2, %v6843_v42 }
 0x4bc   : > { %5540 = vmatmul.mubr.msk.bf16.gmra.mxu0 %vm609_vm2, %v3274_v30 }
 0x4bd   : > { %5555 = vmatprep.mubr.msk.bf16.mxu0 %vm609_vm2, %v2857_v19 }
 0x4bf   : > { %5550 = vmatmul.mubr.msk.bf16.gmra.mxu1 %vm609_vm2, %v3355_v63 }
 0x4c4   : > { %5556 = vmatmul.mubr.msk.bf16.vlgmr.msra.gmra.mxu0 %vm609_vm2, %v2858_v60 }
 0x4c5   : > { %5559 = vmatprep.mubr.msk.bf16.mxu0 %vm609_vm2, %v2859_v26 }
 0x4cc   : > { %5560 = vmatmul.mubr.msk.bf16.gmra.mxu0 %vm609_vm2, %v3444_v29 }
 0x544   : > { %v5477_v62 = vpop.f32.mrf.mxu0 }
 0x546   : > { %v2729_v18 = vpop.f32.mrf.mxu0 }
 0x547   : > { %v5487_v48 = vpop.f32.mrf.mxu1 }
 0x548   : > { %v5478_v52 = vpop.f32.mrf.mxu0  ;;  %v2818_v45 = vadd.f32 %v5487_v48, %v5477_v62 }
 0x549   : > { %v2809_v35 = vpop.f32.mrf.mxu1 }
 0x54a   : > { %v2732_v50 = vpop.f32.mrf.mxu0  ;;  %v2810_v9 = vadd.f32 %v2809_v35, %v2729_v18 }
 0x54b   : > { %v5488_v55 = vpop.f32.mrf.mxu1 }
 0x54c   : > { %v5481_v43 = vpop.f32.mrf.mxu0  ;;  %v2821_v44 = vadd.f32 %v5488_v55, %v5478_v52 }
 0x54d   : > { %v2812_v42 = vpop.f32.mrf.mxu1 }
 0x54e   : > { %v2745_v54 = vpop.f32.mrf.mxu0  ;;  %v2813_v36 = vadd.f32 %v2812_v42, %v2732_v50 }
 0x54f   : > { %v5491_v41 = vpop.f32.mrf.mxu1 }
 0x550   : > { %v6940_v53 = vpop.f32.mrf.mxu0 }
 0x551   : > { %v2825_v57 = vpop.f32.mrf.mxu1 }
 0x552   : > { %v2748_v12 = vpop.f32.mrf.mxu0  ;;  %v2826_v22 = vadd.f32 %v2825_v57, %v2745_v54 }
 0x553   : > { %v5492_v15 = vpop.f32.mrf.mxu1 }
 0x554   : > { %v5497_v61 = vpop.f32.mrf.mxu0  ;;  %v2837_v50 = vadd.f32 %v5492_v15, %v6940_v53 }
 0x555   : > { %v2828_v3 = vpop.f32.mrf.mxu1  ;;  %v2943_v17 = vadd.f32 %v5497_v61, %v2818_v45 }
 0x556   : > { %v2910_v11 = vpop.f32.mrf.mxu0  ;;  %v2829_v55 = vadd.f32 %v2828_v3, %v2748_v12 }
 0x557   : > { %v5507_v5 = vpop.f32.mrf.mxu1  ;;  %v2941_v25 = vadd.f32 %v2910_v11, %v2810_v9 }
 0x558   : > { %v5498_v49 = vpop.f32.mrf.mxu0  ;;  %v3056_v18 = vadd.f32 %v5507_v5, %v2943_v17 }
 0x559   : > { %v3023_v59 = vpop.f32.mrf.mxu1  ;;  %v2944_v63 = vadd.f32 %v5498_v49, %v2821_v44 }
 0x55a   : > { %v2913_v46 = vpop.f32.mrf.mxu0  ;;  %v3054_v29 = vadd.f32 %v3023_v59, %v2941_v25 }
 0x55b   : > { %v5508_v13 = vpop.f32.mrf.mxu1  ;;  %v2942_v56 = vadd.f32 %v2913_v46, %v2813_v36 }
 0x55c   : > { %v5501_v33 = vpop.f32.mrf.mxu0  ;;  %v3057_v11 = vadd.f32 %v5508_v13, %v2944_v63 }
 0x55d   : > { %v3026_v7 = vpop.f32.mrf.mxu1 }
 0x55e   : > { %v2926_v10 = vpop.f32.mrf.mxu0  ;;  %v3055_v9 = vadd.f32 %v3026_v7, %v2942_v56 }
 0x55f   : > { %v5511_v19 = vpop.f32.mrf.mxu1  ;;  %v2945_v62 = vadd.f32 %v2926_v10, %v2826_v22 }
 0x560   : > { %v5502_v14 = vpop.f32.mrf.mxu0 }
 0x561   : > { %v3039_v31 = vpop.f32.mrf.mxu1  ;;  %v2948_v54 = vadd.f32 %v5502_v14, %v2837_v50 }
 0x562   : > { %v2929_v60 = vpop.f32.mrf.mxu0  ;;  %v3058_v57 = vadd.f32 %v3039_v31, %v2945_v62 }
 0x563   : > { %v6942_v38 = vpop.f32.mrf.mxu1  ;;  %v2946_v5 = vadd.f32 %v2929_v60, %v2829_v55 }
 0x564   : > { %v5517_v20 = vpop.f32.mrf.mxu0  ;;  %v3061_v53 = vadd.f32 %v6942_v38, %v2948_v54 }
 0x565   : > { %v6944_v2 = vpop.f32.mrf.mxu1 }
 0x566   : > { %v3116_v58 = vpop.f32.mrf.mxu0  ;;  %v3059_v12 = vadd.f32 %v6944_v2, %v2946_v5 }
 0x567   : > { %v5527_v21 = vpop.f32.mrf.mxu1  ;;  %v3147_v35 = vadd.f32 %v3116_v58, %v3054_v29 }
 0x568   : > { %v5518_v4 = vpop.f32.mrf.mxu0 }
 0x569   : > { %v3229_v6 = vpop.f32.mrf.mxu1  ;;  %v3150_v49 = vadd.f32 %v5518_v4, %v3057_v11 }
 0x56a   : > { %v3119_v8 = vpop.f32.mrf.mxu0  ;;  %v3260_v59 = vadd.f32 %v3229_v6, %v3147_v35 }
 0x56b   : > { %v5528_v0 = vpop.f32.mrf.mxu1  ;;  %v3148_v46 = vadd.f32 %v3119_v8, %v3055_v9 }
 0x56c   : > { %v5521_v51 = vpop.f32.mrf.mxu0  ;;  %v3263_v7 = vadd.f32 %v5528_v0, %v3150_v49 }
 0x56d   : > { %v3232_v26 = vpop.f32.mrf.mxu1 }
 0x56e   : > { %v3132_v32 = vpop.f32.mrf.mxu0  ;;  %v3261_v10 = vadd.f32 %v3232_v26, %v3148_v46 }
 0x56f   : > { %v6946_v37 = vpop.f32.mrf.mxu1  ;;  %v3151_v13 = vadd.f32 %v3132_v32, %v3058_v57 }
 0x570   : > { %7478 = vst [vmem:[#allocation25_spill] sm:$0xff] %v6946_v37  ;;  %v5522_v34 = vpop.f32.mrf.mxu0  ;;  %v2834_v37 = vadd.f32 %v5491_v41, %v5481_v43 }
 0x571   : > { %v3245_v1 = vpop.f32.mrf.mxu1  ;;  %v3154_v4 = vadd.f32 %v5522_v34, %v3061_v53 }
 0x572   : > { %v3135_v39 = vpop.f32.mrf.mxu0  ;;  %v2947_v42 = vadd.f32 %v5501_v33, %v2834_v37 }
 0x573   : > { %v6948_v23 = vpop.f32.mrf.mxu1  ;;  %v3152_v6 = vadd.f32 %v3135_v39, %v3059_v12 }
 0x574   : > { %7479 = vst [vmem:[#allocation27_spill] sm:$0xff] %v6948_v23  ;;  %v5537_v28 = vpop.f32.mrf.mxu0  ;;  %v3060_v41 = vadd.f32 %v5511_v19, %v2947_v42 }
 0x575   : > { %v6950_v27 = vpop.f32.mrf.mxu1 }
 0x576   : > { %7480 = vst [vmem:[#allocation26_spill] sm:$0xff] %v6950_v27  ;;  %v3316_v40 = vpop.f32.mrf.mxu0  ;;  %v3149_v27 = vadd.f32 %v5517_v20, %v3056_v18  ;;  %v3153_v15 = vadd.f32 %v5521_v51, %v3060_v41 }
 0x577   : > { %v5547_v24 = vpop.f32.mrf.mxu1  ;;  %v3347_v43 = vadd.f32 %v3316_v40, %v3260_v59  ;;  %v7481_v0 = vld [vmem:[#allocation25_spill] sm:$0xff] }
 0x578   : > { %v5538_v30 = vpop.f32.mrf.mxu0  ;;  %v3262_v45 = vadd.f32 %v5527_v21, %v3149_v27  ;;  %v3264_v21 = vadd.f32 %v3245_v1, %v3151_v13  ;;  %v3266_v26 = vadd.f32 %v7481_v0, %v3153_v15 }
 0x579   : > { %v3401_v16 = vpop.f32.mrf.mxu1  ;;  %v3350_v33 = vadd.f32 %v5538_v30, %v3263_v7 }
 0x57a   : > { %v3319_v47 = vpop.f32.mrf.mxu0  ;;  %v3349_v20 = vadd.f32 %v5537_v28, %v3262_v45  ;;  %v3432_v14 = vadd.f32 %v3401_v16, %v3347_v43 }
 0x57b   : > { %v5548_v23 = vpop.f32.mrf.mxu1  ;;  %v3348_v31 = vadd.f32 %v3319_v47, %v3261_v10  ;;  %v7482_v27 = vld [vmem:[#allocation27_spill] sm:$0xff] }
 0x57c   : > { %v5541_v48 = vpop.f32.mrf.mxu0  ;;  %v3434_v19 = vadd.f32 %v5547_v24, %v3349_v20  ;;  %v3435_v38 = vadd.f32 %v5548_v23, %v3350_v33  ;;  %v3267_v16 = vadd.f32 %v7482_v27, %v3154_v4  ;;  %v3701_v27 = vld [vmem:[%s7387_s11] sm:$0xf] }
 0x57d   : > { %v3404_v52 = vpop.f32.mrf.mxu1  ;;  %v7483_v47 = vld [vmem:[#allocation26_spill] sm:$0xff]  ;;  %v3353_v34 = vadd.f32 %v5541_v48, %v3266_v26  ;;  %5681 = vmatprep.subr.msk.bf16.mxu0 %vm3719_vm5, %v3701_v27 }
 0x57e   : > { %v3332_v61 = vpop.f32.mrf.mxu0  ;;  %v3433_v25 = vadd.f32 %v3404_v52, %v3348_v31  ;;  %v3265_v40 = vadd.f32 %v7483_v47, %v3152_v6  ;;  %v3801_v47 = vsel %vm3719_vm5, %v3701_v27, 0 }
 0x57f   : > { %v5551_v22 = vpop.f32.mrf.mxu1  ;;  %v3351_v37 = vadd.f32 %v3332_v61, %v3264_v21  ;;  %5574 = vmatpush3.bf16.msra.mxu0 %v3801_v47 }
 0x580   : > { %v5542_v58 = vpop.f32.mrf.mxu0  ;;  %v3438_v48 = vadd.f32 %v5551_v22, %v3353_v34  ;;  %v7034_v34 = vld [vmem:[%s7387_s11 + $0xc] sm:$0xf] }
 0x581   : > { %v3417_v60 = vpop.f32.mrf.mxu1  ;;  %v3354_v17 = vadd.f32 %v5542_v58, %v3267_v16  ;;  %5683 = vmatprep.subr.msk.bf16.mxu0 %vm3719_vm5, %v7034_v34 }
 0x582   : > { %v3335_v56 = vpop.f32.mrf.mxu0  ;;  %v3436_v23 = vadd.f32 %v3417_v60, %v3351_v37 }
 0x583   : > { %v5552_v2 = vpop.f32.mrf.mxu1  ;;  %v3352_v24 = vadd.f32 %v3335_v56, %v3265_v40  ;;  %v7027_v40 = vld [vmem:[%s7387_s11 + $0x8] sm:$0xf] }
 0x584   : > { %v5557_v3 = vpop.f32.mrf.mxu0  ;;  %v3439_v49 = vadd.f32 %v5552_v2, %v3354_v17  ;;  %v3706_v2 = vld [vmem:[%s7387_s11 + $0x4] sm:$0xf] }
 0x585   : > { %v6958_v51 = vadd.f32 %v5557_v3, %v3434_v19  ;;  %v3420_v29 = vpop.f32.mrf.mxu1  ;;  %5680 = vmatprep.subr.msk.bf16.mxu1 %vm3719_vm5, %v3706_v2  ;;  %v3721_v16 = vsel %vm3719_vm5, %v3706_v2, 0 }
 0x586   : > { %v3486_v8 = vpop.f32.mrf.mxu0  ;;  %v3437_v59 = vadd.f32 %v3420_v29, %v3352_v24  ;;  %5564 = vmatpush3.bf16.msra.mxu1 %v3721_v16 }
 0x587   : > { %v6955_v32 = vadd.f32 %v3486_v8, %v3432_v14  ;;  %v3553_v63 = vmul.f32 %v6958_v51, %v6958_v51  ;;  %v3529_v11 = vsel %vm3525_vm4, %v6958_v51, 0.0  ;;  %5682 = vmatprep.subr.msk.bf16.mxu1 %vm3719_vm5, %v7027_v40 }
 0x588   : > { %v5558_v28 = vpop.f32.mrf.mxu0 }
 0x589   : > { %v3551_v39 = vmul.f32 %v6955_v32, %v6955_v32  ;;  %v6964_v44 = vadd.f32 %v5558_v28, %v3435_v38  ;;  %v3526_v18 = vsel %vm3525_vm4, %v6955_v32, 0.0  ;;  %v3562_v5 = vsel %vm3525_vm4, %v3553_v63, 0.0 }
 0x58a   : > { %v3489_v1 = vpop.f32.mrf.mxu0 }
 0x58b   : > { %v6966_v36 = vadd.f32 %v3489_v1, %v3433_v25  ;;  %v3559_v50 = vsel %vm3525_vm4, %v3551_v39, 0.0  ;;  %v3554_v55 = vmul.f32 %v6964_v44, %v6964_v44  ;;  %v3531_v58 = vsel %vm3525_vm4, %v6964_v44, 0.0 }
 0x58c   : > { %v5561_v30 = vpop.f32.mrf.mxu0 }
 0x58d   : > { %v3527_v35 = vsel %vm3525_vm4, %v6966_v36, 0.0  ;;  %v3552_v62 = vmul.f32 %v6966_v36, %v6966_v36  ;;  %v6987_v45 = vadd.f32 %v5561_v30, %v3438_v48  ;;  %v3564_v56 = vsel %vm3525_vm4, %v3554_v55, 0.0 }
 0x58e   : > { %v3528_v9 = vadd.f32 %v3527_v35, %v3526_v18  ;;  %v3502_v52 = vpop.f32.mrf.mxu0 }
 0x58f   : > { %v3560_v42 = vsel %vm3525_vm4, %v3552_v62, 0.0  ;;  %v6982_v61 = vadd.f32 %v3502_v52, %v3436_v23  ;;  %v3557_v15 = vmul.f32 %v6987_v45, %v6987_v45  ;;  %v3537_v4 = vsel %vm3525_vm4, %v6987_v45, 0.0 }
 0x590   : > { %v3530_v46 = vadd.f32 %v3529_v11, %v3528_v9  ;;  %v3561_v54 = vadd.f32 %v3560_v42, %v3559_v50  ;;  %v5562_v57 = vpop.f32.mrf.mxu0 }
 0x591   : > { %v3555_v43 = vmul.f32 %v6982_v61, %v6982_v61  ;;  %v3533_v7 = vsel %vm3525_vm4, %v6982_v61, 0.0  ;;  %v6994_v10 = vadd.f32 %v5562_v57, %v3439_v49  ;;  %v3570_v26 = vsel %vm3525_vm4, %v3557_v15, 0.0 }
 0x592   : > { %v3563_v22 = vadd.f32 %v3562_v5, %v3561_v54  ;;  %v3532_v41 = vadd.f32 %v3531_v58, %v3530_v46  ;;  %v3505_v13 = vpop.f32.mrf.mxu0  ;;  %v5067_v58 = vld [vmem:[%s7385_s9] ss:$0 sm:$0xff] }
 0x593   : > { %v6996_v20 = vadd.f32 %v3505_v13, %v3437_v59  ;;  %v3566_v3 = vsel %vm3525_vm4, %v3555_v43, 0.0  ;;  %v3558_v21 = vmul.f32 %v6994_v10, %v6994_v10  ;;  %v3539_v0 = vsel %vm3525_vm4, %v6994_v10, 0.0 }
 0x594   : > { %v3534_v53 = vadd.f32 %v3533_v7, %v3532_v41  ;;  %v3565_v12 = vadd.f32 %v3564_v56, %v3563_v22 }
 0x595   : > { %v3535_v33 = vsel %vm3525_vm4, %v6996_v20, 0.0  ;;  %v3556_v14 = vmul.f32 %v6996_v20, %v6996_v20  ;;  %v3572_v38 = vsel %vm3525_vm4, %v3558_v21, 0.0 }
 0x596   : > { %v3536_v31 = vadd.f32 %v3535_v33, %v3534_v53  ;;  %v3567_v60 = vadd.f32 %v3566_v3, %v3565_v12 }
 0x597   : > { %v3568_v6 = vsel %vm3525_vm4, %v3556_v14, 0.0 }
 0x598   : > { %v3538_v8 = vadd.f32 %v3537_v4, %v3536_v31  ;;  %v3569_v19 = vadd.f32 %v3568_v6, %v3567_v60 }
 0x59a   : > { %v3540_v37 = vadd.f32 %v3539_v0, %v3538_v8  ;;  %v3571_v28 = vadd.f32 %v3570_v26, %v3569_v19 }
 0x59c   : > { %3541 = vadd.xlane.f32.xlu1 %v3540_v37  ;;  %v3573_v25 = vadd.f32 %v3572_v38, %v3571_v28 }
 0x59e   : > { %3574 = vadd.xlane.f32.xlu0 %v3573_v25 }
 0x625   : > { %v3542_v1 = vpop.xlane.xlu1 %3541 }
 0x626   : > { %v3543_v39 = vrot.slane %v3542_v1, 4 }
 0x627   : > { %v3575_v17 = vpop.xlane.xlu0 %3574 }
 0x628   : > { %v3544_v23 = vadd.f32 %v3543_v39, %v3542_v1  ;;  %v3576_v24 = vrot.slane %v3575_v17, 4 }
 0x62a   : > { %v3545_v30 = vrot.slane %v3544_v23, 2  ;;  %v3577_v63 = vadd.f32 %v3576_v24, %v3575_v17 }
 0x62c   : > { %v3546_v29 = vadd.f32 %v3545_v30, %v3544_v23  ;;  %v3578_v18 = vrot.slane %v3577_v63, 2 }
 0x62e   : > { %v3547_v35 = vrot.slane %v3546_v29, 1  ;;  %v3579_v62 = vadd.f32 %v3578_v18, %v3577_v63  ;;  %v3902_v18 = vsel %vm3719_vm5, %v7027_v40, 0 }
 0x630   : > { %v3548_v48 = vadd.f32 %v3547_v35, %v3546_v29  ;;  %v3580_v11 = vrot.slane %v3579_v62, 1 }
 0x632   : > { %v3550_v9 = vmul.f32 0.001953125, %v3548_v48  ;;  %v3581_v52 = vadd.f32 %v3580_v11, %v3579_v62 }
 0x634   : > { %v3582_v50 = vmul.f32 0.001953125, %v3581_v52  ;;  %v3583_v55 = vmul.f32 %v3550_v9, %v3550_v9  ;;  %v3585_v59 = vsub.f32 %v6955_v32, %v3550_v9  ;;  %v3586_v46 = vsub.f32 %v6966_v36, %v3550_v9 }
 0x635   : > { %v3587_v54 = vsub.f32 %v6958_v51, %v3550_v9  ;;  %v3588_v57 = vsub.f32 %v6964_v44, %v3550_v9  ;;  %v3589_v43 = vsub.f32 %v6982_v61, %v3550_v9  ;;  %v3590_v22 = vsub.f32 %v6996_v20, %v3550_v9  ;;  %v5068_v51 = vld [vmem:[%s7386_s10] ss:$0 sm:$0xff] }
 0x636   : > { %v3584_v42 = vsub.f32 %v3582_v50, %v3583_v55  ;;  %v3591_v41 = vsub.f32 %v6987_v45, %v3550_v9  ;;  %v3592_v0 = vsub.f32 %v6994_v10, %v3550_v9 }
 0x638   : > { %v3593_v49 = vadd.f32 1e-05, %v3584_v42 }
 0x63a   : > { %5796 = vrsqrt.f32 %v3593_v49 }
 0x647   : > { %v5797_v5 = vpop.eup %5796 }
 0x648   : > { %v3595_v13 = vmul.f32 %v5797_v5, %v3585_v59  ;;  %v3596_v56 = vmul.f32 %v5797_v5, %v3586_v46  ;;  %v3597_v32 = vmul.f32 %v5797_v5, %v3587_v54  ;;  %v3598_v7 = vmul.f32 %v5797_v5, %v3588_v57 }
 0x649   : > { %v3599_v44 = vmul.f32 %v5797_v5, %v3589_v43  ;;  %v3600_v36 = vmul.f32 %v5797_v5, %v3590_v22  ;;  %v3601_v53 = vmul.f32 %v5797_v5, %v3591_v41  ;;  %v3602_v25 = vmul.f32 %v5797_v5, %v3592_v0 }
 0x64a   : > { %v3611_v12 = vmul.f32 %v5067_v58, %v3595_v13  ;;  %v3612_v15 = vmul.f32 %v5067_v58, %v3596_v56  ;;  %v3613_v3 = vmul.f32 %v5067_v58, %v3597_v32  ;;  %v3614_v33 = vmul.f32 %v5067_v58, %v3598_v7 }
 0x64b   : > { %v3615_v61 = vmul.f32 %v5067_v58, %v3599_v44  ;;  %v3616_v14 = vmul.f32 %v5067_v58, %v3600_v36  ;;  %v3617_v20 = vmul.f32 %v5067_v58, %v3601_v53  ;;  %v3618_v16 = vmul.f32 %v5067_v58, %v3602_v25  ;;  %v7486_v44 = vld [vmem:[#allocation17_spill] sm:$0xff] }
 0x64c   : > { %v3625_v31 = vadd.f32 %v5068_v51, %v3611_v12  ;;  %v3626_v45 = vadd.f32 %v5068_v51, %v3612_v15  ;;  %v3627_v60 = vadd.f32 %v5068_v51, %v3613_v3  ;;  %v3628_v4 = vadd.f32 %v5068_v51, %v3614_v33  ;;  %v4090_v3 = vld [vmem:[%s7387_s11 + $0x10] sm:$0xf] }
 0x64d   : > { %v3629_v21 = vadd.f32 %v5068_v51, %v3615_v61  ;;  %v3630_v6 = vadd.f32 %v5068_v51, %v3616_v14  ;;  %v3631_v19 = vadd.f32 %v5068_v51, %v3617_v20  ;;  %v7052_v47 = vadd.f32 %v5068_v51, %v3618_v16 }
 0x64e   : > { %v3641_v8 = vmul.f32 0.70710677, %v3625_v31  ;;  %v3642_v26 = vmul.f32 0.70710677, %v3626_v45  ;;  %v3643_v37 = vmul.f32 0.70710677, %v3627_v60 }
 0x64f   : > { %v3644_v28 = vmul.f32 0.70710677, %v3628_v4  ;;  %v3645_v38 = vmul.f32 0.70710677, %v3629_v21  ;;  %v3646_v2 = vmul.f32 0.70710677, %v3630_v6 }
 0x650   : > { %5798 = verf.f32 %v3641_v8  ;;  %v3647_v27 = vmul.f32 0.70710677, %v3631_v19  ;;  %v3648_v1 = vmul.f32 0.70710677, %v7052_v47  ;;  %v3633_v17 = vmul.f32 0.5, %v3625_v31 }
 0x651   : > { %5800 = verf.f32 %v3642_v26  ;;  %v3634_v30 = vmul.f32 0.5, %v3626_v45  ;;  %v3635_v63 = vmul.f32 0.5, %v3627_v60  ;;  %v3636_v11 = vmul.f32 0.5, %v3628_v4  ;;  %v4199_v8 = vld [vmem:[%s7387_s11 + $0x14] sm:$0xf] }
 0x652   : > { %5802 = verf.f32 %v3643_v37  ;;  %v3637_v50 = vmul.f32 0.5, %v3629_v21  ;;  %v3638_v42 = vmul.f32 0.5, %v3630_v6  ;;  %v7484_v59 = vmov 0.0  }
 0x653   : > { %5804 = verf.f32 %v3644_v28  ;;  %v3639_v22 = vmul.f32 0.5, %v3631_v19  ;;  %v4011_v4 = vsel %vm3719_vm5, %v7034_v34, 0 }
 0x654   : > { %5806 = verf.f32 %v3645_v38 }
 0x655   : > { %5808 = verf.f32 %v3646_v2  ;;  %v7487_v2 = vld [vmem:[#allocation22_spill] sm:$0xff] }
 0x656   : > { %5810 = verf.f32 %v3647_v27 }
 0x657   : > { %5812 = verf.f32 %v3648_v1 }
 0x65d   : > { %v5799_v10 = vpop.eup %5798 }
 0x65e   : > { %v5801_v39 = vpop.eup %5800  ;;  %v3657_v23 = vadd.f32 1.0, %v5799_v10 }
 0x65f   : > { %v5803_v24 = vpop.eup %5802  ;;  %v3658_v29 = vadd.f32 1.0, %v5801_v39 }
 0x660   : > { %v5805_v35 = vpop.eup %5804  ;;  %v7057_v62 = vmul.f32 %v3657_v23, %v3633_v17  ;;  %v3659_v48 = vadd.f32 1.0, %v5803_v24 }
 0x661   : > { %v5807_v9 = vpop.eup %5806  ;;  %v7059_v52 = vmul.f32 %v3658_v29, %v3634_v30  ;;  %v3660_v55 = vadd.f32 1.0, %v5805_v35  ;;  %v3640_v35 = vmul.f32 0.5, %v7052_v47  ;;  %v4213_v47 = vsel %vm3719_vm5, %v4199_v8, 0 }
 0x662   : > { %v5809_v49 = vpop.eup %5808  ;;  %v3702_v46 = vpack.c.bf16 %v7057_v62, %v7484_v59  ;;  %v7063_v54 = vmul.f32 %v3659_v48, %v3635_v63  ;;  %v3661_v57 = vadd.f32 1.0, %v5807_v9  ;;  %v3682_v40 = vrot.slane %v7057_v62, 7 }
 0x663   : > { %v5811_v5 = vpop.eup %5810  ;;  %v7066_v58 = vmul.f32 %v3660_v55, %v3636_v11  ;;  %v3683_v43 = vrot.slane %v7059_v52, 7  ;;  %v3662_v41 = vadd.f32 1.0, %v5809_v49  ;;  %v3869_v15 = vrot.slane %v7057_v62, 1  ;;  %v4295_v49 = vld [vmem:[%s7387_s11 + $0x18] sm:$0xf] }
 0x664   : > { %5565 = vmatprep.mubr.msk.bf16.mxu1 %vm3525_vm4, %v3702_v46  ;;  %v7072_v13 = vpack.c.bf16 %v7063_v54, %v7059_v52  ;;  %v7074_v56 = vmul.f32 %v3661_v57, %v3637_v50  ;;  %v3690_v7 = vsel %vm503_vm1, 0.0, %v3682_v40  ;;  %v3684_v51 = vrot.slane %v7063_v54, 7  ;;  %v5813_v25 = vpop.eup %5812 }
 0x665   : > { %v3697_v36 = vpack.c.bf16 %v3690_v7, %v7486_v44  ;;  %v3691_v53 = vsel %vm503_vm1, 0.0, %v3683_v43  ;;  %v3685_v12 = vrot.slane %v7066_v58, 7  ;;  %v3663_v20 = vadd.f32 1.0, %v5811_v5  ;;  %v4376_v5 = vld [vmem:[%s7387_s11 + $0x1c] sm:$0xf] }
 0x666   : > { %5566 = vmatmul.mubr.msk.bf16.vlgmr.msra.gmra.mxu1 %vm3525_vm4, %v7072_v13  ;;  %v7091_v33 = vpack.c.bf16 %v7074_v56, %v7066_v58  ;;  %v3692_v61 = vsel %vm503_vm1, 0.0, %v3684_v51  ;;  %v3686_v14 = vrot.slane %v7074_v56, 7  ;;  %v7101_v60 = vmul.f32 %v3662_v41, %v3638_v42 }
 0x667   : > { %5584 = vmatpush3.bf16.msra.mxu1 %v3902_v18  ;;  %5575 = vmatprep.mubr.msk.bf16.mxu0 %vm3525_vm4, %v3697_v36  ;;  %v7097_v31 = vpack.c.bf16 %v3692_v61, %v3691_v53  ;;  %v3693_v45 = vsel %vm503_vm1, 0.0, %v3685_v12  ;;  %v7109_v6 = vmul.f32 %v3663_v20, %v3639_v22  ;;  %v3877_v0 = vsel %vm504_vm3, 0.0, %v3869_v15 }
 0x668   : > { %5569 = vmatprep.mubr.msk.bf16.mxu1 %vm3525_vm4, %v7091_v33  ;;  %v3694_v21 = vsel %vm503_vm1, 0.0, %v3686_v14  ;;  %5684 = vmatprep.subr.msk.bf16.mxu1 %vm3719_vm5, %v4090_v3  ;;  %v3687_v34 = vrot.slane %v7101_v60, 7  ;;  %v3884_v27 = vpack.c.bf16 %v3877_v0, %v7487_v2  ;;  %v3870_v16 = vrot.slane %v7059_v52, 1 }
 0x669   : > { %5576 = vmatmul.mubr.msk.bf16.vlgmr.msra.gmra.mxu0 %vm3525_vm4, %v7097_v31  ;;  %v7117_v19 = vpack.c.bf16 %v3694_v21, %v3693_v45  ;;  %v3688_v26 = vrot.slane %v7109_v6, 7  ;;  %v7128_v37 = vpack.c.bf16 %v7109_v6, %v7101_v60  ;;  %v3871_v1 = vrot.slane %v7063_v54, 1 }
 0x66a   : > { %5594 = vmatpush3.bf16.msra.mxu0 %v4011_v4  ;;  %v3695_v28 = vsel %vm503_vm1, 0.0, %v3687_v34  ;;  %v3872_v10 = vrot.slane %v7066_v58, 1  ;;  %v3873_v39 = vrot.slane %v7074_v56, 1  ;;  %v3993_v23 = vpack.c.bf16 %v3691_v53, %v3690_v7 }
 0x66b   : > { %5579 = vmatprep.mubr.msk.bf16.mxu0 %vm3525_vm4, %v7117_v19  ;;  %5685 = vmatprep.subr.msk.bf16.mxu0 %vm3719_vm5, %v4199_v8  ;;  %v3696_v38 = vsel %vm503_vm1, 0.0, %v3688_v26  ;;  %v3664_v24 = vadd.f32 1.0, %v5813_v25  ;;  %v3878_v30 = vsel %vm504_vm3, 0.0, %v3870_v16  ;;  %v3879_v63 = vsel %vm504_vm3, 0.0, %v3871_v1 }
 0x66c   : > { %v7142_v17 = vpack.c.bf16 %v3696_v38, %v3695_v28  ;;  %v3880_v29 = vsel %vm504_vm3, 0.0, %v3872_v10  ;;  %v3881_v18 = vsel %vm504_vm3, 0.0, %v3873_v39  ;;  %v3885_v48 = vpack.c.bf16 %v3879_v63, %v3878_v30 }
 0x66d   : > { %v4104_v11 = vsel %vm3719_vm5, %v4090_v3, 0  ;;  %v3672_v9 = vmul.f32 %v3664_v24, %v3640_v35  ;;  %v3886_v50 = vpack.c.bf16 %v3881_v18, %v3880_v29  ;;  %v3874_v55 = vrot.slane %v7101_v60, 1 }
 0x66e   : > { %5570 = vmatmul.mubr.msk.bf16.gmra.mxu1 %vm3525_vm4, %v7128_v37  ;;  %v3875_v42 = vrot.slane %v7109_v6, 1  ;;  %v3994_v46 = vpack.c.bf16 %v3693_v45, %v3692_v61  ;;  %v3995_v57 = vpack.c.bf16 %v3695_v28, %v3694_v21  ;;  %v4086_v51 = vpack.c.bf16 %v7059_v52, %v7057_v62  ;;  %v4461_v62 = vld [vmem:[%s7387_s11 + $0x20] sm:$0xf] }
 0x66f   : > { %5585 = vmatprep.mubr.msk.bf16.mxu1 %vm3525_vm4, %v3884_v27  ;;  %v3984_v40 = vrot.slane %v3672_v9, 7  ;;  %v3882_v43 = vsel %vm504_vm3, 0.0, %v3874_v55  ;;  %v4195_v53 = vpack.c.bf16 %v3878_v30, %v3877_v0  ;;  %v4087_v12 = vpack.c.bf16 %v7066_v58, %v7063_v54 }
 0x670   : > { %v3883_v22 = vsel %vm504_vm3, 0.0, %v3875_v42  ;;  %v4300_v15 = vsel %vm3719_vm5, %v4295_v49, 0  ;;  %v4088_v3 = vpack.c.bf16 %v7101_v60, %v7074_v56  ;;  %v4196_v52 = vpack.c.bf16 %v3880_v29, %v3879_v63 }
 0x671   : > { %5580 = vmatmul.mubr.msk.bf16.gmra.mxu0 %vm3525_vm4, %v7142_v17  ;;  %v3887_v41 = vpack.c.bf16 %v3883_v22, %v3882_v43  ;;  %v3992_v7 = vsel %vm503_vm1, 0.0, %v3984_v40  ;;  %v4381_v61 = vsel %vm3719_vm5, %v4376_v5, 0  ;;  %v4197_v14 = vpack.c.bf16 %v3882_v43, %v3881_v18 }
 0x672   : > { %5595 = vmatprep.mubr.msk.bf16.mxu0 %vm3525_vm4, %v3993_v23  ;;  %v3996_v36 = vpack.c.bf16 %v3992_v7, %v3696_v38  ;;  %v4186_v20 = vrot.slane %v3672_v9, 1  ;;  %v4089_v54 = vpack.c.bf16 %v3672_v9, %v7109_v6  ;;  %v4466_v45 = vsel %vm3719_vm5, %v4461_v62, 0 }
 0x674   : > { %v4194_v58 = vsel %vm504_vm3, 0.0, %v4186_v20 }
 0x675   : > { %v4198_v56 = vpack.c.bf16 %v4194_v58, %v3883_v22  ;;  %v4460_v60 = vpack.c.bf16 %v7487_v2, %v4194_v58 }
 0x676   : > { %5586 = vmatmul.mubr.msk.bf16.vlgmr.msra.gmra.mxu1 %vm3525_vm4, %v3885_v48 }
 0x677   : > { %5604 = vmatpush3.bf16.msra.mxu1 %v4104_v11  ;;  %5589 = vmatprep.mubr.msk.bf16.mxu1 %vm3525_vm4, %v3886_v50 }
 0x678   : > { %5686 = vmatprep.subr.msk.bf16.mxu1 %vm3719_vm5, %v4295_v49 }
 0x679   : > { %5596 = vmatmul.mubr.msk.bf16.vlgmr.msra.gmra.mxu0 %vm3525_vm4, %v3994_v46 }
 0x67a   : > { %5599 = vmatprep.mubr.msk.bf16.mxu0 %vm3525_vm4, %v3995_v57  ;;  %5614 = vmatpush3.bf16.msra.mxu0 %v4213_v47 }
 0x67b   : > { %5687 = vmatprep.subr.msk.bf16.mxu0 %vm3719_vm5, %v4376_v5 }
 0x67e   : > { %5590 = vmatmul.mubr.msk.bf16.gmra.mxu1 %vm3525_vm4, %v3887_v41 }
 0x67f   : > { %5605 = vmatprep.mubr.msk.bf16.mxu1 %vm3525_vm4, %v4086_v51 }
 0x681   : > { %5600 = vmatmul.mubr.msk.bf16.gmra.mxu0 %vm3525_vm4, %v3996_v36 }
 0x682   : > { %5615 = vmatprep.mubr.msk.bf16.mxu0 %vm3525_vm4, %v4195_v53 }
 0x686   : > { %5606 = vmatmul.mubr.msk.bf16.vlgmr.msra.gmra.mxu1 %vm3525_vm4, %v4087_v12 }
 0x687   : > { %5624 = vmatpush3.bf16.msra.mxu1 %v4300_v15  ;;  %5609 = vmatprep.mubr.msk.bf16.mxu1 %vm3525_vm4, %v4088_v3 }
 0x688   : > { %5688 = vmatprep.subr.msk.bf16.mxu1 %vm3719_vm5, %v4461_v62 }
 0x689   : > { %5616 = vmatmul.mubr.msk.bf16.vlgmr.msra.gmra.mxu0 %vm3525_vm4, %v4196_v52 }
 0x68a   : > { %5619 = vmatprep.mubr.msk.bf16.mxu0 %vm3525_vm4, %v4197_v14  ;;  %5634 = vmatpush3.bf16.msra.mxu0 %v4381_v61 }
 0x68e   : > { %5610 = vmatmul.mubr.msk.bf16.gmra.mxu1 %vm3525_vm4, %v4089_v54 }
 0x68f   : > { %5625 = vmatprep.mubr.msk.bf16.mxu1 %vm3525_vm4, %v7097_v31  ;;  %v4294_v31 = vpack.c.bf16 %v7486_v44, %v3992_v7 }
 0x691   : > { %5620 = vmatmul.mubr.msk.bf16.gmra.mxu0 %vm3525_vm4, %v4198_v56 }
 0x692   : > { %5635 = vmatprep.mubr.msk.bf16.mxu0 %vm3525_vm4, %v7072_v13  ;;  %v4375_v13 = vpack.c.bf16 %v7484_v59, %v3672_v9 }
 0x696   : > { %5626 = vmatmul.mubr.msk.bf16.vlgmr.msra.gmra.mxu1 %vm3525_vm4, %v7117_v19 }
 0x697   : > { %5644 = vmatpush3.bf16.msra.mxu1 %v4466_v45  ;;  %5629 = vmatprep.mubr.msk.bf16.mxu1 %vm3525_vm4, %v7142_v17 }
 0x699   : > { %5636 = vmatmul.mubr.msk.bf16.vlgmr.msra.gmra.mxu0 %vm3525_vm4, %v7091_v33 }
 0x69a   : > { %5639 = vmatprep.mubr.msk.bf16.mxu0 %vm3525_vm4, %v7128_v37 }
 0x69e   : > { %5630 = vmatmul.mubr.msk.bf16.gmra.mxu1 %vm3525_vm4, %v4294_v31 }
 0x69f   : > { %5645 = vmatprep.mubr.msk.bf16.mxu1 %vm3525_vm4, %v3885_v48 }
 0x6a1   : > { %5640 = vmatmul.mubr.msk.bf16.gmra.mxu0 %vm3525_vm4, %v4375_v13 }
 0x6a6   : > { %5646 = vmatmul.mubr.msk.bf16.vlgmr.msra.gmra.mxu1 %vm3525_vm4, %v3886_v50 }
 0x6a7   : > { %5649 = vmatprep.mubr.msk.bf16.mxu1 %vm3525_vm4, %v3887_v41 }
 0x6ae   : > { %5650 = vmatmul.mubr.msk.bf16.gmra.mxu1 %vm3525_vm4, %v4460_v60 }
 0x726   : > { %v5567_v33 = vpop.f32.mrf.mxu1 }
 0x728   : > { %v3757_v4 = vpop.f32.mrf.mxu1 }
 0x729   : > { %v5577_v21 = vpop.f32.mrf.mxu0 }
 0x72a   : > { %v5568_v44 = vpop.f32.mrf.mxu1  ;;  %v3846_v15 = vadd.f32 %v5577_v21, %v5567_v33 }
 0x72b   : > { %v3837_v6 = vpop.f32.mrf.mxu0 }
 0x72c   : > { %v3760_v8 = vpop.f32.mrf.mxu1  ;;  %v3838_v36 = vadd.f32 %v3837_v6, %v3757_v4 }
 0x72d   : > { %v5578_v19 = vpop.f32.mrf.mxu0 }
 0x72e   : > { %v5571_v34 = vpop.f32.mrf.mxu1  ;;  %v3849_v61 = vadd.f32 %v5578_v19, %v5568_v44 }
 0x72f   : > { %v3840_v0 = vpop.f32.mrf.mxu0 }
 0x730   : > { %v3773_v59 = vpop.f32.mrf.mxu1  ;;  %v3841_v14 = vadd.f32 %v3840_v0, %v3760_v8 }
 0x731   : > { %v5581_v26 = vpop.f32.mrf.mxu0 }
 0x732   : > { %v7225_v37 = vpop.f32.mrf.mxu1 }
 0x733   : > { %v3853_v28 = vpop.f32.mrf.mxu0 }
 0x734   : > { %v3776_v38 = vpop.f32.mrf.mxu1  ;;  %v3854_v60 = vadd.f32 %v3853_v28, %v3773_v59 }
 0x735   : > { %v5582_v25 = vpop.f32.mrf.mxu0 }
 0x736   : > { %v5587_v27 = vpop.f32.mrf.mxu1  ;;  %v3865_v8 = vadd.f32 %v5582_v25, %v7225_v37 }
 0x737   : > { %v3856_v2 = vpop.f32.mrf.mxu0  ;;  %v3971_v20 = vadd.f32 %v5587_v27, %v3846_v15 }
 0x738   : > { %v3938_v16 = vpop.f32.mrf.mxu1  ;;  %v3857_v19 = vadd.f32 %v3856_v2, %v3776_v38 }
 0x739   : > { %v5597_v1 = vpop.f32.mrf.mxu0  ;;  %v3969_v3 = vadd.f32 %v3938_v16, %v3838_v36 }
 0x73a   : > { %v5588_v10 = vpop.f32.mrf.mxu1  ;;  %v4080_v4 = vadd.f32 %v5597_v1, %v3971_v20 }
 0x73b   : > { %v4047_v39 = vpop.f32.mrf.mxu0  ;;  %v3972_v56 = vadd.f32 %v5588_v10, %v3849_v61 }
 0x73c   : > { %v3941_v17 = vpop.f32.mrf.mxu1  ;;  %v4078_v45 = vadd.f32 %v4047_v39, %v3969_v3 }
 0x73d   : > { %v5598_v23 = vpop.f32.mrf.mxu0  ;;  %v3970_v31 = vadd.f32 %v3941_v17, %v3841_v14 }
 0x73e   : > { %v5591_v24 = vpop.f32.mrf.mxu1  ;;  %v4081_v16 = vadd.f32 %v5598_v23, %v3972_v56 }
 0x73f   : > { %v4050_v30 = vpop.f32.mrf.mxu0 }
 0x740   : > { %v3954_v63 = vpop.f32.mrf.mxu1  ;;  %v4079_v36 = vadd.f32 %v4050_v30, %v3970_v31 }
 0x741   : > { %v5601_v29 = vpop.f32.mrf.mxu0  ;;  %v3973_v33 = vadd.f32 %v3954_v63, %v3854_v60 }
 0x742   : > { %v5592_v18 = vpop.f32.mrf.mxu1 }
 0x743   : > { %v4063_v35 = vpop.f32.mrf.mxu0  ;;  %v3976_v59 = vadd.f32 %v5592_v18, %v3865_v8 }
 0x744   : > { %v3957_v48 = vpop.f32.mrf.mxu1  ;;  %v4082_v28 = vadd.f32 %v4063_v35, %v3973_v33 }
 0x745   : > { %v7227_v11 = vpop.f32.mrf.mxu0  ;;  %v3974_v1 = vadd.f32 %v3957_v48, %v3857_v19 }
 0x746   : > { %v5607_v9 = vpop.f32.mrf.mxu1  ;;  %v4085_v37 = vadd.f32 %v7227_v11, %v3976_v59 }
 0x747   : > { %v7229_v50 = vpop.f32.mrf.mxu0 }
 0x748   : > { %v4140_v55 = vpop.f32.mrf.mxu1  ;;  %v4083_v38 = vadd.f32 %v7229_v50, %v3974_v1 }
 0x749   : > { %v5617_v42 = vpop.f32.mrf.mxu0  ;;  %v4171_v6 = vadd.f32 %v4140_v55, %v4078_v45 }
 0x74a   : > { %v5608_v49 = vpop.f32.mrf.mxu1 }
 0x74b   : > { %v4249_v46 = vpop.f32.mrf.mxu0  ;;  %v4174_v10 = vadd.f32 %v5608_v49, %v4081_v16 }
 0x74c   : > { %v4143_v47 = vpop.f32.mrf.mxu1  ;;  %v4280_v39 = vadd.f32 %v4249_v46, %v4171_v6 }
 0x74d   : > { %v5618_v57 = vpop.f32.mrf.mxu0  ;;  %v4172_v17 = vadd.f32 %v4143_v47, %v4079_v36 }
 0x74e   : > { %v5611_v40 = vpop.f32.mrf.mxu1 }
 0x74f   : > { %v4252_v5 = vpop.f32.mrf.mxu0 }
 0x750   : > { %v4156_v43 = vpop.f32.mrf.mxu1  ;;  %v4281_v3 = vadd.f32 %v4252_v5, %v4172_v17 }
 0x751   : > { %v7231_v22 = vpop.f32.mrf.mxu0  ;;  %v4175_v23 = vadd.f32 %v4156_v43, %v4082_v28 }
 0x752   : > { %7488 = vst [vmem:[#allocation16_spill] sm:$0xff] %v7231_v22  ;;  %v5612_v41 = vpop.f32.mrf.mxu1  ;;  %v3862_v22 = vadd.f32 %v5581_v26, %v5571_v34 }
 0x753   : > { %v4265_v7 = vpop.f32.mrf.mxu0  ;;  %v4178_v49 = vadd.f32 %v5612_v41, %v4085_v37 }
 0x754   : > { %v4159_v51 = vpop.f32.mrf.mxu1  ;;  %v3975_v0 = vadd.f32 %v5591_v24, %v3862_v22 }
 0x755   : > { %v7233_v53 = vpop.f32.mrf.mxu0  ;;  %v4176_v46 = vadd.f32 %v4159_v51, %v4083_v38 }
 0x756   : > { %7489 = vst [vmem:[#allocation19_spill] sm:$0xff] %v7233_v53  ;;  %v5627_v12 = vpop.f32.mrf.mxu1  ;;  %v4084_v63 = vadd.f32 %v5601_v29, %v3975_v0 }
 0x757   : > { %v7235_v62 = vpop.f32.mrf.mxu0 }
 0x758   : > { %7490 = vst [vmem:[#allocation15_spill] sm:$0xff] %v7235_v62  ;;  %v4336_v52 = vpop.f32.mrf.mxu1  ;;  %v4173_v62 = vadd.f32 %v5607_v9, %v4080_v4  ;;  %v4283_v9 = vadd.f32 %v5618_v57, %v4174_v10  ;;  %v4177_v25 = vadd.f32 %v5611_v40, %v4084_v63 }
 0x759   : > { %v5637_v54 = vpop.f32.mrf.mxu0  ;;  %v4367_v34 = vadd.f32 %v4336_v52, %v4280_v39  ;;  %v7491_v57 = vld [vmem:[#allocation16_spill] sm:$0xff] }
 0x75a   : > { %v5628_v58 = vpop.f32.mrf.mxu1  ;;  %v4282_v15 = vadd.f32 %v5617_v42, %v4173_v62  ;;  %v4284_v42 = vadd.f32 %v4265_v7, %v4175_v23  ;;  %v4286_v5 = vadd.f32 %v7491_v57, %v4177_v25 }
 0x75b   : > { %v4417_v13 = vpop.f32.mrf.mxu0  ;;  %v4370_v24 = vadd.f32 %v5628_v58, %v4283_v9 }
 0x75c   : > { %v4339_v32 = vpop.f32.mrf.mxu1  ;;  %v4369_v61 = vadd.f32 %v5627_v12, %v4282_v15  ;;  %v4448_v18 = vadd.f32 %v4417_v13, %v4367_v34 }
 0x75d   : > { %v5638_v53 = vpop.f32.mrf.mxu0  ;;  %v4368_v35 = vadd.f32 %v4339_v32, %v4281_v3  ;;  %v7492_v52 = vld [vmem:[#allocation19_spill] sm:$0xff] }
 0x75e   : > { %v5631_v21 = vpop.f32.mrf.mxu1  ;;  %v4450_v29 = vadd.f32 %v5637_v54, %v4369_v61  ;;  %v4451_v11 = vadd.f32 %v5638_v53, %v4370_v24  ;;  %v4287_v14 = vadd.f32 %v7492_v52, %v4178_v49 }
 0x75f   : > { %v4420_v44 = vpop.f32.mrf.mxu0  ;;  %v7493_v32 = vld [vmem:[#allocation15_spill] sm:$0xff]  ;;  %v4373_v41 = vadd.f32 %v5631_v21, %v4286_v5 }
 0x760   : > { %v4352_v27 = vpop.f32.mrf.mxu1  ;;  %v4449_v62 = vadd.f32 %v4420_v44, %v4368_v35  ;;  %v4285_v20 = vadd.f32 %v7493_v32, %v4176_v46 }
 0x761   : > { %v5641_v26 = vpop.f32.mrf.mxu0  ;;  %v4371_v22 = vadd.f32 %v4352_v27, %v4284_v42 }
 0x762   : > { %v5632_v55 = vpop.f32.mrf.mxu1  ;;  %v4454_v21 = vadd.f32 %v5641_v26, %v4373_v41 }
 0x763   : > { %v4433_v48 = vpop.f32.mrf.mxu0  ;;  %v4374_v56 = vadd.f32 %v5632_v55, %v4287_v14 }
 0x764   : > { %v4355_v30 = vpop.f32.mrf.mxu1  ;;  %v4452_v45 = vadd.f32 %v4433_v48, %v4371_v22 }
 0x765   : > { %v5642_v50 = vpop.f32.mrf.mxu0  ;;  %v4372_v53 = vadd.f32 %v4355_v30, %v4285_v20 }
 0x766   : > { %v5647_v2 = vpop.f32.mrf.mxu1  ;;  %v4455_v10 = vadd.f32 %v5642_v50, %v4374_v56 }
 0x767   : > { %v7243_v40 = vadd.f32 %v5647_v2, %v4450_v29  ;;  %v4436_v60 = vpop.f32.mrf.mxu0 }
 0x768   : > { %v4502_v47 = vpop.f32.mrf.mxu1  ;;  %v4453_v39 = vadd.f32 %v4436_v60, %v4372_v53 }
 0x769   : > { %v7240_v43 = vadd.f32 %v4502_v47, %v4448_v18  ;;  %v4567_v13 = vmul.f32 %v7243_v40, %v7243_v40  ;;  %v4544_v16 = vsel %vm3525_vm4, %v7243_v40, 0.0 }
 0x76a   : > { %v5648_v12 = vpop.f32.mrf.mxu1 }
 0x76b   : > { %v4565_v51 = vmul.f32 %v7240_v43, %v7240_v43  ;;  %v7249_v54 = vadd.f32 %v5648_v12, %v4451_v11  ;;  %v4541_v4 = vsel %vm3525_vm4, %v7240_v43, 0.0  ;;  %v4576_v1 = vsel %vm3525_vm4, %v4567_v13, 0.0 }
 0x76c   : > { %v4505_v7 = vpop.f32.mrf.mxu1 }
 0x76d   : > { %v7251_v58 = vadd.f32 %v4505_v7, %v4449_v62  ;;  %v4573_v8 = vsel %vm3525_vm4, %v4565_v51, 0.0  ;;  %v4568_v19 = vmul.f32 %v7249_v54, %v7249_v54  ;;  %v4546_v55 = vsel %vm3525_vm4, %v7249_v54, 0.0 }
 0x76e   : > { %v5651_v31 = vpop.f32.mrf.mxu1 }
 0x76f   : > { %v4542_v6 = vsel %vm3525_vm4, %v7251_v58, 0.0  ;;  %v4566_v33 = vmul.f32 %v7251_v58, %v7251_v58  ;;  %v7272_v15 = vadd.f32 %v5651_v31, %v4454_v21  ;;  %v4578_v30 = vsel %vm3525_vm4, %v4568_v19, 0.0 }
 0x770   : > { %v4543_v36 = vadd.f32 %v4542_v6, %v4541_v4  ;;  %v4518_v44 = vpop.f32.mrf.mxu1 }
 0x771   : > { %v4574_v0 = vsel %vm3525_vm4, %v4566_v33, 0.0  ;;  %v7267_v27 = vadd.f32 %v4518_v44, %v4452_v45  ;;  %v4571_v25 = vmul.f32 %v7272_v15, %v7272_v15  ;;  %v4552_v49 = vsel %vm3525_vm4, %v7272_v15, 0.0 }
 0x772   : > { %v4545_v17 = vadd.f32 %v4544_v16, %v4543_v36  ;;  %v4575_v59 = vadd.f32 %v4574_v0, %v4573_v8  ;;  %v5652_v28 = vpop.f32.mrf.mxu1  ;;  %v5915_v36 = vmov 1983009808   ;;  %v5916_v8 = vmov 1934713408  }
 0x773   : > { %v4569_v34 = vmul.f32 %v7267_v27, %v7267_v27  ;;  %v4548_v9 = vsel %vm3525_vm4, %v7267_v27, 0.0  ;;  %v7279_v3 = vadd.f32 %v5652_v28, %v4455_v10  ;;  %v4584_v5 = vsel %vm3525_vm4, %v4571_v25, 0.0 }
 0x774   : > { %v4577_v26 = vadd.f32 %v4576_v1, %v4575_v59  ;;  %v4547_v63 = vadd.f32 %v4546_v55, %v4545_v17  ;;  %v4521_v23 = vpop.f32.mrf.mxu1  ;;  %v4665_v44 = vunpack.c.l.s4 %v5915_v36  ;;  %v4729_v19 = vunpack.c.l.s4 %v5916_v8 }
 0x775   : > { %v7281_v61 = vadd.f32 %v4521_v23, %v4453_v39  ;;  %v4580_v2 = vsel %vm3525_vm4, %v4569_v34, 0.0  ;;  %v4572_v42 = vmul.f32 %v7279_v3, %v7279_v3  ;;  %v4554_v57 = vsel %vm3525_vm4, %v7279_v3, 0.0  ;;  %v7494_v39 = vld [vmem:[#allocation14_spill] sm:$0xff] }
 0x776   : > { %v4549_v37 = vadd.f32 %v4548_v9, %v4547_v63  ;;  %v4579_v38 = vadd.f32 %v4578_v30, %v4577_v26  ;;  %v4666_v0 = vunpack.c.0.s8 %v4665_v44  ;;  %v4730_v10 = vunpack.c.0.s8 %v4729_v19 }
 0x777   : > { %v4550_v24 = vsel %vm3525_vm4, %v7281_v61, 0.0  ;;  %v4570_v18 = vmul.f32 %v7281_v61, %v7281_v61  ;;  %v4586_v11 = vsel %vm3525_vm4, %v4572_v42, 0.0 }
 0x778   : > { %v4551_v35 = vadd.f32 %v4550_v24, %v4549_v37  ;;  %v4581_v48 = vadd.f32 %v4580_v2, %v4579_v38  ;;  %v4669_v17 = vsub.s32 %v4666_v0, %v7494_v39  ;;  %v7305_v59 = vsub.s32 %v4730_v10, %v7494_v39  ;;  %v5105_v37 = vld [vmem:[%s7388_s12] ss:$0 sm:$0xff] }
 0x779   : > { %v4582_v46 = vsel %vm3525_vm4, %v4570_v18, 0.0 }
 0x77a   : > { %v4553_v47 = vadd.f32 %v4552_v49, %v4551_v35  ;;  %v4583_v29 = vadd.f32 %v4582_v46, %v4581_v48  ;;  %v5107_v46 = vld [vmem:[%s499_s21] ss:$0 sm:$0xff]  ;;  %s496_s21 = scalar_lea.vmem [#allocation5], %s4942_s28 }
 0x77b   : > { %s4855_s14 = sshll.u32 %s496_s21, 4  ;;  %s4856_s14 = int_to_ptr.vmem [resolvable:$true] %s4855_s14 }
 0x77c   : > { %v4555_v22 = vadd.f32 %v4554_v57, %v4553_v47  ;;  %v4585_v12 = vadd.f32 %v4584_v5, %v4583_v29 }
 0x77e   : > { %4556 = vadd.xlane.f32.xlu1 %v4555_v22  ;;  %v4587_v62 = vadd.f32 %v4586_v11, %v4585_v12 }
 0x780   : > { %4588 = vadd.xlane.f32.xlu0 %v4587_v62 }
 0x807   : > { %v4557_v50 = vpop.xlane.xlu1 %4556 }
 0x808   : > { %v4558_v52 = vrot.slane %v4557_v50, 4 }
 0x809   : > { %v4589_v14 = vpop.xlane.xlu0 %4588 }
 0x80a   : > { %v4559_v32 = vadd.f32 %v4558_v52, %v4557_v50  ;;  %v4590_v20 = vrot.slane %v4589_v14, 4 }
 0x80c   : > { %v4560_v41 = vrot.slane %v4559_v32, 2  ;;  %v4591_v7 = vadd.f32 %v4590_v20, %v4589_v14 }
 0x80e   : > { %v4561_v51 = vadd.f32 %v4560_v41, %v4559_v32  ;;  %v4592_v56 = vrot.slane %v4591_v7, 2 }
 0x810   : > { %v4562_v45 = vrot.slane %v4561_v51, 1  ;;  %v4593_v53 = vadd.f32 %v4592_v56, %v4591_v7 }
 0x812   : > { %v4563_v31 = vadd.f32 %v4562_v45, %v4561_v51  ;;  %v4594_v13 = vrot.slane %v4593_v53, 1 }
 0x814   : > { %v4564_v60 = vmul.f32 0.001953125, %v4563_v31  ;;  %v4595_v4 = vadd.f32 %v4594_v13, %v4593_v53 }
 0x816   : > { %v4596_v6 = vmul.f32 0.001953125, %v4595_v4  ;;  %v4597_v33 = vmul.f32 %v4564_v60, %v4564_v60  ;;  %v4599_v28 = vsub.f32 %v7240_v43, %v4564_v60  ;;  %v4600_v1 = vsub.f32 %v7251_v58, %v4564_v60 }
 0x817   : > { %v4601_v55 = vsub.f32 %v7243_v40, %v4564_v60  ;;  %v4602_v34 = vsub.f32 %v7249_v54, %v4564_v60  ;;  %v4603_v63 = vsub.f32 %v7267_v27, %v4564_v60  ;;  %v4604_v23 = vsub.f32 %v7281_v61, %v4564_v60 }
 0x818   : > { %v4598_v21 = vsub.f32 %v4596_v6, %v4597_v33  ;;  %v4605_v30 = vsub.f32 %v7272_v15, %v4564_v60  ;;  %v4606_v9 = vsub.f32 %v7279_v3, %v4564_v60  ;;  %v5106_v15 = vld [vmem:[%s7389_s13] ss:$0 sm:$0xff] }
 0x81a   : > { %v4607_v16 = vadd.f32 1e-05, %v4598_v21 }
 0x81c   : > { %5814 = vrsqrt.f32 %v4607_v16 }
 0x829   : > { %v5815_v26 = vpop.eup %5814 }
 0x82a   : > { %v4609_v43 = vmul.f32 %v5815_v26, %v4599_v28  ;;  %v4610_v40 = vmul.f32 %v5815_v26, %v4600_v1  ;;  %v4611_v54 = vmul.f32 %v5815_v26, %v4601_v55  ;;  %v4612_v58 = vmul.f32 %v5815_v26, %v4602_v34 }
 0x82b   : > { %v4613_v38 = vmul.f32 %v5815_v26, %v4603_v63  ;;  %v4614_v27 = vmul.f32 %v5815_v26, %v4604_v23  ;;  %v4615_v25 = vmul.f32 %v5815_v26, %v4605_v30  ;;  %v4616_v61 = vmul.f32 %v5815_v26, %v4606_v9 }
 0x82c   : > { %v4625_v3 = vmul.f32 %v5105_v37, %v4609_v43  ;;  %v4626_v2 = vmul.f32 %v5105_v37, %v4610_v40  ;;  %v4627_v24 = vmul.f32 %v5105_v37, %v4611_v54  ;;  %v4628_v18 = vmul.f32 %v5105_v37, %v4612_v58 }
 0x82d   : > { %v4629_v35 = vmul.f32 %v5105_v37, %v4613_v38  ;;  %v4630_v48 = vmul.f32 %v5105_v37, %v4614_v27  ;;  %v4631_v49 = vmul.f32 %v5105_v37, %v4615_v25  ;;  %v4632_v42 = vmul.f32 %v5105_v37, %v4616_v61 }
 0x82e   : > { %v4639_v47 = vadd.f32 %v5106_v15, %v4625_v3  ;;  %v4640_v29 = vadd.f32 %v5106_v15, %v4626_v2  ;;  %v4641_v57 = vadd.f32 %v5106_v15, %v4627_v24  ;;  %v4642_v5 = vadd.f32 %v5106_v15, %v4628_v18 }
 0x82f   : > { %v4643_v22 = vadd.f32 %v5106_v15, %v4629_v35  ;;  %v4644_v12 = vadd.f32 %v5106_v15, %v4630_v48  ;;  %v4645_v11 = vadd.f32 %v5106_v15, %v4631_v49  ;;  %v4646_v62 = vadd.f32 %v5106_v15, %v4632_v42 }
 0x830   : > { %v4654_v50 = vadd.f32 %v5107_v46, %v4639_v47  ;;  %v4655_v52 = vadd.f32 %v5107_v46, %v4640_v29  ;;  %v4656_v14 = vadd.f32 %v5107_v46, %v4641_v57  ;;  %v4657_v32 = vadd.f32 %v5107_v46, %v4642_v5 }
 0x831   : > { %v4658_v20 = vadd.f32 %v5107_v46, %v4643_v22  ;;  %v4659_v41 = vadd.f32 %v5107_v46, %v4644_v12  ;;  %v4660_v7 = vadd.f32 %v5107_v46, %v4645_v11  ;;  %v4661_v51 = vadd.f32 %v5107_v46, %v4646_v62 }
 0x832   : > { %v4662_v56 = vcombine.low %v4654_v50, %v4656_v14  ;;  %v4678_v45 = vcombine.low %v4655_v52, %v4657_v32  ;;  %v4663_v53 = vcombine.high %v4654_v50, %v4656_v14  ;;  %v4679_v31 = vcombine.high %v4655_v52, %v4657_v32 }
 0x833   : > { %v4694_v13 = vcombine.low %v4658_v20, %v4660_v7  ;;  %v4710_v60 = vcombine.low %v4659_v41, %v4661_v51  ;;  %v4695_v4 = vcombine.high %v4658_v20, %v4660_v7  ;;  %v4711_v6 = vcombine.high %v4659_v41, %v4661_v51 }
 0x834   : > { %v4670_v33 = vrot.slane %v4662_v56, %v4669_v17  ;;  %v4686_v21 = vrot.slane %v4678_v45, %v4669_v17  ;;  %v4677_v16 = vrot.slane %v4663_v53, %v4669_v17  ;;  %v4693_v36 = vrot.slane %v4679_v31, %v4669_v17 }
 0x835   : > { %v4702_v44 = vrot.slane %v4694_v13, %v4669_v17  ;;  %v4718_v8 = vrot.slane %v4710_v60, %v4669_v17  ;;  %v4709_v19 = vrot.slane %v4695_v4, %v4669_v17  ;;  %v4725_v0 = vrot.slane %v4711_v6, %v4669_v17 }
 0x836   : > { %v4727_v10 = vcombine.high %v4670_v33, %v4686_v21  ;;  %v4726_v39 = vcombine.low %v4670_v33, %v4686_v21  ;;  %v4742_v55 = vcombine.low %v4677_v16, %v4693_v36  ;;  %v4743_v9 = vcombine.high %v4677_v16, %v4693_v36 }
 0x837   : > { %v4759_v28 = vcombine.high %v4702_v44, %v4718_v8  ;;  %v4758_v1 = vcombine.low %v4702_v44, %v4718_v8  ;;  %v4774_v34 = vcombine.low %v4709_v19, %v4725_v0  ;;  %v4775_v37 = vcombine.high %v4709_v19, %v4725_v0 }
 0x838   : > { %v4741_v26 = vrot.slane %v4727_v10, %v7305_v59  ;;  %v4734_v63 = vrot.slane %v4726_v39, %v7305_v59  ;;  %v4750_v17 = vrot.slane %v4742_v55, %v7305_v59  ;;  %v4757_v25 = vrot.slane %v4743_v9, %v7305_v59 }
 0x839   : > { %v4773_v23 = vrot.slane %v4759_v28, %v7305_v59  ;;  %v4766_v30 = vrot.slane %v4758_v1, %v7305_v59  ;;  %v4782_v54 = vrot.slane %v4774_v34, %v7305_v59  ;;  %v4789_v61 = vrot.slane %v4775_v37, %v7305_v59 }
 0x83b   : > { %v4792_v43 = vcombine.low %v4741_v26, %v4773_v23  ;;  %v4791_v40 = vcombine.high %v4734_v63, %v4766_v30  ;;  %v4790_v58 = vcombine.low %v4734_v63, %v4766_v30  ;;  %v4795_v38 = vcombine.high %v4750_v17, %v4782_v54 }
 0x83c   : > { %v4793_v27 = vcombine.high %v4741_v26, %v4773_v23  ;;  %v4797_v15 = vcombine.high %v4757_v25, %v4789_v61  ;;  %v4794_v3 = vcombine.low %v4750_v17, %v4782_v54  ;;  %v4796_v2 = vcombine.low %v4757_v25, %v4789_v61 }
 0x83d   : > { %4803 = vrot.lane.b32.xlu0 %v4792_v43, %s5917_s15  ;;  %4799 = vrot.lane.b32.xlu1 %v4791_v40, %s5918_s19  ;;  %s7496_s19 = sld [smem:[#allocation28_spill]] }
 0x841   : > { %4815 = vrot.lane.b32.xlu0 %v4795_v38, %s5919_s24  ;;  %4807 = vrot.lane.b32.xlu1 %v4793_v27, %s5920_s27  ;;  %s4842_s27 = scalar_lea.sflag [#allocation4], %s6097_s25 }
 0x843   : > { %s7339_s24 = scalar_lea.hbm %s7496_s19, %s5109_s20 }
 0x845   : > { %4823 = vrot.lane.b32.xlu0 %v4797_v15, %s5921_s18  ;;  %4811 = vrot.lane.b32.xlu1 %v4794_v3, %s5922_s22  ;;  %s5844_s18 = scalar_lea.vmem %s4856_s14, 128  ;;  %s5848_s22 = sshll.u32 %s5924_s17, 4  ;;  %s5849_s22 = int_to_ptr.vmem [resolvable:$false] %s5848_s22 }
 0x846   : > { %p5845_p12 = scmp.ne.s32.totalorder %s4856_s14, %s5844_s18  ;;  %p5851_p7 = scmp.lt.s32.totalorder %s4856_s14, %s5849_s22 }
 0x848   : > { %p5846_p4 = pnand %p5845_p12, %p7497_p13 }
 0x849   : > { %4819 = vrot.lane.b32.xlu1 %v4796_v2, %s5923_s26  ;;  %s5850_s26 = scalar_lea.vmem %s5849_s22, 256 }
 0x84a   : > { %p5847_p5 = pneg %p5846_p4  ;;  %p5852_p8 = scmp.lt.s32.totalorder %s5850_s26, %s5844_s18 }
 0x84c   : > { %p5853_p10 = por %p5852_p8, %p5851_p7 }
 0x84e   : > { %p5854_p0 = pnand %p5853_p10, %p5847_p5 }
 0x8af   : > { %v4800_v24 = vpop.permute.xlu1 %4799  ;;  %v4804_v18 = vpop.permute.xlu0 %4803 }
 0x8b0   : > { %v4826_v35 = vsel %vm3525_vm4, %v4790_v58, %v4800_v24 }
 0x8b1   : > { %v4828_v49 = vsel %vm4827_vm6, %v4826_v35, %v4804_v18 }
 0x8b3   : > { %v4808_v59 = vpop.permute.xlu1 %4807  ;;  %v4816_v48 = vpop.permute.xlu0 %4815 }
 0x8b4   : > { %v4830_v42 = vsel %vm4829_vm7, %v4828_v49, %v4808_v59 }
 0x8b7   : > { %v4812_v46 = vpop.permute.xlu1 %4811  ;;  %v4824_v5 = vpop.permute.xlu0 %4823 }
 0x8b8   : > { %v4832_v47 = vsel %vm4831_vm8, %v4830_v42, %v4812_v46 }
 0x8b9   : > { %v4834_v57 = vsel %vm4833_vm9, %v4832_v47, %v4816_v48 }
 0x8bb   : > { %v4820_v29 = vpop.permute.xlu1 %4819 }
 0x8bc   : > { %v4836_v22 = vsel %vm4835_vm10, %v4834_v57, %v4820_v29 }
 0x8bd   : > { %v4838_v12 = vsel %vm4837_vm11, %v4836_v22, %v4824_v5 }
 0x8be   : > { %4840 = vst.msk [vmem:[%s496_s21] sm:$0xff] %vm4839_vm12, %v4838_v12 }
 0x8bf   : > { %5857 = shalt.err (!%p5854_p0)
}
 0x8c0   : > { %s5858_s28 = scalar_lea.hbm %s7339_s24, 128  ;;  %s5862_s21 = scalar_lea.hbm %s7496_s19, 256 }
 0x8c1   : > { %p5859_p2 = scmp.ne.s32.totalorder %s7339_s24, %s5858_s28  ;;  %p5863_p3 = scmp.lt.s32.totalorder %s7339_s24, %s7496_s19 }
 0x8c2   : > { %p5864_p6 = scmp.lt.s32.totalorder %s5862_s21, %s5858_s28 }
 0x8c3   : > { %p5860_p9 = pnand %p5859_p2, %p7497_p13 }
 0x8c4   : > { %p5865_p11 = por %p5864_p6, %p5863_p3 }
 0x8c5   : > { %p5861_p1 = pneg %p5860_p9 }
 0x8c7   : > { %p5866_p12 = pnand %p5865_p11, %p5861_p1 }
 0x8c9   : > { %5869 = shalt.err (!%p5866_p12)
}
 0x8ca   : > { %5691 = dma.vmem_to_hbm [thread:$0]  (%p7497_p13), %s4856_s14, 128, %s7339_s24, %s4842_s27  }
 0x8cb PF: > { %s7498_s18 = sld [smem:[#allocation8_spill]]  ;;  %p7501_p5 = scmp.ge.s32.totalorder %s5908_s16, 2 }
 0x8cc   : > { %s7499_s17 = sld [smem:[#allocation13_spill]] }
 0x8d1   : > { %s4867_s22 = sand.u32 1, %s7498_s18  }
 0x8d2   : > { %p7500_p4 = scmp.ne.s32.totalorder %s7499_s17, 0  ;;  %s4868_s26 = scalar_lea.sflag [#allocation4], %s4867_s22 }
 0x8d4   : > { %p5698_p7 = pnand %p7501_p5, %p7500_p4 }
 0x8d6   : > { %p5699_p8 = pneg %p5698_p7 }
 0x8d8   : > { %5891 = dma.done.wait (%p5699_p8), %s4868_s26, 128  }
 0x8d9   : > { %5893 = vsyncadd (%p5699_p8), %s4868_s26, 4294967168  ;;  %s7502_s16 = sld [smem:[#allocation10_spill]]  ;;  %s7505_s29 = smov %s5900_s30 }
 0x8da   : > { %s7503_s28 = sld [smem:[#allocation9_spill]] }
 0x8db   : > { %s7504_s15 = sld [smem:[#allocation11_spill]] }
 0x8df   : > { %p27_p10 = scmp.ge.s32.totalorder %s7502_s16, 4  }
 0x8e0   : > { %s7506_s30 = smov %s7503_s28 }
 0x8e1   :  { %29 = sbr.rel (!%p27_p10) target bundleno = 7 (0x7), region = 124 }
 0x8e6   :  { %4873 = vsyncpa [#allocation3], 1 }
 0x8e7   :  { %4875 = vsyncpa [#allocation3 + $0x1], 1 }
 0x8e8   :  { %4876 = vsyncpa [#allocation4], 1 }
 0x8e9   :  { %4878 = vsyncpa [#allocation4 + $0x1], 1 }

// kernel: tpu_custom_call.1
= control target key start
LH: loop header
LB: loop body
LE: loop exit
PB: predicated region body
PF: predicated region fallthrough
CT: control target
= control target key end

     0   :  { %s7376_s0 = inlined_call_operand.hbm [shape: f32[2,8,2,8,8], index: 0, kind: input, shape index: {}]   ;;  %s7377_s1 = inlined_call_operand.vmem [shape: f32[2,1,8], index: 1, kind: input, shape index: {}]   ;;  %s7378_s2 = inlined_call_operand.vmem [shape: bf16[36,4], index: 2, kind: input, shape index: {}]   ;;  %s7379_s3 = inlined_call_operand.vmem [shape: f32[1,4], index: 3, kind: input, shape index: {}]   ;;  %s7380_s4 = inlined_call_operand.vmem [shape: f32[1,4], index: 4, kind: input, shape index: {}]   ;;  %s7381_s5 = inlined_call_operand.vmem [shape: bf16[36,4], index: 5, kind: input, shape index: {}]   ;;  %s7382_s6 = inlined_call_operand.vmem [shape: f32[1,4], index: 6, kind: input, shape index: {}]   ;;  %s7383_s7 = inlined_call_operand.vmem [shape: f32[1,4], index: 7, kind: input, shape index: {}]   ;;  %s7384_s8 = inlined_call_operand.vmem [shape: bf16[36,8], index: 8, kind: input, shape index: {}]   ;;  %s7385_s9 = inlined_call_operand.vmem [shape: f32[1,8], index: 9, kind: input, shape index: {}]   ;;  %s7386_s10 = inlined_call_operand.vmem [shape: f32[1,8], index: 10, kind: input, shape index: {}]   ;;  %s7387_s11 = inlined_call_operand.vmem [shape: bf16[72,8], index: 11, kind: input, shape index: {}]   ;;  %s7388_s12 = inlined_call_operand.vmem [shape: f32[1,8], index: 12, kind: input, shape index: {}]   ;;  %s7389_s13 = inlined_call_operand.vmem [shape: f32[1,8], index: 13, kind: input, shape index: {}]   ;;  %s7390_s14 = inlined_call_operand.hbm [shape: f32[2,8,64], index: 14, kind: output, shape index: {}]  }
   0x1   :  { %7426 = sst [smem:[#allocation28_spill]] %s7390_s14 }
   0x2   :  { %19 = vsyncpa [#allocation3], 0 }
   0x3   :  { %21 = vsyncpa [#allocation3 + $0x1], 0 }
   0x4   :  { %22 = vsyncpa [#allocation4], 0 }
   0x5   :  { %24 = vsyncpa [#allocation4 + $0x1], 0  ;;  %s6000_s29 = smov 0   ;;  %s6002_s30 = smov 0  }
   0x6   :  { %s6004_s15 = smov 0   ;;  %s6006_s16 = smov 0  }
   0x7 LB: > { %7427 = sst [smem:[#allocation8_spill]] %s5896_s29  ;;  %s6021_s17 = sadd.s32 4294967295, %s5908_s16   ;;  %s5908_s16 = sphi %s6006_s16, %s7502_s16   ;;  %s5904_s15 = sphi %s6004_s15, %s7504_s15   ;;  %s5900_s30 = sphi %s6002_s30, %s7506_s30   ;;  %s5896_s29 = sphi %s6000_s29, %s7505_s29  }
   0x8   : > { %7428 = sst [smem:[#allocation9_spill]] %s5904_s15  ;;  %s4934_s18 = sadd.s32 4294967294, %s5908_s16  }
   0x9   : > { %s6025_s19 = sadd.s32 1, %s5908_s16   ;;  %s37_s20 = sadd.s32 1, %s5904_s15 }
   0xa   : > { %7429 = sst [smem:[#allocation10_spill]] %s6025_s19  ;;  %s34_s21 = ssub.s32 %s5908_s16, %s6025_s19 }
   0xb   : > { %p44_p0 = scmp.ne.s32.totalorder %s5904_s15, %s5900_s30  ;;  %p35_p1 = scmp.eq.s32.totalorder %s34_s21, 0 }
   0xc   : > { %p45_p2 = scmp.eq.s32.totalorder %s5908_s16, 0  ;;  %p50_p3 = scmp.ne.s32.totalorder %s5900_s30, %s5896_s29 }
   0xd   : > { %p51_p4 = scmp.eq.s32.totalorder %s6021_s17, 0  ;;  %p352_p7 = scmp.eq.s32.totalorder %s6021_s17, 1 }
   0xe   : > { %s6037_s22 = scalar_select %p35_p1, %s5904_s15, %s37_s20  }
   0xf   : > { %p6039_p5 = por %p45_p2, %p44_p0  ;;  %p6043_p6 = por %p51_p4, %p50_p3 }
  0x10   : > { %7430 = sst [smem:[#allocation11_spill]] %s6037_s22  ;;  %p358_p8 = scmp.eq.s32.totalorder %s4934_s18, 1 }
  0x11   : > { %s7432_s24 = scalar_select %p6043_p6, 1, 0 }
  0x12   : > { %p5701_p10 = scmp.lt.s32.totalorder %s5908_s16, 2  ;;  %p6050_p11 = por %p352_p7, %p44_p0 }
  0x13   : > { %p6054_p12 = por %p358_p8, %p50_p3  ;;  %s414_s27 = sand.u32 1, %s5904_s15  }
  0x14   : > { %s7433_s25 = scalar_select %p6050_p11, 1, 0 }
  0x15   : > { %s7435_s26 = scalar_select %p6054_p12, 1, 0 }
  0x16   : > { %7434 = sst [smem:[#allocation12_spill]] %s7433_s25  ;;  %s5112_s28 = sshll.u32 %s5908_s16, 11 }
  0x17   : > { %7436 = sst [smem:[#allocation13_spill]] %s7435_s26  ;;  %s4937_s20 = sshll.u32 %s414_s27, 7 }
  0x18   : > { %s6063_s19 = scalar_lea.hbm %s7376_s0, %s5112_s28  ;;  %s418_s18 = scalar_lea.vmem [#allocation2], %s4937_s20 }
  0x19   : > { %s425_s29 = sshll.u32 %s418_s18, 4  ;;  %p6067_p13 = pnand %p5701_p10, %p6039_p5  ;;  %s6071_s29 = int_to_ptr.vmem [resolvable:$true] %s425_s29 }
  0x1a   : > { %s6073_s15 = scalar_lea.sflag [#allocation3], %s414_s27  ;;  %s5816_s26 = scalar_lea.hbm %s6063_s19, 2048 }
  0x1b   : > { %p5817_p0 = scmp.ne.s32.totalorder %s6063_s19, %s5816_s26  ;;  %p5818_p1 = pneg %p6067_p13 }
  0x1c   : > { %s5821_s20 = scalar_lea.hbm %s7376_s0, 4096  ;;  %p5822_p4 = scmp.lt.s32.totalorder %s6063_s19, %s7376_s0 }
  0x1d   : > { %p5819_p2 = pnand %p5818_p1, %p5817_p0  ;;  %p5823_p5 = scmp.lt.s32.totalorder %s5821_s20, %s5816_s26 }
  0x1f   : > { %p5820_p3 = pneg %p5819_p2  ;;  %p5824_p7 = por %p5823_p5, %p5822_p4 }
  0x21   : > { %p5825_p8 = pnand %p5824_p7, %p5820_p3 }
  0x23   : > { %5828 = shalt.err (!%p5825_p8)
}
  0x24   : > { %s5829_s27 = scalar_lea.vmem %s6071_s29, 2048  ;;  %s5910_s18 = smov [#allocation2]  }
  0x25   : > { %p5830_p10 = scmp.ne.s32.totalorder %s6071_s29, %s5829_s27  ;;  %s5834_s25 = sshll.u32 %s5910_s18, 4  ;;  %s5835_s25 = int_to_ptr.vmem [resolvable:$false] %s5834_s25 }
  0x26   : > { %s5836_s22 = scalar_lea.vmem %s5835_s25, 4096  ;;  %p5837_p2 = scmp.lt.s32.totalorder %s6071_s29, %s5835_s25 }
  0x27   : > { %p5832_p9 = pnand %p5830_p10, %p5818_p1  ;;  %p5838_p12 = scmp.lt.s32.totalorder %s5836_s22, %s5829_s27 }
  0x29   : > { %p5833_p0 = pneg %p5832_p9  ;;  %p5839_p11 = por %p5838_p12, %p5837_p2 }
  0x2b   : > { %p5840_p6 = pnand %p5839_p11, %p5833_p0 }
  0x2d   : > { %5843 = shalt.err (!%p5840_p6)
}
  0x2e   : > { %s5911_s26 = smov 128   ;;  %s5912_s28 = smov 8  }
  0x2f   : > { %5696 = dma.hbm_to_vmem [thread:$0]  (!%p6067_p13), %s6063_s19, 2048, %s6071_s29, %s6073_s15, %s5911_s26, %s5911_s26, %s5912_s28  }
  0x30   : > { %p4940_p9 = scmp.ge.s32.totalorder %s5908_s16, 1  ;;  %p439_p1 = scmp.lt.s32.totalorder %s5908_s16, 3 }
  0x32   : > { %p440_p3 = pnand %p4940_p9, %p439_p1 }
  0x34   : > { %443 = sbr.rel (%p440_p3) target bundleno = 2251 (0x8cb), region = 76 }
  0x39   : > { %s6097_s25 = sand.u32 1, %s5900_s30   ;;  %p7438_p6 = scmp.ne.s32.totalorder %s7432_s24, 0 }
  0x3a   : > { %s4941_s20 = sshll.u32 %s6097_s25, 7  ;;  %s446_s23 = scalar_lea.sflag [#allocation3], %s6097_s25 }
  0x3b   : > { %s6101_s21 = scalar_lea.vmem [#allocation2], %s4941_s20 }
  0x3c   : > { %5887 = dma.done.wait (%p7438_p6), %s446_s23, 2048  }
  0x3d   : > { %5889 = vsyncadd (%p7438_p6), %s446_s23, 4294965248  ;;  %v509_v0 = vld [vmem:[%s6101_s21 + $0x20] sm:$0xff]  ;;  %v510_v1 = vld [vmem:[%s6101_s21 + $0x28] sm:$0xff]  ;;  %s5913_s14 = smov 124   ;;  %vm622_vm0 = vcmask 1041408   ;;  %v501_v32 = vlaneseq  ;;  %v7401_v35 = vmov 0.0  }
  0x3e   : > { %v505_v2 = vld [vmem:[%s6101_s21] sm:$0xff]  ;;  %v523_v3 = vmax.f32 %v509_v0, %v510_v1  ;;  %v506_v4 = vld [vmem:[%s6101_s21 + $0x8] sm:$0xff]  ;;  %v511_v5 = vld [vmem:[%s6101_s21 + $0x30] sm:$0xff]  ;;  %v577_v36 = vrot.slane %v7401_v35, 7  ;;  %vm609_vm2 = vcmask 31744   ;;  %v771_v57 = vrot.slane %v7401_v35, 1 }
  0x3f   : > { %v512_v6 = vld [vmem:[%s6101_s21 + $0x38] sm:$0xff]  ;;  %v521_v7 = vmax.f32 %v505_v2, %v506_v4  ;;  %v507_v8 = vld [vmem:[%s6101_s21 + $0x10] sm:$0xff]  ;;  %v513_v14 = vld [vmem:[%s6101_s21 + $0x40] sm:$0xff]  ;;  %v6152_v33 = vshrl.u32 %v501_v32, 7  ;;  %vm3525_vm4 = vcmask 64512   ;;  %vm3719_vm5 = vcmask 1043456  }
  0x40   : > { %v508_v9 = vld [vmem:[%s6101_s21 + $0x18] sm:$0xff]  ;;  %541 = vrot.lane.b32.xlu1 %v523_v3, %s5913_s14  ;;  %v524_v10 = vmax.f32 %v511_v5, %v512_v6  ;;  %v515_v12 = vld [vmem:[%s6101_s21 + $0x50] sm:$0xff]  ;;  %v514_v15 = vld [vmem:[%s6101_s21 + $0x48] sm:$0xff]  ;;  %p497_p11 = scmp.lt.s32.totalorder %s6021_s17, 1  ;;  %s5917_s15 = smov 16   ;;  %vm4827_vm6 = vcmask 130048  }
  0x41   : > { %537 = vrot.lane.b32.xlu0 %v521_v7, %s5913_s14  ;;  %v522_v11 = vmax.f32 %v507_v8, %v508_v9  ;;  %v516_v13 = vld [vmem:[%s6101_s21 + $0x58] sm:$0xff]  ;;  %v5748_v16 = vld [vmem:[%s7378_s2] ss:$0 sps:$4 sm:$0xcc]   ;;  %v519_v17 = vld [vmem:[%s6101_s21 + $0x70] sm:$0xff]  ;;  %v525_v25 = vmax.f32 %v513_v14, %v514_v15  ;;  %7439 = vst [vmem:[#allocation14_spill] sm:$0xff] %v6152_v33 }
  0x42   : > { %v520_v18 = vld [vmem:[%s6101_s21 + $0x78] sm:$0xff]  ;;  %v599_v19 = vld [vmem:[%s7378_s2] sm:$0x3]  ;;  %v526_v20 = vmax.f32 %v515_v12, %v516_v13  ;;  %v608_v22 = vrot.slane %v5748_v16, 2  ;;  %v793_v23 = vld [vmem:[%s7378_s2 + $0x4] sm:$0x3] }
  0x43   : > { %v517_v21 = vld [vmem:[%s6101_s21 + $0x60] sm:$0xff]  ;;  %5654 = vmatprep.subr.msk.bf16.mxu1 %vm622_vm0, %v599_v19  ;;  %v704_v24 = vsel %vm622_vm0, %v599_v19, 0  ;;  %v518_v26 = vld [vmem:[%s6101_s21 + $0x68] sm:$0xff]  ;;  %v6144_v29 = vmax.f32 %v519_v17, %v520_v18  ;;  %vm503_vm1 = vcmp.eq.s32.totalorder %v6152_v33, 0  ;;  %v807_v55 = vsel %vm622_vm0, %v793_v23, 0  ;;  %s7301_s22 = scalar_select %p497_p11, %s6021_s17, 1 }
  0x44   : > { %543 = vrot.lane.b32.xlu1 %v524_v10, %s5913_s14  ;;  %5304 = vmatpush3.bf16.msra.mxu1 %v704_v24  ;;  %v624_v27 = vsel %vm622_vm0, %v608_v22, 0  ;;  %v5749_v28 = vld [vmem:[%s7378_s2 + $0x4] ss:$0 sps:$4 sm:$0xcc]   ;;  %v527_v30 = vmax.f32 %v517_v21, %v518_v26  ;;  %v6166_v44 = vsel %vm503_vm1, 0.0, %v577_v36  ;;  %vm504_vm3 = vcmp.eq.s32.totalorder %v6152_v33, 7 }
  0x45   : > { %539 = vrot.lane.b32.xlu0 %v522_v11, %s5913_s14  ;;  %5653 = vmatprep.subr.msk.bf16.mxu0 %vm622_vm0, %v608_v22  ;;  %v906_v31 = vrot.slane %v5749_v28, 2  ;;  %7442 = vst [vmem:[#allocation17_spill] sm:$0xff] %v6166_v44  ;;  %v6179_v50 = vld [vmem:[%s7378_s2 + $0x8] ss:$0 sps:$4 sm:$0xcc]   ;;  %v6222_v6 = vsel %vm504_vm3, 0.0, %v771_v57  ;;  %s499_s21 = scalar_lea.vmem %s7377_s1, %s7301_s22 }
  0x46   : > { %5294 = vmatpush3.bf16.msra.mxu0 %v624_v27  ;;  %v999_v59 = vld [vmem:[%s7378_s2 + $0x8] sm:$0x3]  ;;  %v1112_v2 = vrot.slane %v6179_v50, 2  ;;  %7447 = vst [vmem:[#allocation22_spill] sm:$0xff] %v6222_v6  ;;  %s5918_s19 = smov 8   ;;  %s5919_s24 = smov 40  }
  0x47   : > { %5655 = vmatprep.subr.msk.bf16.mxu0 %vm622_vm0, %v793_v23  ;;  %5656 = vmatprep.subr.msk.bf16.mxu1 %vm622_vm0, %v906_v31  ;;  %v920_v1 = vsel %vm622_vm0, %v906_v31, 0  ;;  %v5751_v28 = vld [vmem:[%s7378_s2 + $0xc] ss:$0 sps:$4 sm:$0xcc]   ;;  %v1013_v32 = vsel %vm622_vm0, %v999_v59, 0  ;;  %s5920_s27 = smov 24  }
  0x48   : > { %547 = vrot.lane.b32.xlu1 %v526_v20, %s5913_s14  ;;  %s5921_s18 = smov 56   ;;  %s5922_s22 = smov 32   ;;  %vm4829_vm7 = vcmask 195584   ;;  %vm4831_vm8 = vcmask 261120   ;;  %vm4833_vm9 = vcmask 326656   ;;  %vm4835_vm10 = vcmask 392192  }
  0x49   : > { %545 = vrot.lane.b32.xlu0 %v525_v25, %s5913_s14  ;;  %s5923_s26 = smov 48   ;;  %s4942_s28 = sshll.u32 %s6097_s25, 3  ;;  %vm4837_vm11 = vcmask 457728   ;;  %vm4839_vm12 = vcmask 523264  }
  0x4a   : > { %s5109_s20 = sshll.u32 %s6021_s17, 7  ;;  %s7495_s23 = sld [smem:[#allocation12_spill]] }
  0x4b   : > { %s5924_s17 = smov [#allocation5]  }
  0x4c   : > { %551 = vrot.lane.b32.xlu1 %v6144_v29, %s5913_s14 }
  0x4d   : > { %549 = vrot.lane.b32.xlu0 %v527_v30, %s5913_s14 }
  0x50   : > { %p7497_p13 = scmp.ne.s32.totalorder %s7495_s23, 0 }
  0xb2   : > { %v542_v34 = vpop.permute.xlu1 %541 }
  0xb3   : > { %v6155_v37 = vmax.f32 %v523_v3, %v542_v34  ;;  %v538_v38 = vpop.permute.xlu0 %537 }
  0xb4   : > { %v6158_v39 = vmax.f32 %v521_v7, %v538_v38 }
  0xb5   : > { %7440 = vst [vmem:[#allocation15_spill] sm:$0xff] %v6155_v37  ;;  %v580_v43 = vrot.slane %v6155_v37, 7  ;;  %v774_v15 = vrot.slane %v6155_v37, 1 }
  0xb6   : > { %7441 = vst [vmem:[#allocation16_spill] sm:$0xff] %v6158_v39  ;;  %v544_v40 = vpop.permute.xlu1 %543  ;;  %v600_v41 = vpack.c.bf16 %v6158_v39, %v7401_v35  ;;  %v578_v42 = vrot.slane %v6158_v39, 7  ;;  %v772_v58 = vrot.slane %v6158_v39, 1 }
  0xb7   : > { %v540_v45 = vpop.permute.xlu0 %539  ;;  %v6168_v46 = vmax.f32 %v524_v10, %v544_v40  ;;  %v6184_v53 = vsel %vm503_vm1, 0.0, %v580_v43  ;;  %v784_v24 = vsel %vm504_vm3, 0.0, %v774_v15  ;;  %v1208_v40 = vld [vmem:[%s7378_s2 + $0xc] sm:$0x3]  ;;  %v1293_v43 = vrot.slane %v5751_v28, 2 }
  0xb8   : > { %v6170_v47 = vmax.f32 %v522_v11, %v540_v45  ;;  %5295 = vmatprep.mubr.msk.bf16.mxu0 %vm609_vm2, %v600_v41  ;;  %v588_v48 = vsel %vm503_vm1, 0.0, %v578_v42  ;;  %v782_v7 = vsel %vm504_vm3, 0.0, %v772_v58  ;;  %v1126_v42 = vsel %vm622_vm0, %v1112_v2, 0 }
  0xb9   : > { %7443 = vst [vmem:[#allocation18_spill] sm:$0xff] %v6168_v46  ;;  %v595_v49 = vpack.c.bf16 %v588_v48, %v6166_v44  ;;  %v581_v61 = vrot.slane %v6168_v46, 7  ;;  %v789_v17 = vpack.c.bf16 %v782_v7, %v6222_v6  ;;  %v775_v23 = vrot.slane %v6168_v46, 1 }
  0xba   : > { %7444 = vst [vmem:[#allocation19_spill] sm:$0xff] %v6170_v47  ;;  %v548_v51 = vpop.permute.xlu1 %547  ;;  %v579_v52 = vrot.slane %v6170_v47, 7  ;;  %v6188_v54 = vpack.c.bf16 %v6155_v37, %v6170_v47  ;;  %v773_v16 = vrot.slane %v6170_v47, 1  ;;  %v996_v57 = vpack.c.bf16 %v6168_v46, %v6155_v37 }
  0xbb   : > { %5305 = vmatprep.mubr.msk.bf16.mxu1 %vm609_vm2, %v595_v49  ;;  %v546_v56 = vpop.permute.xlu0 %545  ;;  %v6198_v60 = vmax.f32 %v526_v20, %v548_v51  ;;  %v591_v8 = vsel %vm503_vm1, 0.0, %v581_v61  ;;  %v785_v34 = vsel %vm504_vm3, 0.0, %v775_v23  ;;  %v1213_v58 = vsel %vm622_vm0, %v1208_v40, 0  ;;  %v1378_v61 = vld [vmem:[%s7378_s2 + $0x10] sm:$0x3] }
  0xbc   : > { %v589_v62 = vsel %vm503_vm1, 0.0, %v579_v52  ;;  %v6203_v63 = vmax.f32 %v525_v25, %v546_v56  ;;  %5296 = vmatmul.mubr.msk.bf16.vlgmr.msra.gmra.mxu0 %vm609_vm2, %v6188_v54  ;;  %v783_v25 = vsel %vm504_vm3, 0.0, %v773_v16  ;;  %v899_v41 = vpack.c.bf16 %v591_v8, %v6184_v53 }
  0xbd   : > { %7445 = vst [vmem:[#allocation20_spill] sm:$0xff] %v6198_v60  ;;  %v6208_v0 = vpack.c.bf16 %v6184_v53, %v589_v62  ;;  %5314 = vmatpush3.bf16.msra.mxu0 %v807_v55  ;;  %v583_v11 = vrot.slane %v6198_v60, 7  ;;  %v898_v22 = vpack.c.bf16 %v589_v62, %v588_v48  ;;  %v995_v53 = vpack.c.bf16 %v6170_v47, %v6158_v39 }
  0xbe   : > { %7446 = vst [vmem:[#allocation21_spill] sm:$0xff] %v6203_v63  ;;  %v6214_v3 = vpack.c.bf16 %v6203_v63, %v6168_v46  ;;  %v582_v4 = vrot.slane %v6203_v63, 7  ;;  %5657 = vmatprep.subr.msk.bf16.mxu0 %vm622_vm0, %v999_v59  ;;  %v776_v20 = vrot.slane %v6203_v63, 1  ;;  %v552_v26 = vpop.permute.xlu1 %551  ;;  %v1104_v56 = vpack.c.bf16 %v783_v25, %v782_v7 }
  0xbf   : > { %5306 = vmatmul.mubr.msk.bf16.vlgmr.msra.gmra.mxu1 %vm609_vm2, %v6208_v0  ;;  %v550_v5 = vpop.permute.xlu0 %549  ;;  %v593_v18 = vsel %vm503_vm1, 0.0, %v583_v11  ;;  %v6272_v31 = vmax.f32 %v6144_v29, %v552_v26  ;;  %v777_v29 = vrot.slane %v6198_v60, 1  ;;  %v997_v59 = vpack.c.bf16 %v6198_v60, %v6203_v63 }
  0xc0   : > { %v6228_v9 = vmax.f32 %v527_v30, %v550_v5  ;;  %5299 = vmatprep.mubr.msk.bf16.mxu0 %vm609_vm2, %v6214_v3  ;;  %v592_v10 = vsel %vm503_vm1, 0.0, %v582_v4  ;;  %5324 = vmatpush3.bf16.msra.mxu1 %v920_v1  ;;  %v786_v27 = vsel %vm504_vm3, 0.0, %v776_v20  ;;  %v790_v30 = vpack.c.bf16 %v784_v24, %v783_v25 }
  0xc1   : > { %v6235_v12 = vpack.c.bf16 %v592_v10, %v591_v8  ;;  %5658 = vmatprep.subr.msk.bf16.mxu1 %vm622_vm0, %v1112_v2  ;;  %7449 = vst [vmem:[#allocation24_spill] sm:$0xff] %v6272_v31  ;;  %v791_v36 = vpack.c.bf16 %v786_v27, %v785_v34  ;;  %v900_v45 = vpack.c.bf16 %v593_v18, %v592_v10  ;;  %v889_v48 = vrot.slane %v6272_v31, 7 }
  0xc2   : > { %7448 = vst [vmem:[#allocation23_spill] sm:$0xff] %v6228_v9  ;;  %v6240_v13 = vpack.c.bf16 %v6228_v9, %v6198_v60  ;;  %v584_v14 = vrot.slane %v6228_v9, 7  ;;  %v778_v38 = vrot.slane %v6228_v9, 1  ;;  %v787_v50 = vsel %vm504_vm3, 0.0, %v777_v29 }
  0xc3   : > { %5309 = vmatprep.mubr.msk.bf16.mxu1 %vm609_vm2, %v6235_v12  ;;  %v897_v52 = vsel %vm503_vm1, 0.0, %v889_v48  ;;  %v1105_v62 = vpack.c.bf16 %v785_v34, %v784_v24  ;;  %v1298_v1 = vsel %vm622_vm0, %v1293_v43, 0  ;;  %v1106_v2 = vpack.c.bf16 %v787_v50, %v786_v27 }
  0xc4   : > { %5300 = vmatmul.mubr.msk.bf16.gmra.mxu0 %vm609_vm2, %v6240_v13  ;;  %v594_v19 = vsel %vm503_vm1, 0.0, %v584_v14  ;;  %v788_v49 = vsel %vm504_vm3, 0.0, %v778_v38  ;;  %v1095_v4 = vrot.slane %v6272_v31, 1  ;;  %v998_v5 = vpack.c.bf16 %v6272_v31, %v6228_v9 }
  0xc5   : > { %5315 = vmatprep.mubr.msk.bf16.mxu0 %vm609_vm2, %v789_v17  ;;  %v6256_v21 = vpack.c.bf16 %v594_v19, %v593_v18  ;;  %v792_v51 = vpack.c.bf16 %v788_v49, %v787_v50  ;;  %v901_v55 = vpack.c.bf16 %v897_v52, %v594_v19  ;;  %v1383_v10 = vsel %vm622_vm0, %v1378_v61, 0 }
  0xc6   : > { %v1103_v7 = vsel %vm504_vm3, 0.0, %v1095_v4 }
  0xc7   : > { %5310 = vmatmul.mubr.msk.bf16.gmra.mxu1 %vm609_vm2, %v6256_v21  ;;  %v1107_v8 = vpack.c.bf16 %v1103_v7, %v788_v49 }
  0xc8   : > { %5325 = vmatprep.mubr.msk.bf16.mxu1 %vm609_vm2, %v898_v22 }
  0xcc   : > { %5316 = vmatmul.mubr.msk.bf16.vlgmr.msra.gmra.mxu0 %vm609_vm2, %v790_v30 }
  0xcd   : > { %5334 = vmatpush3.bf16.msra.mxu0 %v1013_v32  ;;  %5319 = vmatprep.mubr.msk.bf16.mxu0 %vm609_vm2, %v791_v36 }
  0xce   : > { %5659 = vmatprep.subr.msk.bf16.mxu0 %vm622_vm0, %v1208_v40 }
  0xcf   : > { %5326 = vmatmul.mubr.msk.bf16.vlgmr.msra.gmra.mxu1 %vm609_vm2, %v899_v41 }
  0xd0   : > { %5329 = vmatprep.mubr.msk.bf16.mxu1 %vm609_vm2, %v900_v45  ;;  %5344 = vmatpush3.bf16.msra.mxu1 %v1126_v42 }
  0xd1   : > { %5660 = vmatprep.subr.msk.bf16.mxu1 %vm622_vm0, %v1293_v43 }
  0xd4   : > { %5320 = vmatmul.mubr.msk.bf16.gmra.mxu0 %vm609_vm2, %v792_v51 }
  0xd5   : > { %5335 = vmatprep.mubr.msk.bf16.mxu0 %vm609_vm2, %v995_v53 }
  0xd7   : > { %5330 = vmatmul.mubr.msk.bf16.gmra.mxu1 %vm609_vm2, %v901_v55 }
  0xd8   : > { %5345 = vmatprep.mubr.msk.bf16.mxu1 %vm609_vm2, %v1104_v56 }
  0xdc   : > { %5336 = vmatmul.mubr.msk.bf16.vlgmr.msra.gmra.mxu0 %vm609_vm2, %v996_v57 }
  0xdd   : > { %5354 = vmatpush3.bf16.msra.mxu0 %v1213_v58  ;;  %5339 = vmatprep.mubr.msk.bf16.mxu0 %vm609_vm2, %v997_v59 }
  0xde   : > { %5661 = vmatprep.subr.msk.bf16.mxu0 %vm622_vm0, %v1378_v61 }
  0xdf   : > { %5346 = vmatmul.mubr.msk.bf16.vlgmr.msra.gmra.mxu1 %vm609_vm2, %v1105_v62 }
  0xe0   : > { %5349 = vmatprep.mubr.msk.bf16.mxu1 %vm609_vm2, %v1106_v2  ;;  %5364 = vmatpush3.bf16.msra.mxu1 %v1298_v1 }
  0xe4   : > { %5340 = vmatmul.mubr.msk.bf16.gmra.mxu0 %vm609_vm2, %v998_v5 }
  0xe5   : > { %5355 = vmatprep.mubr.msk.bf16.mxu0 %vm609_vm2, %v6208_v0  ;;  %v1207_v0 = vpack.c.bf16 %v6166_v44, %v897_v52 }
  0xe7   : > { %5350 = vmatmul.mubr.msk.bf16.gmra.mxu1 %vm609_vm2, %v1107_v8 }
  0xe8   : > { %5365 = vmatprep.mubr.msk.bf16.mxu1 %vm609_vm2, %v6188_v54  ;;  %v1288_v54 = vpack.c.bf16 %v7401_v35, %v6272_v31 }
  0xec   : > { %5356 = vmatmul.mubr.msk.bf16.vlgmr.msra.gmra.mxu0 %vm609_vm2, %v6235_v12 }
  0xed   : > { %5374 = vmatpush3.bf16.msra.mxu0 %v1383_v10  ;;  %5359 = vmatprep.mubr.msk.bf16.mxu0 %vm609_vm2, %v6256_v21 }
  0xef   : > { %5366 = vmatmul.mubr.msk.bf16.vlgmr.msra.gmra.mxu1 %vm609_vm2, %v6214_v3  ;;  %v1377_v3 = vpack.c.bf16 %v6222_v6, %v1103_v7 }
  0xf0   : > { %5369 = vmatprep.mubr.msk.bf16.mxu1 %vm609_vm2, %v6240_v13 }
  0xf4   : > { %5360 = vmatmul.mubr.msk.bf16.gmra.mxu0 %vm609_vm2, %v1207_v0 }
  0xf5   : > { %5375 = vmatprep.mubr.msk.bf16.mxu0 %vm609_vm2, %v790_v30 }
  0xf7   : > { %5370 = vmatmul.mubr.msk.bf16.gmra.mxu1 %vm609_vm2, %v1288_v54 }
  0xfc   : > { %5376 = vmatmul.mubr.msk.bf16.vlgmr.msra.gmra.mxu0 %vm609_vm2, %v791_v36 }
  0xfd   : > { %5379 = vmatprep.mubr.msk.bf16.mxu0 %vm609_vm2, %v792_v51 }
 0x104   : > { %5380 = vmatmul.mubr.msk.bf16.gmra.mxu0 %vm609_vm2, %v1377_v3 }
 0x17c   : > { %v5297_v11 = vpop.f32.mrf.mxu0 }
 0x17e   : > { %v660_v12 = vpop.f32.mrf.mxu0 }
 0x17f   : > { %v5307_v13 = vpop.f32.mrf.mxu1 }
 0x180   : > { %v5298_v14 = vpop.f32.mrf.mxu0  ;;  %v749_v0 = vadd.f32 %v5307_v13, %v5297_v11 }
 0x181   : > { %v740_v15 = vpop.f32.mrf.mxu1 }
 0x182   : > { %v663_v16 = vpop.f32.mrf.mxu0  ;;  %v741_v7 = vadd.f32 %v740_v15, %v660_v12 }
 0x183   : > { %v5308_v17 = vpop.f32.mrf.mxu1 }
 0x184   : > { %v5301_v18 = vpop.f32.mrf.mxu0  ;;  %v752_v31 = vadd.f32 %v5308_v17, %v5298_v14 }
 0x185   : > { %v743_v19 = vpop.f32.mrf.mxu1 }
 0x186   : > { %v676_v20 = vpop.f32.mrf.mxu0  ;;  %v744_v9 = vadd.f32 %v743_v19, %v663_v16 }
 0x187   : > { %v5311_v21 = vpop.f32.mrf.mxu1 }
 0x188   : > { %v6347_v22 = vpop.f32.mrf.mxu0 }
 0x189   : > { %v756_v23 = vpop.f32.mrf.mxu1 }
 0x18a   : > { %v679_v24 = vpop.f32.mrf.mxu0  ;;  %v757_v44 = vadd.f32 %v756_v23, %v676_v20 }
 0x18b   : > { %v5312_v25 = vpop.f32.mrf.mxu1 }
 0x18c   : > { %v5317_v26 = vpop.f32.mrf.mxu0  ;;  %v768_v16 = vadd.f32 %v5312_v25, %v6347_v22 }
 0x18d   : > { %v759_v27 = vpop.f32.mrf.mxu1  ;;  %v876_v60 = vadd.f32 %v5317_v26, %v749_v0 }
 0x18e   : > { %v843_v28 = vpop.f32.mrf.mxu0  ;;  %v760_v17 = vadd.f32 %v759_v27, %v679_v24 }
 0x18f   : > { %v5327_v30 = vpop.f32.mrf.mxu1  ;;  %v874_v54 = vadd.f32 %v843_v28, %v741_v7 }
 0x190   : > { %v5318_v32 = vpop.f32.mrf.mxu0  ;;  %v989_v12 = vadd.f32 %v5327_v30, %v876_v60 }
 0x191   : > { %v956_v34 = vpop.f32.mrf.mxu1  ;;  %v877_v37 = vadd.f32 %v5318_v32, %v752_v31 }
 0x192   : > { %v846_v36 = vpop.f32.mrf.mxu0  ;;  %v987_v47 = vadd.f32 %v956_v34, %v874_v54 }
 0x193   : > { %v5328_v38 = vpop.f32.mrf.mxu1  ;;  %v875_v39 = vadd.f32 %v846_v36, %v744_v9 }
 0x194   : > { %v5321_v40 = vpop.f32.mrf.mxu0  ;;  %v990_v28 = vadd.f32 %v5328_v38, %v877_v37 }
 0x195   : > { %v959_v41 = vpop.f32.mrf.mxu1 }
 0x196   : > { %v859_v29 = vpop.f32.mrf.mxu0  ;;  %v988_v7 = vadd.f32 %v959_v41, %v875_v39 }
 0x197   : > { %v5331_v42 = vpop.f32.mrf.mxu1  ;;  %v878_v11 = vadd.f32 %v859_v29, %v757_v44 }
 0x198   : > { %v5322_v43 = vpop.f32.mrf.mxu0 }
 0x199   : > { %v972_v45 = vpop.f32.mrf.mxu1  ;;  %v881_v20 = vadd.f32 %v5322_v43, %v768_v16 }
 0x19a   : > { %v862_v48 = vpop.f32.mrf.mxu0  ;;  %v991_v23 = vadd.f32 %v972_v45, %v878_v11 }
 0x19b   : > { %v6349_v49 = vpop.f32.mrf.mxu1  ;;  %v879_v60 = vadd.f32 %v862_v48, %v760_v17 }
 0x19c   : > { %v5337_v50 = vpop.f32.mrf.mxu0  ;;  %v994_v22 = vadd.f32 %v6349_v49, %v881_v20 }
 0x19d   : > { %v6351_v51 = vpop.f32.mrf.mxu1 }
 0x19e   : > { %v1049_v52 = vpop.f32.mrf.mxu0  ;;  %v992_v24 = vadd.f32 %v6351_v51, %v879_v60 }
 0x19f   : > { %v5347_v53 = vpop.f32.mrf.mxu1  ;;  %v1080_v15 = vadd.f32 %v1049_v52, %v987_v47 }
 0x1a0   : > { %v5338_v55 = vpop.f32.mrf.mxu0 }
 0x1a1   : > { %v1162_v56 = vpop.f32.mrf.mxu1  ;;  %v1083_v26 = vadd.f32 %v5338_v55, %v990_v28 }
 0x1a2   : > { %v1052_v57 = vpop.f32.mrf.mxu0  ;;  %v1193_v9 = vadd.f32 %v1162_v56, %v1080_v15 }
 0x1a3   : > { %v5348_v58 = vpop.f32.mrf.mxu1  ;;  %v1081_v32 = vadd.f32 %v1052_v57, %v988_v7 }
 0x1a4   : > { %v5341_v59 = vpop.f32.mrf.mxu0  ;;  %v1196_v34 = vadd.f32 %v5348_v58, %v1083_v26 }
 0x1a5   : > { %v1165_v61 = vpop.f32.mrf.mxu1 }
 0x1a6   : > { %v1065_v62 = vpop.f32.mrf.mxu0  ;;  %v1194_v36 = vadd.f32 %v1165_v61, %v1081_v32 }
 0x1a7   : > { %v6353_v1 = vpop.f32.mrf.mxu1  ;;  %v1084_v37 = vadd.f32 %v1065_v62, %v991_v23 }
 0x1a8   : > { %7450 = vst [vmem:[#allocation25_spill] sm:$0xff] %v6353_v1  ;;  %v5342_v2 = vpop.f32.mrf.mxu0  ;;  %v765_v1 = vadd.f32 %v5311_v21, %v5301_v18 }
 0x1a9   : > { %v1178_v4 = vpop.f32.mrf.mxu1  ;;  %v1087_v45 = vadd.f32 %v5342_v2, %v994_v22 }
 0x1aa   : > { %v1068_v5 = vpop.f32.mrf.mxu0  ;;  %v880_v19 = vadd.f32 %v5321_v40, %v765_v1  ;;  %v1197_v48 = vadd.f32 %v1178_v4, %v1084_v37 }
 0x1ab   : > { %v6355_v8 = vpop.f32.mrf.mxu1 }
 0x1ac   : > { %7451 = vst [vmem:[#allocation26_spill] sm:$0xff] %v6355_v8  ;;  %v5357_v10 = vpop.f32.mrf.mxu0  ;;  %v993_v21 = vadd.f32 %v5331_v42, %v880_v19 }
 0x1ad   : > { %v6357_v3 = vpop.f32.mrf.mxu1 }
 0x1ae   : > { %7452 = vst [vmem:[#allocation27_spill] sm:$0xff] %v6357_v3  ;;  %v1249_v35 = vpop.f32.mrf.mxu0  ;;  %v1082_v3 = vadd.f32 %v5337_v50, %v989_v12  ;;  %v1086_v25 = vadd.f32 %v5341_v59, %v993_v21 }
 0x1af   : > { %v5367_v63 = vpop.f32.mrf.mxu1  ;;  %v1280_v18 = vadd.f32 %v1249_v35, %v1193_v9  ;;  %v1085_v35 = vadd.f32 %v1068_v5, %v992_v24 }
 0x1b0   : > { %v5358_v46 = vpop.f32.mrf.mxu0  ;;  %v1195_v30 = vadd.f32 %v5347_v53, %v1082_v3  ;;  %v7453_v53 = vld [vmem:[#allocation25_spill] sm:$0xff] }
 0x1b1   : > { %v1334_v6 = vpop.f32.mrf.mxu1  ;;  %v1283_v40 = vadd.f32 %v5358_v46, %v1196_v34  ;;  %v1199_v55 = vadd.f32 %v7453_v53, %v1086_v25 }
 0x1b2   : > { %v1252_v33 = vpop.f32.mrf.mxu0  ;;  %v1282_v38 = vadd.f32 %v5357_v10, %v1195_v30  ;;  %v1365_v41 = vadd.f32 %v1334_v6, %v1280_v18 }
 0x1b3   : > { %v5368_v8 = vpop.f32.mrf.mxu1  ;;  %v1281_v29 = vadd.f32 %v1252_v33, %v1194_v36  ;;  %v7454_v46 = vld [vmem:[#allocation26_spill] sm:$0xff] }
 0x1b4   : > { %v5361_v13 = vpop.f32.mrf.mxu0  ;;  %v1367_v42 = vadd.f32 %v5367_v63, %v1282_v38  ;;  %v1368_v49 = vadd.f32 %v5368_v8, %v1283_v40  ;;  %v1200_v6 = vadd.f32 %v7454_v46, %v1087_v45  ;;  %v1633_v46 = vld [vmem:[%s7381_s5] sm:$0x3] }
 0x1b5   : > { %v1337_v14 = vpop.f32.mrf.mxu1  ;;  %v7455_v33 = vld [vmem:[#allocation27_spill] sm:$0xff]  ;;  %v1286_v62 = vadd.f32 %v5361_v13, %v1199_v55  ;;  %5663 = vmatprep.subr.msk.bf16.mxu0 %vm622_vm0, %v1633_v46 }
 0x1b6   : > { %v1265_v31 = vpop.f32.mrf.mxu0  ;;  %v1366_v58 = vadd.f32 %v1337_v14, %v1281_v29  ;;  %v1198_v61 = vadd.f32 %v7455_v33, %v1085_v35 }
 0x1b7   : > { %v5371_v44 = vpop.f32.mrf.mxu1  ;;  %v1284_v56 = vadd.f32 %v1265_v31, %v1197_v48 }
 0x1b8   : > { %v5362_v47 = vpop.f32.mrf.mxu0  ;;  %v1371_v13 = vadd.f32 %v5371_v44, %v1286_v62  ;;  %v6434_v62 = vld [vmem:[%s7381_s5 + $0x4] sm:$0x3] }
 0x1b9   : > { %v1350_v43 = vpop.f32.mrf.mxu1  ;;  %v1287_v5 = vadd.f32 %v5362_v47, %v1200_v6  ;;  %v1736_v6 = vsel %vm622_vm0, %v1633_v46, 0 }
 0x1ba   : > { %v1268_v39 = vpop.f32.mrf.mxu0  ;;  %v1369_v10 = vadd.f32 %v1350_v43, %v1284_v56  ;;  %5394 = vmatpush3.bf16.msra.mxu0 %v1736_v6 }
 0x1bb   : > { %v5372_v51 = vpop.f32.mrf.mxu1  ;;  %v1285_v8 = vadd.f32 %v1268_v39, %v1198_v61 }
 0x1bc   : > { %v5377_v27 = vpop.f32.mrf.mxu0  ;;  %v1372_v26 = vadd.f32 %v5372_v51, %v1287_v5  ;;  %v5752_v51 = vld [vmem:[%s7381_s5] ss:$0 sps:$4 sm:$0xcc]  }
 0x1bd   : > { %v6365_v59 = vadd.f32 %v5377_v27, %v1367_v42  ;;  %v1353_v3 = vpop.f32.mrf.mxu1  ;;  %v1642_v33 = vrot.slane %v5752_v51, 2 }
 0x1be   : > { %v1419_v50 = vpop.f32.mrf.mxu0  ;;  %v1370_v9 = vadd.f32 %v1353_v3, %v1285_v8 }
 0x1bf   : > { %v6362_v52 = vadd.f32 %v1419_v50, %v1365_v41  ;;  %v1485_v54 = vmul.f32 %v6365_v59, %v6365_v59  ;;  %v1461_v28 = vsel %vm609_vm2, %v6365_v59, 0.0  ;;  %5662 = vmatprep.subr.msk.bf16.mxu1 %vm622_vm0, %v1642_v33  ;;  %v1656_v61 = vsel %vm622_vm0, %v1642_v33, 0 }
 0x1c0   : > { %v5378_v57 = vpop.f32.mrf.mxu0  ;;  %5384 = vmatpush3.bf16.msra.mxu1 %v1656_v61 }
 0x1c1   : > { %v1483_v63 = vmul.f32 %v6362_v52, %v6362_v52  ;;  %v6371_v2 = vadd.f32 %v5378_v57, %v1368_v49  ;;  %v1458_v12 = vsel %vm609_vm2, %v6362_v52, 0.0  ;;  %v1494_v60 = vsel %vm609_vm2, %v1485_v54, 0.0  ;;  %5664 = vmatprep.subr.msk.bf16.mxu1 %vm622_vm0, %v6434_v62 }
 0x1c2   : > { %v1422_v1 = vpop.f32.mrf.mxu0 }
 0x1c3   : > { %v6373_v4 = vadd.f32 %v1422_v1, %v1366_v58  ;;  %v1491_v16 = vsel %vm609_vm2, %v1483_v63, 0.0  ;;  %v1486_v17 = vmul.f32 %v6371_v2, %v6371_v2  ;;  %v1463_v47 = vsel %vm609_vm2, %v6371_v2, 0.0  ;;  %v6441_v1 = vld [vmem:[%s7381_s5 + $0x4] ss:$0 sps:$4 sm:$0xcc]  }
 0x1c4   : > { %v5381_v0 = vpop.f32.mrf.mxu0  ;;  %v1936_v63 = vrot.slane %v6441_v1, 2 }
 0x1c5   : > { %v1459_v15 = vsel %vm609_vm2, %v6373_v4, 0.0  ;;  %v1484_v11 = vmul.f32 %v6373_v4, %v6373_v4  ;;  %v6394_v30 = vadd.f32 %v5381_v0, %v1371_v13  ;;  %v1496_v39 = vsel %vm609_vm2, %v1486_v17, 0.0 }
 0x1c6   : > { %v1460_v7 = vadd.f32 %v1459_v15, %v1458_v12  ;;  %v1435_v14 = vpop.f32.mrf.mxu0  ;;  %5665 = vmatprep.subr.msk.bf16.mxu0 %vm622_vm0, %v1936_v63 }
 0x1c7   : > { %v1492_v19 = vsel %vm609_vm2, %v1484_v11, 0.0  ;;  %v6389_v31 = vadd.f32 %v1435_v14, %v1369_v10  ;;  %v1489_v25 = vmul.f32 %v6394_v30, %v6394_v30  ;;  %v1469_v45 = vsel %vm609_vm2, %v6394_v30, 0.0 }
 0x1c8   : > { %v1462_v32 = vadd.f32 %v1461_v28, %v1460_v7  ;;  %v1493_v20 = vadd.f32 %v1492_v19, %v1491_v16  ;;  %v5382_v23 = vpop.f32.mrf.mxu0 }
 0x1c9   : > { %v1487_v18 = vmul.f32 %v6389_v31, %v6389_v31  ;;  %v1465_v34 = vsel %vm609_vm2, %v6389_v31, 0.0  ;;  %v6401_v36 = vadd.f32 %v5382_v23, %v1372_v26  ;;  %v1502_v55 = vsel %vm609_vm2, %v1489_v25, 0.0 }
 0x1ca   : > { %v1495_v44 = vadd.f32 %v1494_v60, %v1493_v20  ;;  %v1464_v21 = vadd.f32 %v1463_v47, %v1462_v32  ;;  %v1438_v37 = vpop.f32.mrf.mxu0 }
 0x1cb   : > { %v6403_v38 = vadd.f32 %v1438_v37, %v1370_v9  ;;  %v1498_v27 = vsel %vm609_vm2, %v1487_v18, 0.0  ;;  %v1490_v48 = vmul.f32 %v6401_v36, %v6401_v36  ;;  %v1471_v53 = vsel %vm609_vm2, %v6401_v36, 0.0 }
 0x1cc   : > { %v1466_v22 = vadd.f32 %v1465_v34, %v1464_v21  ;;  %v1497_v24 = vadd.f32 %v1496_v39, %v1495_v44  ;;  %v4983_v44 = vld [vmem:[%s7379_s3] ss:$0 sm:$0xff] }
 0x1cd   : > { %v1467_v40 = vsel %vm609_vm2, %v6403_v38, 0.0  ;;  %v1488_v41 = vmul.f32 %v6403_v38, %v6403_v38  ;;  %v1504_v49 = vsel %vm609_vm2, %v1490_v48, 0.0 }
 0x1ce   : > { %v1468_v29 = vadd.f32 %v1467_v40, %v1466_v22  ;;  %v1499_v43 = vadd.f32 %v1498_v27, %v1497_v24 }
 0x1cf   : > { %v1500_v35 = vsel %vm609_vm2, %v1488_v41, 0.0 }
 0x1d0   : > { %v1470_v50 = vadd.f32 %v1469_v45, %v1468_v29  ;;  %v1501_v42 = vadd.f32 %v1500_v35, %v1499_v43 }
 0x1d2   : > { %v1472_v56 = vadd.f32 %v1471_v53, %v1470_v50  ;;  %v1503_v57 = vadd.f32 %v1502_v55, %v1501_v42 }
 0x1d4   : > { %1473 = vadd.xlane.f32.xlu0 %v1472_v56  ;;  %v1505_v58 = vadd.f32 %v1504_v49, %v1503_v57 }
 0x1d6   : > { %1506 = vadd.xlane.f32.xlu1 %v1505_v58 }
 0x25d   : > { %v1474_v5 = vpop.xlane.xlu0 %1473 }
 0x25e   : > { %v1475_v10 = vrot.slane %v1474_v5, 4 }
 0x25f   : > { %v1507_v8 = vpop.xlane.xlu1 %1506 }
 0x260   : > { %v1476_v0 = vadd.f32 %v1475_v10, %v1474_v5  ;;  %v1508_v54 = vrot.slane %v1507_v8, 4 }
 0x262   : > { %v1477_v3 = vrot.slane %v1476_v0, 2  ;;  %v1509_v12 = vadd.f32 %v1508_v54, %v1507_v8 }
 0x264   : > { %v1478_v15 = vadd.f32 %v1477_v3, %v1476_v0  ;;  %v1510_v11 = vrot.slane %v1509_v12, 2  ;;  %v1837_v3 = vsel %vm622_vm0, %v6434_v62, 0 }
 0x266   : > { %v1479_v13 = vrot.slane %v1478_v15, 1  ;;  %v1511_v28 = vadd.f32 %v1510_v11, %v1509_v12  ;;  %v1950_v12 = vsel %vm622_vm0, %v1936_v63, 0 }
 0x268   : > { %v1480_v7 = vadd.f32 %v1479_v13, %v1478_v15  ;;  %v1512_v14 = vrot.slane %v1511_v28, 1 }
 0x26a   : > { %v1482_v16 = vmul.f32 0.00390625, %v1480_v7  ;;  %v1513_v17 = vadd.f32 %v1512_v14, %v1511_v28 }
 0x26c   : > { %v1514_v19 = vmul.f32 0.00390625, %v1513_v17  ;;  %v1515_v26 = vmul.f32 %v1482_v16, %v1482_v16  ;;  %v1517_v20 = vsub.f32 %v6362_v52, %v1482_v16  ;;  %v1518_v23 = vsub.f32 %v6373_v4, %v1482_v16 }
 0x26d   : > { %v1519_v60 = vsub.f32 %v6365_v59, %v1482_v16  ;;  %v1520_v47 = vsub.f32 %v6371_v2, %v1482_v16  ;;  %v1521_v21 = vsub.f32 %v6389_v31, %v1482_v16  ;;  %v1522_v37 = vsub.f32 %v6403_v38, %v1482_v16  ;;  %v4984_v59 = vld [vmem:[%s7380_s4] ss:$0 sm:$0xff] }
 0x26e   : > { %v1516_v9 = vsub.f32 %v1514_v19, %v1515_v26  ;;  %v1523_v39 = vsub.f32 %v6394_v30, %v1482_v16  ;;  %v1524_v56 = vsub.f32 %v6401_v36, %v1482_v16 }
 0x270   : > { %v1525_v32 = vadd.f32 1e-05, %v1516_v9 }
 0x272   : > { %5760 = vrsqrt.f32 %v1525_v32 }
 0x27f   : > { %v5761_v18 = vpop.eup %5760 }
 0x280   : > { %v1527_v34 = vmul.f32 %v5761_v18, %v1517_v20  ;;  %v1528_v22 = vmul.f32 %v5761_v18, %v1518_v23  ;;  %v1529_v52 = vmul.f32 %v5761_v18, %v1519_v60  ;;  %v1530_v24 = vmul.f32 %v5761_v18, %v1520_v47 }
 0x281   : > { %v1531_v2 = vmul.f32 %v5761_v18, %v1521_v21  ;;  %v1532_v4 = vmul.f32 %v5761_v18, %v1522_v37  ;;  %v1533_v25 = vmul.f32 %v5761_v18, %v1523_v39  ;;  %v1534_v46 = vmul.f32 %v5761_v18, %v1524_v56 }
 0x282   : > { %v1543_v27 = vmul.f32 %v4983_v44, %v1527_v34  ;;  %v1544_v40 = vmul.f32 %v4983_v44, %v1528_v22  ;;  %v1545_v41 = vmul.f32 %v4983_v44, %v1529_v52  ;;  %v1546_v29 = vmul.f32 %v4983_v44, %v1530_v24  ;;  %v6485_v22 = vld [vmem:[%s7381_s5 + $0x8] ss:$0 sps:$4 sm:$0xcc]  }
 0x283   : > { %v1547_v31 = vmul.f32 %v4983_v44, %v1531_v2  ;;  %v1548_v43 = vmul.f32 %v4983_v44, %v1532_v4  ;;  %v1549_v38 = vmul.f32 %v4983_v44, %v1533_v25  ;;  %v1550_v61 = vmul.f32 %v4983_v44, %v1534_v46  ;;  %v7458_v25 = vld [vmem:[#allocation17_spill] sm:$0xff] }
 0x284   : > { %v1557_v45 = vadd.f32 %v4984_v59, %v1543_v27  ;;  %v1558_v30 = vadd.f32 %v4984_v59, %v1544_v40  ;;  %v1559_v48 = vadd.f32 %v4984_v59, %v1545_v41  ;;  %v1560_v35 = vadd.f32 %v4984_v59, %v1546_v29 }
 0x285   : > { %v1561_v50 = vadd.f32 %v4984_v59, %v1547_v31  ;;  %v1562_v42 = vadd.f32 %v4984_v59, %v1548_v43  ;;  %v1563_v55 = vadd.f32 %v4984_v59, %v1549_v38  ;;  %v6461_v5 = vadd.f32 %v4984_v59, %v1550_v61  ;;  %v2029_v31 = vld [vmem:[%s7381_s5 + $0x8] sm:$0x3] }
 0x286   : > { %v1573_v53 = vmul.f32 0.70710677, %v1557_v45  ;;  %v1574_v57 = vmul.f32 0.70710677, %v1558_v30  ;;  %v1575_v49 = vmul.f32 0.70710677, %v1559_v48 }
 0x287   : > { %v1576_v58 = vmul.f32 0.70710677, %v1560_v35  ;;  %v1577_v51 = vmul.f32 0.70710677, %v1561_v50  ;;  %v1578_v6 = vmul.f32 0.70710677, %v1562_v42 }
 0x288   : > { %5762 = verf.f32 %v1573_v53  ;;  %v1579_v33 = vmul.f32 0.70710677, %v1563_v55  ;;  %v1580_v10 = vmul.f32 0.70710677, %v6461_v5  ;;  %v1565_v0 = vmul.f32 0.5, %v1557_v45 }
 0x289   : > { %5764 = verf.f32 %v1574_v57  ;;  %v1566_v11 = vmul.f32 0.5, %v1558_v30  ;;  %v1567_v13 = vmul.f32 0.5, %v1559_v48  ;;  %v1568_v7 = vmul.f32 0.5, %v1560_v35 }
 0x28a   : > { %5766 = verf.f32 %v1575_v49  ;;  %v1569_v19 = vmul.f32 0.5, %v1561_v50  ;;  %v1570_v62 = vmul.f32 0.5, %v1562_v42  ;;  %v1571_v20 = vmul.f32 0.5, %v1563_v55 }
 0x28b   : > { %5768 = verf.f32 %v1576_v58  ;;  %v7456_v23 = vmov 0.0   ;;  %v2142_v42 = vrot.slane %v6485_v22, 2 }
 0x28c   : > { %5770 = verf.f32 %v1577_v51 }
 0x28d   : > { %5772 = verf.f32 %v1578_v6 }
 0x28e   : > { %5774 = verf.f32 %v1579_v33  ;;  %v7459_v33 = vld [vmem:[#allocation22_spill] sm:$0xff] }
 0x28f   : > { %5776 = verf.f32 %v1580_v10 }
 0x295   : > { %v5763_v36 = vpop.eup %5762 }
 0x296   : > { %v5765_v8 = vpop.eup %5764  ;;  %v1589_v54 = vadd.f32 1.0, %v5763_v36 }
 0x297   : > { %v5767_v15 = vpop.eup %5766  ;;  %v1590_v28 = vadd.f32 1.0, %v5765_v8 }
 0x298   : > { %v5769_v14 = vpop.eup %5768  ;;  %v6469_v16 = vmul.f32 %v1589_v54, %v1565_v0  ;;  %v1591_v17 = vadd.f32 1.0, %v5767_v15 }
 0x299   : > { %v5771_v26 = vpop.eup %5770  ;;  %v6471_v9 = vmul.f32 %v1590_v28, %v1566_v11  ;;  %v1592_v32 = vadd.f32 1.0, %v5769_v14  ;;  %v5755_v14 = vld [vmem:[%s7381_s5 + $0xc] ss:$0 sps:$4 sm:$0xcc]  }
 0x29a   : > { %v5773_v1 = vpop.eup %5772  ;;  %v1634_v63 = vpack.c.bf16 %v6469_v16, %v7456_v23  ;;  %v6475_v60 = vmul.f32 %v1591_v17, %v1567_v13  ;;  %v1593_v47 = vadd.f32 1.0, %v5771_v26  ;;  %v1614_v18 = vrot.slane %v6469_v16, 7 }
 0x29b   : > { %v5775_v44 = vpop.eup %5774  ;;  %v6478_v21 = vmul.f32 %v1592_v32, %v1568_v7  ;;  %v1615_v37 = vrot.slane %v6471_v9, 7  ;;  %v1594_v39 = vadd.f32 1.0, %v5773_v1  ;;  %v1804_v34 = vrot.slane %v6469_v16, 1  ;;  %v2238_v1 = vld [vmem:[%s7381_s5 + $0xc] sm:$0x3] }
 0x29c   : > { %5385 = vmatprep.mubr.msk.bf16.mxu1 %vm609_vm2, %v1634_v63  ;;  %v6490_v52 = vpack.c.bf16 %v6475_v60, %v6471_v9  ;;  %v6492_v24 = vmul.f32 %v1593_v47, %v1569_v19  ;;  %v1622_v2 = vsel %vm503_vm1, 0.0, %v1614_v18  ;;  %v1616_v4 = vrot.slane %v6475_v60, 7  ;;  %v5777_v6 = vpop.eup %5776 }
 0x29d   : > { %v1629_v27 = vpack.c.bf16 %v1622_v2, %v7458_v25  ;;  %v1623_v40 = vsel %vm503_vm1, 0.0, %v1615_v37  ;;  %v1617_v41 = vrot.slane %v6478_v21, 7  ;;  %v1595_v29 = vadd.f32 1.0, %v5775_v44 }
 0x29e   : > { %5386 = vmatmul.mubr.msk.bf16.vlgmr.msra.gmra.mxu1 %vm609_vm2, %v6490_v52  ;;  %v6508_v43 = vpack.c.bf16 %v6492_v24, %v6478_v21  ;;  %v1624_v38 = vsel %vm503_vm1, 0.0, %v1616_v4  ;;  %v1618_v45 = vrot.slane %v6492_v24, 7  ;;  %v6513_v30 = vmul.f32 %v1594_v39, %v1570_v62 }
 0x29f   : > { %5404 = vmatpush3.bf16.msra.mxu1 %v1837_v3  ;;  %5395 = vmatprep.mubr.msk.bf16.mxu0 %vm609_vm2, %v1629_v27  ;;  %v6516_v48 = vpack.c.bf16 %v1624_v38, %v1623_v40  ;;  %v1625_v35 = vsel %vm503_vm1, 0.0, %v1617_v41  ;;  %v6520_v50 = vmul.f32 %v1595_v29, %v1571_v20  ;;  %v1812_v49 = vsel %vm504_vm3, 0.0, %v1804_v34 }
 0x2a0   : > { %5389 = vmatprep.mubr.msk.bf16.mxu1 %vm609_vm2, %v6508_v43  ;;  %v1626_v53 = vsel %vm503_vm1, 0.0, %v1618_v45  ;;  %v1619_v55 = vrot.slane %v6513_v30, 7  ;;  %5666 = vmatprep.subr.msk.bf16.mxu1 %vm622_vm0, %v2029_v31  ;;  %v1819_v61 = vpack.c.bf16 %v1812_v49, %v7459_v33  ;;  %v1805_v10 = vrot.slane %v6471_v9, 1 }
 0x2a1   : > { %5396 = vmatmul.mubr.msk.bf16.vlgmr.msra.gmra.mxu0 %vm609_vm2, %v6516_v48  ;;  %v6531_v56 = vpack.c.bf16 %v1626_v53, %v1625_v35  ;;  %v1620_v57 = vrot.slane %v6520_v50, 7  ;;  %v6541_v58 = vpack.c.bf16 %v6520_v50, %v6513_v30  ;;  %v1806_v36 = vrot.slane %v6475_v60, 1 }
 0x2a2   : > { %5414 = vmatpush3.bf16.msra.mxu0 %v1950_v12  ;;  %v1627_v51 = vsel %vm503_vm1, 0.0, %v1619_v55  ;;  %v1807_v8 = vrot.slane %v6478_v21, 1  ;;  %v1808_v0 = vrot.slane %v6492_v24, 1  ;;  %v1928_v3 = vpack.c.bf16 %v1623_v40, %v1622_v2 }
 0x2a3   : > { %5399 = vmatprep.mubr.msk.bf16.mxu0 %vm609_vm2, %v6531_v56  ;;  %5667 = vmatprep.subr.msk.bf16.mxu0 %vm622_vm0, %v2142_v42  ;;  %v1628_v46 = vsel %vm503_vm1, 0.0, %v1620_v57  ;;  %v1596_v12 = vadd.f32 1.0, %v5777_v6  ;;  %v1813_v15 = vsel %vm504_vm3, 0.0, %v1805_v10  ;;  %v1814_v11 = vsel %vm504_vm3, 0.0, %v1806_v36 }
 0x2a4   : > { %v6555_v54 = vpack.c.bf16 %v1628_v46, %v1627_v51  ;;  %v1815_v13 = vsel %vm504_vm3, 0.0, %v1807_v8  ;;  %v1816_v28 = vsel %vm504_vm3, 0.0, %v1808_v0  ;;  %v1572_v7 = vmul.f32 0.5, %v6461_v5 }
 0x2a5   : > { %v1820_v17 = vpack.c.bf16 %v1814_v11, %v1813_v15  ;;  %v2043_v19 = vsel %vm622_vm0, %v2029_v31, 0  ;;  %v1821_v32 = vpack.c.bf16 %v1816_v28, %v1815_v13  ;;  %v1809_v62 = vrot.slane %v6513_v30, 1 }
 0x2a6   : > { %5390 = vmatmul.mubr.msk.bf16.gmra.mxu1 %vm609_vm2, %v6541_v58  ;;  %v1604_v26 = vmul.f32 %v1596_v12, %v1572_v7  ;;  %v1810_v20 = vrot.slane %v6520_v50, 1  ;;  %v1929_v5 = vpack.c.bf16 %v1625_v35, %v1624_v38  ;;  %v2156_v63 = vsel %vm622_vm0, %v2142_v42, 0 }
 0x2a7   : > { %5405 = vmatprep.mubr.msk.bf16.mxu1 %vm609_vm2, %v1819_v61  ;;  %v2323_v47 = vrot.slane %v5755_v14, 2  ;;  %v1930_v18 = vpack.c.bf16 %v1627_v51, %v1626_v53  ;;  %v1817_v37 = vsel %vm504_vm3, 0.0, %v1809_v62  ;;  %v2025_v2 = vpack.c.bf16 %v6471_v9, %v6469_v16  ;;  %v2408_v16 = vld [vmem:[%s7381_s5 + $0x10] sm:$0x3] }
 0x2a8   : > { %v1919_v44 = vrot.slane %v1604_v26, 7  ;;  %v1818_v39 = vsel %vm504_vm3, 0.0, %v1810_v20  ;;  %v2134_v27 = vpack.c.bf16 %v1813_v15, %v1812_v49  ;;  %v2026_v40 = vpack.c.bf16 %v6478_v21, %v6475_v60 }
 0x2a9   : > { %5400 = vmatmul.mubr.msk.bf16.gmra.mxu0 %vm609_vm2, %v6555_v54  ;;  %v1822_v34 = vpack.c.bf16 %v1818_v39, %v1817_v37  ;;  %v2243_v41 = vsel %vm622_vm0, %v2238_v1, 0  ;;  %v2027_v29 = vpack.c.bf16 %v6513_v30, %v6492_v24  ;;  %v2135_v9 = vpack.c.bf16 %v1815_v13, %v1814_v11 }
 0x2aa   : > { %5415 = vmatprep.mubr.msk.bf16.mxu0 %vm609_vm2, %v1928_v3  ;;  %v1927_v22 = vsel %vm503_vm1, 0.0, %v1919_v44  ;;  %v2328_v31 = vsel %vm622_vm0, %v2323_v47, 0  ;;  %v2136_v38 = vpack.c.bf16 %v1817_v37, %v1816_v28  ;;  %v2125_v45 = vrot.slane %v1604_v26, 1 }
 0x2ab   : > { %v1931_v4 = vpack.c.bf16 %v1927_v22, %v1628_v46  ;;  %v2028_v60 = vpack.c.bf16 %v1604_v26, %v6520_v50  ;;  %v2413_v30 = vsel %vm622_vm0, %v2408_v16, 0 }
 0x2ac   : > { %v2133_v21 = vsel %vm504_vm3, 0.0, %v2125_v45 }
 0x2ad   : > { %v2137_v24 = vpack.c.bf16 %v2133_v21, %v1818_v39  ;;  %v2407_v35 = vpack.c.bf16 %v7459_v33, %v2133_v21 }
 0x2ae   : > { %5406 = vmatmul.mubr.msk.bf16.vlgmr.msra.gmra.mxu1 %vm609_vm2, %v1820_v17 }
 0x2af   : > { %5424 = vmatpush3.bf16.msra.mxu1 %v2043_v19  ;;  %5409 = vmatprep.mubr.msk.bf16.mxu1 %vm609_vm2, %v1821_v32 }
 0x2b0   : > { %5668 = vmatprep.subr.msk.bf16.mxu1 %vm622_vm0, %v2238_v1 }
 0x2b1   : > { %5416 = vmatmul.mubr.msk.bf16.vlgmr.msra.gmra.mxu0 %vm609_vm2, %v1929_v5 }
 0x2b2   : > { %5419 = vmatprep.mubr.msk.bf16.mxu0 %vm609_vm2, %v1930_v18  ;;  %5434 = vmatpush3.bf16.msra.mxu0 %v2156_v63 }
 0x2b3   : > { %5669 = vmatprep.subr.msk.bf16.mxu0 %vm622_vm0, %v2323_v47 }
 0x2b6   : > { %5410 = vmatmul.mubr.msk.bf16.gmra.mxu1 %vm609_vm2, %v1822_v34 }
 0x2b7   : > { %5425 = vmatprep.mubr.msk.bf16.mxu1 %vm609_vm2, %v2025_v2 }
 0x2b9   : > { %5420 = vmatmul.mubr.msk.bf16.gmra.mxu0 %vm609_vm2, %v1931_v4 }
 0x2ba   : > { %5435 = vmatprep.mubr.msk.bf16.mxu0 %vm609_vm2, %v2134_v27 }
 0x2be   : > { %5426 = vmatmul.mubr.msk.bf16.vlgmr.msra.gmra.mxu1 %vm609_vm2, %v2026_v40 }
 0x2bf   : > { %5444 = vmatpush3.bf16.msra.mxu1 %v2243_v41  ;;  %5429 = vmatprep.mubr.msk.bf16.mxu1 %vm609_vm2, %v2027_v29 }
 0x2c0   : > { %5670 = vmatprep.subr.msk.bf16.mxu1 %vm622_vm0, %v2408_v16 }
 0x2c1   : > { %5436 = vmatmul.mubr.msk.bf16.vlgmr.msra.gmra.mxu0 %vm609_vm2, %v2135_v9 }
 0x2c2   : > { %5439 = vmatprep.mubr.msk.bf16.mxu0 %vm609_vm2, %v2136_v38  ;;  %5454 = vmatpush3.bf16.msra.mxu0 %v2328_v31 }
 0x2c6   : > { %5430 = vmatmul.mubr.msk.bf16.gmra.mxu1 %vm609_vm2, %v2028_v60 }
 0x2c7   : > { %5445 = vmatprep.mubr.msk.bf16.mxu1 %vm609_vm2, %v6516_v48  ;;  %v2237_v48 = vpack.c.bf16 %v7458_v25, %v1927_v22 }
 0x2c9   : > { %5440 = vmatmul.mubr.msk.bf16.gmra.mxu0 %vm609_vm2, %v2137_v24 }
 0x2ca   : > { %5455 = vmatprep.mubr.msk.bf16.mxu0 %vm609_vm2, %v6490_v52  ;;  %v2318_v52 = vpack.c.bf16 %v7456_v23, %v1604_v26 }
 0x2ce   : > { %5446 = vmatmul.mubr.msk.bf16.vlgmr.msra.gmra.mxu1 %vm609_vm2, %v6531_v56 }
 0x2cf   : > { %5464 = vmatpush3.bf16.msra.mxu1 %v2413_v30  ;;  %5449 = vmatprep.mubr.msk.bf16.mxu1 %vm609_vm2, %v6555_v54 }
 0x2d1   : > { %5456 = vmatmul.mubr.msk.bf16.vlgmr.msra.gmra.mxu0 %vm609_vm2, %v6508_v43 }
 0x2d2   : > { %5459 = vmatprep.mubr.msk.bf16.mxu0 %vm609_vm2, %v6541_v58 }
 0x2d6   : > { %5450 = vmatmul.mubr.msk.bf16.gmra.mxu1 %vm609_vm2, %v2237_v48 }
 0x2d7   : > { %5465 = vmatprep.mubr.msk.bf16.mxu1 %vm609_vm2, %v1820_v17 }
 0x2d9   : > { %5460 = vmatmul.mubr.msk.bf16.gmra.mxu0 %vm609_vm2, %v2318_v52 }
 0x2de   : > { %5466 = vmatmul.mubr.msk.bf16.vlgmr.msra.gmra.mxu1 %vm609_vm2, %v1821_v32 }
 0x2df   : > { %5469 = vmatprep.mubr.msk.bf16.mxu1 %vm609_vm2, %v1822_v34 }
 0x2e6   : > { %5470 = vmatmul.mubr.msk.bf16.gmra.mxu1 %vm609_vm2, %v2407_v35 }
 0x35e   : > { %v5387_v43 = vpop.f32.mrf.mxu1 }
 0x360   : > { %v1692_v50 = vpop.f32.mrf.mxu1 }
 0x361   : > { %v5397_v42 = vpop.f32.mrf.mxu0 }
 0x362   : > { %v5388_v53 = vpop.f32.mrf.mxu1  ;;  %v1781_v9 = vadd.f32 %v5397_v42, %v5387_v43 }
 0x363   : > { %v1772_v55 = vpop.f32.mrf.mxu0 }
 0x364   : > { %v1695_v56 = vpop.f32.mrf.mxu1  ;;  %v1773_v41 = vadd.f32 %v1772_v55, %v1692_v50 }
 0x365   : > { %v5398_v57 = vpop.f32.mrf.mxu0 }
 0x366   : > { %v5391_v49 = vpop.f32.mrf.mxu1  ;;  %v1784_v60 = vadd.f32 %v5398_v57, %v5388_v53 }
 0x367   : > { %v1775_v58 = vpop.f32.mrf.mxu0 }
 0x368   : > { %v1708_v51 = vpop.f32.mrf.mxu1  ;;  %v1776_v21 = vadd.f32 %v1775_v58, %v1695_v56 }
 0x369   : > { %v5401_v46 = vpop.f32.mrf.mxu0 }
 0x36a   : > { %v6638_v6 = vpop.f32.mrf.mxu1 }
 0x36b   : > { %v1788_v61 = vpop.f32.mrf.mxu0 }
 0x36c   : > { %v1711_v10 = vpop.f32.mrf.mxu1  ;;  %v1789_v59 = vadd.f32 %v1788_v61, %v1708_v51 }
 0x36d   : > { %v6640_v36 = vpop.f32.mrf.mxu0 }
 0x36e   : > { %v5407_v8 = vpop.f32.mrf.mxu1  ;;  %v1800_v51 = vadd.f32 %v6640_v36, %v6638_v6 }
 0x36f   : > { %v1791_v0 = vpop.f32.mrf.mxu0  ;;  %v1906_v24 = vadd.f32 %v5407_v8, %v1781_v9 }
 0x370   : > { %v1873_v54 = vpop.f32.mrf.mxu1  ;;  %v1792_v53 = vadd.f32 %v1791_v0, %v1711_v10 }
 0x371   : > { %v5417_v3 = vpop.f32.mrf.mxu0  ;;  %v1904_v31 = vadd.f32 %v1873_v54, %v1773_v41 }
 0x372   : > { %v5408_v12 = vpop.f32.mrf.mxu1  ;;  %v2019_v50 = vadd.f32 %v5417_v3, %v1906_v24 }
 0x373   : > { %v1986_v15 = vpop.f32.mrf.mxu0  ;;  %v1907_v52 = vadd.f32 %v5408_v12, %v1784_v60 }
 0x374   : > { %v1876_v11 = vpop.f32.mrf.mxu1  ;;  %v2017_v35 = vadd.f32 %v1986_v15, %v1904_v31 }
 0x375   : > { %v5418_v13 = vpop.f32.mrf.mxu0  ;;  %v1905_v33 = vadd.f32 %v1876_v11, %v1776_v21 }
 0x376   : > { %v5411_v28 = vpop.f32.mrf.mxu1  ;;  %v2020_v54 = vadd.f32 %v5418_v13, %v1907_v52 }
 0x377   : > { %v1989_v7 = vpop.f32.mrf.mxu0 }
 0x378   : > { %v1889_v14 = vpop.f32.mrf.mxu1  ;;  %v2018_v41 = vadd.f32 %v1989_v7, %v1905_v33 }
 0x379   : > { %v5421_v17 = vpop.f32.mrf.mxu0  ;;  %v1908_v43 = vadd.f32 %v1889_v14, %v1789_v59 }
 0x37a   : > { %v5412_v19 = vpop.f32.mrf.mxu1 }
 0x37b   : > { %v2002_v26 = vpop.f32.mrf.mxu0 }
 0x37c   : > { %v1892_v32 = vpop.f32.mrf.mxu1  ;;  %v2021_v61 = vadd.f32 %v2002_v26, %v1908_v43 }
 0x37d   : > { %v6642_v62 = vpop.f32.mrf.mxu0  ;;  %v1909_v3 = vadd.f32 %v1892_v32, %v1792_v53 }
 0x37e   : > { %v5427_v20 = vpop.f32.mrf.mxu1 }
 0x37f   : > { %v2005_v1 = vpop.f32.mrf.mxu0 }
 0x380   : > { %v2079_v5 = vpop.f32.mrf.mxu1  ;;  %v2022_v14 = vadd.f32 %v2005_v1, %v1909_v3 }
 0x381   : > { %v5437_v63 = vpop.f32.mrf.mxu0  ;;  %v2110_v55 = vadd.f32 %v2079_v5, %v2017_v35 }
 0x382   : > { %v5428_v47 = vpop.f32.mrf.mxu1 }
 0x383   : > { %v2192_v18 = vpop.f32.mrf.mxu0  ;;  %v2113_v8 = vadd.f32 %v5428_v47, %v2020_v54 }
 0x384   : > { %v2082_v44 = vpop.f32.mrf.mxu1  ;;  %v2223_v12 = vadd.f32 %v2192_v18, %v2110_v55 }
 0x385   : > { %v5438_v37 = vpop.f32.mrf.mxu0  ;;  %v2111_v15 = vadd.f32 %v2082_v44, %v2018_v41 }
 0x386   : > { %v5431_v39 = vpop.f32.mrf.mxu1  ;;  %v2226_v10 = vadd.f32 %v5438_v37, %v2113_v8 }
 0x387   : > { %v2195_v34 = vpop.f32.mrf.mxu0 }
 0x388   : > { %v2095_v22 = vpop.f32.mrf.mxu1  ;;  %v2224_v0 = vadd.f32 %v2195_v34, %v2111_v15 }
 0x389   : > { %v6644_v2 = vpop.f32.mrf.mxu0  ;;  %v2114_v13 = vadd.f32 %v2095_v22, %v2021_v61 }
 0x38a   : > { %v6646_v4 = vpop.f32.mrf.mxu1 }
 0x38b   : > { %7460 = vst [vmem:[#allocation25_spill] sm:$0xff] %v6646_v4  ;;  %v2208_v27 = vpop.f32.mrf.mxu0  ;;  %v1797_v4 = vadd.f32 %v5401_v46, %v5391_v49  ;;  %v1911_v46 = vadd.f32 %v5412_v19, %v1800_v51 }
 0x38c   : > { %v2098_v40 = vpop.f32.mrf.mxu1  ;;  %v2227_v36 = vadd.f32 %v2208_v27, %v2114_v13 }
 0x38d   : > { %v6648_v29 = vpop.f32.mrf.mxu0  ;;  %v1910_v56 = vadd.f32 %v5411_v28, %v1797_v4  ;;  %v2024_v6 = vadd.f32 %v6642_v62, %v1911_v46  ;;  %v2115_v26 = vadd.f32 %v2098_v40, %v2022_v14 }
 0x38e   : > { %7461 = vst [vmem:[#allocation26_spill] sm:$0xff] %v6648_v29  ;;  %v5447_v16 = vpop.f32.mrf.mxu1 }
 0x38f   : > { %v6650_v38 = vpop.f32.mrf.mxu0  ;;  %v2023_v59 = vadd.f32 %v5421_v17, %v1910_v56 }
 0x390   : > { %7462 = vst [vmem:[#allocation27_spill] sm:$0xff] %v6650_v38  ;;  %v2279_v45 = vpop.f32.mrf.mxu1  ;;  %v2112_v38 = vadd.f32 %v5427_v20, %v2019_v50 }
 0x391   : > { %v5457_v30 = vpop.f32.mrf.mxu0  ;;  %v2310_v49 = vadd.f32 %v2279_v45, %v2223_v12  ;;  %v2116_v20 = vadd.f32 %v5431_v39, %v2023_v59 }
 0x392   : > { %v5448_v48 = vpop.f32.mrf.mxu1  ;;  %v2225_v5 = vadd.f32 %v5437_v63, %v2112_v38  ;;  %v7463_v37 = vld [vmem:[#allocation25_spill] sm:$0xff] }
 0x393   : > { %v2364_v25 = vpop.f32.mrf.mxu0  ;;  %v2313_v18 = vadd.f32 %v5448_v48, %v2226_v10  ;;  %v2229_v22 = vadd.f32 %v6644_v2, %v2116_v20  ;;  %v2117_v34 = vadd.f32 %v7463_v37, %v2024_v6 }
 0x394   : > { %v2282_v23 = vpop.f32.mrf.mxu1  ;;  %v2312_v28 = vadd.f32 %v5447_v16, %v2225_v5  ;;  %v2395_v44 = vadd.f32 %v2364_v25, %v2310_v49 }
 0x395   : > { %v5458_v29 = vpop.f32.mrf.mxu0  ;;  %v2311_v4 = vadd.f32 %v2282_v23, %v2224_v0  ;;  %v7465_v2 = vld [vmem:[#allocation26_spill] sm:$0xff] }
 0x396   : > { %v5451_v42 = vpop.f32.mrf.mxu1  ;;  %v2397_v17 = vadd.f32 %v5457_v30, %v2312_v28  ;;  %v2398_v39 = vadd.f32 %v5458_v29, %v2313_v18  ;;  %v2230_v21 = vadd.f32 %v7465_v2, %v2117_v34  ;;  %v6735_v2 = vld [vmem:[%s7384_s8 + $0x4] ss:$0 sps:$4 sm:$0xcc]  }
 0x397   : > { %v2367_v57 = vpop.f32.mrf.mxu0  ;;  %v7464_v23 = vld [vmem:[#allocation27_spill] sm:$0xff]  ;;  %v2316_v62 = vadd.f32 %v5451_v42, %v2229_v22 }
 0x398   : > { %v2295_v58 = vpop.f32.mrf.mxu1  ;;  %v2396_v9 = vadd.f32 %v2367_v57, %v2311_v4  ;;  %v2228_v25 = vadd.f32 %v7464_v23, %v2115_v26  ;;  %v5756_v23 = vld [vmem:[%s7384_s8] ss:$0 sps:$4 sm:$0xcc]  }
 0x399   : > { %v5461_v33 = vpop.f32.mrf.mxu0  ;;  %v2314_v16 = vadd.f32 %v2295_v58, %v2227_v36 }
 0x39a   : > { %v5452_v11 = vpop.f32.mrf.mxu1  ;;  %v2401_v55 = vadd.f32 %v5461_v33, %v2316_v62 }
 0x39b   : > { %v2380_v32 = vpop.f32.mrf.mxu0  ;;  %v2317_v43 = vadd.f32 %v5452_v11, %v2230_v21  ;;  %v2973_v21 = vrot.slane %v6735_v2, 2 }
 0x39c   : > { %v2298_v7 = vpop.f32.mrf.mxu1  ;;  %v2399_v24 = vadd.f32 %v2380_v32, %v2314_v16 }
 0x39d   : > { %v5462_v27 = vpop.f32.mrf.mxu0  ;;  %v2315_v30 = vadd.f32 %v2298_v7, %v2228_v25  ;;  %v2670_v25 = vld [vmem:[%s7384_s8] sm:$0x3] }
 0x39e   : > { %v5467_v47 = vpop.f32.mrf.mxu1  ;;  %v2402_v33 = vadd.f32 %v5462_v27, %v2317_v43  ;;  %5672 = vmatprep.subr.msk.bf16.mxu1 %vm622_vm0, %v2670_v25  ;;  %v2773_v62 = vsel %vm622_vm0, %v2670_v25, 0  ;;  %v2679_v27 = vrot.slane %v5756_v23, 2  ;;  %v7468_v25 = vld [vmem:[#allocation15_spill] sm:$0xff] }
 0x39f   : > { %v6659_v31 = vadd.f32 %v5467_v47, %v2397_v17  ;;  %v2383_v54 = vpop.f32.mrf.mxu0  ;;  %5484 = vmatpush3.bf16.msra.mxu1 %v2773_v62 }
 0x3a0   : > { %v2449_v63 = vpop.f32.mrf.mxu1  ;;  %v2400_v11 = vadd.f32 %v2383_v54, %v2315_v30  ;;  %5671 = vmatprep.subr.msk.bf16.mxu0 %vm622_vm0, %v2679_v27  ;;  %5674 = vmatprep.subr.msk.bf16.mxu1 %vm622_vm0, %v2973_v21 }
 0x3a1   : > { %v6655_v19 = vadd.f32 %v2449_v63, %v2395_v44  ;;  %v2514_v48 = vmul.f32 %v6659_v31, %v6659_v31  ;;  %v2491_v42 = vsel %vm609_vm2, %v6659_v31, 0.0 }
 0x3a2   : > { %v5468_v1 = vpop.f32.mrf.mxu1 }
 0x3a3   : > { %v2512_v38 = vmul.f32 %v6655_v19, %v6655_v19  ;;  %v6664_v45 = vadd.f32 %v5468_v1, %v2398_v39  ;;  %v2488_v52 = vsel %vm609_vm2, %v6655_v19, 0.0  ;;  %v2523_v3 = vsel %vm609_vm2, %v2514_v48, 0.0 }
 0x3a4   : > { %v2452_v40 = vpop.f32.mrf.mxu1 }
 0x3a5   : > { %v6666_v60 = vadd.f32 %v2452_v40, %v2396_v9  ;;  %v2520_v56 = vsel %vm609_vm2, %v2512_v38, 0.0  ;;  %v2515_v57 = vmul.f32 %v6664_v45, %v6664_v45  ;;  %v2493_v5 = vsel %vm609_vm2, %v6664_v45, 0.0  ;;  %v6728_v38 = vld [vmem:[%s7384_s8 + $0x4] sm:$0x3] }
 0x3a6   : > { %v5471_v29 = vpop.f32.mrf.mxu1  ;;  %v2693_v40 = vsel %vm622_vm0, %v2679_v27, 0  ;;  %v7469_v27 = vld [vmem:[#allocation18_spill] sm:$0xff] }
 0x3a7   : > { %v2489_v35 = vsel %vm609_vm2, %v6666_v60, 0.0  ;;  %v2513_v50 = vmul.f32 %v6666_v60, %v6666_v60  ;;  %v6685_v51 = vadd.f32 %v5471_v29, %v2401_v55  ;;  %v2525_v7 = vsel %vm609_vm2, %v2515_v57, 0.0  ;;  %5474 = vmatpush3.bf16.msra.mxu0 %v2693_v40 }
 0x3a8   : > { %v2490_v41 = vadd.f32 %v2489_v35, %v2488_v52  ;;  %v2465_v53 = vpop.f32.mrf.mxu1  ;;  %5673 = vmatprep.subr.msk.bf16.mxu0 %vm622_vm0, %v6728_v38 }
 0x3a9   : > { %v2521_v58 = vsel %vm609_vm2, %v2513_v50, 0.0  ;;  %v6683_v8 = vadd.f32 %v2465_v53, %v2399_v24  ;;  %v2518_v28 = vmul.f32 %v6685_v51, %v6685_v51  ;;  %v2499_v26 = vsel %vm609_vm2, %v6685_v51, 0.0 }
 0x3aa   : > { %v2492_v12 = vadd.f32 %v2491_v42, %v2490_v41  ;;  %v2522_v15 = vadd.f32 %v2521_v58, %v2520_v56  ;;  %v5472_v61 = vpop.f32.mrf.mxu1 }
 0x3ab   : > { %v2516_v49 = vmul.f32 %v6683_v8, %v6683_v8  ;;  %v2495_v10 = vsel %vm609_vm2, %v6683_v8, 0.0  ;;  %v6700_v18 = vadd.f32 %v5472_v61, %v2402_v33  ;;  %v2531_v34 = vsel %vm609_vm2, %v2518_v28, 0.0 }
 0x3ac   : > { %v2524_v59 = vadd.f32 %v2523_v3, %v2522_v15  ;;  %v2494_v46 = vadd.f32 %v2493_v5, %v2492_v12  ;;  %v2468_v13 = vpop.f32.mrf.mxu1 }
 0x3ad   : > { %v6695_v0 = vadd.f32 %v2468_v13, %v2400_v11  ;;  %v2527_v47 = vsel %vm609_vm2, %v2516_v49, 0.0  ;;  %v2501_v22 = vsel %vm609_vm2, %v6700_v18, 0.0  ;;  %v2519_v37 = vmul.f32 %v6700_v18, %v6700_v18 }
 0x3ae   : > { %v2496_v14 = vadd.f32 %v2495_v10, %v2494_v46  ;;  %v2526_v20 = vadd.f32 %v2525_v7, %v2524_v59  ;;  %v5025_v46 = vld [vmem:[%s7382_s6] ss:$0 sm:$0xff] }
 0x3af   : > { %v2497_v44 = vsel %vm609_vm2, %v6695_v0, 0.0  ;;  %v2517_v4 = vmul.f32 %v6695_v0, %v6695_v0  ;;  %v2533_v39 = vsel %vm609_vm2, %v2519_v37, 0.0 }
 0x3b0   : > { %v2498_v6 = vadd.f32 %v2497_v44, %v2496_v14  ;;  %v2528_v36 = vadd.f32 %v2527_v47, %v2526_v20 }
 0x3b1   : > { %v2529_v32 = vsel %vm609_vm2, %v2517_v4, 0.0 }
 0x3b2   : > { %v2500_v63 = vadd.f32 %v2499_v26, %v2498_v6  ;;  %v2530_v17 = vadd.f32 %v2529_v32, %v2528_v36 }
 0x3b4   : > { %v2502_v16 = vadd.f32 %v2501_v22, %v2500_v63  ;;  %v2532_v1 = vadd.f32 %v2531_v34, %v2530_v17 }
 0x3b6   : > { %2503 = vadd.xlane.f32.xlu0 %v2502_v16  ;;  %v2534_v9 = vadd.f32 %v2533_v39, %v2532_v1  ;;  %v7466_v1 = vld [vmem:[#allocation16_spill] sm:$0xff] }
 0x3ba   : > { %2535 = vadd.xlane.f32.xlu0 %v2534_v9  ;;  %v7467_v9 = vld [vmem:[#allocation19_spill] sm:$0xff] }
 0x43f   : > { %v2504_v24 = vpop.xlane.xlu0 %2503 }
 0x440   : > { %v2505_v30 = vrot.slane %v2504_v24, 4 }
 0x442   : > { %v2506_v29 = vadd.f32 %v2505_v30, %v2504_v24  ;;  %v7470_v24 = vld [vmem:[#allocation21_spill] sm:$0xff] }
 0x443   : > { %v2536_v48 = vpop.xlane.xlu0 %2535 }
 0x444   : > { %v2507_v52 = vrot.slane %v2506_v29, 2  ;;  %v2537_v35 = vrot.slane %v2536_v48, 4 }
 0x446   : > { %v2508_v50 = vadd.f32 %v2507_v52, %v2506_v29  ;;  %v2538_v55 = vadd.f32 %v2537_v35, %v2536_v48  ;;  %v7471_v29 = vld [vmem:[#allocation20_spill] sm:$0xff]  ;;  %v7472_v52 = vld [vmem:[#allocation23_spill] sm:$0xff] }
 0x448   : > { %v2509_v43 = vrot.slane %v2508_v50, 1  ;;  %v2539_v42 = vrot.slane %v2538_v55, 2 }
 0x44a   : > { %v2510_v54 = vadd.f32 %v2509_v43, %v2508_v50  ;;  %v2540_v41 = vadd.f32 %v2539_v42, %v2538_v55 }
 0x44c   : > { %v2511_v53 = vmul.f32 0.00390625, %v2510_v54  ;;  %v2541_v56 = vrot.slane %v2540_v41, 1 }
 0x44e   : > { %v2542_v57 = vadd.f32 %v2541_v56, %v2540_v41  ;;  %v2544_v58 = vmul.f32 %v2511_v53, %v2511_v53  ;;  %v2546_v3 = vsub.f32 %v6655_v19, %v2511_v53  ;;  %v2547_v11 = vsub.f32 %v6666_v60, %v2511_v53 }
 0x44f   : > { %v2548_v5 = vsub.f32 %v6659_v31, %v2511_v53  ;;  %v2549_v49 = vsub.f32 %v6664_v45, %v2511_v53  ;;  %v2550_v13 = vsub.f32 %v6683_v8, %v2511_v53  ;;  %v2551_v33 = vsub.f32 %v6695_v0, %v2511_v53  ;;  %v5026_v31 = vld [vmem:[%s7383_s7] ss:$0 sm:$0xff] }
 0x450   : > { %v2543_v12 = vmul.f32 0.00390625, %v2542_v57  ;;  %v2552_v7 = vsub.f32 %v6685_v51, %v2511_v53  ;;  %v2553_v51 = vsub.f32 %v6700_v18, %v2511_v53  ;;  %v7473_v57 = vld [vmem:[#allocation24_spill] sm:$0xff] }
 0x452   : > { %v2545_v15 = vsub.f32 %v2543_v12, %v2544_v58 }
 0x454   : > { %v2554_v61 = vadd.f32 1e-05, %v2545_v15 }
 0x456   : > { %5778 = vrsqrt.f32 %v2554_v61 }
 0x463   : > { %v5779_v59 = vpop.eup %5778 }
 0x464   : > { %v2556_v10 = vmul.f32 %v5779_v59, %v2546_v3  ;;  %v2557_v28 = vmul.f32 %v5779_v59, %v2547_v11  ;;  %v2558_v19 = vmul.f32 %v5779_v59, %v2548_v5  ;;  %v2559_v14 = vmul.f32 %v5779_v59, %v2549_v49 }
 0x465   : > { %v2560_v45 = vmul.f32 %v5779_v59, %v2550_v13  ;;  %v2561_v60 = vmul.f32 %v5779_v59, %v2551_v33  ;;  %v2562_v20 = vmul.f32 %v5779_v59, %v2552_v7  ;;  %v2563_v16 = vmul.f32 %v5779_v59, %v2553_v51 }
 0x466   : > { %v2572_v47 = vmul.f32 %v5025_v46, %v2556_v10  ;;  %v2573_v44 = vmul.f32 %v5025_v46, %v2557_v28  ;;  %v2574_v4 = vmul.f32 %v5025_v46, %v2558_v19  ;;  %v2575_v6 = vmul.f32 %v5025_v46, %v2559_v14 }
 0x467   : > { %v2576_v8 = vmul.f32 %v5025_v46, %v2560_v45  ;;  %v2577_v36 = vmul.f32 %v5025_v46, %v2561_v60  ;;  %v2578_v0 = vmul.f32 %v5025_v46, %v2562_v20  ;;  %v2579_v54 = vmul.f32 %v5025_v46, %v2563_v16  ;;  %v7476_v16 = vld [vmem:[#allocation17_spill] sm:$0xff] }
 0x468   : > { %v2586_v26 = vadd.f32 %v5026_v31, %v2572_v47  ;;  %v2587_v32 = vadd.f32 %v5026_v31, %v2573_v44  ;;  %v2588_v63 = vadd.f32 %v5026_v31, %v2574_v4  ;;  %v2589_v17 = vadd.f32 %v5026_v31, %v2575_v6 }
 0x469   : > { %v2590_v22 = vadd.f32 %v5026_v31, %v2576_v8  ;;  %v2591_v37 = vadd.f32 %v5026_v31, %v2577_v36  ;;  %v2592_v34 = vadd.f32 %v5026_v31, %v2578_v0  ;;  %v2593_v56 = vadd.f32 %v5026_v31, %v2579_v54 }
 0x46a   : > { %v2594_v39 = vadd.f32 %v2586_v26, %v7466_v1  ;;  %v2595_v23 = vadd.f32 %v2587_v32, %v7467_v9  ;;  %v2596_v62 = vadd.f32 %v2588_v63, %v7468_v25  ;;  %v2597_v40 = vadd.f32 %v2589_v17, %v7469_v27  ;;  %v6787_v32 = vld [vmem:[%s7384_s8 + $0x8] ss:$0 sps:$4 sm:$0xcc]  }
 0x46b   : > { %v2598_v30 = vadd.f32 %v2590_v22, %v7470_v24  ;;  %v2599_v18 = vadd.f32 %v2591_v37, %v7471_v29  ;;  %v2600_v35 = vadd.f32 %v2592_v34, %v7472_v52  ;;  %v6763_v58 = vadd.f32 %v2593_v56, %v7473_v57  ;;  %v3066_v25 = vld [vmem:[%s7384_s8 + $0x8] sm:$0x3]  ;;  %v7477_v56 = vld [vmem:[#allocation22_spill] sm:$0xff] }
 0x46c   : > { %v2610_v48 = vmul.f32 0.70710677, %v2594_v39  ;;  %v2611_v50 = vmul.f32 0.70710677, %v2595_v23  ;;  %v2612_v55 = vmul.f32 0.70710677, %v2596_v62 }
 0x46d   : > { %v2613_v43 = vmul.f32 0.70710677, %v2597_v40  ;;  %v2614_v42 = vmul.f32 0.70710677, %v2598_v30  ;;  %v2615_v41 = vmul.f32 0.70710677, %v2599_v18 }
 0x46e   : > { %5780 = verf.f32 %v2610_v48  ;;  %v2616_v53 = vmul.f32 0.70710677, %v2600_v35  ;;  %v2617_v12 = vmul.f32 0.70710677, %v6763_v58  ;;  %v2602_v3 = vmul.f32 0.5, %v2594_v39 }
 0x46f   : > { %5782 = verf.f32 %v2611_v50  ;;  %v2874_v5 = vsel %vm622_vm0, %v6728_v38, 0  ;;  %v2987_v49 = vsel %vm622_vm0, %v2973_v21, 0  ;;  %v2603_v46 = vmul.f32 0.5, %v2595_v23 }
 0x470   : > { %5784 = verf.f32 %v2612_v55  ;;  %v2604_v13 = vmul.f32 0.5, %v2596_v62  ;;  %v2605_v7 = vmul.f32 0.5, %v2597_v40  ;;  %v2606_v14 = vmul.f32 0.5, %v2598_v30 }
 0x471   : > { %5786 = verf.f32 %v2613_v43  ;;  %v2607_v38 = vmul.f32 0.5, %v2599_v18  ;;  %v2608_v20 = vmul.f32 0.5, %v2600_v35  ;;  %v7474_v47 = vmov 0.0  }
 0x472   : > { %5788 = verf.f32 %v2614_v42  ;;  %v3179_v48 = vrot.slane %v6787_v32, 2 }
 0x473   : > { %5790 = verf.f32 %v2615_v41 }
 0x474   : > { %5792 = verf.f32 %v2616_v53 }
 0x475   : > { %5794 = verf.f32 %v2617_v12 }
 0x47b   : > { %v5781_v15 = vpop.eup %5780 }
 0x47c   : > { %v5783_v61 = vpop.eup %5782  ;;  %v2626_v11 = vadd.f32 1.0, %v5781_v15 }
 0x47d   : > { %v5785_v59 = vpop.eup %5784  ;;  %v2627_v33 = vadd.f32 1.0, %v5783_v61 }
 0x47e   : > { %v5787_v10 = vpop.eup %5786  ;;  %v6771_v28 = vmul.f32 %v2626_v11, %v2602_v3  ;;  %v2628_v19 = vadd.f32 1.0, %v5785_v59 }
 0x47f   : > { %v5789_v31 = vpop.eup %5788  ;;  %v6773_v45 = vmul.f32 %v2627_v33, %v2603_v46  ;;  %v2629_v60 = vadd.f32 1.0, %v5787_v10  ;;  %v5759_v10 = vld [vmem:[%s7384_s8 + $0xc] ss:$0 sps:$4 sm:$0xcc]  }
 0x480   : > { %v5791_v2 = vpop.eup %5790  ;;  %v2671_v21 = vpack.c.bf16 %v6771_v28, %v7474_v47  ;;  %v6777_v44 = vmul.f32 %v2628_v19, %v2604_v13  ;;  %v2630_v4 = vadd.f32 1.0, %v5789_v31  ;;  %v2651_v6 = vrot.slane %v6771_v28, 7 }
 0x481   : > { %v5793_v8 = vpop.eup %5792  ;;  %v6780_v36 = vmul.f32 %v2629_v60, %v2605_v7  ;;  %v2652_v0 = vrot.slane %v6773_v45, 7  ;;  %v2631_v51 = vadd.f32 1.0, %v5791_v2  ;;  %v2841_v26 = vrot.slane %v6771_v28, 1  ;;  %v3275_v2 = vld [vmem:[%s7384_s8 + $0xc] sm:$0x3] }
 0x482   : > { %5475 = vmatprep.mubr.msk.bf16.mxu0 %vm609_vm2, %v2671_v21  ;;  %v6792_v63 = vpack.c.bf16 %v6777_v44, %v6773_v45  ;;  %v6794_v17 = vmul.f32 %v2630_v4, %v2606_v14  ;;  %v2659_v37 = vsel %vm503_vm1, 0.0, %v2651_v6  ;;  %v2653_v34 = vrot.slane %v6777_v44, 7  ;;  %v5795_v53 = vpop.eup %5794 }
 0x483   : > { %v2666_v1 = vpack.c.bf16 %v2659_v37, %v7476_v16  ;;  %v2660_v39 = vsel %vm503_vm1, 0.0, %v2652_v0  ;;  %v2654_v9 = vrot.slane %v6780_v36, 7  ;;  %v2632_v23 = vadd.f32 1.0, %v5793_v8 }
 0x484   : > { %5476 = vmatmul.mubr.msk.bf16.vlgmr.msra.gmra.mxu0 %vm609_vm2, %v6792_v63  ;;  %v6810_v62 = vpack.c.bf16 %v6794_v17, %v6780_v36  ;;  %v2661_v27 = vsel %vm503_vm1, 0.0, %v2653_v34  ;;  %v2655_v40 = vrot.slane %v6794_v17, 7  ;;  %v6815_v24 = vmul.f32 %v2631_v51, %v2607_v38 }
 0x485   : > { %5494 = vmatpush3.bf16.msra.mxu0 %v2874_v5  ;;  %5485 = vmatprep.mubr.msk.bf16.mxu1 %vm609_vm2, %v2666_v1  ;;  %v6818_v30 = vpack.c.bf16 %v2661_v27, %v2660_v39  ;;  %v2662_v29 = vsel %vm503_vm1, 0.0, %v2654_v9  ;;  %v6822_v18 = vmul.f32 %v2632_v23, %v2608_v20  ;;  %v2849_v43 = vsel %vm504_vm3, 0.0, %v2841_v26 }
 0x486   : > { %5479 = vmatprep.mubr.msk.bf16.mxu0 %vm609_vm2, %v6810_v62  ;;  %v2663_v52 = vsel %vm503_vm1, 0.0, %v2655_v40  ;;  %v2656_v35 = vrot.slane %v6815_v24, 7  ;;  %5675 = vmatprep.subr.msk.bf16.mxu0 %vm622_vm0, %v3066_v25  ;;  %v2856_v57 = vpack.c.bf16 %v2849_v43, %v7477_v56  ;;  %v2842_v12 = vrot.slane %v6773_v45, 1 }
 0x487   : > { %5486 = vmatmul.mubr.msk.bf16.vlgmr.msra.gmra.mxu1 %vm609_vm2, %v6818_v30  ;;  %v6833_v50 = vpack.c.bf16 %v2663_v52, %v2662_v29  ;;  %v2657_v55 = vrot.slane %v6822_v18, 7  ;;  %v6843_v42 = vpack.c.bf16 %v6822_v18, %v6815_v24  ;;  %v2843_v15 = vrot.slane %v6777_v44, 1 }
 0x488   : > { %5504 = vmatpush3.bf16.msra.mxu1 %v2987_v49  ;;  %v2664_v54 = vsel %vm503_vm1, 0.0, %v2656_v35  ;;  %v2844_v61 = vrot.slane %v6780_v36, 1  ;;  %v2845_v3 = vrot.slane %v6794_v17, 1  ;;  %v2965_v5 = vpack.c.bf16 %v2660_v39, %v2659_v37 }
 0x489   : > { %5489 = vmatprep.mubr.msk.bf16.mxu1 %vm609_vm2, %v6833_v50  ;;  %5676 = vmatprep.subr.msk.bf16.mxu1 %vm622_vm0, %v3179_v48  ;;  %v2665_v41 = vsel %vm503_vm1, 0.0, %v2657_v55  ;;  %v2633_v49 = vadd.f32 1.0, %v5795_v53  ;;  %v2850_v59 = vsel %vm504_vm3, 0.0, %v2842_v12  ;;  %v2851_v46 = vsel %vm504_vm3, 0.0, %v2843_v15 }
 0x48a   : > { %v6857_v11 = vpack.c.bf16 %v2665_v41, %v2664_v54  ;;  %v2852_v13 = vsel %vm504_vm3, 0.0, %v2844_v61  ;;  %v2853_v33 = vsel %vm504_vm3, 0.0, %v2845_v3  ;;  %v2609_v7 = vmul.f32 0.5, %v6763_v58 }
 0x48b   : > { %v2857_v19 = vpack.c.bf16 %v2851_v46, %v2850_v59  ;;  %v3080_v14 = vsel %vm622_vm0, %v3066_v25, 0  ;;  %v2858_v60 = vpack.c.bf16 %v2853_v33, %v2852_v13  ;;  %v2846_v38 = vrot.slane %v6815_v24, 1 }
 0x48c   : > { %5480 = vmatmul.mubr.msk.bf16.gmra.mxu0 %vm609_vm2, %v6843_v42  ;;  %v2641_v31 = vmul.f32 %v2633_v49, %v2609_v7  ;;  %v2847_v20 = vrot.slane %v6822_v18, 1  ;;  %v2966_v58 = vpack.c.bf16 %v2662_v29, %v2661_v27  ;;  %v3193_v21 = vsel %vm622_vm0, %v3179_v48, 0 }
 0x48d   : > { %5495 = vmatprep.mubr.msk.bf16.mxu0 %vm609_vm2, %v2856_v57  ;;  %v3360_v4 = vrot.slane %v5759_v10, 2  ;;  %v2967_v6 = vpack.c.bf16 %v2664_v54, %v2663_v52  ;;  %v2854_v0 = vsel %vm504_vm3, 0.0, %v2846_v38  ;;  %v3062_v37 = vpack.c.bf16 %v6773_v45, %v6771_v28  ;;  %v3445_v28 = vld [vmem:[%s7384_s8 + $0x10] sm:$0x3] }
 0x48e   : > { %v2956_v8 = vrot.slane %v2641_v31, 7  ;;  %v2855_v51 = vsel %vm504_vm3, 0.0, %v2847_v20  ;;  %v3171_v1 = vpack.c.bf16 %v2850_v59, %v2849_v43  ;;  %v3063_v39 = vpack.c.bf16 %v6780_v36, %v6777_v44 }
 0x48f   : > { %5490 = vmatmul.mubr.msk.bf16.gmra.mxu1 %vm609_vm2, %v6857_v11  ;;  %v2859_v26 = vpack.c.bf16 %v2855_v51, %v2854_v0  ;;  %v3280_v9 = vsel %vm622_vm0, %v3275_v2, 0  ;;  %v3064_v23 = vpack.c.bf16 %v6815_v24, %v6794_v17  ;;  %v3172_v45 = vpack.c.bf16 %v2852_v13, %v2851_v46 }
 0x490   : > { %5505 = vmatprep.mubr.msk.bf16.mxu1 %vm609_vm2, %v2965_v5  ;;  %v2964_v32 = vsel %vm503_vm1, 0.0, %v2956_v8  ;;  %v3365_v25 = vsel %vm622_vm0, %v3360_v4, 0  ;;  %v3173_v27 = vpack.c.bf16 %v2854_v0, %v2853_v33  ;;  %v3162_v40 = vrot.slane %v2641_v31, 1 }
 0x491   : > { %v2968_v34 = vpack.c.bf16 %v2964_v32, %v2665_v41  ;;  %v3065_v44 = vpack.c.bf16 %v2641_v31, %v6822_v18  ;;  %v3450_v24 = vsel %vm622_vm0, %v3445_v28, 0 }
 0x492   : > { %v3170_v36 = vsel %vm504_vm3, 0.0, %v3162_v40 }
 0x493   : > { %v3174_v17 = vpack.c.bf16 %v3170_v36, %v2855_v51  ;;  %v3444_v29 = vpack.c.bf16 %v7477_v56, %v3170_v36 }
 0x494   : > { %5496 = vmatmul.mubr.msk.bf16.vlgmr.msra.gmra.mxu0 %vm609_vm2, %v2857_v19 }
 0x495   : > { %5514 = vmatpush3.bf16.msra.mxu0 %v3080_v14  ;;  %5499 = vmatprep.mubr.msk.bf16.mxu0 %vm609_vm2, %v2858_v60 }
 0x496   : > { %5677 = vmatprep.subr.msk.bf16.mxu0 %vm622_vm0, %v3275_v2 }
 0x497   : > { %5506 = vmatmul.mubr.msk.bf16.vlgmr.msra.gmra.mxu1 %vm609_vm2, %v2966_v58 }
 0x498   : > { %5509 = vmatprep.mubr.msk.bf16.mxu1 %vm609_vm2, %v2967_v6  ;;  %5524 = vmatpush3.bf16.msra.mxu1 %v3193_v21 }
 0x499   : > { %5678 = vmatprep.subr.msk.bf16.mxu1 %vm622_vm0, %v3360_v4 }
 0x49c   : > { %5500 = vmatmul.mubr.msk.bf16.gmra.mxu0 %vm609_vm2, %v2859_v26 }
 0x49d   : > { %5515 = vmatprep.mubr.msk.bf16.mxu0 %vm609_vm2, %v3062_v37 }
 0x49f   : > { %5510 = vmatmul.mubr.msk.bf16.gmra.mxu1 %vm609_vm2, %v2968_v34 }
 0x4a0   : > { %5525 = vmatprep.mubr.msk.bf16.mxu1 %vm609_vm2, %v3171_v1 }
 0x4a4   : > { %5516 = vmatmul.mubr.msk.bf16.vlgmr.msra.gmra.mxu0 %vm609_vm2, %v3063_v39 }
 0x4a5   : > { %5534 = vmatpush3.bf16.msra.mxu0 %v3280_v9  ;;  %5519 = vmatprep.mubr.msk.bf16.mxu0 %vm609_vm2, %v3064_v23 }
 0x4a6   : > { %5679 = vmatprep.subr.msk.bf16.mxu0 %vm622_vm0, %v3445_v28 }
 0x4a7   : > { %5526 = vmatmul.mubr.msk.bf16.vlgmr.msra.gmra.mxu1 %vm609_vm2, %v3172_v45 }
 0x4a8   : > { %5529 = vmatprep.mubr.msk.bf16.mxu1 %vm609_vm2, %v3173_v27  ;;  %5544 = vmatpush3.bf16.msra.mxu1 %v3365_v25 }
 0x4ac   : > { %5520 = vmatmul.mubr.msk.bf16.gmra.mxu0 %vm609_vm2, %v3065_v44 }
 0x4ad   : > { %5535 = vmatprep.mubr.msk.bf16.mxu0 %vm609_vm2, %v6818_v30  ;;  %v3274_v30 = vpack.c.bf16 %v7476_v16, %v2964_v32 }
 0x4af   : > { %5530 = vmatmul.mubr.msk.bf16.gmra.mxu1 %vm609_vm2, %v3174_v17 }
 0x4b0   : > { %5545 = vmatprep.mubr.msk.bf16.mxu1 %vm609_vm2, %v6792_v63  ;;  %v3355_v63 = vpack.c.bf16 %v7474_v47, %v2641_v31 }
 0x4b4   : > { %5536 = vmatmul.mubr.msk.bf16.vlgmr.msra.gmra.mxu0 %vm609_vm2, %v6833_v50 }
 0x4b5   : > { %5554 = vmatpush3.bf16.msra.mxu0 %v3450_v24  ;;  %5539 = vmatprep.mubr.msk.bf16.mxu0 %vm609_vm2, %v6857_v11 }
 0x4b7   : > { %5546 = vmatmul.mubr.msk.bf16.vlgmr.msra.gmra.mxu1 %vm609_vm2, %v6810_v62 }
 0x4b8   : > { %5549 = vmatprep.mubr.msk.bf16.mxu1 %vm609_vm2, %v6843_v42 }
 0x4bc   : > { %5540 = vmatmul.mubr.msk.bf16.gmra.mxu0 %vm609_vm2, %v3274_v30 }
 0x4bd   : > { %5555 = vmatprep.mubr.msk.bf16.mxu0 %vm609_vm2, %v2857_v19 }
 0x4bf   : > { %5550 = vmatmul.mubr.msk.bf16.gmra.mxu1 %vm609_vm2, %v3355_v63 }
 0x4c4   : > { %5556 = vmatmul.mubr.msk.bf16.vlgmr.msra.gmra.mxu0 %vm609_vm2, %v2858_v60 }
 0x4c5   : > { %5559 = vmatprep.mubr.msk.bf16.mxu0 %vm609_vm2, %v2859_v26 }
 0x4cc   : > { %5560 = vmatmul.mubr.msk.bf16.gmra.mxu0 %vm609_vm2, %v3444_v29 }
 0x544   : > { %v5477_v62 = vpop.f32.mrf.mxu0 }
 0x546   : > { %v2729_v18 = vpop.f32.mrf.mxu0 }
 0x547   : > { %v5487_v48 = vpop.f32.mrf.mxu1 }
 0x548   : > { %v5478_v52 = vpop.f32.mrf.mxu0  ;;  %v2818_v45 = vadd.f32 %v5487_v48, %v5477_v62 }
 0x549   : > { %v2809_v35 = vpop.f32.mrf.mxu1 }
 0x54a   : > { %v2732_v50 = vpop.f32.mrf.mxu0  ;;  %v2810_v9 = vadd.f32 %v2809_v35, %v2729_v18 }
 0x54b   : > { %v5488_v55 = vpop.f32.mrf.mxu1 }
 0x54c   : > { %v5481_v43 = vpop.f32.mrf.mxu0  ;;  %v2821_v44 = vadd.f32 %v5488_v55, %v5478_v52 }
 0x54d   : > { %v2812_v42 = vpop.f32.mrf.mxu1 }
 0x54e   : > { %v2745_v54 = vpop.f32.mrf.mxu0  ;;  %v2813_v36 = vadd.f32 %v2812_v42, %v2732_v50 }
 0x54f   : > { %v5491_v41 = vpop.f32.mrf.mxu1 }
 0x550   : > { %v6940_v53 = vpop.f32.mrf.mxu0 }
 0x551   : > { %v2825_v57 = vpop.f32.mrf.mxu1 }
 0x552   : > { %v2748_v12 = vpop.f32.mrf.mxu0  ;;  %v2826_v22 = vadd.f32 %v2825_v57, %v2745_v54 }
 0x553   : > { %v5492_v15 = vpop.f32.mrf.mxu1 }
 0x554   : > { %v5497_v61 = vpop.f32.mrf.mxu0  ;;  %v2837_v50 = vadd.f32 %v5492_v15, %v6940_v53 }
 0x555   : > { %v2828_v3 = vpop.f32.mrf.mxu1  ;;  %v2943_v17 = vadd.f32 %v5497_v61, %v2818_v45 }
 0x556   : > { %v2910_v11 = vpop.f32.mrf.mxu0  ;;  %v2829_v55 = vadd.f32 %v2828_v3, %v2748_v12 }
 0x557   : > { %v5507_v5 = vpop.f32.mrf.mxu1  ;;  %v2941_v25 = vadd.f32 %v2910_v11, %v2810_v9 }
 0x558   : > { %v5498_v49 = vpop.f32.mrf.mxu0  ;;  %v3056_v18 = vadd.f32 %v5507_v5, %v2943_v17 }
 0x559   : > { %v3023_v59 = vpop.f32.mrf.mxu1  ;;  %v2944_v63 = vadd.f32 %v5498_v49, %v2821_v44 }
 0x55a   : > { %v2913_v46 = vpop.f32.mrf.mxu0  ;;  %v3054_v29 = vadd.f32 %v3023_v59, %v2941_v25 }
 0x55b   : > { %v5508_v13 = vpop.f32.mrf.mxu1  ;;  %v2942_v56 = vadd.f32 %v2913_v46, %v2813_v36 }
 0x55c   : > { %v5501_v33 = vpop.f32.mrf.mxu0  ;;  %v3057_v11 = vadd.f32 %v5508_v13, %v2944_v63 }
 0x55d   : > { %v3026_v7 = vpop.f32.mrf.mxu1 }
 0x55e   : > { %v2926_v10 = vpop.f32.mrf.mxu0  ;;  %v3055_v9 = vadd.f32 %v3026_v7, %v2942_v56 }
 0x55f   : > { %v5511_v19 = vpop.f32.mrf.mxu1  ;;  %v2945_v62 = vadd.f32 %v2926_v10, %v2826_v22 }
 0x560   : > { %v5502_v14 = vpop.f32.mrf.mxu0 }
 0x561   : > { %v3039_v31 = vpop.f32.mrf.mxu1  ;;  %v2948_v54 = vadd.f32 %v5502_v14, %v2837_v50 }
 0x562   : > { %v2929_v60 = vpop.f32.mrf.mxu0  ;;  %v3058_v57 = vadd.f32 %v3039_v31, %v2945_v62 }
 0x563   : > { %v6942_v38 = vpop.f32.mrf.mxu1  ;;  %v2946_v5 = vadd.f32 %v2929_v60, %v2829_v55 }
 0x564   : > { %v5517_v20 = vpop.f32.mrf.mxu0  ;;  %v3061_v53 = vadd.f32 %v6942_v38, %v2948_v54 }
 0x565   : > { %v6944_v2 = vpop.f32.mrf.mxu1 }
 0x566   : > { %v3116_v58 = vpop.f32.mrf.mxu0  ;;  %v3059_v12 = vadd.f32 %v6944_v2, %v2946_v5 }
 0x567   : > { %v5527_v21 = vpop.f32.mrf.mxu1  ;;  %v3147_v35 = vadd.f32 %v3116_v58, %v3054_v29 }
 0x568   : > { %v5518_v4 = vpop.f32.mrf.mxu0 }
 0x569   : > { %v3229_v6 = vpop.f32.mrf.mxu1  ;;  %v3150_v49 = vadd.f32 %v5518_v4, %v3057_v11 }
 0x56a   : > { %v3119_v8 = vpop.f32.mrf.mxu0  ;;  %v3260_v59 = vadd.f32 %v3229_v6, %v3147_v35 }
 0x56b   : > { %v5528_v0 = vpop.f32.mrf.mxu1  ;;  %v3148_v46 = vadd.f32 %v3119_v8, %v3055_v9 }
 0x56c   : > { %v5521_v51 = vpop.f32.mrf.mxu0  ;;  %v3263_v7 = vadd.f32 %v5528_v0, %v3150_v49 }
 0x56d   : > { %v3232_v26 = vpop.f32.mrf.mxu1 }
 0x56e   : > { %v3132_v32 = vpop.f32.mrf.mxu0  ;;  %v3261_v10 = vadd.f32 %v3232_v26, %v3148_v46 }
 0x56f   : > { %v6946_v37 = vpop.f32.mrf.mxu1  ;;  %v3151_v13 = vadd.f32 %v3132_v32, %v3058_v57 }
 0x570   : > { %7478 = vst [vmem:[#allocation25_spill] sm:$0xff] %v6946_v37  ;;  %v5522_v34 = vpop.f32.mrf.mxu0  ;;  %v2834_v37 = vadd.f32 %v5491_v41, %v5481_v43 }
 0x571   : > { %v3245_v1 = vpop.f32.mrf.mxu1  ;;  %v3154_v4 = vadd.f32 %v5522_v34, %v3061_v53 }
 0x572   : > { %v3135_v39 = vpop.f32.mrf.mxu0  ;;  %v2947_v42 = vadd.f32 %v5501_v33, %v2834_v37 }
 0x573   : > { %v6948_v23 = vpop.f32.mrf.mxu1  ;;  %v3152_v6 = vadd.f32 %v3135_v39, %v3059_v12 }
 0x574   : > { %7479 = vst [vmem:[#allocation27_spill] sm:$0xff] %v6948_v23  ;;  %v5537_v28 = vpop.f32.mrf.mxu0  ;;  %v3060_v41 = vadd.f32 %v5511_v19, %v2947_v42 }
 0x575   : > { %v6950_v27 = vpop.f32.mrf.mxu1 }
 0x576   : > { %7480 = vst [vmem:[#allocation26_spill] sm:$0xff] %v6950_v27  ;;  %v3316_v40 = vpop.f32.mrf.mxu0  ;;  %v3149_v27 = vadd.f32 %v5517_v20, %v3056_v18  ;;  %v3153_v15 = vadd.f32 %v5521_v51, %v3060_v41 }
 0x577   : > { %v5547_v24 = vpop.f32.mrf.mxu1  ;;  %v3347_v43 = vadd.f32 %v3316_v40, %v3260_v59  ;;  %v7481_v0 = vld [vmem:[#allocation25_spill] sm:$0xff] }
 0x578   : > { %v5538_v30 = vpop.f32.mrf.mxu0  ;;  %v3262_v45 = vadd.f32 %v5527_v21, %v3149_v27  ;;  %v3264_v21 = vadd.f32 %v3245_v1, %v3151_v13  ;;  %v3266_v26 = vadd.f32 %v7481_v0, %v3153_v15 }
 0x579   : > { %v3401_v16 = vpop.f32.mrf.mxu1  ;;  %v3350_v33 = vadd.f32 %v5538_v30, %v3263_v7 }
 0x57a   : > { %v3319_v47 = vpop.f32.mrf.mxu0  ;;  %v3349_v20 = vadd.f32 %v5537_v28, %v3262_v45  ;;  %v3432_v14 = vadd.f32 %v3401_v16, %v3347_v43 }
 0x57b   : > { %v5548_v23 = vpop.f32.mrf.mxu1  ;;  %v3348_v31 = vadd.f32 %v3319_v47, %v3261_v10  ;;  %v7482_v27 = vld [vmem:[#allocation27_spill] sm:$0xff] }
 0x57c   : > { %v5541_v48 = vpop.f32.mrf.mxu0  ;;  %v3434_v19 = vadd.f32 %v5547_v24, %v3349_v20  ;;  %v3435_v38 = vadd.f32 %v5548_v23, %v3350_v33  ;;  %v3267_v16 = vadd.f32 %v7482_v27, %v3154_v4  ;;  %v3701_v27 = vld [vmem:[%s7387_s11] sm:$0xf] }
 0x57d   : > { %v3404_v52 = vpop.f32.mrf.mxu1  ;;  %v7483_v47 = vld [vmem:[#allocation26_spill] sm:$0xff]  ;;  %v3353_v34 = vadd.f32 %v5541_v48, %v3266_v26  ;;  %5681 = vmatprep.subr.msk.bf16.mxu0 %vm3719_vm5, %v3701_v27 }
 0x57e   : > { %v3332_v61 = vpop.f32.mrf.mxu0  ;;  %v3433_v25 = vadd.f32 %v3404_v52, %v3348_v31  ;;  %v3265_v40 = vadd.f32 %v7483_v47, %v3152_v6  ;;  %v3801_v47 = vsel %vm3719_vm5, %v3701_v27, 0 }
 0x57f   : > { %v5551_v22 = vpop.f32.mrf.mxu1  ;;  %v3351_v37 = vadd.f32 %v3332_v61, %v3264_v21  ;;  %5574 = vmatpush3.bf16.msra.mxu0 %v3801_v47 }
 0x580   : > { %v5542_v58 = vpop.f32.mrf.mxu0  ;;  %v3438_v48 = vadd.f32 %v5551_v22, %v3353_v34  ;;  %v7034_v34 = vld [vmem:[%s7387_s11 + $0xc] sm:$0xf] }
 0x581   : > { %v3417_v60 = vpop.f32.mrf.mxu1  ;;  %v3354_v17 = vadd.f32 %v5542_v58, %v3267_v16  ;;  %5683 = vmatprep.subr.msk.bf16.mxu0 %vm3719_vm5, %v7034_v34 }
 0x582   : > { %v3335_v56 = vpop.f32.mrf.mxu0  ;;  %v3436_v23 = vadd.f32 %v3417_v60, %v3351_v37 }
 0x583   : > { %v5552_v2 = vpop.f32.mrf.mxu1  ;;  %v3352_v24 = vadd.f32 %v3335_v56, %v3265_v40  ;;  %v7027_v40 = vld [vmem:[%s7387_s11 + $0x8] sm:$0xf] }
 0x584   : > { %v5557_v3 = vpop.f32.mrf.mxu0  ;;  %v3439_v49 = vadd.f32 %v5552_v2, %v3354_v17  ;;  %v3706_v2 = vld [vmem:[%s7387_s11 + $0x4] sm:$0xf] }
 0x585   : > { %v6958_v51 = vadd.f32 %v5557_v3, %v3434_v19  ;;  %v3420_v29 = vpop.f32.mrf.mxu1  ;;  %5680 = vmatprep.subr.msk.bf16.mxu1 %vm3719_vm5, %v3706_v2  ;;  %v3721_v16 = vsel %vm3719_vm5, %v3706_v2, 0 }
 0x586   : > { %v3486_v8 = vpop.f32.mrf.mxu0  ;;  %v3437_v59 = vadd.f32 %v3420_v29, %v3352_v24  ;;  %5564 = vmatpush3.bf16.msra.mxu1 %v3721_v16 }
 0x587   : > { %v6955_v32 = vadd.f32 %v3486_v8, %v3432_v14  ;;  %v3553_v63 = vmul.f32 %v6958_v51, %v6958_v51  ;;  %v3529_v11 = vsel %vm3525_vm4, %v6958_v51, 0.0  ;;  %5682 = vmatprep.subr.msk.bf16.mxu1 %vm3719_vm5, %v7027_v40 }
 0x588   : > { %v5558_v28 = vpop.f32.mrf.mxu0 }
 0x589   : > { %v3551_v39 = vmul.f32 %v6955_v32, %v6955_v32  ;;  %v6964_v44 = vadd.f32 %v5558_v28, %v3435_v38  ;;  %v3526_v18 = vsel %vm3525_vm4, %v6955_v32, 0.0  ;;  %v3562_v5 = vsel %vm3525_vm4, %v3553_v63, 0.0 }
 0x58a   : > { %v3489_v1 = vpop.f32.mrf.mxu0 }
 0x58b   : > { %v6966_v36 = vadd.f32 %v3489_v1, %v3433_v25  ;;  %v3559_v50 = vsel %vm3525_vm4, %v3551_v39, 0.0  ;;  %v3554_v55 = vmul.f32 %v6964_v44, %v6964_v44  ;;  %v3531_v58 = vsel %vm3525_vm4, %v6964_v44, 0.0 }
 0x58c   : > { %v5561_v30 = vpop.f32.mrf.mxu0 }
 0x58d   : > { %v3527_v35 = vsel %vm3525_vm4, %v6966_v36, 0.0  ;;  %v3552_v62 = vmul.f32 %v6966_v36, %v6966_v36  ;;  %v6987_v45 = vadd.f32 %v5561_v30, %v3438_v48  ;;  %v3564_v56 = vsel %vm3525_vm4, %v3554_v55, 0.0 }
 0x58e   : > { %v3528_v9 = vadd.f32 %v3527_v35, %v3526_v18  ;;  %v3502_v52 = vpop.f32.mrf.mxu0 }
 0x58f   : > { %v3560_v42 = vsel %vm3525_vm4, %v3552_v62, 0.0  ;;  %v6982_v61 = vadd.f32 %v3502_v52, %v3436_v23  ;;  %v3557_v15 = vmul.f32 %v6987_v45, %v6987_v45  ;;  %v3537_v4 = vsel %vm3525_vm4, %v6987_v45, 0.0 }
 0x590   : > { %v3530_v46 = vadd.f32 %v3529_v11, %v3528_v9  ;;  %v3561_v54 = vadd.f32 %v3560_v42, %v3559_v50  ;;  %v5562_v57 = vpop.f32.mrf.mxu0 }
 0x591   : > { %v3555_v43 = vmul.f32 %v6982_v61, %v6982_v61  ;;  %v3533_v7 = vsel %vm3525_vm4, %v6982_v61, 0.0  ;;  %v6994_v10 = vadd.f32 %v5562_v57, %v3439_v49  ;;  %v3570_v26 = vsel %vm3525_vm4, %v3557_v15, 0.0 }
 0x592   : > { %v3563_v22 = vadd.f32 %v3562_v5, %v3561_v54  ;;  %v3532_v41 = vadd.f32 %v3531_v58, %v3530_v46  ;;  %v3505_v13 = vpop.f32.mrf.mxu0  ;;  %v5067_v58 = vld [vmem:[%s7385_s9] ss:$0 sm:$0xff] }
 0x593   : > { %v6996_v20 = vadd.f32 %v3505_v13, %v3437_v59  ;;  %v3566_v3 = vsel %vm3525_vm4, %v3555_v43, 0.0  ;;  %v3558_v21 = vmul.f32 %v6994_v10, %v6994_v10  ;;  %v3539_v0 = vsel %vm3525_vm4, %v6994_v10, 0.0 }
 0x594   : > { %v3534_v53 = vadd.f32 %v3533_v7, %v3532_v41  ;;  %v3565_v12 = vadd.f32 %v3564_v56, %v3563_v22 }
 0x595   : > { %v3535_v33 = vsel %vm3525_vm4, %v6996_v20, 0.0  ;;  %v3556_v14 = vmul.f32 %v6996_v20, %v6996_v20  ;;  %v3572_v38 = vsel %vm3525_vm4, %v3558_v21, 0.0 }
 0x596   : > { %v3536_v31 = vadd.f32 %v3535_v33, %v3534_v53  ;;  %v3567_v60 = vadd.f32 %v3566_v3, %v3565_v12 }
 0x597   : > { %v3568_v6 = vsel %vm3525_vm4, %v3556_v14, 0.0 }
 0x598   : > { %v3538_v8 = vadd.f32 %v3537_v4, %v3536_v31  ;;  %v3569_v19 = vadd.f32 %v3568_v6, %v3567_v60 }
 0x59a   : > { %v3540_v37 = vadd.f32 %v3539_v0, %v3538_v8  ;;  %v3571_v28 = vadd.f32 %v3570_v26, %v3569_v19 }
 0x59c   : > { %3541 = vadd.xlane.f32.xlu1 %v3540_v37  ;;  %v3573_v25 = vadd.f32 %v3572_v38, %v3571_v28 }
 0x59e   : > { %3574 = vadd.xlane.f32.xlu0 %v3573_v25 }
 0x625   : > { %v3542_v1 = vpop.xlane.xlu1 %3541 }
 0x626   : > { %v3543_v39 = vrot.slane %v3542_v1, 4 }
 0x627   : > { %v3575_v17 = vpop.xlane.xlu0 %3574 }
 0x628   : > { %v3544_v23 = vadd.f32 %v3543_v39, %v3542_v1  ;;  %v3576_v24 = vrot.slane %v3575_v17, 4 }
 0x62a   : > { %v3545_v30 = vrot.slane %v3544_v23, 2  ;;  %v3577_v63 = vadd.f32 %v3576_v24, %v3575_v17 }
 0x62c   : > { %v3546_v29 = vadd.f32 %v3545_v30, %v3544_v23  ;;  %v3578_v18 = vrot.slane %v3577_v63, 2 }
 0x62e   : > { %v3547_v35 = vrot.slane %v3546_v29, 1  ;;  %v3579_v62 = vadd.f32 %v3578_v18, %v3577_v63  ;;  %v3902_v18 = vsel %vm3719_vm5, %v7027_v40, 0 }
 0x630   : > { %v3548_v48 = vadd.f32 %v3547_v35, %v3546_v29  ;;  %v3580_v11 = vrot.slane %v3579_v62, 1 }
 0x632   : > { %v3550_v9 = vmul.f32 0.001953125, %v3548_v48  ;;  %v3581_v52 = vadd.f32 %v3580_v11, %v3579_v62 }
 0x634   : > { %v3582_v50 = vmul.f32 0.001953125, %v3581_v52  ;;  %v3583_v55 = vmul.f32 %v3550_v9, %v3550_v9  ;;  %v3585_v59 = vsub.f32 %v6955_v32, %v3550_v9  ;;  %v3586_v46 = vsub.f32 %v6966_v36, %v3550_v9 }
 0x635   : > { %v3587_v54 = vsub.f32 %v6958_v51, %v3550_v9  ;;  %v3588_v57 = vsub.f32 %v6964_v44, %v3550_v9  ;;  %v3589_v43 = vsub.f32 %v6982_v61, %v3550_v9  ;;  %v3590_v22 = vsub.f32 %v6996_v20, %v3550_v9  ;;  %v5068_v51 = vld [vmem:[%s7386_s10] ss:$0 sm:$0xff] }
 0x636   : > { %v3584_v42 = vsub.f32 %v3582_v50, %v3583_v55  ;;  %v3591_v41 = vsub.f32 %v6987_v45, %v3550_v9  ;;  %v3592_v0 = vsub.f32 %v6994_v10, %v3550_v9 }
 0x638   : > { %v3593_v49 = vadd.f32 1e-05, %v3584_v42 }
 0x63a   : > { %5796 = vrsqrt.f32 %v3593_v49 }
 0x647   : > { %v5797_v5 = vpop.eup %5796 }
 0x648   : > { %v3595_v13 = vmul.f32 %v5797_v5, %v3585_v59  ;;  %v3596_v56 = vmul.f32 %v5797_v5, %v3586_v46  ;;  %v3597_v32 = vmul.f32 %v5797_v5, %v3587_v54  ;;  %v3598_v7 = vmul.f32 %v5797_v5, %v3588_v57 }
 0x649   : > { %v3599_v44 = vmul.f32 %v5797_v5, %v3589_v43  ;;  %v3600_v36 = vmul.f32 %v5797_v5, %v3590_v22  ;;  %v3601_v53 = vmul.f32 %v5797_v5, %v3591_v41  ;;  %v3602_v25 = vmul.f32 %v5797_v5, %v3592_v0 }
 0x64a   : > { %v3611_v12 = vmul.f32 %v5067_v58, %v3595_v13  ;;  %v3612_v15 = vmul.f32 %v5067_v58, %v3596_v56  ;;  %v3613_v3 = vmul.f32 %v5067_v58, %v3597_v32  ;;  %v3614_v33 = vmul.f32 %v5067_v58, %v3598_v7 }
 0x64b   : > { %v3615_v61 = vmul.f32 %v5067_v58, %v3599_v44  ;;  %v3616_v14 = vmul.f32 %v5067_v58, %v3600_v36  ;;  %v3617_v20 = vmul.f32 %v5067_v58, %v3601_v53  ;;  %v3618_v16 = vmul.f32 %v5067_v58, %v3602_v25  ;;  %v7486_v44 = vld [vmem:[#allocation17_spill] sm:$0xff] }
 0x64c   : > { %v3625_v31 = vadd.f32 %v5068_v51, %v3611_v12  ;;  %v3626_v45 = vadd.f32 %v5068_v51, %v3612_v15  ;;  %v3627_v60 = vadd.f32 %v5068_v51, %v3613_v3  ;;  %v3628_v4 = vadd.f32 %v5068_v51, %v3614_v33  ;;  %v4090_v3 = vld [vmem:[%s7387_s11 + $0x10] sm:$0xf] }
 0x64d   : > { %v3629_v21 = vadd.f32 %v5068_v51, %v3615_v61  ;;  %v3630_v6 = vadd.f32 %v5068_v51, %v3616_v14  ;;  %v3631_v19 = vadd.f32 %v5068_v51, %v3617_v20  ;;  %v7052_v47 = vadd.f32 %v5068_v51, %v3618_v16 }
 0x64e   : > { %v3641_v8 = vmul.f32 0.70710677, %v3625_v31  ;;  %v3642_v26 = vmul.f32 0.70710677, %v3626_v45  ;;  %v3643_v37 = vmul.f32 0.70710677, %v3627_v60 }
 0x64f   : > { %v3644_v28 = vmul.f32 0.70710677, %v3628_v4  ;;  %v3645_v38 = vmul.f32 0.70710677, %v3629_v21  ;;  %v3646_v2 = vmul.f32 0.70710677, %v3630_v6 }
 0x650   : > { %5798 = verf.f32 %v3641_v8  ;;  %v3647_v27 = vmul.f32 0.70710677, %v3631_v19  ;;  %v3648_v1 = vmul.f32 0.70710677, %v7052_v47  ;;  %v3633_v17 = vmul.f32 0.5, %v3625_v31 }
 0x651   : > { %5800 = verf.f32 %v3642_v26  ;;  %v3634_v30 = vmul.f32 0.5, %v3626_v45  ;;  %v3635_v63 = vmul.f32 0.5, %v3627_v60  ;;  %v3636_v11 = vmul.f32 0.5, %v3628_v4  ;;  %v4199_v8 = vld [vmem:[%s7387_s11 + $0x14] sm:$0xf] }
 0x652   : > { %5802 = verf.f32 %v3643_v37  ;;  %v3637_v50 = vmul.f32 0.5, %v3629_v21  ;;  %v3638_v42 = vmul.f32 0.5, %v3630_v6  ;;  %v7484_v59 = vmov 0.0  }
 0x653   : > { %5804 = verf.f32 %v3644_v28  ;;  %v3639_v22 = vmul.f32 0.5, %v3631_v19  ;;  %v4011_v4 = vsel %vm3719_vm5, %v7034_v34, 0 }
 0x654   : > { %5806 = verf.f32 %v3645_v38 }
 0x655   : > { %5808 = verf.f32 %v3646_v2  ;;  %v7487_v2 = vld [vmem:[#allocation22_spill] sm:$0xff] }
 0x656   : > { %5810 = verf.f32 %v3647_v27 }
 0x657   : > { %5812 = verf.f32 %v3648_v1 }
 0x65d   : > { %v5799_v10 = vpop.eup %5798 }
 0x65e   : > { %v5801_v39 = vpop.eup %5800  ;;  %v3657_v23 = vadd.f32 1.0, %v5799_v10 }
 0x65f   : > { %v5803_v24 = vpop.eup %5802  ;;  %v3658_v29 = vadd.f32 1.0, %v5801_v39 }
 0x660   : > { %v5805_v35 = vpop.eup %5804  ;;  %v7057_v62 = vmul.f32 %v3657_v23, %v3633_v17  ;;  %v3659_v48 = vadd.f32 1.0, %v5803_v24 }
 0x661   : > { %v5807_v9 = vpop.eup %5806  ;;  %v7059_v52 = vmul.f32 %v3658_v29, %v3634_v30  ;;  %v3660_v55 = vadd.f32 1.0, %v5805_v35  ;;  %v3640_v35 = vmul.f32 0.5, %v7052_v47  ;;  %v4213_v47 = vsel %vm3719_vm5, %v4199_v8, 0 }
 0x662   : > { %v5809_v49 = vpop.eup %5808  ;;  %v3702_v46 = vpack.c.bf16 %v7057_v62, %v7484_v59  ;;  %v7063_v54 = vmul.f32 %v3659_v48, %v3635_v63  ;;  %v3661_v57 = vadd.f32 1.0, %v5807_v9  ;;  %v3682_v40 = vrot.slane %v7057_v62, 7 }
 0x663   : > { %v5811_v5 = vpop.eup %5810  ;;  %v7066_v58 = vmul.f32 %v3660_v55, %v3636_v11  ;;  %v3683_v43 = vrot.slane %v7059_v52, 7  ;;  %v3662_v41 = vadd.f32 1.0, %v5809_v49  ;;  %v3869_v15 = vrot.slane %v7057_v62, 1  ;;  %v4295_v49 = vld [vmem:[%s7387_s11 + $0x18] sm:$0xf] }
 0x664   : > { %5565 = vmatprep.mubr.msk.bf16.mxu1 %vm3525_vm4, %v3702_v46  ;;  %v7072_v13 = vpack.c.bf16 %v7063_v54, %v7059_v52  ;;  %v7074_v56 = vmul.f32 %v3661_v57, %v3637_v50  ;;  %v3690_v7 = vsel %vm503_vm1, 0.0, %v3682_v40  ;;  %v3684_v51 = vrot.slane %v7063_v54, 7  ;;  %v5813_v25 = vpop.eup %5812 }
 0x665   : > { %v3697_v36 = vpack.c.bf16 %v3690_v7, %v7486_v44  ;;  %v3691_v53 = vsel %vm503_vm1, 0.0, %v3683_v43  ;;  %v3685_v12 = vrot.slane %v7066_v58, 7  ;;  %v3663_v20 = vadd.f32 1.0, %v5811_v5  ;;  %v4376_v5 = vld [vmem:[%s7387_s11 + $0x1c] sm:$0xf] }
 0x666   : > { %5566 = vmatmul.mubr.msk.bf16.vlgmr.msra.gmra.mxu1 %vm3525_vm4, %v7072_v13  ;;  %v7091_v33 = vpack.c.bf16 %v7074_v56, %v7066_v58  ;;  %v3692_v61 = vsel %vm503_vm1, 0.0, %v3684_v51  ;;  %v3686_v14 = vrot.slane %v7074_v56, 7  ;;  %v7101_v60 = vmul.f32 %v3662_v41, %v3638_v42 }
 0x667   : > { %5584 = vmatpush3.bf16.msra.mxu1 %v3902_v18  ;;  %5575 = vmatprep.mubr.msk.bf16.mxu0 %vm3525_vm4, %v3697_v36  ;;  %v7097_v31 = vpack.c.bf16 %v3692_v61, %v3691_v53  ;;  %v3693_v45 = vsel %vm503_vm1, 0.0, %v3685_v12  ;;  %v7109_v6 = vmul.f32 %v3663_v20, %v3639_v22  ;;  %v3877_v0 = vsel %vm504_vm3, 0.0, %v3869_v15 }
 0x668   : > { %5569 = vmatprep.mubr.msk.bf16.mxu1 %vm3525_vm4, %v7091_v33  ;;  %v3694_v21 = vsel %vm503_vm1, 0.0, %v3686_v14  ;;  %5684 = vmatprep.subr.msk.bf16.mxu1 %vm3719_vm5, %v4090_v3  ;;  %v3687_v34 = vrot.slane %v7101_v60, 7  ;;  %v3884_v27 = vpack.c.bf16 %v3877_v0, %v7487_v2  ;;  %v3870_v16 = vrot.slane %v7059_v52, 1 }
 0x669   : > { %5576 = vmatmul.mubr.msk.bf16.vlgmr.msra.gmra.mxu0 %vm3525_vm4, %v7097_v31  ;;  %v7117_v19 = vpack.c.bf16 %v3694_v21, %v3693_v45  ;;  %v3688_v26 = vrot.slane %v7109_v6, 7  ;;  %v7128_v37 = vpack.c.bf16 %v7109_v6, %v7101_v60  ;;  %v3871_v1 = vrot.slane %v7063_v54, 1 }
 0x66a   : > { %5594 = vmatpush3.bf16.msra.mxu0 %v4011_v4  ;;  %v3695_v28 = vsel %vm503_vm1, 0.0, %v3687_v34  ;;  %v3872_v10 = vrot.slane %v7066_v58, 1  ;;  %v3873_v39 = vrot.slane %v7074_v56, 1  ;;  %v3993_v23 = vpack.c.bf16 %v3691_v53, %v3690_v7 }
 0x66b   : > { %5579 = vmatprep.mubr.msk.bf16.mxu0 %vm3525_vm4, %v7117_v19  ;;  %5685 = vmatprep.subr.msk.bf16.mxu0 %vm3719_vm5, %v4199_v8  ;;  %v3696_v38 = vsel %vm503_vm1, 0.0, %v3688_v26  ;;  %v3664_v24 = vadd.f32 1.0, %v5813_v25  ;;  %v3878_v30 = vsel %vm504_vm3, 0.0, %v3870_v16  ;;  %v3879_v63 = vsel %vm504_vm3, 0.0, %v3871_v1 }
 0x66c   : > { %v7142_v17 = vpack.c.bf16 %v3696_v38, %v3695_v28  ;;  %v3880_v29 = vsel %vm504_vm3, 0.0, %v3872_v10  ;;  %v3881_v18 = vsel %vm504_vm3, 0.0, %v3873_v39  ;;  %v3885_v48 = vpack.c.bf16 %v3879_v63, %v3878_v30 }
 0x66d   : > { %v4104_v11 = vsel %vm3719_vm5, %v4090_v3, 0  ;;  %v3672_v9 = vmul.f32 %v3664_v24, %v3640_v35  ;;  %v3886_v50 = vpack.c.bf16 %v3881_v18, %v3880_v29  ;;  %v3874_v55 = vrot.slane %v7101_v60, 1 }
 0x66e   : > { %5570 = vmatmul.mubr.msk.bf16.gmra.mxu1 %vm3525_vm4, %v7128_v37  ;;  %v3875_v42 = vrot.slane %v7109_v6, 1  ;;  %v3994_v46 = vpack.c.bf16 %v3693_v45, %v3692_v61  ;;  %v3995_v57 = vpack.c.bf16 %v3695_v28, %v3694_v21  ;;  %v4086_v51 = vpack.c.bf16 %v7059_v52, %v7057_v62  ;;  %v4461_v62 = vld [vmem:[%s7387_s11 + $0x20] sm:$0xf] }
 0x66f   : > { %5585 = vmatprep.mubr.msk.bf16.mxu1 %vm3525_vm4, %v3884_v27  ;;  %v3984_v40 = vrot.slane %v3672_v9, 7  ;;  %v3882_v43 = vsel %vm504_vm3, 0.0, %v3874_v55  ;;  %v4195_v53 = vpack.c.bf16 %v3878_v30, %v3877_v0  ;;  %v4087_v12 = vpack.c.bf16 %v7066_v58, %v7063_v54 }
 0x670   : > { %v3883_v22 = vsel %vm504_vm3, 0.0, %v3875_v42  ;;  %v4300_v15 = vsel %vm3719_vm5, %v4295_v49, 0  ;;  %v4088_v3 = vpack.c.bf16 %v7101_v60, %v7074_v56  ;;  %v4196_v52 = vpack.c.bf16 %v3880_v29, %v3879_v63 }
 0x671   : > { %5580 = vmatmul.mubr.msk.bf16.gmra.mxu0 %vm3525_vm4, %v7142_v17  ;;  %v3887_v41 = vpack.c.bf16 %v3883_v22, %v3882_v43  ;;  %v3992_v7 = vsel %vm503_vm1, 0.0, %v3984_v40  ;;  %v4381_v61 = vsel %vm3719_vm5, %v4376_v5, 0  ;;  %v4197_v14 = vpack.c.bf16 %v3882_v43, %v3881_v18 }
 0x672   : > { %5595 = vmatprep.mubr.msk.bf16.mxu0 %vm3525_vm4, %v3993_v23  ;;  %v3996_v36 = vpack.c.bf16 %v3992_v7, %v3696_v38  ;;  %v4186_v20 = vrot.slane %v3672_v9, 1  ;;  %v4089_v54 = vpack.c.bf16 %v3672_v9, %v7109_v6  ;;  %v4466_v45 = vsel %vm3719_vm5, %v4461_v62, 0 }
 0x674   : > { %v4194_v58 = vsel %vm504_vm3, 0.0, %v4186_v20 }
 0x675   : > { %v4198_v56 = vpack.c.bf16 %v4194_v58, %v3883_v22  ;;  %v4460_v60 = vpack.c.bf16 %v7487_v2, %v4194_v58 }
 0x676   : > { %5586 = vmatmul.mubr.msk.bf16.vlgmr.msra.gmra.mxu1 %vm3525_vm4, %v3885_v48 }
 0x677   : > { %5604 = vmatpush3.bf16.msra.mxu1 %v4104_v11  ;;  %5589 = vmatprep.mubr.msk.bf16.mxu1 %vm3525_vm4, %v3886_v50 }
 0x678   : > { %5686 = vmatprep.subr.msk.bf16.mxu1 %vm3719_vm5, %v4295_v49 }
 0x679   : > { %5596 = vmatmul.mubr.msk.bf16.vlgmr.msra.gmra.mxu0 %vm3525_vm4, %v3994_v46 }
 0x67a   : > { %5599 = vmatprep.mubr.msk.bf16.mxu0 %vm3525_vm4, %v3995_v57  ;;  %5614 = vmatpush3.bf16.msra.mxu0 %v4213_v47 }
 0x67b   : > { %5687 = vmatprep.subr.msk.bf16.mxu0 %vm3719_vm5, %v4376_v5 }
 0x67e   : > { %5590 = vmatmul.mubr.msk.bf16.gmra.mxu1 %vm3525_vm4, %v3887_v41 }
 0x67f   : > { %5605 = vmatprep.mubr.msk.bf16.mxu1 %vm3525_vm4, %v4086_v51 }
 0x681   : > { %5600 = vmatmul.mubr.msk.bf16.gmra.mxu0 %vm3525_vm4, %v3996_v36 }
 0x682   : > { %5615 = vmatprep.mubr.msk.bf16.mxu0 %vm3525_vm4, %v4195_v53 }
 0x686   : > { %5606 = vmatmul.mubr.msk.bf16.vlgmr.msra.gmra.mxu1 %vm3525_vm4, %v4087_v12 }
 0x687   : > { %5624 = vmatpush3.bf16.msra.mxu1 %v4300_v15  ;;  %5609 = vmatprep.mubr.msk.bf16.mxu1 %vm3525_vm4, %v4088_v3 }
 0x688   : > { %5688 = vmatprep.subr.msk.bf16.mxu1 %vm3719_vm5, %v4461_v62 }
 0x689   : > { %5616 = vmatmul.mubr.msk.bf16.vlgmr.msra.gmra.mxu0 %vm3525_vm4, %v4196_v52 }
 0x68a   : > { %5619 = vmatprep.mubr.msk.bf16.mxu0 %vm3525_vm4, %v4197_v14  ;;  %5634 = vmatpush3.bf16.msra.mxu0 %v4381_v61 }
 0x68e   : > { %5610 = vmatmul.mubr.msk.bf16.gmra.mxu1 %vm3525_vm4, %v4089_v54 }
 0x68f   : > { %5625 = vmatprep.mubr.msk.bf16.mxu1 %vm3525_vm4, %v7097_v31  ;;  %v4294_v31 = vpack.c.bf16 %v7486_v44, %v3992_v7 }
 0x691   : > { %5620 = vmatmul.mubr.msk.bf16.gmra.mxu0 %vm3525_vm4, %v4198_v56 }
 0x692   : > { %5635 = vmatprep.mubr.msk.bf16.mxu0 %vm3525_vm4, %v7072_v13  ;;  %v4375_v13 = vpack.c.bf16 %v7484_v59, %v3672_v9 }
 0x696   : > { %5626 = vmatmul.mubr.msk.bf16.vlgmr.msra.gmra.mxu1 %vm3525_vm4, %v7117_v19 }
 0x697   : > { %5644 = vmatpush3.bf16.msra.mxu1 %v4466_v45  ;;  %5629 = vmatprep.mubr.msk.bf16.mxu1 %vm3525_vm4, %v7142_v17 }
 0x699   : > { %5636 = vmatmul.mubr.msk.bf16.vlgmr.msra.gmra.mxu0 %vm3525_vm4, %v7091_v33 }
 0x69a   : > { %5639 = vmatprep.mubr.msk.bf16.mxu0 %vm3525_vm4, %v7128_v37 }
 0x69e   : > { %5630 = vmatmul.mubr.msk.bf16.gmra.mxu1 %vm3525_vm4, %v4294_v31 }
 0x69f   : > { %5645 = vmatprep.mubr.msk.bf16.mxu1 %vm3525_vm4, %v3885_v48 }
 0x6a1   : > { %5640 = vmatmul.mubr.msk.bf16.gmra.mxu0 %vm3525_vm4, %v4375_v13 }
 0x6a6   : > { %5646 = vmatmul.mubr.msk.bf16.vlgmr.msra.gmra.mxu1 %vm3525_vm4, %v3886_v50 }
 0x6a7   : > { %5649 = vmatprep.mubr.msk.bf16.mxu1 %vm3525_vm4, %v3887_v41 }
 0x6ae   : > { %5650 = vmatmul.mubr.msk.bf16.gmra.mxu1 %vm3525_vm4, %v4460_v60 }
 0x726   : > { %v5567_v33 = vpop.f32.mrf.mxu1 }
 0x728   : > { %v3757_v4 = vpop.f32.mrf.mxu1 }
 0x729   : > { %v5577_v21 = vpop.f32.mrf.mxu0 }
 0x72a   : > { %v5568_v44 = vpop.f32.mrf.mxu1  ;;  %v3846_v15 = vadd.f32 %v5577_v21, %v5567_v33 }
 0x72b   : > { %v3837_v6 = vpop.f32.mrf.mxu0 }
 0x72c   : > { %v3760_v8 = vpop.f32.mrf.mxu1  ;;  %v3838_v36 = vadd.f32 %v3837_v6, %v3757_v4 }
 0x72d   : > { %v5578_v19 = vpop.f32.mrf.mxu0 }
 0x72e   : > { %v5571_v34 = vpop.f32.mrf.mxu1  ;;  %v3849_v61 = vadd.f32 %v5578_v19, %v5568_v44 }
 0x72f   : > { %v3840_v0 = vpop.f32.mrf.mxu0 }
 0x730   : > { %v3773_v59 = vpop.f32.mrf.mxu1  ;;  %v3841_v14 = vadd.f32 %v3840_v0, %v3760_v8 }
 0x731   : > { %v5581_v26 = vpop.f32.mrf.mxu0 }
 0x732   : > { %v7225_v37 = vpop.f32.mrf.mxu1 }
 0x733   : > { %v3853_v28 = vpop.f32.mrf.mxu0 }
 0x734   : > { %v3776_v38 = vpop.f32.mrf.mxu1  ;;  %v3854_v60 = vadd.f32 %v3853_v28, %v3773_v59 }
 0x735   : > { %v5582_v25 = vpop.f32.mrf.mxu0 }
 0x736   : > { %v5587_v27 = vpop.f32.mrf.mxu1  ;;  %v3865_v8 = vadd.f32 %v5582_v25, %v7225_v37 }
 0x737   : > { %v3856_v2 = vpop.f32.mrf.mxu0  ;;  %v3971_v20 = vadd.f32 %v5587_v27, %v3846_v15 }
 0x738   : > { %v3938_v16 = vpop.f32.mrf.mxu1  ;;  %v3857_v19 = vadd.f32 %v3856_v2, %v3776_v38 }
 0x739   : > { %v5597_v1 = vpop.f32.mrf.mxu0  ;;  %v3969_v3 = vadd.f32 %v3938_v16, %v3838_v36 }
 0x73a   : > { %v5588_v10 = vpop.f32.mrf.mxu1  ;;  %v4080_v4 = vadd.f32 %v5597_v1, %v3971_v20 }
 0x73b   : > { %v4047_v39 = vpop.f32.mrf.mxu0  ;;  %v3972_v56 = vadd.f32 %v5588_v10, %v3849_v61 }
 0x73c   : > { %v3941_v17 = vpop.f32.mrf.mxu1  ;;  %v4078_v45 = vadd.f32 %v4047_v39, %v3969_v3 }
 0x73d   : > { %v5598_v23 = vpop.f32.mrf.mxu0  ;;  %v3970_v31 = vadd.f32 %v3941_v17, %v3841_v14 }
 0x73e   : > { %v5591_v24 = vpop.f32.mrf.mxu1  ;;  %v4081_v16 = vadd.f32 %v5598_v23, %v3972_v56 }
 0x73f   : > { %v4050_v30 = vpop.f32.mrf.mxu0 }
 0x740   : > { %v3954_v63 = vpop.f32.mrf.mxu1  ;;  %v4079_v36 = vadd.f32 %v4050_v30, %v3970_v31 }
 0x741   : > { %v5601_v29 = vpop.f32.mrf.mxu0  ;;  %v3973_v33 = vadd.f32 %v3954_v63, %v3854_v60 }
 0x742   : > { %v5592_v18 = vpop.f32.mrf.mxu1 }
 0x743   : > { %v4063_v35 = vpop.f32.mrf.mxu0  ;;  %v3976_v59 = vadd.f32 %v5592_v18, %v3865_v8 }
 0x744   : > { %v3957_v48 = vpop.f32.mrf.mxu1  ;;  %v4082_v28 = vadd.f32 %v4063_v35, %v3973_v33 }
 0x745   : > { %v7227_v11 = vpop.f32.mrf.mxu0  ;;  %v3974_v1 = vadd.f32 %v3957_v48, %v3857_v19 }
 0x746   : > { %v5607_v9 = vpop.f32.mrf.mxu1  ;;  %v4085_v37 = vadd.f32 %v7227_v11, %v3976_v59 }
 0x747   : > { %v7229_v50 = vpop.f32.mrf.mxu0 }
 0x748   : > { %v4140_v55 = vpop.f32.mrf.mxu1  ;;  %v4083_v38 = vadd.f32 %v7229_v50, %v3974_v1 }
 0x749   : > { %v5617_v42 = vpop.f32.mrf.mxu0  ;;  %v4171_v6 = vadd.f32 %v4140_v55, %v4078_v45 }
 0x74a   : > { %v5608_v49 = vpop.f32.mrf.mxu1 }
 0x74b   : > { %v4249_v46 = vpop.f32.mrf.mxu0  ;;  %v4174_v10 = vadd.f32 %v5608_v49, %v4081_v16 }
 0x74c   : > { %v4143_v47 = vpop.f32.mrf.mxu1  ;;  %v4280_v39 = vadd.f32 %v4249_v46, %v4171_v6 }
 0x74d   : > { %v5618_v57 = vpop.f32.mrf.mxu0  ;;  %v4172_v17 = vadd.f32 %v4143_v47, %v4079_v36 }
 0x74e   : > { %v5611_v40 = vpop.f32.mrf.mxu1 }
 0x74f   : > { %v4252_v5 = vpop.f32.mrf.mxu0 }
 0x750   : > { %v4156_v43 = vpop.f32.mrf.mxu1  ;;  %v4281_v3 = vadd.f32 %v4252_v5, %v4172_v17 }
 0x751   : > { %v7231_v22 = vpop.f32.mrf.mxu0  ;;  %v4175_v23 = vadd.f32 %v4156_v43, %v4082_v28 }
 0x752   : > { %7488 = vst [vmem:[#allocation16_spill] sm:$0xff] %v7231_v22  ;;  %v5612_v41 = vpop.f32.mrf.mxu1  ;;  %v3862_v22 = vadd.f32 %v5581_v26, %v5571_v34 }
 0x753   : > { %v4265_v7 = vpop.f32.mrf.mxu0  ;;  %v4178_v49 = vadd.f32 %v5612_v41, %v4085_v37 }
 0x754   : > { %v4159_v51 = vpop.f32.mrf.mxu1  ;;  %v3975_v0 = vadd.f32 %v5591_v24, %v3862_v22 }
 0x755   : > { %v7233_v53 = vpop.f32.mrf.mxu0  ;;  %v4176_v46 = vadd.f32 %v4159_v51, %v4083_v38 }
 0x756   : > { %7489 = vst [vmem:[#allocation19_spill] sm:$0xff] %v7233_v53  ;;  %v5627_v12 = vpop.f32.mrf.mxu1  ;;  %v4084_v63 = vadd.f32 %v5601_v29, %v3975_v0 }
 0x757   : > { %v7235_v62 = vpop.f32.mrf.mxu0 }
 0x758   : > { %7490 = vst [vmem:[#allocation15_spill] sm:$0xff] %v7235_v62  ;;  %v4336_v52 = vpop.f32.mrf.mxu1  ;;  %v4173_v62 = vadd.f32 %v5607_v9, %v4080_v4  ;;  %v4283_v9 = vadd.f32 %v5618_v57, %v4174_v10  ;;  %v4177_v25 = vadd.f32 %v5611_v40, %v4084_v63 }
 0x759   : > { %v5637_v54 = vpop.f32.mrf.mxu0  ;;  %v4367_v34 = vadd.f32 %v4336_v52, %v4280_v39  ;;  %v7491_v57 = vld [vmem:[#allocation16_spill] sm:$0xff] }
 0x75a   : > { %v5628_v58 = vpop.f32.mrf.mxu1  ;;  %v4282_v15 = vadd.f32 %v5617_v42, %v4173_v62  ;;  %v4284_v42 = vadd.f32 %v4265_v7, %v4175_v23  ;;  %v4286_v5 = vadd.f32 %v7491_v57, %v4177_v25 }
 0x75b   : > { %v4417_v13 = vpop.f32.mrf.mxu0  ;;  %v4370_v24 = vadd.f32 %v5628_v58, %v4283_v9 }
 0x75c   : > { %v4339_v32 = vpop.f32.mrf.mxu1  ;;  %v4369_v61 = vadd.f32 %v5627_v12, %v4282_v15  ;;  %v4448_v18 = vadd.f32 %v4417_v13, %v4367_v34 }
 0x75d   : > { %v5638_v53 = vpop.f32.mrf.mxu0  ;;  %v4368_v35 = vadd.f32 %v4339_v32, %v4281_v3  ;;  %v7492_v52 = vld [vmem:[#allocation19_spill] sm:$0xff] }
 0x75e   : > { %v5631_v21 = vpop.f32.mrf.mxu1  ;;  %v4450_v29 = vadd.f32 %v5637_v54, %v4369_v61  ;;  %v4451_v11 = vadd.f32 %v5638_v53, %v4370_v24  ;;  %v4287_v14 = vadd.f32 %v7492_v52, %v4178_v49 }
 0x75f   : > { %v4420_v44 = vpop.f32.mrf.mxu0  ;;  %v7493_v32 = vld [vmem:[#allocation15_spill] sm:$0xff]  ;;  %v4373_v41 = vadd.f32 %v5631_v21, %v4286_v5 }
 0x760   : > { %v4352_v27 = vpop.f32.mrf.mxu1  ;;  %v4449_v62 = vadd.f32 %v4420_v44, %v4368_v35  ;;  %v4285_v20 = vadd.f32 %v7493_v32, %v4176_v46 }
 0x761   : > { %v5641_v26 = vpop.f32.mrf.mxu0  ;;  %v4371_v22 = vadd.f32 %v4352_v27, %v4284_v42 }
 0x762   : > { %v5632_v55 = vpop.f32.mrf.mxu1  ;;  %v4454_v21 = vadd.f32 %v5641_v26, %v4373_v41 }
 0x763   : > { %v4433_v48 = vpop.f32.mrf.mxu0  ;;  %v4374_v56 = vadd.f32 %v5632_v55, %v4287_v14 }
 0x764   : > { %v4355_v30 = vpop.f32.mrf.mxu1  ;;  %v4452_v45 = vadd.f32 %v4433_v48, %v4371_v22 }
 0x765   : > { %v5642_v50 = vpop.f32.mrf.mxu0  ;;  %v4372_v53 = vadd.f32 %v4355_v30, %v4285_v20 }
 0x766   : > { %v5647_v2 = vpop.f32.mrf.mxu1  ;;  %v4455_v10 = vadd.f32 %v5642_v50, %v4374_v56 }
 0x767   : > { %v7243_v40 = vadd.f32 %v5647_v2, %v4450_v29  ;;  %v4436_v60 = vpop.f32.mrf.mxu0 }
 0x768   : > { %v4502_v47 = vpop.f32.mrf.mxu1  ;;  %v4453_v39 = vadd.f32 %v4436_v60, %v4372_v53 }
 0x769   : > { %v7240_v43 = vadd.f32 %v4502_v47, %v4448_v18  ;;  %v4567_v13 = vmul.f32 %v7243_v40, %v7243_v40  ;;  %v4544_v16 = vsel %vm3525_vm4, %v7243_v40, 0.0 }
 0x76a   : > { %v5648_v12 = vpop.f32.mrf.mxu1 }
 0x76b   : > { %v4565_v51 = vmul.f32 %v7240_v43, %v7240_v43  ;;  %v7249_v54 = vadd.f32 %v5648_v12, %v4451_v11  ;;  %v4541_v4 = vsel %vm3525_vm4, %v7240_v43, 0.0  ;;  %v4576_v1 = vsel %vm3525_vm4, %v4567_v13, 0.0 }
 0x76c   : > { %v4505_v7 = vpop.f32.mrf.mxu1 }
 0x76d   : > { %v7251_v58 = vadd.f32 %v4505_v7, %v4449_v62  ;;  %v4573_v8 = vsel %vm3525_vm4, %v4565_v51, 0.0  ;;  %v4568_v19 = vmul.f32 %v7249_v54, %v7249_v54  ;;  %v4546_v55 = vsel %vm3525_vm4, %v7249_v54, 0.0 }
 0x76e   : > { %v5651_v31 = vpop.f32.mrf.mxu1 }
 0x76f   : > { %v4542_v6 = vsel %vm3525_vm4, %v7251_v58, 0.0  ;;  %v4566_v33 = vmul.f32 %v7251_v58, %v7251_v58  ;;  %v7272_v15 = vadd.f32 %v5651_v31, %v4454_v21  ;;  %v4578_v30 = vsel %vm3525_vm4, %v4568_v19, 0.0 }
 0x770   : > { %v4543_v36 = vadd.f32 %v4542_v6, %v4541_v4  ;;  %v4518_v44 = vpop.f32.mrf.mxu1 }
 0x771   : > { %v4574_v0 = vsel %vm3525_vm4, %v4566_v33, 0.0  ;;  %v7267_v27 = vadd.f32 %v4518_v44, %v4452_v45  ;;  %v4571_v25 = vmul.f32 %v7272_v15, %v7272_v15  ;;  %v4552_v49 = vsel %vm3525_vm4, %v7272_v15, 0.0 }
 0x772   : > { %v4545_v17 = vadd.f32 %v4544_v16, %v4543_v36  ;;  %v4575_v59 = vadd.f32 %v4574_v0, %v4573_v8  ;;  %v5652_v28 = vpop.f32.mrf.mxu1  ;;  %v5915_v36 = vmov 1983009808   ;;  %v5916_v8 = vmov 1934713408  }
 0x773   : > { %v4569_v34 = vmul.f32 %v7267_v27, %v7267_v27  ;;  %v4548_v9 = vsel %vm3525_vm4, %v7267_v27, 0.0  ;;  %v7279_v3 = vadd.f32 %v5652_v28, %v4455_v10  ;;  %v4584_v5 = vsel %vm3525_vm4, %v4571_v25, 0.0 }
 0x774   : > { %v4577_v26 = vadd.f32 %v4576_v1, %v4575_v59  ;;  %v4547_v63 = vadd.f32 %v4546_v55, %v4545_v17  ;;  %v4521_v23 = vpop.f32.mrf.mxu1  ;;  %v4665_v44 = vunpack.c.l.s4 %v5915_v36  ;;  %v4729_v19 = vunpack.c.l.s4 %v5916_v8 }
 0x775   : > { %v7281_v61 = vadd.f32 %v4521_v23, %v4453_v39  ;;  %v4580_v2 = vsel %vm3525_vm4, %v4569_v34, 0.0  ;;  %v4572_v42 = vmul.f32 %v7279_v3, %v7279_v3  ;;  %v4554_v57 = vsel %vm3525_vm4, %v7279_v3, 0.0  ;;  %v7494_v39 = vld [vmem:[#allocation14_spill] sm:$0xff] }
 0x776   : > { %v4549_v37 = vadd.f32 %v4548_v9, %v4547_v63  ;;  %v4579_v38 = vadd.f32 %v4578_v30, %v4577_v26  ;;  %v4666_v0 = vunpack.c.0.s8 %v4665_v44  ;;  %v4730_v10 = vunpack.c.0.s8 %v4729_v19 }
 0x777   : > { %v4550_v24 = vsel %vm3525_vm4, %v7281_v61, 0.0  ;;  %v4570_v18 = vmul.f32 %v7281_v61, %v7281_v61  ;;  %v4586_v11 = vsel %vm3525_vm4, %v4572_v42, 0.0 }
 0x778   : > { %v4551_v35 = vadd.f32 %v4550_v24, %v4549_v37  ;;  %v4581_v48 = vadd.f32 %v4580_v2, %v4579_v38  ;;  %v4669_v17 = vsub.s32 %v4666_v0, %v7494_v39  ;;  %v7305_v59 = vsub.s32 %v4730_v10, %v7494_v39  ;;  %v5105_v37 = vld [vmem:[%s7388_s12] ss:$0 sm:$0xff] }
 0x779   : > { %v4582_v46 = vsel %vm3525_vm4, %v4570_v18, 0.0 }
 0x77a   : > { %v4553_v47 = vadd.f32 %v4552_v49, %v4551_v35  ;;  %v4583_v29 = vadd.f32 %v4582_v46, %v4581_v48  ;;  %v5107_v46 = vld [vmem:[%s499_s21] ss:$0 sm:$0xff]  ;;  %s496_s21 = scalar_lea.vmem [#allocation5], %s4942_s28 }
 0x77b   : > { %s4855_s14 = sshll.u32 %s496_s21, 4  ;;  %s4856_s14 = int_to_ptr.vmem [resolvable:$true] %s4855_s14 }
 0x77c   : > { %v4555_v22 = vadd.f32 %v4554_v57, %v4553_v47  ;;  %v4585_v12 = vadd.f32 %v4584_v5, %v4583_v29 }
 0x77e   : > { %4556 = vadd.xlane.f32.xlu1 %v4555_v22  ;;  %v4587_v62 = vadd.f32 %v4586_v11, %v4585_v12 }
 0x780   : > { %4588 = vadd.xlane.f32.xlu0 %v4587_v62 }
 0x807   : > { %v4557_v50 = vpop.xlane.xlu1 %4556 }
 0x808   : > { %v4558_v52 = vrot.slane %v4557_v50, 4 }
 0x809   : > { %v4589_v14 = vpop.xlane.xlu0 %4588 }
 0x80a   : > { %v4559_v32 = vadd.f32 %v4558_v52, %v4557_v50  ;;  %v4590_v20 = vrot.slane %v4589_v14, 4 }
 0x80c   : > { %v4560_v41 = vrot.slane %v4559_v32, 2  ;;  %v4591_v7 = vadd.f32 %v4590_v20, %v4589_v14 }
 0x80e   : > { %v4561_v51 = vadd.f32 %v4560_v41, %v4559_v32  ;;  %v4592_v56 = vrot.slane %v4591_v7, 2 }
 0x810   : > { %v4562_v45 = vrot.slane %v4561_v51, 1  ;;  %v4593_v53 = vadd.f32 %v4592_v56, %v4591_v7 }
 0x812   : > { %v4563_v31 = vadd.f32 %v4562_v45, %v4561_v51  ;;  %v4594_v13 = vrot.slane %v4593_v53, 1 }
 0x814   : > { %v4564_v60 = vmul.f32 0.001953125, %v4563_v31  ;;  %v4595_v4 = vadd.f32 %v4594_v13, %v4593_v53 }
 0x816   : > { %v4596_v6 = vmul.f32 0.001953125, %v4595_v4  ;;  %v4597_v33 = vmul.f32 %v4564_v60, %v4564_v60  ;;  %v4599_v28 = vsub.f32 %v7240_v43, %v4564_v60  ;;  %v4600_v1 = vsub.f32 %v7251_v58, %v4564_v60 }
 0x817   : > { %v4601_v55 = vsub.f32 %v7243_v40, %v4564_v60  ;;  %v4602_v34 = vsub.f32 %v7249_v54, %v4564_v60  ;;  %v4603_v63 = vsub.f32 %v7267_v27, %v4564_v60  ;;  %v4604_v23 = vsub.f32 %v7281_v61, %v4564_v60 }
 0x818   : > { %v4598_v21 = vsub.f32 %v4596_v6, %v4597_v33  ;;  %v4605_v30 = vsub.f32 %v7272_v15, %v4564_v60  ;;  %v4606_v9 = vsub.f32 %v7279_v3, %v4564_v60  ;;  %v5106_v15 = vld [vmem:[%s7389_s13] ss:$0 sm:$0xff] }
 0x81a   : > { %v4607_v16 = vadd.f32 1e-05, %v4598_v21 }
 0x81c   : > { %5814 = vrsqrt.f32 %v4607_v16 }
 0x829   : > { %v5815_v26 = vpop.eup %5814 }
 0x82a   : > { %v4609_v43 = vmul.f32 %v5815_v26, %v4599_v28  ;;  %v4610_v40 = vmul.f32 %v5815_v26, %v4600_v1  ;;  %v4611_v54 = vmul.f32 %v5815_v26, %v4601_v55  ;;  %v4612_v58 = vmul.f32 %v5815_v26, %v4602_v34 }
 0x82b   : > { %v4613_v38 = vmul.f32 %v5815_v26, %v4603_v63  ;;  %v4614_v27 = vmul.f32 %v5815_v26, %v4604_v23  ;;  %v4615_v25 = vmul.f32 %v5815_v26, %v4605_v30  ;;  %v4616_v61 = vmul.f32 %v5815_v26, %v4606_v9 }
 0x82c   : > { %v4625_v3 = vmul.f32 %v5105_v37, %v4609_v43  ;;  %v4626_v2 = vmul.f32 %v5105_v37, %v4610_v40  ;;  %v4627_v24 = vmul.f32 %v5105_v37, %v4611_v54  ;;  %v4628_v18 = vmul.f32 %v5105_v37, %v4612_v58 }
 0x82d   : > { %v4629_v35 = vmul.f32 %v5105_v37, %v4613_v38  ;;  %v4630_v48 = vmul.f32 %v5105_v37, %v4614_v27  ;;  %v4631_v49 = vmul.f32 %v5105_v37, %v4615_v25  ;;  %v4632_v42 = vmul.f32 %v5105_v37, %v4616_v61 }
 0x82e   : > { %v4639_v47 = vadd.f32 %v5106_v15, %v4625_v3  ;;  %v4640_v29 = vadd.f32 %v5106_v15, %v4626_v2  ;;  %v4641_v57 = vadd.f32 %v5106_v15, %v4627_v24  ;;  %v4642_v5 = vadd.f32 %v5106_v15, %v4628_v18 }
 0x82f   : > { %v4643_v22 = vadd.f32 %v5106_v15, %v4629_v35  ;;  %v4644_v12 = vadd.f32 %v5106_v15, %v4630_v48  ;;  %v4645_v11 = vadd.f32 %v5106_v15, %v4631_v49  ;;  %v4646_v62 = vadd.f32 %v5106_v15, %v4632_v42 }
 0x830   : > { %v4654_v50 = vadd.f32 %v5107_v46, %v4639_v47  ;;  %v4655_v52 = vadd.f32 %v5107_v46, %v4640_v29  ;;  %v4656_v14 = vadd.f32 %v5107_v46, %v4641_v57  ;;  %v4657_v32 = vadd.f32 %v5107_v46, %v4642_v5 }
 0x831   : > { %v4658_v20 = vadd.f32 %v5107_v46, %v4643_v22  ;;  %v4659_v41 = vadd.f32 %v5107_v46, %v4644_v12  ;;  %v4660_v7 = vadd.f32 %v5107_v46, %v4645_v11  ;;  %v4661_v51 = vadd.f32 %v5107_v46, %v4646_v62 }
 0x832   : > { %v4662_v56 = vcombine.low %v4654_v50, %v4656_v14  ;;  %v4678_v45 = vcombine.low %v4655_v52, %v4657_v32  ;;  %v4663_v53 = vcombine.high %v4654_v50, %v4656_v14  ;;  %v4679_v31 = vcombine.high %v4655_v52, %v4657_v32 }
 0x833   : > { %v4694_v13 = vcombine.low %v4658_v20, %v4660_v7  ;;  %v4710_v60 = vcombine.low %v4659_v41, %v4661_v51  ;;  %v4695_v4 = vcombine.high %v4658_v20, %v4660_v7  ;;  %v4711_v6 = vcombine.high %v4659_v41, %v4661_v51 }
 0x834   : > { %v4670_v33 = vrot.slane %v4662_v56, %v4669_v17  ;;  %v4686_v21 = vrot.slane %v4678_v45, %v4669_v17  ;;  %v4677_v16 = vrot.slane %v4663_v53, %v4669_v17  ;;  %v4693_v36 = vrot.slane %v4679_v31, %v4669_v17 }
 0x835   : > { %v4702_v44 = vrot.slane %v4694_v13, %v4669_v17  ;;  %v4718_v8 = vrot.slane %v4710_v60, %v4669_v17  ;;  %v4709_v19 = vrot.slane %v4695_v4, %v4669_v17  ;;  %v4725_v0 = vrot.slane %v4711_v6, %v4669_v17 }
 0x836   : > { %v4727_v10 = vcombine.high %v4670_v33, %v4686_v21  ;;  %v4726_v39 = vcombine.low %v4670_v33, %v4686_v21  ;;  %v4742_v55 = vcombine.low %v4677_v16, %v4693_v36  ;;  %v4743_v9 = vcombine.high %v4677_v16, %v4693_v36 }
 0x837   : > { %v4759_v28 = vcombine.high %v4702_v44, %v4718_v8  ;;  %v4758_v1 = vcombine.low %v4702_v44, %v4718_v8  ;;  %v4774_v34 = vcombine.low %v4709_v19, %v4725_v0  ;;  %v4775_v37 = vcombine.high %v4709_v19, %v4725_v0 }
 0x838   : > { %v4741_v26 = vrot.slane %v4727_v10, %v7305_v59  ;;  %v4734_v63 = vrot.slane %v4726_v39, %v7305_v59  ;;  %v4750_v17 = vrot.slane %v4742_v55, %v7305_v59  ;;  %v4757_v25 = vrot.slane %v4743_v9, %v7305_v59 }
 0x839   : > { %v4773_v23 = vrot.slane %v4759_v28, %v7305_v59  ;;  %v4766_v30 = vrot.slane %v4758_v1, %v7305_v59  ;;  %v4782_v54 = vrot.slane %v4774_v34, %v7305_v59  ;;  %v4789_v61 = vrot.slane %v4775_v37, %v7305_v59 }
 0x83b   : > { %v4792_v43 = vcombine.low %v4741_v26, %v4773_v23  ;;  %v4791_v40 = vcombine.high %v4734_v63, %v4766_v30  ;;  %v4790_v58 = vcombine.low %v4734_v63, %v4766_v30  ;;  %v4795_v38 = vcombine.high %v4750_v17, %v4782_v54 }
 0x83c   : > { %v4793_v27 = vcombine.high %v4741_v26, %v4773_v23  ;;  %v4797_v15 = vcombine.high %v4757_v25, %v4789_v61  ;;  %v4794_v3 = vcombine.low %v4750_v17, %v4782_v54  ;;  %v4796_v2 = vcombine.low %v4757_v25, %v4789_v61 }
 0x83d   : > { %4803 = vrot.lane.b32.xlu0 %v4792_v43, %s5917_s15  ;;  %4799 = vrot.lane.b32.xlu1 %v4791_v40, %s5918_s19  ;;  %s7496_s19 = sld [smem:[#allocation28_spill]] }
 0x841   : > { %4815 = vrot.lane.b32.xlu0 %v4795_v38, %s5919_s24  ;;  %4807 = vrot.lane.b32.xlu1 %v4793_v27, %s5920_s27  ;;  %s4842_s27 = scalar_lea.sflag [#allocation4], %s6097_s25 }
 0x843   : > { %s7339_s24 = scalar_lea.hbm %s7496_s19, %s5109_s20 }
 0x845   : > { %4823 = vrot.lane.b32.xlu0 %v4797_v15, %s5921_s18  ;;  %4811 = vrot.lane.b32.xlu1 %v4794_v3, %s5922_s22  ;;  %s5844_s18 = scalar_lea.vmem %s4856_s14, 128  ;;  %s5848_s22 = sshll.u32 %s5924_s17, 4  ;;  %s5849_s22 = int_to_ptr.vmem [resolvable:$false] %s5848_s22 }
 0x846   : > { %p5845_p12 = scmp.ne.s32.totalorder %s4856_s14, %s5844_s18  ;;  %p5851_p7 = scmp.lt.s32.totalorder %s4856_s14, %s5849_s22 }
 0x848   : > { %p5846_p4 = pnand %p5845_p12, %p7497_p13 }
 0x849   : > { %4819 = vrot.lane.b32.xlu1 %v4796_v2, %s5923_s26  ;;  %s5850_s26 = scalar_lea.vmem %s5849_s22, 256 }
 0x84a   : > { %p5847_p5 = pneg %p5846_p4  ;;  %p5852_p8 = scmp.lt.s32.totalorder %s5850_s26, %s5844_s18 }
 0x84c   : > { %p5853_p10 = por %p5852_p8, %p5851_p7 }
 0x84e   : > { %p5854_p0 = pnand %p5853_p10, %p5847_p5 }
 0x8af   : > { %v4800_v24 = vpop.permute.xlu1 %4799  ;;  %v4804_v18 = vpop.permute.xlu0 %4803 }
 0x8b0   : > { %v4826_v35 = vsel %vm3525_vm4, %v4790_v58, %v4800_v24 }
 0x8b1   : > { %v4828_v49 = vsel %vm4827_vm6, %v4826_v35, %v4804_v18 }
 0x8b3   : > { %v4808_v59 = vpop.permute.xlu1 %4807  ;;  %v4816_v48 = vpop.permute.xlu0 %4815 }
 0x8b4   : > { %v4830_v42 = vsel %vm4829_vm7, %v4828_v49, %v4808_v59 }
 0x8b7   : > { %v4812_v46 = vpop.permute.xlu1 %4811  ;;  %v4824_v5 = vpop.permute.xlu0 %4823 }
 0x8b8   : > { %v4832_v47 = vsel %vm4831_vm8, %v4830_v42, %v4812_v46 }
 0x8b9   : > { %v4834_v57 = vsel %vm4833_vm9, %v4832_v47, %v4816_v48 }
 0x8bb   : > { %v4820_v29 = vpop.permute.xlu1 %4819 }
 0x8bc   : > { %v4836_v22 = vsel %vm4835_vm10, %v4834_v57, %v4820_v29 }
 0x8bd   : > { %v4838_v12 = vsel %vm4837_vm11, %v4836_v22, %v4824_v5 }
 0x8be   : > { %4840 = vst.msk [vmem:[%s496_s21] sm:$0xff] %vm4839_vm12, %v4838_v12 }
 0x8bf   : > { %5857 = shalt.err (!%p5854_p0)
}
 0x8c0   : > { %s5858_s28 = scalar_lea.hbm %s7339_s24, 128  ;;  %s5862_s21 = scalar_lea.hbm %s7496_s19, 256 }
 0x8c1   : > { %p5859_p2 = scmp.ne.s32.totalorder %s7339_s24, %s5858_s28  ;;  %p5863_p3 = scmp.lt.s32.totalorder %s7339_s24, %s7496_s19 }
 0x8c2   : > { %p5864_p6 = scmp.lt.s32.totalorder %s5862_s21, %s5858_s28 }
 0x8c3   : > { %p5860_p9 = pnand %p5859_p2, %p7497_p13 }
 0x8c4   : > { %p5865_p11 = por %p5864_p6, %p5863_p3 }
 0x8c5   : > { %p5861_p1 = pneg %p5860_p9 }
 0x8c7   : > { %p5866_p12 = pnand %p5865_p11, %p5861_p1 }
 0x8c9   : > { %5869 = shalt.err (!%p5866_p12)
}
 0x8ca   : > { %5691 = dma.vmem_to_hbm [thread:$0]  (%p7497_p13), %s4856_s14, 128, %s7339_s24, %s4842_s27  }
 0x8cb PF: > { %s7498_s18 = sld [smem:[#allocation8_spill]]  ;;  %p7501_p5 = scmp.ge.s32.totalorder %s5908_s16, 2 }
 0x8cc   : > { %s7499_s17 = sld [smem:[#allocation13_spill]] }
 0x8d1   : > { %s4867_s22 = sand.u32 1, %s7498_s18  }
 0x8d2   : > { %p7500_p4 = scmp.ne.s32.totalorder %s7499_s17, 0  ;;  %s4868_s26 = scalar_lea.sflag [#allocation4], %s4867_s22 }
 0x8d4   : > { %p5698_p7 = pnand %p7501_p5, %p7500_p4 }
 0x8d6   : > { %p5699_p8 = pneg %p5698_p7 }
 0x8d8   : > { %5891 = dma.done.wait (%p5699_p8), %s4868_s26, 128  }
 0x8d9   : > { %5893 = vsyncadd (%p5699_p8), %s4868_s26, 4294967168  ;;  %s7502_s16 = sld [smem:[#allocation10_spill]]  ;;  %s7505_s29 = smov %s5900_s30 }
 0x8da   : > { %s7503_s28 = sld [smem:[#allocation9_spill]] }
 0x8db   : > { %s7504_s15 = sld [smem:[#allocation11_spill]] }
 0x8df   : > { %p27_p10 = scmp.ge.s32.totalorder %s7502_s16, 4  }
 0x8e0   : > { %s7506_s30 = smov %s7503_s28 }
 0x8e1   :  { %29 = sbr.rel (!%p27_p10) target bundleno = 7 (0x7), region = 124 }
 0x8e6   :  { %4873 = vsyncpa [#allocation3], 1 }
 0x8e7   :  { %4875 = vsyncpa [#allocation3 + $0x1], 1 }
 0x8e8   :  { %4876 = vsyncpa [#allocation4], 1 }
 0x8e9   :  { %4878 = vsyncpa [#allocation4 + $0x1], 1 }

</bundles_post_ra>
